<compile_context>
chip_gen: v5e
topology: v5e:2x2
jax: 0.10.0
libtpu: 0.0.40
codegen_flags: <defaults>
</compile_context>

<pallas_src>
import jax
import jax.numpy as jnp
from jax.experimental import pallas as pl
from jax.experimental.pallas import tpu as pltpu

# ----------------------------------------------------------------------------
# Synthetic (small but TPU-friendly) CLIP vision config
# ----------------------------------------------------------------------------
IMAGE_SIZE = 32
PATCH_SIZE = 8
CHANNELS = 3
HIDDEN = 128                 # lane-dense (multiple of 128)
NUM_HEADS = 4
HEAD_DIM = HIDDEN // NUM_HEADS
MLP_DIM = 4 * HIDDEN
NUM_LAYERS = 3
LN_EPS = 1e-5
SELECT_LAYER = -2            # CLIPVisionTower default
SELECT_FEATURE = "patch"     # CLIPVisionTower default

GRID_SIDE = IMAGE_SIZE // PATCH_SIZE
NUM_PATCHES = GRID_SIDE * GRID_SIDE            # 16
SEQ = NUM_PATCHES + 1                          # +1 CLS token -> 17
PATCH_DIM = CHANNELS * PATCH_SIZE * PATCH_SIZE # 192

# hidden_states has NUM_LAYERS+1 entries; hidden_states[SELECT_LAYER] is the
# output of encoder layer (select_idx - 1), so only select_idx layers run.
_SELECT_IDX = SELECT_LAYER % (NUM_LAYERS + 1)
NUM_ACTIVE_LAYERS = _SELECT_IDX
assert 1 <= NUM_ACTIVE_LAYERS <= NUM_LAYERS
# TODO(synk): only the default select_feature='patch' path is implemented; the
# 'cls_patch' mode would need the CLS row re-prepended to the reordered tokens.
assert SELECT_FEATURE == "patch"
OUT_TOKENS = NUM_PATCHES

COMPUTE_DTYPE = jnp.bfloat16     # MXU operand dtype (f32 accumulation)
WEIGHT_DTYPE = jnp.bfloat16      # matmul-weight storage dtype


# ----------------------------------------------------------------------------
# In-kernel helpers (all f32 elementwise math)
# ----------------------------------------------------------------------------
def _layer_norm(x, gamma, beta):
    mu = jnp.mean(x, axis=-1, keepdims=True)
    var = jnp.mean(jnp.square(x - mu), axis=-1, keepdims=True)
    return (x - mu) * jax.lax.rsqrt(var + LN_EPS) * gamma + beta


# ----------------------------------------------------------------------------
# Fused kernel: embeddings + all active encoder layers for one image per grid
# step.  All weights are full replicated blocks (constant index maps), so they
# are DMA'd into VMEM once and reused across the whole batch.
# ----------------------------------------------------------------------------
def fused_clip_vit_kernel(
    patches_ref,                 # (1, P, PATCH_DIM)  f32
    pw_ref,                      # (PATCH_DIM, D)     bf16
    cls_ref,                     # (1, D)             f32
    pos_ref,                     # (S, D)             f32  (order: patches..., CLS)
    prew_ref, preb_ref,          # (1, D)             f32
    ln1w_ref, ln1b_ref,          # (LA, 1, D)         f32
    wqkv_ref, bqkv_ref,          # (LA, D, 3D) bf16 / (LA, 1, 3D) f32
    wo_ref, bo_ref,              # (LA, D, D)  bf16 / (LA, 1, D)  f32
    ln2w_ref, ln2b_ref,          # (LA, 1, D)         f32
    w1_ref, b1_ref,              # (LA, D, M)  bf16 / (LA, 1, M)  f32
    w2_ref, b2_ref,              # (LA, M, D)  bf16 / (LA, 1, D)  f32
    o_ref,                       # (1, OUT_TOKENS, D) images.dtype
):
    D, H, Dh, S = HIDDEN, NUM_HEADS, HEAD_DIM, SEQ
    scale = HEAD_DIM ** -0.5

    # --- embeddings: patch-conv matmul + CLS + pos emb + pre_layrnorm --------
    pe = jnp.dot(patches_ref[0].astype(COMPUTE_DTYPE), pw_ref[...],
                 preferred_element_type=jnp.float32)                # (P, D)
    x = jnp.concatenate([pe, cls_ref[...]], axis=0) + pos_ref[...]  # (S, D)
    x = _layer_norm(x, prew_ref[...], preb_ref[...])

    # --- encoder layers (static unroll over the active layers only) ----------
    for l in range(NUM_ACTIVE_LAYERS):
        # self-attention block (pre-LN, residual)
        h1 = _layer_norm(x, ln1w_ref[l], ln1b_ref[l])
        qkv = jnp.dot(h1.astype(COMPUTE_DTYPE), wqkv_ref[l],
                      preferred_element_type=jnp.float32) + bqkv_ref[l]  # (S, 3D)

        # head split only for the scores / context contractions
        qkvh = jnp.transpose(qkv.reshape(S, 3 * H, Dh), (1, 0, 2))       # (3H, S, Dh)
        qh = (qkvh[0:H] * scale).astype(COMPUTE_DTYPE)                   # (H, S, Dh)
        kh = qkvh[H:2 * H].astype(COMPUTE_DTYPE)
        vh = qkvh[2 * H:3 * H].astype(COMPUTE_DTYPE)

        scores = jnp.einsum('hqe,hke->hqk', qh, kh,
                            preferred_element_type=jnp.float32)          # (H, S, S)
        m = jnp.max(scores, axis=-1, keepdims=True)
        e = jnp.exp(scores - m)
        denom = jnp.sum(e, axis=-1, keepdims=True)                       # (H, S, 1)
        p = (e * pl.reciprocal(denom, approx=True)).astype(COMPUTE_DTYPE)
        ctx = jnp.einsum('hqk,hke->hqe', p, vh,
                         preferred_element_type=jnp.float32)             # (H, S, Dh)

        # merge heads -> dense out-projection (contraction depth 128)
        ctx2 = jnp.transpose(ctx, (1, 0, 2)).reshape(S, D)               # (S, D)
        attn = jnp.dot(ctx2.astype(COMPUTE_DTYPE), wo_ref[l],
                       preferred_element_type=jnp.float32) + bo_ref[l]
        x = x + attn

        # MLP block (quick_gelu = x * sigmoid(1.702 * x))
        h2 = _layer_norm(x, ln2w_ref[l], ln2b_ref[l])
        ff = jnp.dot(h2.astype(COMPUTE_DTYPE), w1_ref[l],
                     preferred_element_type=jnp.float32) + b1_ref[l]
        ff = ff * jax.nn.sigmoid(1.702 * ff)
        ff = jnp.dot(ff.astype(COMPUTE_DTYPE), w2_ref[l],
                     preferred_element_type=jnp.float32) + b2_ref[l]
        x = x + ff

    # feature_select('patch'): tokens are [patches..., CLS] -> aligned rows 0..P-1
    o_ref[0] = x[0:OUT_TOKENS, :].astype(o_ref.dtype)


# ----------------------------------------------------------------------------
# Parameter construction (deterministic, synthetic — no checkpoint loading).
# Matmul weights are pre-transposed so y = x @ W.T + b from PyTorch nn.Linear
# is reproduced exactly (up to bf16 weight storage); q/k/v are pre-fused.
# ----------------------------------------------------------------------------
def init_params(key):
    L, D, M = NUM_LAYERS, HIDDEN, MLP_DIM

    def nrm(k, shape, scale=0.02):
        return (scale * jax.random.normal(k, shape)).astype(jnp.float32)

    ks = jax.random.split(key, 12)

    # Conv2d(C, D, kernel=patch, stride=patch, bias=False), PyTorch (O, I, kh, kw)
    conv_w = nrm(ks[0], (D, CHANNELS, PATCH_SIZE, PATCH_SIZE))
    params = {
        "patch_w": conv_w.reshape(D, PATCH_DIM).T.astype(WEIGHT_DTYPE),  # (Cpp, D)
        "cls": nrm(ks[1], (1, D)),
        "pos": nrm(ks[2], (SEQ, D)),          # row 0 = CLS (PyTorch convention)
        "pre_ln_w": jnp.ones((1, D), jnp.float32),
        "pre_ln_b": jnp.zeros((1, D), jnp.float32),
        "ln1_w": jnp.ones((L, 1, D), jnp.float32),
        "ln1_b": jnp.zeros((L, 1, D), jnp.float32),
        "ln2_w": jnp.ones((L, 1, D), jnp.float32),
        "ln2_b": jnp.zeros((L, 1, D), jnp.float32),
    }

    # fused QKV: PyTorch (out, in) per layer -> W^T (in, out), concat along out
    wq = jnp.swapaxes(nrm(ks[3], (L, D, D)), 1, 2)
    wk = jnp.swapaxes(nrm(ks[4], (L, D, D)), 1, 2)
    wv = jnp.swapaxes(nrm(ks[5], (L, D, D)), 1, 2)
    params["wqkv"] = jnp.concatenate([wq, wk, wv], axis=-1).astype(WEIGHT_DTYPE)  # (L, D, 3D)
    bq = nrm(ks[6], (L, 1, D))
    bk = jnp.zeros((L, 1, D), jnp.float32)
    bv = nrm(ks[7], (L, 1, D))
    params["bqkv"] = jnp.concatenate([bq, bk, bv], axis=-1)                       # (L, 1, 3D)

    wo = nrm(ks[8], (L, D, D))                      # out_proj (out, in)
    params["wo"] = jnp.swapaxes(wo, 1, 2).astype(WEIGHT_DTYPE)                    # (L, D, D)
    params["bo"] = jnp.zeros((L, 1, D), jnp.float32)

    w1 = nrm(ks[9], (L, M, D))                      # fc1 (out, in)
    params["w1"] = jnp.swapaxes(w1, 1, 2).astype(WEIGHT_DTYPE)                    # (L, D, M)
    params["b1"] = jnp.zeros((L, 1, M), jnp.float32)
    w2 = nrm(ks[10], (L, D, M))                     # fc2 (out, in)
    params["w2"] = jnp.swapaxes(w2, 1, 2).astype(WEIGHT_DTYPE)                    # (L, M, D)
    params["b2"] = jnp.zeros((L, 1, D), jnp.float32)
    return params


# ----------------------------------------------------------------------------
# Full CLIPVisionTower.forward equivalent (batched-images path)
# ----------------------------------------------------------------------------
def clip_vision_tower_forward(images, params):
    """images: (B, C, H, W) NCHW, like the PyTorch module."""
    B = images.shape[0]
    imgs = images.astype(jnp.float32)

    # TODO(synk): patch extraction (conv "unfold") kept as tiny host-side
    # reshape/transpose glue; everything downstream runs in one Pallas kernel.
    p = PATCH_SIZE
    x = imgs.reshape(B, CHANNELS, GRID_SIDE, p, GRID_SIDE, p)
    x = x.transpose(0, 2, 4, 1, 3, 5).reshape(B, NUM_PATCHES, PATCH_DIM)

    D, M, S, P = HIDDEN, MLP_DIM, SEQ, NUM_PATCHES
    LA = NUM_ACTIVE_LAYERS

    # Token order inside the kernel is [patches..., CLS]; permute the position
    # embedding accordingly (attention/LN/MLP are permutation-equivariant, so
    # per-token outputs are unchanged and the patch slice becomes aligned).
    pos = jnp.concatenate([params["pos"][1:], params["pos"][:1]], axis=0)

    def act(w):                          # ship only the layers we will run
        return w[:LA]

    def rep(shape):                      # replicated block (DMA'd once)
        zeros = (0,) * len(shape)
        return pl.BlockSpec(tuple(shape), lambda b, zeros=zeros: zeros)

    grid_spec = pltpu.PrefetchScalarGridSpec(
        num_scalar_prefetch=0,
        grid=(B,),                       # batch only; layers loop in-kernel
        in_specs=[
            pl.BlockSpec((1, P, PATCH_DIM), lambda b: (b, 0, 0)),
            rep((PATCH_DIM, D)),
            rep((1, D)),
            rep((S, D)),
            rep((1, D)), rep((1, D)),                      # pre-LN w, b
            rep((LA, 1, D)), rep((LA, 1, D)),              # ln1 w, b
            rep((LA, D, 3 * D)), rep((LA, 1, 3 * D)),      # fused QKV w, b
            rep((LA, D, D)), rep((LA, 1, D)),              # out-proj w, b
            rep((LA, 1, D)), rep((LA, 1, D)),              # ln2 w, b
            rep((LA, D, M)), rep((LA, 1, M)),              # fc1 w, b
            rep((LA, M, D)), rep((LA, 1, D)),              # fc2 w, b
        ],
        out_specs=pl.BlockSpec((1, OUT_TOKENS, D), lambda b: (b, 0, 0)),
    )

    out = pl.pallas_call(
        fused_clip_vit_kernel,
        out_shape=jax.ShapeDtypeStruct((B, OUT_TOKENS, D), images.dtype),
        grid_spec=grid_spec,
        # NOTE: at real CLIP-L scale, raise vmem_limit_bytes (v6e) / K-split or
        # Buffered(1) the MLP weight blocks (v7x); footprint here is ~1.5 MiB.
        compiler_params=pltpu.CompilerParams(
            dimension_semantics=("parallel",)),
    )(x, params["patch_w"], params["cls"], pos,
      params["pre_ln_w"], params["pre_ln_b"],
      act(params["ln1_w"]), act(params["ln1_b"]),
      act(params["wqkv"]), act(params["bqkv"]),
      act(params["wo"]), act(params["bo"]),
      act(params["ln2_w"]), act(params["ln2_b"]),
      act(params["w1"]), act(params["b1"]),
      act(params["w2"]), act(params["b2"]))

    # TODO(synk): list-of-images input path of CLIPVisionTower.forward is just
    # a per-image Python loop over this same function; only the batched path
    # is shown.
    return out                            # already in images.dtype


# ----------------------------------------------------------------------------
if __name__ == "__main__":
    key = jax.random.PRNGKey(0)
    pkey, ikey = jax.random.split(key)
    params = init_params(pkey)

    images = jax.random.normal(
        ikey, (2, CHANNELS, IMAGE_SIZE, IMAGE_SIZE), dtype=jnp.float32)

    fwd = jax.jit(clip_vision_tower_forward)
    out = jax.block_until_ready(fwd(images, params))

    assert out.shape == (2, OUT_TOKENS, HIDDEN), out.shape
    assert out.dtype == images.dtype
    assert bool(jnp.all(jnp.isfinite(out)))
    print("KERNEL_OK")
</pallas_src>

<mosaic_0001>
module attributes {stable_mosaic.version = 11 : i64} {
  func.func @fused_clip_vit_kernel(%arg0: i32, %arg1: memref<1x16x192xf32, #tpu.memory_space<vmem>>, %arg2: memref<192x128xbf16, #tpu.memory_space<vmem>>, %arg3: memref<1x128xf32, #tpu.memory_space<vmem>>, %arg4: memref<17x128xf32, #tpu.memory_space<vmem>>, %arg5: memref<1x128xf32, #tpu.memory_space<vmem>>, %arg6: memref<1x128xf32, #tpu.memory_space<vmem>>, %arg7: memref<2x1x128xf32, #tpu.memory_space<vmem>>, %arg8: memref<2x1x128xf32, #tpu.memory_space<vmem>>, %arg9: memref<2x128x384xbf16, #tpu.memory_space<vmem>>, %arg10: memref<2x1x384xf32, #tpu.memory_space<vmem>>, %arg11: memref<2x128x128xbf16, #tpu.memory_space<vmem>>, %arg12: memref<2x1x128xf32, #tpu.memory_space<vmem>>, %arg13: memref<2x1x128xf32, #tpu.memory_space<vmem>>, %arg14: memref<2x1x128xf32, #tpu.memory_space<vmem>>, %arg15: memref<2x128x512xbf16, #tpu.memory_space<vmem>>, %arg16: memref<2x1x512xf32, #tpu.memory_space<vmem>>, %arg17: memref<2x512x128xbf16, #tpu.memory_space<vmem>>, %arg18: memref<2x1x128xf32, #tpu.memory_space<vmem>>, %arg19: memref<1x16x128xf32, #tpu.memory_space<vmem>>) attributes {dimension_semantics = [#tpu.dimension_semantics<parallel>], iteration_bounds = array<i64: 2>, scalar_prefetch = 0 : i64, scratch_operands = 0 : i64, tpu.core_type = #tpu.core_type<tc>, window_params = [{transform_indices = @transform_0, window_bounds = array<i64: 1, 16, 192>}, {pipeline_mode = #tpu.pipeline_mode<synchronous>, transform_indices = @transform_1, window_bounds = array<i64: 192, 128>}, {pipeline_mode = #tpu.pipeline_mode<synchronous>, transform_indices = @transform_2, window_bounds = array<i64: 1, 128>}, {pipeline_mode = #tpu.pipeline_mode<synchronous>, transform_indices = @transform_3, window_bounds = array<i64: 17, 128>}, {pipeline_mode = #tpu.pipeline_mode<synchronous>, transform_indices = @transform_4, window_bounds = array<i64: 1, 128>}, {pipeline_mode = #tpu.pipeline_mode<synchronous>, transform_indices = @transform_5, window_bounds = array<i64: 1, 128>}, {pipeline_mode = #tpu.pipeline_mode<synchronous>, transform_indices = @transform_6, window_bounds = array<i64: 2, 1, 128>}, {pipeline_mode = #tpu.pipeline_mode<synchronous>, transform_indices = @transform_7, window_bounds = array<i64: 2, 1, 128>}, {pipeline_mode = #tpu.pipeline_mode<synchronous>, transform_indices = @transform_8, window_bounds = array<i64: 2, 128, 384>}, {pipeline_mode = #tpu.pipeline_mode<synchronous>, transform_indices = @transform_9, window_bounds = array<i64: 2, 1, 384>}, {pipeline_mode = #tpu.pipeline_mode<synchronous>, transform_indices = @transform_10, window_bounds = array<i64: 2, 128, 128>}, {pipeline_mode = #tpu.pipeline_mode<synchronous>, transform_indices = @transform_11, window_bounds = array<i64: 2, 1, 128>}, {pipeline_mode = #tpu.pipeline_mode<synchronous>, transform_indices = @transform_12, window_bounds = array<i64: 2, 1, 128>}, {pipeline_mode = #tpu.pipeline_mode<synchronous>, transform_indices = @transform_13, window_bounds = array<i64: 2, 1, 128>}, {pipeline_mode = #tpu.pipeline_mode<synchronous>, transform_indices = @transform_14, window_bounds = array<i64: 2, 128, 512>}, {pipeline_mode = #tpu.pipeline_mode<synchronous>, transform_indices = @transform_15, window_bounds = array<i64: 2, 1, 512>}, {pipeline_mode = #tpu.pipeline_mode<synchronous>, transform_indices = @transform_16, window_bounds = array<i64: 2, 512, 128>}, {pipeline_mode = #tpu.pipeline_mode<synchronous>, transform_indices = @transform_17, window_bounds = array<i64: 2, 1, 128>}, {transform_indices = @transform_18, window_bounds = array<i64: 1, 16, 128>}]} {
    %c0 = arith.constant 0 : index
    %c0_0 = arith.constant 0 : index
    %c0_1 = arith.constant 0 : index
    %0 = vector.load %arg1[%c0, %c0_0, %c0_1] : memref<1x16x192xf32, #tpu.memory_space<vmem>>, vector<1x16x192xf32>
    %1 = vector.shape_cast %0 : vector<1x16x192xf32> to vector<16x192xf32>
    %2 = arith.truncf %1 : vector<16x192xf32> to vector<16x192xbf16>
    %c0_2 = arith.constant 0 : index
    %c0_3 = arith.constant 0 : index
    %3 = vector.load %arg2[%c0_2, %c0_3] : memref<192x128xbf16, #tpu.memory_space<vmem>>, vector<192x128xbf16>
    %cst = arith.constant dense<0.000000e+00> : vector<16x128xf32>
    %4 = tpu.matmul %2, %3, %cst {dimension_numbers = #tpu.dot_dimension_numbers<[1], [0], [0], [1], [0, 0, 1, 1], [], []>} : vector<16x192xbf16>, vector<192x128xbf16>, vector<16x128xf32> -> vector<16x128xf32>
    %c0_4 = arith.constant 0 : index
    %c0_5 = arith.constant 0 : index
    %5 = vector.load %arg3[%c0_4, %c0_5] : memref<1x128xf32, #tpu.memory_space<vmem>>, vector<1x128xf32>
    %6 = tpu.concatenate %4, %5 in 0 : vector<16x128xf32>, vector<1x128xf32> -> vector<17x128xf32>
    %c0_6 = arith.constant 0 : index
    %c0_7 = arith.constant 0 : index
    %7 = vector.load %arg4[%c0_6, %c0_7] : memref<17x128xf32, #tpu.memory_space<vmem>>, vector<17x128xf32>
    %8 = arith.addf %6, %7 : vector<17x128xf32>
    %c0_8 = arith.constant 0 : index
    %c0_9 = arith.constant 0 : index
    %9 = vector.load %arg5[%c0_8, %c0_9] : memref<1x128xf32, #tpu.memory_space<vmem>>, vector<1x128xf32>
    %c0_10 = arith.constant 0 : index
    %c0_11 = arith.constant 0 : index
    %10 = vector.load %arg6[%c0_10, %c0_11] : memref<1x128xf32, #tpu.memory_space<vmem>>, vector<1x128xf32>
    %cst_12 = arith.constant dense<0.000000e+00> : vector<17xf32>
    %11 = vector.multi_reduction <add>, %8, %cst_12 [1] : vector<17x128xf32> to vector<17xf32>
    %12 = vector.shape_cast %11 : vector<17xf32> to vector<17x1xf32>
    %cst_13 = arith.constant 1.280000e+02 : f32
    %13 = vector.broadcast %cst_13 : f32 to vector<17x1xf32>
    %14 = arith.divf %12, %13 : vector<17x1xf32>
    %15 = vector.broadcast %14 : vector<17x1xf32> to vector<17x128xf32>
    %16 = arith.subf %8, %15 : vector<17x128xf32>
    %17 = arith.mulf %16, %16 : vector<17x128xf32>
    %cst_14 = arith.constant dense<0.000000e+00> : vector<17xf32>
    %18 = vector.multi_reduction <add>, %17, %cst_14 [1] : vector<17x128xf32> to vector<17xf32>
    %19 = vector.shape_cast %18 : vector<17xf32> to vector<17x1xf32>
    %cst_15 = arith.constant 1.280000e+02 : f32
    %20 = vector.broadcast %cst_15 : f32 to vector<17x1xf32>
    %21 = arith.divf %19, %20 : vector<17x1xf32>
    %22 = vector.broadcast %14 : vector<17x1xf32> to vector<17x128xf32>
    %23 = arith.subf %8, %22 : vector<17x128xf32>
    %cst_16 = arith.constant 9.99999974E-6 : f32
    %24 = vector.broadcast %cst_16 : f32 to vector<17x1xf32>
    %25 = arith.addf %21, %24 : vector<17x1xf32>
    %26 = math.rsqrt %25 : vector<17x1xf32>
    %27 = vector.broadcast %26 : vector<17x1xf32> to vector<17x128xf32>
    %28 = arith.mulf %23, %27 : vector<17x128xf32>
    %29 = vector.broadcast %9 : vector<1x128xf32> to vector<17x128xf32>
    %30 = arith.mulf %28, %29 : vector<17x128xf32>
    %31 = vector.broadcast %10 : vector<1x128xf32> to vector<17x128xf32>
    %32 = arith.addf %30, %31 : vector<17x128xf32>
    %c0_17 = arith.constant 0 : index
    %c0_18 = arith.constant 0 : index
    %c0_19 = arith.constant 0 : index
    %33 = vector.load %arg7[%c0_17, %c0_18, %c0_19] : memref<2x1x128xf32, #tpu.memory_space<vmem>>, vector<1x1x128xf32>
    %34 = vector.shape_cast %33 : vector<1x1x128xf32> to vector<1x128xf32>
    %c0_20 = arith.constant 0 : index
    %c0_21 = arith.constant 0 : index
    %c0_22 = arith.constant 0 : index
    %35 = vector.load %arg8[%c0_20, %c0_21, %c0_22] : memref<2x1x128xf32, #tpu.memory_space<vmem>>, vector<1x1x128xf32>
    %36 = vector.shape_cast %35 : vector<1x1x128xf32> to vector<1x128xf32>
    %cst_23 = arith.constant dense<0.000000e+00> : vector<17xf32>
    %37 = vector.multi_reduction <add>, %32, %cst_23 [1] : vector<17x128xf32> to vector<17xf32>
    %38 = vector.shape_cast %37 : vector<17xf32> to vector<17x1xf32>
    %cst_24 = arith.constant 1.280000e+02 : f32
    %39 = vector.broadcast %cst_24 : f32 to vector<17x1xf32>
    %40 = arith.divf %38, %39 : vector<17x1xf32>
    %41 = vector.broadcast %40 : vector<17x1xf32> to vector<17x128xf32>
    %42 = arith.subf %32, %41 : vector<17x128xf32>
    %43 = arith.mulf %42, %42 : vector<17x128xf32>
    %cst_25 = arith.constant dense<0.000000e+00> : vector<17xf32>
    %44 = vector.multi_reduction <add>, %43, %cst_25 [1] : vector<17x128xf32> to vector<17xf32>
    %45 = vector.shape_cast %44 : vector<17xf32> to vector<17x1xf32>
    %cst_26 = arith.constant 1.280000e+02 : f32
    %46 = vector.broadcast %cst_26 : f32 to vector<17x1xf32>
    %47 = arith.divf %45, %46 : vector<17x1xf32>
    %48 = vector.broadcast %40 : vector<17x1xf32> to vector<17x128xf32>
    %49 = arith.subf %32, %48 : vector<17x128xf32>
    %cst_27 = arith.constant 9.99999974E-6 : f32
    %50 = vector.broadcast %cst_27 : f32 to vector<17x1xf32>
    %51 = arith.addf %47, %50 : vector<17x1xf32>
    %52 = math.rsqrt %51 : vector<17x1xf32>
    %53 = vector.broadcast %52 : vector<17x1xf32> to vector<17x128xf32>
    %54 = arith.mulf %49, %53 : vector<17x128xf32>
    %55 = vector.broadcast %34 : vector<1x128xf32> to vector<17x128xf32>
    %56 = arith.mulf %54, %55 : vector<17x128xf32>
    %57 = vector.broadcast %36 : vector<1x128xf32> to vector<17x128xf32>
    %58 = arith.addf %56, %57 : vector<17x128xf32>
    %59 = arith.truncf %58 : vector<17x128xf32> to vector<17x128xbf16>
    %c0_28 = arith.constant 0 : index
    %c0_29 = arith.constant 0 : index
    %c0_30 = arith.constant 0 : index
    %60 = vector.load %arg9[%c0_28, %c0_29, %c0_30] : memref<2x128x384xbf16, #tpu.memory_space<vmem>>, vector<1x128x384xbf16>
    %61 = vector.shape_cast %60 : vector<1x128x384xbf16> to vector<128x384xbf16>
    %cst_31 = arith.constant dense<0.000000e+00> : vector<17x384xf32>
    %62 = tpu.matmul %59, %61, %cst_31 {dimension_numbers = #tpu.dot_dimension_numbers<[1], [0], [0], [1], [0, 0, 1, 1], [], []>} : vector<17x128xbf16>, vector<128x384xbf16>, vector<17x384xf32> -> vector<17x384xf32>
    %c0_32 = arith.constant 0 : index
    %c0_33 = arith.constant 0 : index
    %c0_34 = arith.constant 0 : index
    %63 = vector.load %arg10[%c0_32, %c0_33, %c0_34] : memref<2x1x384xf32, #tpu.memory_space<vmem>>, vector<1x1x384xf32>
    %64 = vector.shape_cast %63 : vector<1x1x384xf32> to vector<1x384xf32>
    %65 = vector.broadcast %64 : vector<1x384xf32> to vector<17x384xf32>
    %66 = arith.addf %62, %65 : vector<17x384xf32>
    %67 = vector.shape_cast %66 : vector<17x384xf32> to vector<17x12x32xf32>
    %68 = tpu.transpose %67, [1, 0, 2] : vector<17x12x32xf32> -> vector<12x17x32xf32>
    %69 = vector.extract_strided_slice %68 {offsets = [0, 0, 0], sizes = [4, 17, 32], strides = [1, 1, 1]} : vector<12x17x32xf32> to vector<4x17x32xf32>
    %cst_35 = arith.constant 0.176776692 : f32
    %70 = vector.broadcast %cst_35 : f32 to vector<4x17x32xf32>
    %71 = arith.mulf %69, %70 : vector<4x17x32xf32>
    %72 = arith.truncf %71 : vector<4x17x32xf32> to vector<4x17x32xbf16>
    %73 = vector.extract_strided_slice %68 {offsets = [4, 0, 0], sizes = [4, 17, 32], strides = [1, 1, 1]} : vector<12x17x32xf32> to vector<4x17x32xf32>
    %74 = arith.truncf %73 : vector<4x17x32xf32> to vector<4x17x32xbf16>
    %75 = vector.extract_strided_slice %68 {offsets = [8, 0, 0], sizes = [4, 17, 32], strides = [1, 1, 1]} : vector<12x17x32xf32> to vector<4x17x32xf32>
    %76 = arith.truncf %75 : vector<4x17x32xf32> to vector<4x17x32xbf16>
    "tpu.trace_start"() <{level = 10 : i32, message = "hqe,hke->hqk"}> : () -> ()
    %cst_36 = arith.constant dense<0.000000e+00> : vector<4x17x17xf32>
    %77 = tpu.matmul %72, %74, %cst_36 {dimension_numbers = #tpu.dot_dimension_numbers<[2], [2], [1], [1], [0, 0, 0, 1, 1, 1], [0], [0]>} : vector<4x17x32xbf16>, vector<4x17x32xbf16>, vector<4x17x17xf32> -> vector<4x17x17xf32>
    "tpu.trace_stop"() : () -> ()
    %cst_37 = arith.constant dense<0xFF800000> : vector<4x17xf32>
    %78 = vector.multi_reduction <maximumf>, %77, %cst_37 [2] : vector<4x17x17xf32> to vector<4x17xf32>
    %79 = vector.shape_cast %78 : vector<4x17xf32> to vector<4x17x1xf32>
    %80 = vector.broadcast %79 : vector<4x17x1xf32> to vector<4x17x17xf32>
    %81 = arith.subf %77, %80 : vector<4x17x17xf32>
    %82 = math.exp %81 : vector<4x17x17xf32>
    %cst_38 = arith.constant dense<0.000000e+00> : vector<4x17xf32>
    %83 = vector.multi_reduction <add>, %82, %cst_38 [2] : vector<4x17x17xf32> to vector<4x17xf32>
    %84 = vector.shape_cast %83 : vector<4x17xf32> to vector<4x17x1xf32>
    %85 = tpu.reciprocal %84 {approx = true} : vector<4x17x1xf32> -> vector<4x17x1xf32>
    %86 = vector.broadcast %85 : vector<4x17x1xf32> to vector<4x17x17xf32>
    %87 = arith.mulf %82, %86 : vector<4x17x17xf32>
    %88 = arith.truncf %87 : vector<4x17x17xf32> to vector<4x17x17xbf16>
    "tpu.trace_start"() <{level = 10 : i32, message = "hqk,hke->hqe"}> : () -> ()
    %cst_39 = arith.constant dense<0.000000e+00> : vector<4x17x32xf32>
    %89 = tpu.matmul %88, %76, %cst_39 {dimension_numbers = #tpu.dot_dimension_numbers<[2], [1], [1], [2], [0, 0, 0, 1, 1, 2], [0], [0]>} : vector<4x17x17xbf16>, vector<4x17x32xbf16>, vector<4x17x32xf32> -> vector<4x17x32xf32>
    "tpu.trace_stop"() : () -> ()
    %90 = tpu.transpose %89, [1, 0, 2] : vector<4x17x32xf32> -> vector<17x4x32xf32>
    %91 = vector.shape_cast %90 : vector<17x4x32xf32> to vector<17x128xf32>
    %92 = arith.truncf %91 : vector<17x128xf32> to vector<17x128xbf16>
    %c0_40 = arith.constant 0 : index
    %c0_41 = arith.constant 0 : index
    %c0_42 = arith.constant 0 : index
    %93 = vector.load %arg11[%c0_40, %c0_41, %c0_42] : memref<2x128x128xbf16, #tpu.memory_space<vmem>>, vector<1x128x128xbf16>
    %94 = vector.shape_cast %93 : vector<1x128x128xbf16> to vector<128x128xbf16>
    %cst_43 = arith.constant dense<0.000000e+00> : vector<17x128xf32>
    %95 = tpu.matmul %92, %94, %cst_43 {dimension_numbers = #tpu.dot_dimension_numbers<[1], [0], [0], [1], [0, 0, 1, 1], [], []>} : vector<17x128xbf16>, vector<128x128xbf16>, vector<17x128xf32> -> vector<17x128xf32>
    %c0_44 = arith.constant 0 : index
    %c0_45 = arith.constant 0 : index
    %c0_46 = arith.constant 0 : index
    %96 = vector.load %arg12[%c0_44, %c0_45, %c0_46] : memref<2x1x128xf32, #tpu.memory_space<vmem>>, vector<1x1x128xf32>
    %97 = vector.shape_cast %96 : vector<1x1x128xf32> to vector<1x128xf32>
    %98 = vector.broadcast %97 : vector<1x128xf32> to vector<17x128xf32>
    %99 = arith.addf %95, %98 : vector<17x128xf32>
    %100 = arith.addf %32, %99 : vector<17x128xf32>
    %c0_47 = arith.constant 0 : index
    %c0_48 = arith.constant 0 : index
    %c0_49 = arith.constant 0 : index
    %101 = vector.load %arg13[%c0_47, %c0_48, %c0_49] : memref<2x1x128xf32, #tpu.memory_space<vmem>>, vector<1x1x128xf32>
    %102 = vector.shape_cast %101 : vector<1x1x128xf32> to vector<1x128xf32>
    %c0_50 = arith.constant 0 : index
    %c0_51 = arith.constant 0 : index
    %c0_52 = arith.constant 0 : index
    %103 = vector.load %arg14[%c0_50, %c0_51, %c0_52] : memref<2x1x128xf32, #tpu.memory_space<vmem>>, vector<1x1x128xf32>
    %104 = vector.shape_cast %103 : vector<1x1x128xf32> to vector<1x128xf32>
    %cst_53 = arith.constant dense<0.000000e+00> : vector<17xf32>
    %105 = vector.multi_reduction <add>, %100, %cst_53 [1] : vector<17x128xf32> to vector<17xf32>
    %106 = vector.shape_cast %105 : vector<17xf32> to vector<17x1xf32>
    %cst_54 = arith.constant 1.280000e+02 : f32
    %107 = vector.broadcast %cst_54 : f32 to vector<17x1xf32>
    %108 = arith.divf %106, %107 : vector<17x1xf32>
    %109 = vector.broadcast %108 : vector<17x1xf32> to vector<17x128xf32>
    %110 = arith.subf %100, %109 : vector<17x128xf32>
    %111 = arith.mulf %110, %110 : vector<17x128xf32>
    %cst_55 = arith.constant dense<0.000000e+00> : vector<17xf32>
    %112 = vector.multi_reduction <add>, %111, %cst_55 [1] : vector<17x128xf32> to vector<17xf32>
    %113 = vector.shape_cast %112 : vector<17xf32> to vector<17x1xf32>
    %cst_56 = arith.constant 1.280000e+02 : f32
    %114 = vector.broadcast %cst_56 : f32 to vector<17x1xf32>
    %115 = arith.divf %113, %114 : vector<17x1xf32>
    %116 = vector.broadcast %108 : vector<17x1xf32> to vector<17x128xf32>
    %117 = arith.subf %100, %116 : vector<17x128xf32>
    %cst_57 = arith.constant 9.99999974E-6 : f32
    %118 = vector.broadcast %cst_57 : f32 to vector<17x1xf32>
    %119 = arith.addf %115, %118 : vector<17x1xf32>
    %120 = math.rsqrt %119 : vector<17x1xf32>
    %121 = vector.broadcast %120 : vector<17x1xf32> to vector<17x128xf32>
    %122 = arith.mulf %117, %121 : vector<17x128xf32>
    %123 = vector.broadcast %102 : vector<1x128xf32> to vector<17x128xf32>
    %124 = arith.mulf %122, %123 : vector<17x128xf32>
    %125 = vector.broadcast %104 : vector<1x128xf32> to vector<17x128xf32>
    %126 = arith.addf %124, %125 : vector<17x128xf32>
    %127 = arith.truncf %126 : vector<17x128xf32> to vector<17x128xbf16>
    %c0_58 = arith.constant 0 : index
    %c0_59 = arith.constant 0 : index
    %c0_60 = arith.constant 0 : index
    %128 = vector.load %arg15[%c0_58, %c0_59, %c0_60] : memref<2x128x512xbf16, #tpu.memory_space<vmem>>, vector<1x128x512xbf16>
    %129 = vector.shape_cast %128 : vector<1x128x512xbf16> to vector<128x512xbf16>
    %cst_61 = arith.constant dense<0.000000e+00> : vector<17x512xf32>
    %130 = tpu.matmul %127, %129, %cst_61 {dimension_numbers = #tpu.dot_dimension_numbers<[1], [0], [0], [1], [0, 0, 1, 1], [], []>} : vector<17x128xbf16>, vector<128x512xbf16>, vector<17x512xf32> -> vector<17x512xf32>
    %c0_62 = arith.constant 0 : index
    %c0_63 = arith.constant 0 : index
    %c0_64 = arith.constant 0 : index
    %131 = vector.load %arg16[%c0_62, %c0_63, %c0_64] : memref<2x1x512xf32, #tpu.memory_space<vmem>>, vector<1x1x512xf32>
    %132 = vector.shape_cast %131 : vector<1x1x512xf32> to vector<1x512xf32>
    %133 = vector.broadcast %132 : vector<1x512xf32> to vector<17x512xf32>
    %134 = arith.addf %130, %133 : vector<17x512xf32>
    %cst_65 = arith.constant 1.702000e+00 : f32
    %135 = vector.broadcast %cst_65 : f32 to vector<17x512xf32>
    %136 = arith.mulf %135, %134 : vector<17x512xf32>
    %137 = arith.negf %136 : vector<17x512xf32>
    %138 = math.exp %137 : vector<17x512xf32>
    %cst_66 = arith.constant 1.000000e+00 : f32
    %139 = vector.broadcast %cst_66 : f32 to vector<17x512xf32>
    %140 = arith.addf %139, %138 : vector<17x512xf32>
    %141 = arith.divf %139, %140 : vector<17x512xf32>
    %142 = arith.mulf %134, %141 : vector<17x512xf32>
    %143 = arith.truncf %142 : vector<17x512xf32> to vector<17x512xbf16>
    %c0_67 = arith.constant 0 : index
    %c0_68 = arith.constant 0 : index
    %c0_69 = arith.constant 0 : index
    %144 = vector.load %arg17[%c0_67, %c0_68, %c0_69] : memref<2x512x128xbf16, #tpu.memory_space<vmem>>, vector<1x512x128xbf16>
    %145 = vector.shape_cast %144 : vector<1x512x128xbf16> to vector<512x128xbf16>
    %cst_70 = arith.constant dense<0.000000e+00> : vector<17x128xf32>
    %146 = tpu.matmul %143, %145, %cst_70 {dimension_numbers = #tpu.dot_dimension_numbers<[1], [0], [0], [1], [0, 0, 1, 1], [], []>} : vector<17x512xbf16>, vector<512x128xbf16>, vector<17x128xf32> -> vector<17x128xf32>
    %c0_71 = arith.constant 0 : index
    %c0_72 = arith.constant 0 : index
    %c0_73 = arith.constant 0 : index
    %147 = vector.load %arg18[%c0_71, %c0_72, %c0_73] : memref<2x1x128xf32, #tpu.memory_space<vmem>>, vector<1x1x128xf32>
    %148 = vector.shape_cast %147 : vector<1x1x128xf32> to vector<1x128xf32>
    %149 = vector.broadcast %148 : vector<1x128xf32> to vector<17x128xf32>
    %150 = arith.addf %146, %149 : vector<17x128xf32>
    %151 = arith.addf %100, %150 : vector<17x128xf32>
    %c1 = arith.constant 1 : index
    %c0_74 = arith.constant 0 : index
    %c0_75 = arith.constant 0 : index
    %152 = vector.load %arg7[%c1, %c0_74, %c0_75] : memref<2x1x128xf32, #tpu.memory_space<vmem>>, vector<1x1x128xf32>
    %153 = vector.shape_cast %152 : vector<1x1x128xf32> to vector<1x128xf32>
    %c1_76 = arith.constant 1 : index
    %c0_77 = arith.constant 0 : index
    %c0_78 = arith.constant 0 : index
    %154 = vector.load %arg8[%c1_76, %c0_77, %c0_78] : memref<2x1x128xf32, #tpu.memory_space<vmem>>, vector<1x1x128xf32>
    %155 = vector.shape_cast %154 : vector<1x1x128xf32> to vector<1x128xf32>
    %cst_79 = arith.constant dense<0.000000e+00> : vector<17xf32>
    %156 = vector.multi_reduction <add>, %151, %cst_79 [1] : vector<17x128xf32> to vector<17xf32>
    %157 = vector.shape_cast %156 : vector<17xf32> to vector<17x1xf32>
    %cst_80 = arith.constant 1.280000e+02 : f32
    %158 = vector.broadcast %cst_80 : f32 to vector<17x1xf32>
    %159 = arith.divf %157, %158 : vector<17x1xf32>
    %160 = vector.broadcast %159 : vector<17x1xf32> to vector<17x128xf32>
    %161 = arith.subf %151, %160 : vector<17x128xf32>
    %162 = arith.mulf %161, %161 : vector<17x128xf32>
    %cst_81 = arith.constant dense<0.000000e+00> : vector<17xf32>
    %163 = vector.multi_reduction <add>, %162, %cst_81 [1] : vector<17x128xf32> to vector<17xf32>
    %164 = vector.shape_cast %163 : vector<17xf32> to vector<17x1xf32>
    %cst_82 = arith.constant 1.280000e+02 : f32
    %165 = vector.broadcast %cst_82 : f32 to vector<17x1xf32>
    %166 = arith.divf %164, %165 : vector<17x1xf32>
    %167 = vector.broadcast %159 : vector<17x1xf32> to vector<17x128xf32>
    %168 = arith.subf %151, %167 : vector<17x128xf32>
    %cst_83 = arith.constant 9.99999974E-6 : f32
    %169 = vector.broadcast %cst_83 : f32 to vector<17x1xf32>
    %170 = arith.addf %166, %169 : vector<17x1xf32>
    %171 = math.rsqrt %170 : vector<17x1xf32>
    %172 = vector.broadcast %171 : vector<17x1xf32> to vector<17x128xf32>
    %173 = arith.mulf %168, %172 : vector<17x128xf32>
    %174 = vector.broadcast %153 : vector<1x128xf32> to vector<17x128xf32>
    %175 = arith.mulf %173, %174 : vector<17x128xf32>
    %176 = vector.broadcast %155 : vector<1x128xf32> to vector<17x128xf32>
    %177 = arith.addf %175, %176 : vector<17x128xf32>
    %178 = arith.truncf %177 : vector<17x128xf32> to vector<17x128xbf16>
    %c1_84 = arith.constant 1 : index
    %c0_85 = arith.constant 0 : index
    %c0_86 = arith.constant 0 : index
    %179 = vector.load %arg9[%c1_84, %c0_85, %c0_86] : memref<2x128x384xbf16, #tpu.memory_space<vmem>>, vector<1x128x384xbf16>
    %180 = vector.shape_cast %179 : vector<1x128x384xbf16> to vector<128x384xbf16>
    %cst_87 = arith.constant dense<0.000000e+00> : vector<17x384xf32>
    %181 = tpu.matmul %178, %180, %cst_87 {dimension_numbers = #tpu.dot_dimension_numbers<[1], [0], [0], [1], [0, 0, 1, 1], [], []>} : vector<17x128xbf16>, vector<128x384xbf16>, vector<17x384xf32> -> vector<17x384xf32>
    %c1_88 = arith.constant 1 : index
    %c0_89 = arith.constant 0 : index
    %c0_90 = arith.constant 0 : index
    %182 = vector.load %arg10[%c1_88, %c0_89, %c0_90] : memref<2x1x384xf32, #tpu.memory_space<vmem>>, vector<1x1x384xf32>
    %183 = vector.shape_cast %182 : vector<1x1x384xf32> to vector<1x384xf32>
    %184 = vector.broadcast %183 : vector<1x384xf32> to vector<17x384xf32>
    %185 = arith.addf %181, %184 : vector<17x384xf32>
    %186 = vector.shape_cast %185 : vector<17x384xf32> to vector<17x12x32xf32>
    %187 = tpu.transpose %186, [1, 0, 2] : vector<17x12x32xf32> -> vector<12x17x32xf32>
    %188 = vector.extract_strided_slice %187 {offsets = [0, 0, 0], sizes = [4, 17, 32], strides = [1, 1, 1]} : vector<12x17x32xf32> to vector<4x17x32xf32>
    %cst_91 = arith.constant 0.176776692 : f32
    %189 = vector.broadcast %cst_91 : f32 to vector<4x17x32xf32>
    %190 = arith.mulf %188, %189 : vector<4x17x32xf32>
    %191 = arith.truncf %190 : vector<4x17x32xf32> to vector<4x17x32xbf16>
    %192 = vector.extract_strided_slice %187 {offsets = [4, 0, 0], sizes = [4, 17, 32], strides = [1, 1, 1]} : vector<12x17x32xf32> to vector<4x17x32xf32>
    %193 = arith.truncf %192 : vector<4x17x32xf32> to vector<4x17x32xbf16>
    %194 = vector.extract_strided_slice %187 {offsets = [8, 0, 0], sizes = [4, 17, 32], strides = [1, 1, 1]} : vector<12x17x32xf32> to vector<4x17x32xf32>
    %195 = arith.truncf %194 : vector<4x17x32xf32> to vector<4x17x32xbf16>
    "tpu.trace_start"() <{level = 10 : i32, message = "hqe,hke->hqk"}> : () -> ()
    %cst_92 = arith.constant dense<0.000000e+00> : vector<4x17x17xf32>
    %196 = tpu.matmul %191, %193, %cst_92 {dimension_numbers = #tpu.dot_dimension_numbers<[2], [2], [1], [1], [0, 0, 0, 1, 1, 1], [0], [0]>} : vector<4x17x32xbf16>, vector<4x17x32xbf16>, vector<4x17x17xf32> -> vector<4x17x17xf32>
    "tpu.trace_stop"() : () -> ()
    %cst_93 = arith.constant dense<0xFF800000> : vector<4x17xf32>
    %197 = vector.multi_reduction <maximumf>, %196, %cst_93 [2] : vector<4x17x17xf32> to vector<4x17xf32>
    %198 = vector.shape_cast %197 : vector<4x17xf32> to vector<4x17x1xf32>
    %199 = vector.broadcast %198 : vector<4x17x1xf32> to vector<4x17x17xf32>
    %200 = arith.subf %196, %199 : vector<4x17x17xf32>
    %201 = math.exp %200 : vector<4x17x17xf32>
    %cst_94 = arith.constant dense<0.000000e+00> : vector<4x17xf32>
    %202 = vector.multi_reduction <add>, %201, %cst_94 [2] : vector<4x17x17xf32> to vector<4x17xf32>
    %203 = vector.shape_cast %202 : vector<4x17xf32> to vector<4x17x1xf32>
    %204 = tpu.reciprocal %203 {approx = true} : vector<4x17x1xf32> -> vector<4x17x1xf32>
    %205 = vector.broadcast %204 : vector<4x17x1xf32> to vector<4x17x17xf32>
    %206 = arith.mulf %201, %205 : vector<4x17x17xf32>
    %207 = arith.truncf %206 : vector<4x17x17xf32> to vector<4x17x17xbf16>
    "tpu.trace_start"() <{level = 10 : i32, message = "hqk,hke->hqe"}> : () -> ()
    %cst_95 = arith.constant dense<0.000000e+00> : vector<4x17x32xf32>
    %208 = tpu.matmul %207, %195, %cst_95 {dimension_numbers = #tpu.dot_dimension_numbers<[2], [1], [1], [2], [0, 0, 0, 1, 1, 2], [0], [0]>} : vector<4x17x17xbf16>, vector<4x17x32xbf16>, vector<4x17x32xf32> -> vector<4x17x32xf32>
    "tpu.trace_stop"() : () -> ()
    %209 = tpu.transpose %208, [1, 0, 2] : vector<4x17x32xf32> -> vector<17x4x32xf32>
    %210 = vector.shape_cast %209 : vector<17x4x32xf32> to vector<17x128xf32>
    %211 = arith.truncf %210 : vector<17x128xf32> to vector<17x128xbf16>
    %c1_96 = arith.constant 1 : index
    %c0_97 = arith.constant 0 : index
    %c0_98 = arith.constant 0 : index
    %212 = vector.load %arg11[%c1_96, %c0_97, %c0_98] : memref<2x128x128xbf16, #tpu.memory_space<vmem>>, vector<1x128x128xbf16>
    %213 = vector.shape_cast %212 : vector<1x128x128xbf16> to vector<128x128xbf16>
    %cst_99 = arith.constant dense<0.000000e+00> : vector<17x128xf32>
    %214 = tpu.matmul %211, %213, %cst_99 {dimension_numbers = #tpu.dot_dimension_numbers<[1], [0], [0], [1], [0, 0, 1, 1], [], []>} : vector<17x128xbf16>, vector<128x128xbf16>, vector<17x128xf32> -> vector<17x128xf32>
    %c1_100 = arith.constant 1 : index
    %c0_101 = arith.constant 0 : index
    %c0_102 = arith.constant 0 : index
    %215 = vector.load %arg12[%c1_100, %c0_101, %c0_102] : memref<2x1x128xf32, #tpu.memory_space<vmem>>, vector<1x1x128xf32>
    %216 = vector.shape_cast %215 : vector<1x1x128xf32> to vector<1x128xf32>
    %217 = vector.broadcast %216 : vector<1x128xf32> to vector<17x128xf32>
    %218 = arith.addf %214, %217 : vector<17x128xf32>
    %219 = arith.addf %151, %218 : vector<17x128xf32>
    %c1_103 = arith.constant 1 : index
    %c0_104 = arith.constant 0 : index
    %c0_105 = arith.constant 0 : index
    %220 = vector.load %arg13[%c1_103, %c0_104, %c0_105] : memref<2x1x128xf32, #tpu.memory_space<vmem>>, vector<1x1x128xf32>
    %221 = vector.shape_cast %220 : vector<1x1x128xf32> to vector<1x128xf32>
    %c1_106 = arith.constant 1 : index
    %c0_107 = arith.constant 0 : index
    %c0_108 = arith.constant 0 : index
    %222 = vector.load %arg14[%c1_106, %c0_107, %c0_108] : memref<2x1x128xf32, #tpu.memory_space<vmem>>, vector<1x1x128xf32>
    %223 = vector.shape_cast %222 : vector<1x1x128xf32> to vector<1x128xf32>
    %cst_109 = arith.constant dense<0.000000e+00> : vector<17xf32>
    %224 = vector.multi_reduction <add>, %219, %cst_109 [1] : vector<17x128xf32> to vector<17xf32>
    %225 = vector.shape_cast %224 : vector<17xf32> to vector<17x1xf32>
    %cst_110 = arith.constant 1.280000e+02 : f32
    %226 = vector.broadcast %cst_110 : f32 to vector<17x1xf32>
    %227 = arith.divf %225, %226 : vector<17x1xf32>
    %228 = vector.broadcast %227 : vector<17x1xf32> to vector<17x128xf32>
    %229 = arith.subf %219, %228 : vector<17x128xf32>
    %230 = arith.mulf %229, %229 : vector<17x128xf32>
    %cst_111 = arith.constant dense<0.000000e+00> : vector<17xf32>
    %231 = vector.multi_reduction <add>, %230, %cst_111 [1] : vector<17x128xf32> to vector<17xf32>
    %232 = vector.shape_cast %231 : vector<17xf32> to vector<17x1xf32>
    %cst_112 = arith.constant 1.280000e+02 : f32
    %233 = vector.broadcast %cst_112 : f32 to vector<17x1xf32>
    %234 = arith.divf %232, %233 : vector<17x1xf32>
    %235 = vector.broadcast %227 : vector<17x1xf32> to vector<17x128xf32>
    %236 = arith.subf %219, %235 : vector<17x128xf32>
    %cst_113 = arith.constant 9.99999974E-6 : f32
    %237 = vector.broadcast %cst_113 : f32 to vector<17x1xf32>
    %238 = arith.addf %234, %237 : vector<17x1xf32>
    %239 = math.rsqrt %238 : vector<17x1xf32>
    %240 = vector.broadcast %239 : vector<17x1xf32> to vector<17x128xf32>
    %241 = arith.mulf %236, %240 : vector<17x128xf32>
    %242 = vector.broadcast %221 : vector<1x128xf32> to vector<17x128xf32>
    %243 = arith.mulf %241, %242 : vector<17x128xf32>
    %244 = vector.broadcast %223 : vector<1x128xf32> to vector<17x128xf32>
    %245 = arith.addf %243, %244 : vector<17x128xf32>
    %246 = arith.truncf %245 : vector<17x128xf32> to vector<17x128xbf16>
    %c1_114 = arith.constant 1 : index
    %c0_115 = arith.constant 0 : index
    %c0_116 = arith.constant 0 : index
    %247 = vector.load %arg15[%c1_114, %c0_115, %c0_116] : memref<2x128x512xbf16, #tpu.memory_space<vmem>>, vector<1x128x512xbf16>
    %248 = vector.shape_cast %247 : vector<1x128x512xbf16> to vector<128x512xbf16>
    %cst_117 = arith.constant dense<0.000000e+00> : vector<17x512xf32>
    %249 = tpu.matmul %246, %248, %cst_117 {dimension_numbers = #tpu.dot_dimension_numbers<[1], [0], [0], [1], [0, 0, 1, 1], [], []>} : vector<17x128xbf16>, vector<128x512xbf16>, vector<17x512xf32> -> vector<17x512xf32>
    %c1_118 = arith.constant 1 : index
    %c0_119 = arith.constant 0 : index
    %c0_120 = arith.constant 0 : index
    %250 = vector.load %arg16[%c1_118, %c0_119, %c0_120] : memref<2x1x512xf32, #tpu.memory_space<vmem>>, vector<1x1x512xf32>
    %251 = vector.shape_cast %250 : vector<1x1x512xf32> to vector<1x512xf32>
    %252 = vector.broadcast %251 : vector<1x512xf32> to vector<17x512xf32>
    %253 = arith.addf %249, %252 : vector<17x512xf32>
    %cst_121 = arith.constant 1.702000e+00 : f32
    %254 = vector.broadcast %cst_121 : f32 to vector<17x512xf32>
    %255 = arith.mulf %254, %253 : vector<17x512xf32>
    %256 = arith.negf %255 : vector<17x512xf32>
    %257 = math.exp %256 : vector<17x512xf32>
    %cst_122 = arith.constant 1.000000e+00 : f32
    %258 = vector.broadcast %cst_122 : f32 to vector<17x512xf32>
    %259 = arith.addf %258, %257 : vector<17x512xf32>
    %260 = arith.divf %258, %259 : vector<17x512xf32>
    %261 = arith.mulf %253, %260 : vector<17x512xf32>
    %262 = arith.truncf %261 : vector<17x512xf32> to vector<17x512xbf16>
    %c1_123 = arith.constant 1 : index
    %c0_124 = arith.constant 0 : index
    %c0_125 = arith.constant 0 : index
    %263 = vector.load %arg17[%c1_123, %c0_124, %c0_125] : memref<2x512x128xbf16, #tpu.memory_space<vmem>>, vector<1x512x128xbf16>
    %264 = vector.shape_cast %263 : vector<1x512x128xbf16> to vector<512x128xbf16>
    %cst_126 = arith.constant dense<0.000000e+00> : vector<17x128xf32>
    %265 = tpu.matmul %262, %264, %cst_126 {dimension_numbers = #tpu.dot_dimension_numbers<[1], [0], [0], [1], [0, 0, 1, 1], [], []>} : vector<17x512xbf16>, vector<512x128xbf16>, vector<17x128xf32> -> vector<17x128xf32>
    %c1_127 = arith.constant 1 : index
    %c0_128 = arith.constant 0 : index
    %c0_129 = arith.constant 0 : index
    %266 = vector.load %arg18[%c1_127, %c0_128, %c0_129] : memref<2x1x128xf32, #tpu.memory_space<vmem>>, vector<1x1x128xf32>
    %267 = vector.shape_cast %266 : vector<1x1x128xf32> to vector<1x128xf32>
    %268 = vector.broadcast %267 : vector<1x128xf32> to vector<17x128xf32>
    %269 = arith.addf %265, %268 : vector<17x128xf32>
    %270 = arith.addf %219, %269 : vector<17x128xf32>
    %271 = vector.extract_strided_slice %270 {offsets = [0, 0], sizes = [16, 128], strides = [1, 1]} : vector<17x128xf32> to vector<16x128xf32>
    %c0_130 = arith.constant 0 : index
    %c0_131 = arith.constant 0 : index
    %c0_132 = arith.constant 0 : index
    %272 = vector.load %arg19[%c0_130, %c0_131, %c0_132] : memref<1x16x128xf32, #tpu.memory_space<vmem>>, vector<1x16x128xf32>
    %273 = vector.shape_cast %272 : vector<1x16x128xf32> to vector<16x128xf32>
    %274 = vector.shape_cast %271 : vector<16x128xf32> to vector<1x16x128xf32>
    tpu.vector_store %arg19[%c0_130, %c0_131, %c0_132], %274 {strides = array<i32>} : memref<1x16x128xf32, #tpu.memory_space<vmem>>, vector<1x16x128xf32>,
    return
  }
  func.func @transform_0(%arg0: i32) -> (i32, i32, i32) {
    %c0_i32 = arith.constant 0 : i32
    %c0_i32_0 = arith.constant 0 : i32
    %c0_i32_1 = arith.constant 0 : i32
    return %arg0, %c0_i32, %c0_i32_0 : i32, i32, i32
  }
  func.func @transform_1(%arg0: i32) -> (i32, i32) {
    %c0_i32 = arith.constant 0 : i32
    %c0_i32_0 = arith.constant 0 : i32
    %c0_i32_1 = arith.constant 0 : i32
    return %c0_i32, %c0_i32_0 : i32, i32
  }
  func.func @transform_2(%arg0: i32) -> (i32, i32) {
    %c0_i32 = arith.constant 0 : i32
    %c0_i32_0 = arith.constant 0 : i32
    %c0_i32_1 = arith.constant 0 : i32
    return %c0_i32, %c0_i32_0 : i32, i32
  }
  func.func @transform_3(%arg0: i32) -> (i32, i32) {
    %c0_i32 = arith.constant 0 : i32
    %c0_i32_0 = arith.constant 0 : i32
    %c0_i32_1 = arith.constant 0 : i32
    return %c0_i32, %c0_i32_0 : i32, i32
  }
  func.func @transform_4(%arg0: i32) -> (i32, i32) {
    %c0_i32 = arith.constant 0 : i32
    %c0_i32_0 = arith.constant 0 : i32
    %c0_i32_1 = arith.constant 0 : i32
    return %c0_i32, %c0_i32_0 : i32, i32
  }
  func.func @transform_5(%arg0: i32) -> (i32, i32) {
    %c0_i32 = arith.constant 0 : i32
    %c0_i32_0 = arith.constant 0 : i32
    %c0_i32_1 = arith.constant 0 : i32
    return %c0_i32, %c0_i32_0 : i32, i32
  }
  func.func @transform_6(%arg0: i32) -> (i32, i32, i32) {
    %c0_i32 = arith.constant 0 : i32
    %c0_i32_0 = arith.constant 0 : i32
    %c0_i32_1 = arith.constant 0 : i32
    %c0_i32_2 = arith.constant 0 : i32
    return %c0_i32, %c0_i32_0, %c0_i32_1 : i32, i32, i32
  }
  func.func @transform_7(%arg0: i32) -> (i32, i32, i32) {
    %c0_i32 = arith.constant 0 : i32
    %c0_i32_0 = arith.constant 0 : i32
    %c0_i32_1 = arith.constant 0 : i32
    %c0_i32_2 = arith.constant 0 : i32
    return %c0_i32, %c0_i32_0, %c0_i32_1 : i32, i32, i32
  }
  func.func @transform_8(%arg0: i32) -> (i32, i32, i32) {
    %c0_i32 = arith.constant 0 : i32
    %c0_i32_0 = arith.constant 0 : i32
    %c0_i32_1 = arith.constant 0 : i32
    %c0_i32_2 = arith.constant 0 : i32
    return %c0_i32, %c0_i32_0, %c0_i32_1 : i32, i32, i32
  }
  func.func @transform_9(%arg0: i32) -> (i32, i32, i32) {
    %c0_i32 = arith.constant 0 : i32
    %c0_i32_0 = arith.constant 0 : i32
    %c0_i32_1 = arith.constant 0 : i32
    %c0_i32_2 = arith.constant 0 : i32
    return %c0_i32, %c0_i32_0, %c0_i32_1 : i32, i32, i32
  }
  func.func @transform_10(%arg0: i32) -> (i32, i32, i32) {
    %c0_i32 = arith.constant 0 : i32
    %c0_i32_0 = arith.constant 0 : i32
    %c0_i32_1 = arith.constant 0 : i32
    %c0_i32_2 = arith.constant 0 : i32
    return %c0_i32, %c0_i32_0, %c0_i32_1 : i32, i32, i32
  }
  func.func @transform_11(%arg0: i32) -> (i32, i32, i32) {
    %c0_i32 = arith.constant 0 : i32
    %c0_i32_0 = arith.constant 0 : i32
    %c0_i32_1 = arith.constant 0 : i32
    %c0_i32_2 = arith.constant 0 : i32
    return %c0_i32, %c0_i32_0, %c0_i32_1 : i32, i32, i32
  }
  func.func @transform_12(%arg0: i32) -> (i32, i32, i32) {
    %c0_i32 = arith.constant 0 : i32
    %c0_i32_0 = arith.constant 0 : i32
    %c0_i32_1 = arith.constant 0 : i32
    %c0_i32_2 = arith.constant 0 : i32
    return %c0_i32, %c0_i32_0, %c0_i32_1 : i32, i32, i32
  }
  func.func @transform_13(%arg0: i32) -> (i32, i32, i32) {
    %c0_i32 = arith.constant 0 : i32
    %c0_i32_0 = arith.constant 0 : i32
    %c0_i32_1 = arith.constant 0 : i32
    %c0_i32_2 = arith.constant 0 : i32
    return %c0_i32, %c0_i32_0, %c0_i32_1 : i32, i32, i32
  }
  func.func @transform_14(%arg0: i32) -> (i32, i32, i32) {
    %c0_i32 = arith.constant 0 : i32
    %c0_i32_0 = arith.constant 0 : i32
    %c0_i32_1 = arith.constant 0 : i32
    %c0_i32_2 = arith.constant 0 : i32
    return %c0_i32, %c0_i32_0, %c0_i32_1 : i32, i32, i32
  }
  func.func @transform_15(%arg0: i32) -> (i32, i32, i32) {
    %c0_i32 = arith.constant 0 : i32
    %c0_i32_0 = arith.constant 0 : i32
    %c0_i32_1 = arith.constant 0 : i32
    %c0_i32_2 = arith.constant 0 : i32
    return %c0_i32, %c0_i32_0, %c0_i32_1 : i32, i32, i32
  }
  func.func @transform_16(%arg0: i32) -> (i32, i32, i32) {
    %c0_i32 = arith.constant 0 : i32
    %c0_i32_0 = arith.constant 0 : i32
    %c0_i32_1 = arith.constant 0 : i32
    %c0_i32_2 = arith.constant 0 : i32
    return %c0_i32, %c0_i32_0, %c0_i32_1 : i32, i32, i32
  }
  func.func @transform_17(%arg0: i32) -> (i32, i32, i32) {
    %c0_i32 = arith.constant 0 : i32
    %c0_i32_0 = arith.constant 0 : i32
    %c0_i32_1 = arith.constant 0 : i32
    %c0_i32_2 = arith.constant 0 : i32
    return %c0_i32, %c0_i32_0, %c0_i32_1 : i32, i32, i32
  }
  func.func @transform_18(%arg0: i32) -> (i32, i32, i32) {
    %c0_i32 = arith.constant 0 : i32
    %c0_i32_0 = arith.constant 0 : i32
    %c0_i32_1 = arith.constant 0 : i32
    return %arg0, %c0_i32, %c0_i32_0 : i32, i32, i32
  }
}

</mosaic_0001>

<bundles_post_ra>
// kernel: clip_vision_tower_forward.1
= control target key start
LH: loop header
LB: loop body
LE: loop exit
PB: predicated region body
PF: predicated region fallthrough
CT: control target
= control target key end

     0   :  { %s12118_s0 = inlined_call_operand.vmem [shape: f32[2,16,192], index: 0, kind: input, shape index: {}]   ;;  %s12119_s1 = inlined_call_operand.vmem [shape: bf16[192,128], index: 1, kind: input, shape index: {}]   ;;  %s12120_s2 = inlined_call_operand.vmem [shape: f32[1,128], index: 2, kind: input, shape index: {}]   ;;  %s12121_s3 = inlined_call_operand.vmem [shape: f32[17,128], index: 3, kind: input, shape index: {}]   ;;  %s12122_s4 = inlined_call_operand.vmem [shape: f32[1,128], index: 4, kind: input, shape index: {}]   ;;  %s12123_s5 = inlined_call_operand.vmem [shape: f32[1,128], index: 5, kind: input, shape index: {}]   ;;  %s12124_s6 = inlined_call_operand.vmem [shape: f32[2,1,128], index: 6, kind: input, shape index: {}]   ;;  %s12125_s7 = inlined_call_operand.vmem [shape: f32[2,1,128], index: 7, kind: input, shape index: {}]   ;;  %s12126_s8 = inlined_call_operand.vmem [shape: bf16[2,128,384], index: 8, kind: input, shape index: {}]   ;;  %s12127_s9 = inlined_call_operand.vmem [shape: f32[2,1,384], index: 9, kind: input, shape index: {}]   ;;  %s12128_s10 = inlined_call_operand.vmem [shape: bf16[2,128,128], index: 10, kind: input, shape index: {}]   ;;  %s12129_s11 = inlined_call_operand.vmem [shape: f32[2,1,128], index: 11, kind: input, shape index: {}]   ;;  %s12130_s12 = inlined_call_operand.vmem [shape: f32[2,1,128], index: 12, kind: input, shape index: {}]   ;;  %s12131_s13 = inlined_call_operand.vmem [shape: f32[2,1,128], index: 13, kind: input, shape index: {}]   ;;  %s12132_s14 = inlined_call_operand.vmem [shape: bf16[2,128,512], index: 14, kind: input, shape index: {}]   ;;  %s12133_s15 = inlined_call_operand.vmem [shape: f32[2,1,512], index: 15, kind: input, shape index: {}]   ;;  %s12134_s16 = inlined_call_operand.vmem [shape: bf16[2,512,128], index: 16, kind: input, shape index: {}]   ;;  %s12135_s17 = inlined_call_operand.vmem [shape: f32[2,1,128], index: 17, kind: input, shape index: {}]   ;;  %s12136_s18 = inlined_call_operand.hbm [shape: f32[2,16,128], index: 18, kind: output, shape index: {}]  }
   0x1   :  { %12150 = sst [smem:[#allocation13_spill]] %s12118_s0 }
   0x2   :  { %12151 = sst [smem:[#allocation14_spill]] %s12119_s1 }
   0x3   :  { %12152 = sst [smem:[#allocation15_spill]] %s12120_s2 }
   0x4   :  { %12153 = sst [smem:[#allocation16_spill]] %s12121_s3 }
   0x5   :  { %12154 = sst [smem:[#allocation17_spill]] %s12122_s4 }
   0x6   :  { %12155 = sst [smem:[#allocation18_spill]] %s12136_s18 }
   0x7   :  { %23 = vsyncpa [#allocation3], 0 }
   0x8   :  { %25 = vsyncpa [#allocation3 + $0x1], 0  ;;  %s8773_s27 = smov 0   ;;  %s8775_s28 = smov 0  }
   0x9   :  { %s8777_s29 = smov 0   ;;  %s8779_s30 = smov 0  }
   0xa LB: > { %12156 = sst [smem:[#allocation5_spill]] %s8655_s27  ;;  %s8794_s0 = sadd.s32 4294967295, %s8667_s30   ;;  %s8667_s30 = sphi %s8779_s30, %s12218_s30   ;;  %s8663_s29 = sphi %s8777_s29, %s12223_s29   ;;  %s8659_s28 = sphi %s8775_s28, %s12222_s28   ;;  %s8655_s27 = sphi %s8773_s27, %s12221_s27  }
   0xb   : > { %12157 = sst [smem:[#allocation6_spill]] %s8663_s29  ;;  %s7016_s19 = sadd.s32 4294967294, %s8667_s30  }
   0xc   : > { %12158 = sst [smem:[#allocation7_spill]] %s8667_s30  ;;  %s8798_s1 = sadd.s32 1, %s8667_s30  }
   0xd   : > { %12159 = sst [smem:[#allocation8_spill]] %s8794_s0  ;;  %s421_s20 = sadd.s32 1, %s8663_s29 }
   0xe   : > { %12160 = sst [smem:[#allocation9_spill]] %s8798_s1  ;;  %s418_s21 = ssub.s32 %s8667_s30, %s8798_s1 }
   0xf   : > { %p431_p0 = scmp.ne.s32.totalorder %s8663_s29, %s8659_s28  ;;  %p419_p1 = scmp.eq.s32.totalorder %s418_s21, 0 }
  0x10   : > { %p432_p2 = scmp.eq.s32.totalorder %s8794_s0, 1  ;;  %p437_p3 = scmp.ne.s32.totalorder %s8659_s28, %s8655_s27 }
  0x11   : > { %p438_p4 = scmp.eq.s32.totalorder %s7016_s19, 1  ;;  %p7019_p7 = scmp.ge.s32.totalorder %s8667_s30, 1 }
  0x12   : > { %s8809_s22 = scalar_select %p419_p1, %s8663_s29, %s421_s20  }
  0x13   : > { %p8811_p5 = por %p432_p2, %p431_p0  ;;  %p8815_p6 = por %p438_p4, %p437_p3 }
  0x14   : > { %12161 = sst [smem:[#allocation10_spill]] %s8809_s22  ;;  %p515_p8 = scmp.lt.s32.totalorder %s8667_s30, 3 }
  0x15   : > { %s12162_s2 = scalar_select %p8811_p5, 1, 0 }
  0x16   : > { %s12164_s23 = scalar_select %p8815_p6, 1, 0 }
  0x17   : > { %12163 = sst [smem:[#allocation11_spill]] %s12162_s2  ;;  %p516_p9 = pnand %p7019_p7, %p515_p8 }
  0x18   : > { %12165 = sst [smem:[#allocation12_spill]] %s12164_s23  ;;  %p569_p10 = scmp.lt.s32.totalorder (!%p516_p9), %s8794_s0, 1 }
  0x19   : > { %519 = sbr.rel (%p516_p9) target bundleno = 4693 (0x1255), region = 92  ;;  %s12166_s26 = sld [smem:[#allocation14_spill]] (!%p516_p9) }
  0x1a   : > { %s12167_s21 = sld [smem:[#allocation13_spill]] (!%p516_p9)  ;;  %s12148_s1 = smov (!%p516_p9), 64  }
  0x1b   : > { %s12169_s3 = sld [smem:[#allocation16_spill]] (!%p516_p9)  ;;  %s8672_s27 = smov (!%p516_p9), 32  }
  0x1c   : > { %s12170_s4 = sld [smem:[#allocation17_spill]] (!%p516_p9)  ;;  %s12189_s25 = smov (!%p516_p9), 64  }
  0x1d   : > { %s12213_s19 = sld [smem:[#allocation18_spill]] (!%p516_p9) }
  0x1e   : > { %s570_s29 = scalar_select %p569_p10, %s8794_s0, 1  ;;  %vm677_vm0 = vcmask 523264   ;;  %vm722_vm1 = vcmask 1040384   ;;  %v8669_v32 = vmov 128.0  }
  0x1f   : > { %v8061_v0 = vld [vmem:[%s12166_s26 + $0x38] sm:$0xff]  ;;  %v8060_v2 = vld [vmem:[%s12166_s26 + $0x30] sm:$0xff]  ;;  %v8059_v4 = vld [vmem:[%s12166_s26 + $0x28] sm:$0xff]  ;;  %8381 = vrcp.f32 %v8669_v32 }
  0x20   : > { %v8065_v1 = vld [vmem:[%s12166_s26 + $0x58] sm:$0xff]  ;;  %681 = vmatpush.bf16.msra.mxu0 %v8061_v0  ;;  %v8064_v3 = vld [vmem:[%s12166_s26 + $0x50] sm:$0xff]  ;;  %s8053_s24 = sshll.u32 %s570_s29, 5  ;;  %v8063_v5 = vld [vmem:[%s12166_s26 + $0x48] sm:$0xff]  ;;  %s8670_s29 = smov 96  }
  0x21   : > { %699 = vmatpush.bf16.msra.mxu1 %v8065_v1  ;;  %s573_s2 = scalar_lea.vmem %s12167_s21, %s8053_s24  ;;  %v8058_v6 = vld [vmem:[%s12166_s26 + $0x20] sm:$0xff]  ;;  %v8057_v10 = vld [vmem:[%s12166_s26 + $0x18] sm:$0xff]  ;;  %v8056_v12 = vld [vmem:[%s12166_s26 + $0x10] sm:$0xff]  ;;  %s12168_s21 = sld [smem:[#allocation15_spill]] }
  0x22   : > { %v8062_v7 = vld [vmem:[%s12166_s26 + $0x40] sm:$0xff]  ;;  %v576_v8 = vld [vmem:[%s573_s2 + $0x8] sm:$0xff]  ;;  %v578_v9 = vld [vmem:[%s573_s2 + $0x18] sm:$0xff]  ;;  %s566_s24 = sand.u32 1, %s8659_s28  }
  0x23   : > { %v580_v11 = vpack.c.bf16 %v578_v9, %v576_v8  ;;  %v8055_v13 = vld [vmem:[%s12166_s26 + $0x8] sm:$0xff]  ;;  %v8054_v14 = vld [vmem:[%s12166_s26] sm:$0xff]  ;;  %v577_v16 = vld [vmem:[%s573_s2 + $0x10] sm:$0xff]  ;;  %s7020_s18 = sshll.u32 %s566_s24, 4  ;;  %s8625_s0 = scalar_lea.hbm %s12213_s19, 32 }
  0x24   : > { %682 = vmatpush.bf16.msra.mxu0 %v8060_v2  ;;  %v575_v15 = vld [vmem:[%s573_s2] sm:$0xff]  ;;  %v712_v19 = vld [vmem:[%s12169_s3 + $0x10] sm:$0x1]  ;;  %v711_v29 = vld [vmem:[%s12169_s3 + $0x8] sm:$0xff]  ;;  %s568_s22 = scalar_lea.vmem [#allocation2], %s7020_s18 }
  0x25   : > { %700 = vmatpush.bf16.msra.mxu1 %v8064_v3  ;;  %v579_v17 = vpack.c.bf16 %v577_v16, %v575_v15  ;;  %v710_v24 = vld [vmem:[%s12169_s3] sm:$0xff]  ;;  %v8382_v33 = vpop.eup %8381 }
  0x26   : > { %v727_v34 = vmul.f32 128.0, %v8382_v33  ;;  %vm731_vm2 = vweird.f32 %v8382_v33  ;;  %v8368_v9 = vld [vmem:[%s12123_s5] ss:$0 sm:$0xff] }
  0x27   : > { %v709_v18 = vld [vmem:[%s12168_s21] sm:$0x1]  ;;  %s6951_s21 = sshll.u32 %s568_s22, 4  ;;  %s6952_s21 = int_to_ptr.vmem [resolvable:$true] %s6951_s21 }
  0x28   : > { %683 = vmatpush.bf16.msra.mxu0 %v8059_v4  ;;  %v715_v20 = vadd.f32 %v712_v19, %v709_v18  ;;  %v728_v35 = vsub.f32 1.0, %v727_v34 }
  0x29   : > { %701 = vmatpush.bf16.msra.mxu1 %v8063_v5  ;;  %v8367_v5 = vld [vmem:[%s12170_s4] ss:$0 sm:$0xff] }
  0x2a   : > { %v723_v21 = vsel %vm722_vm1, %v715_v20, 0.0  ;;  %v729_v36 = vmul.f32 %v8382_v33, %v728_v35 }
  0x2b   : > { %724 = vadd.xlane.f32.xlu1 %v723_v21 }
  0x2c   : > { %684 = vmatpush.bf16.msra.mxu0 %v8058_v6  ;;  %v730_v37 = vadd.f32 %v8382_v33, %v729_v36 }
  0x2d   : > { %702 = vmatpush.bf16.msra.mxu1 %v8062_v7 }
  0x2e   : > { %v8876_v38 = vsel %vm731_vm2, %v8382_v33, %v730_v37 }
  0x30   : > { %685 = vmatpush.bf16.msra.mxu0 %v8057_v10  ;;  %7071 = vmatmul.msk.bf16.vlgmr.msra.gmra.mxu1 %vm677_vm0, %v580_v11 }
  0x34   : > { %686 = vmatpush.bf16.msra.mxu0 %v8056_v12 }
  0x38   : > { %687 = vmatpush.bf16.msra.mxu0 %v8055_v13 }
  0x3c   : > { %688 = vmatpush.bf16.msra.mxu0 %v8054_v14 }
  0x3f   : > { %689 = vmatmul.bf16.vlgmr.msra.gmra.mxu0 %v579_v17 }
  0x9e   : > { %v725_v43 = vpop.xlane.xlu1 %724 }
  0x9f   : > { %v735_v45 = vmul.f32 %v8876_v38, %v725_v43 }
  0xa1   : > { %v738_v48 = vsub.f32 %v715_v20, %v735_v45  ;;  %v8088_v45 = vld [vmem:[%s12126_s8 + $0xb0] sm:$0xf0] }
  0xa3   : > { %v741_v50 = vmul.f32 %v738_v48, %v738_v48 }
  0xa5   : > { %v746_v51 = vsel %vm722_vm1, %v741_v50, 0.0  ;;  %v8089_v50 = vld [vmem:[%s12126_s8 + $0xb8] sm:$0xf0] }
  0xad   : > { %v704_v22 = vpop.f32.mrf.mxu1 }
  0xb5   : > { %v706_v27 = vpop.f32.mrf.mxu1 }
  0xbc   : > { %v690_v23 = vpop.f32.mrf.mxu0 }
  0xbd   : > { %v705_v25 = vadd.f32 %v704_v22, %v690_v23 }
  0xbf   : > { %v713_v26 = vadd.f32 %v710_v24, %v705_v25 }
  0xc1   : > { %718 = vadd.xlane.f32.xlu0 %v713_v26 }
  0xc4   : > { %v692_v28 = vpop.f32.mrf.mxu0 }
  0xc5   : > { %v707_v30 = vadd.f32 %v706_v27, %v692_v28 }
  0xc7   : > { %v714_v31 = vadd.f32 %v711_v29, %v707_v30 }
  0xc9   : > { %720 = vadd.xlane.f32.xlu0 %v714_v31 }
 0x134   : > { %v719_v39 = vpop.xlane.xlu0 %718 }
 0x135   : > { %v733_v40 = vmul.f32 %v8876_v38, %v719_v39 }
 0x137   : > { %v736_v41 = vsub.f32 %v713_v26, %v733_v40 }
 0x139   : > { %v739_v42 = vmul.f32 %v736_v41, %v736_v41 }
 0x13b   : > { %742 = vadd.xlane.f32.xlu1 %v739_v42 }
 0x13c   : > { %v721_v44 = vpop.xlane.xlu0 %720 }
 0x13d   : > { %v734_v46 = vmul.f32 %v8876_v38, %v721_v44  ;;  %v7158_v44 = vld [vmem:[%s12126_s8 + $0xa8] sm:$0xf] }
 0x13f   : > { %v737_v47 = vsub.f32 %v714_v31, %v734_v46  ;;  %v8087_v46 = vld [vmem:[%s12126_s8 + $0xac] sm:$0xf] }
 0x141   : > { %v740_v49 = vmul.f32 %v737_v47, %v737_v47 }
 0x143   : > { %744 = vadd.xlane.f32.xlu2 %v740_v49  ;;  %v7166_v49 = vld [vmem:[%s12126_s8 + $0xb0] sm:$0xf] }
 0x14b   : > { %747 = vadd.xlane.f32.xlu2 %v746_v51 }
 0x1ae   : > { %v743_v52 = vpop.xlane.xlu1 %742 }
 0x1af   : > { %v749_v53 = vmul.f32 %v743_v52, %v8876_v38  ;;  %v7167_v52 = vor.u32 %v8089_v50, %v7166_v49 }
 0x1b1   : > { %v752_v54 = vadd.f32 1e-05, %v749_v53  ;;  %1082 = vmatpush.bf16.msrb.mxu1 %v7167_v52  ;;  %v7146_v53 = vld [vmem:[%s12126_s8 + $0x90] sm:$0xf]  ;;  %v7074_v52 = vld [vmem:[%s12126_s8] sm:$0xf] }
 0x1b3   : > { %8383 = vrsqrt.f32 %v752_v54  ;;  %vm761_vm4 = vweird.f32 %v752_v54 }
 0x1b6   : > { %v745_v55 = vpop.xlane.xlu2 %744 }
 0x1b7   : > { %v750_v56 = vmul.f32 %v745_v55, %v8876_v38  ;;  %v8084_v55 = vld [vmem:[%s12126_s8 + $0x94] sm:$0xf] }
 0x1b9   : > { %v8384_v57 = vpop.eup %8383  ;;  %v753_v58 = vadd.f32 1e-05, %v750_v56 }
 0x1ba   : > { %v756_v59 = vmul.f32 %v8384_v57, %v752_v54  ;;  %vm762_vm3 = vweird.f32 %v8384_v57  ;;  %v8085_v54 = vld [vmem:[%s12126_s8 + $0x98] sm:$0xf0] }
 0x1bb   : > { %8385 = vrsqrt.f32 %v753_v58  ;;  %vm763_vm5 = vmor %vm761_vm4, %vm762_vm3  ;;  %vm771_vm7 = vweird.f32 %v753_v58  ;;  %v7147_v56 = vor.u32 %v8085_v54, %v7146_v53  ;;  %v8067_v53 = vld [vmem:[%s12126_s8 + $0x8] sm:$0xf0]  ;;  %v8066_v54 = vld [vmem:[%s12126_s8 + $0x4] sm:$0xf] }
 0x1bc   : > { %v757_v60 = vmul.f32 %v8384_v57, %v756_v59  ;;  %v8086_v59 = vld [vmem:[%s12126_s8 + $0xa0] sm:$0xf0] }
 0x1be   : > { %v758_v61 = vmul.f32 0.5, %v757_v60  ;;  %v748_v62 = vpop.xlane.xlu2 %747 }
 0x1bf   : > { %v751_v63 = vmul.f32 %v748_v62, %v8876_v38  ;;  %v7134_v62 = vld [vmem:[%s12126_s8 + $0x78] sm:$0xf] }
 0x1c0   : > { %v759_v0 = vsub.f32 1.5, %v758_v61 }
 0x1c1   : > { %v8386_v1 = vpop.eup %8385  ;;  %v754_v2 = vadd.f32 1e-05, %v751_v63  ;;  %v8082_v63 = vld [vmem:[%s12126_s8 + $0x80] sm:$0xf0] }
 0x1c2   : > { %v760_v3 = vmul.f32 %v8384_v57, %v759_v0  ;;  %v766_v4 = vmul.f32 %v8386_v1, %v753_v58  ;;  %vm772_vm6 = vweird.f32 %v8386_v1  ;;  %v7154_v58 = vld [vmem:[%s12126_s8 + $0x98] sm:$0xf]  ;;  %v8081_v0 = vld [vmem:[%s12126_s8 + $0x7c] sm:$0xf] }
 0x1c3   : > { %8387 = vrsqrt.f32 %v754_v2  ;;  %vm773_vm8 = vmor %vm771_vm7, %vm772_vm6  ;;  %vm781_vm9 = vweird.f32 %v754_v2  ;;  %v7155_v61 = vor.u32 %v8086_v59, %v7154_v58  ;;  %v8068_v58 = vld [vmem:[%s12126_s8 + $0x10] sm:$0xf0]  ;;  %vm1191_vm7 = vcmask 1047556  }
 0x1c4   : > { %v764_v6 = vsel %vm763_vm5, %v8384_v57, %v760_v3  ;;  %v767_v7 = vmul.f32 %v8386_v1, %v766_v4  ;;  %v7148_v57 = vld [vmem:[%s12126_s8 + $0x9c] sm:$0xf0]  ;;  %v8083_v4 = vld [vmem:[%s12126_s8 + $0x88] sm:$0xf0] }
 0x1c5   : > { %v785_v8 = vmul.f32 %v764_v6, %v736_v41  ;;  %v7151_v60 = vor.u32 %v8084_v55, %v7148_v57  ;;  %1083 = vmatpush.bf16.msrb.mxu1 %v7155_v61  ;;  %v7142_v3 = vld [vmem:[%s12126_s8 + $0x80] sm:$0xf]  ;;  %v7075_v55 = vor.u32 %v8067_v53, %v7074_v52  ;;  %v7082_v57 = vld [vmem:[%s12126_s8 + $0x8] sm:$0xf] }
 0x1c6   : > { %v768_v10 = vmul.f32 0.5, %v767_v7  ;;  %v7143_v6 = vor.u32 %v8083_v4, %v7142_v3  ;;  %v7122_v7 = vld [vmem:[%s12126_s8 + $0x60] sm:$0xf]  ;;  %v7083_v61 = vor.u32 %v8068_v58, %v7082_v57 }
 0x1c7   : > { %v791_v11 = vmul.f32 %v8367_v5, %v785_v8  ;;  %v8079_v8 = vld [vmem:[%s12126_s8 + $0x68] sm:$0xf0] }
 0x1c8   : > { %v769_v12 = vsub.f32 1.5, %v768_v10  ;;  %v7123_v10 = vor.u32 %v8079_v8, %v7122_v7 }
 0x1c9   : > { %v8388_v13 = vpop.eup %8387  ;;  %v8891_v14 = vadd.f32 %v8368_v9, %v791_v11  ;;  %1084 = vmatpush.bf16.msrb.mxu1 %v7143_v6  ;;  %v7124_v11 = vld [vmem:[%s12126_s8 + $0x6c] sm:$0xf0] }
 0x1ca   : > { %v770_v15 = vmul.f32 %v8386_v1, %v769_v12  ;;  %v776_v16 = vmul.f32 %v8388_v13, %v754_v2  ;;  %vm782_vm10 = vweird.f32 %v8388_v13  ;;  %v7136_v2 = vld [vmem:[%s12126_s8 + $0x84] sm:$0xf0] }
 0x1cb   : > { %802 = vadd.xlane.f32.xlu0 %v8891_v14  ;;  %vm783_vm11 = vmor %vm781_vm9, %vm782_vm10  ;;  %v7130_v12 = vld [vmem:[%s12126_s8 + $0x68] sm:$0xf]  ;;  %vm2204_vm9 = vcmask 138240   ;;  %vm2211_vm10 = vcmask 131072  }
 0x1cc   : > { %v774_v17 = vsel %vm773_vm8, %v8386_v1, %v770_v15  ;;  %v777_v18 = vmul.f32 %v8388_v13, %v776_v16  ;;  %v7135_v1 = vor.u32 %v8082_v63, %v7134_v62  ;;  %vm2035_vm8 = vcmask 261120  }
 0x1cd   : > { %v786_v19 = vmul.f32 %v774_v17, %v737_v47  ;;  %v7159_v47 = vor.u32 %v8088_v45, %v7158_v44  ;;  %v7110_v17 = vld [vmem:[%s12126_s8 + $0x48] sm:$0xf] }
 0x1ce   : > { %v778_v20 = vmul.f32 0.5, %v777_v18  ;;  %v8076_v18 = vld [vmem:[%s12126_s8 + $0x50] sm:$0xf0]  ;;  %v7088_v45 = vld [vmem:[%s12126_s8 + $0x24] sm:$0xf0] }
 0x1cf   : > { %v792_v21 = vmul.f32 %v8367_v5, %v786_v19  ;;  %1046 = vmatpush.bf16.msra.mxu2 %v7159_v47  ;;  %v8075_v19 = vld [vmem:[%s12126_s8 + $0x4c] sm:$0xf] }
 0x1d0   : > { %v779_v22 = vsub.f32 1.5, %v778_v20  ;;  %v7111_v20 = vor.u32 %v8076_v18, %v7110_v17  ;;  %v8071_v47 = vld [vmem:[%s12126_s8 + $0x28] sm:$0xf0]  ;;  %v8369_v18 = vld [vmem:[%s12124_s6] ss:$0 sm:$0xff] }
 0x1d1   : > { %v8894_v23 = vadd.f32 %v8368_v9, %v792_v21  ;;  %v7112_v21 = vld [vmem:[%s12126_s8 + $0x54] sm:$0xf0] }
 0x1d2   : > { %v780_v24 = vmul.f32 %v8388_v13, %v779_v22  ;;  %v7118_v22 = vld [vmem:[%s12126_s8 + $0x50] sm:$0xf] }
 0x1d3   : > { %804 = vadd.xlane.f32.xlu1 %v8894_v23  ;;  %1047 = vmatpush.bf16.msra.mxu2 %v7147_v56  ;;  %v7076_v56 = vld [vmem:[%s12126_s8 + $0xc] sm:$0xf0] }
 0x1d4   : > { %v784_v25 = vsel %vm783_vm11, %v8388_v13, %v780_v24  ;;  %v8080_v13 = vld [vmem:[%s12126_s8 + $0x70] sm:$0xf0]  ;;  %v8077_v24 = vld [vmem:[%s12126_s8 + $0x58] sm:$0xf0]  ;;  %vm2826_vm11 = vcmask 785408  }
 0x1d5   : > { %v787_v26 = vmul.f32 %v784_v25, %v738_v48  ;;  %v7160_v48 = vld [vmem:[%s12126_s8 + $0xb4] sm:$0xf0]  ;;  %v7131_v16 = vor.u32 %v8080_v13, %v7130_v12  ;;  %v7115_v25 = vor.u32 %v8075_v19, %v7112_v21 }
 0x1d6   : > { %v7163_v51 = vor.u32 %v8087_v46, %v7160_v48  ;;  %v7094_v46 = vld [vmem:[%s12126_s8 + $0x20] sm:$0xf] }
 0x1d7   : > { %v793_v27 = vmul.f32 %v8367_v5, %v787_v26  ;;  %v7139_v5 = vor.u32 %v8081_v0, %v7136_v2  ;;  %1048 = vmatpush.bf16.msra.mxu2 %v7135_v1  ;;  %1085 = vmatpush.bf16.msrb.mxu1 %v7131_v16  ;;  %v7119_v26 = vor.u32 %v8077_v24, %v7118_v22 }
 0x1d8   : > { %1064 = vmatpush.bf16.msra.mxu3 %v7163_v51  ;;  %v7095_v49 = vor.u32 %v8071_v47, %v7094_v46 }
 0x1d9   : > { %v8897_v28 = vadd.f32 %v8368_v9, %v793_v27  ;;  %v8078_v9 = vld [vmem:[%s12126_s8 + $0x64] sm:$0xf]  ;;  %v7098_v27 = vld [vmem:[%s12126_s8 + $0x30] sm:$0xf] }
 0x1da   : > { %v7127_v15 = vor.u32 %v8078_v9, %v7124_v11 }
 0x1db   : > { %v806_v29 = vsel %vm722_vm1, %v8897_v28, 0.0  ;;  %1049 = vmatpush.bf16.msra.mxu2 %v7123_v10  ;;  %1086 = vmatpush.bf16.msrb.mxu1 %v7119_v26  ;;  %v8370_v26 = vld [vmem:[%s12125_s7] ss:$0 sm:$0xff] }
 0x1dc   : > { %807 = vadd.xlane.f32.xlu2 %v806_v29  ;;  %1065 = vmatpush.bf16.msra.mxu3 %v7151_v60  ;;  %v8073_v29 = vld [vmem:[%s12126_s8 + $0x38] sm:$0xf0]  ;;  %v7079_v60 = vor.u32 %v8066_v54, %v7076_v56 }
 0x1df   : > { %1050 = vmatpush.bf16.msra.mxu2 %v7111_v20 }
 0x1e0   : > { %1066 = vmatpush.bf16.msra.mxu3 %v7139_v5 }
 0x1e4   : > { %1067 = vmatpush.bf16.msra.mxu3 %v7127_v15 }
 0x1e8   : > { %1068 = vmatpush.bf16.msra.mxu3 %v7115_v25 }
 0x23e   : > { %v803_v30 = vpop.xlane.xlu0 %802 }
 0x23f   : > { %v809_v31 = vmul.f32 %v803_v30, %v8876_v38  ;;  %v8072_v30 = vld [vmem:[%s12126_s8 + $0x34] sm:$0xf] }
 0x241   : > { %v8903_v32 = vsub.f32 %v8891_v14, %v809_v31  ;;  %v7099_v31 = vor.u32 %v8073_v29, %v7098_v27 }
 0x243   : > { %v815_v33 = vmul.f32 %v8903_v32, %v8903_v32  ;;  %1051 = vmatpush.bf16.msra.mxu2 %v7099_v31 }
 0x245   : > { %818 = vadd.xlane.f32.xlu0 %v815_v33  ;;  %v7100_v33 = vld [vmem:[%s12126_s8 + $0x3c] sm:$0xf0] }
 0x246   : > { %v805_v34 = vpop.xlane.xlu1 %804 }
 0x247   : > { %v810_v35 = vmul.f32 %v805_v34, %v8876_v38  ;;  %v7106_v34 = vld [vmem:[%s12126_s8 + $0x38] sm:$0xf] }
 0x249   : > { %v8909_v36 = vsub.f32 %v8894_v23, %v810_v35  ;;  %v8074_v35 = vld [vmem:[%s12126_s8 + $0x40] sm:$0xf0] }
 0x24b   : > { %v816_v37 = vmul.f32 %v8909_v36, %v8909_v36 }
 0x24d   : > { %820 = vadd.xlane.f32.xlu1 %v816_v37  ;;  %v7103_v37 = vor.u32 %v8072_v30, %v7100_v33 }
 0x24f   : > { %v808_v39 = vpop.xlane.xlu2 %807  ;;  %1069 = vmatpush.bf16.msra.mxu3 %v7103_v37 }
 0x250   : > { %v811_v40 = vmul.f32 %v808_v39, %v8876_v38  ;;  %v7107_v39 = vor.u32 %v8074_v35, %v7106_v34 }
 0x252   : > { %v8915_v41 = vsub.f32 %v8897_v28, %v811_v40  ;;  %1087 = vmatpush.bf16.msrb.mxu1 %v7107_v39  ;;  %v7086_v40 = vld [vmem:[%s12126_s8 + $0x18] sm:$0xf] }
 0x254   : > { %v817_v42 = vmul.f32 %v8915_v41, %v8915_v41 }
 0x256   : > { %v822_v43 = vsel %vm722_vm1, %v817_v42, 0.0  ;;  %v8070_v42 = vld [vmem:[%s12126_s8 + $0x20] sm:$0xf0]  ;;  %1088 = vmatpush.bf16.msrb.mxu1 %v7095_v49 }
 0x257   : > { %823 = vadd.xlane.f32.xlu2 %v822_v43  ;;  %v8069_v43 = vld [vmem:[%s12126_s8 + $0x1c] sm:$0xf]  ;;  %v7087_v44 = vor.u32 %v8070_v42, %v7086_v40 }
 0x258   : > { %v7091_v48 = vor.u32 %v8069_v43, %v7088_v45 }
 0x259   : > { %1052 = vmatpush.bf16.msra.mxu2 %v7087_v44  ;;  %v910_v44 = vld [vmem:[%s12127_s9] sm:$0x7] }
 0x25a   : > { %1070 = vmatpush.bf16.msra.mxu3 %v7091_v48  ;;  %1089 = vmatpush.bf16.msrb.mxu1 %v7083_v61  ;;  %v912_v45 = vperm.slane %v910_v44, 0  ;;  %v913_v46 = vperm.slane %v910_v44, 1 }
 0x25d   : > { %1053 = vmatpush.bf16.msra.mxu2 %v7075_v55 }
 0x25e   : > { %1071 = vmatpush.bf16.msra.mxu3 %v7079_v60 }
 0x2b8   : > { %v819_v50 = vpop.xlane.xlu0 %818 }
 0x2b9   : > { %v825_v51 = vmul.f32 %v819_v50, %v8876_v38 }
 0x2bb   : > { %v828_v59 = vadd.f32 1e-05, %v825_v51 }
 0x2bd   : > { %8389 = vrsqrt.f32 %v828_v59  ;;  %vm837_vm13 = vweird.f32 %v828_v59 }
 0x2c0   : > { %v821_v62 = vpop.xlane.xlu1 %820 }
 0x2c1   : > { %v826_v63 = vmul.f32 %v821_v62, %v8876_v38 }
 0x2c3   : > { %v8390_v0 = vpop.eup %8389  ;;  %v829_v1 = vadd.f32 1e-05, %v826_v63  ;;  %v914_v63 = vperm.slane %v910_v44, 2 }
 0x2c4   : > { %v832_v2 = vmul.f32 %v8390_v0, %v828_v59  ;;  %vm838_vm12 = vweird.f32 %v8390_v0 }
 0x2c5   : > { %8391 = vrsqrt.f32 %v829_v1  ;;  %vm839_vm14 = vmor %vm837_vm13, %vm838_vm12  ;;  %vm847_vm2 = vweird.f32 %v829_v1 }
 0x2c6   : > { %v833_v3 = vmul.f32 %v8390_v0, %v832_v2 }
 0x2c8   : > { %v834_v4 = vmul.f32 0.5, %v833_v3 }
 0x2ca   : > { %v835_v5 = vsub.f32 1.5, %v834_v4  ;;  %v824_v6 = vpop.xlane.xlu2 %823 }
 0x2cb   : > { %v8392_v7 = vpop.eup %8391  ;;  %v827_v8 = vmul.f32 %v824_v6, %v8876_v38 }
 0x2cc   : > { %v836_v9 = vmul.f32 %v8390_v0, %v835_v5  ;;  %v842_v10 = vmul.f32 %v8392_v7, %v829_v1  ;;  %vm848_vm15 = vweird.f32 %v8392_v7 }
 0x2cd   : > { %v830_v11 = vadd.f32 1e-05, %v827_v8  ;;  %vm849_vm3 = vmor %vm847_vm2, %vm848_vm15 }
 0x2ce   : > { %v843_v12 = vmul.f32 %v8392_v7, %v842_v10  ;;  %v840_v13 = vsel %vm839_vm14, %v8390_v0, %v836_v9 }
 0x2cf   : > { %8393 = vrsqrt.f32 %v830_v11  ;;  %v861_v17 = vmul.f32 %v840_v13, %v8903_v32  ;;  %vm857_vm5 = vweird.f32 %v830_v11 }
 0x2d0   : > { %v844_v15 = vmul.f32 0.5, %v843_v12 }
 0x2d1   : > { %v867_v25 = vmul.f32 %v8369_v18, %v861_v17 }
 0x2d2   : > { %v845_v16 = vsub.f32 1.5, %v844_v15  ;;  %v8673_v15 = vmov 1983009808  }
 0x2d3   : > { %v873_v30 = vadd.f32 %v8370_v26, %v867_v25 }
 0x2d4   : > { %v846_v19 = vmul.f32 %v8392_v7, %v845_v16  ;;  %v1196_v16 = vunpack.c.l.s4 %v8673_v15 }
 0x2d5   : > { %v8394_v20 = vpop.eup %8393 }
 0x2d6   : > { %v850_v21 = vsel %vm849_vm3, %v8392_v7, %v846_v19  ;;  %v852_v22 = vmul.f32 %v8394_v20, %v830_v11  ;;  %vm858_vm4 = vweird.f32 %v8394_v20 }
 0x2d7   : > { %v862_v24 = vmul.f32 %v850_v21, %v8909_v36  ;;  %vm859_vm6 = vmor %vm857_vm5, %vm858_vm4 }
 0x2d8   : > { %v853_v27 = vmul.f32 %v8394_v20, %v852_v22 }
 0x2d9   : > { %v868_v29 = vmul.f32 %v8369_v18, %v862_v24 }
 0x2da   : > { %v854_v32 = vmul.f32 0.5, %v853_v27 }
 0x2db   : > { %v874_v31 = vadd.f32 %v8370_v26, %v868_v29 }
 0x2dc   : > { %v855_v33 = vsub.f32 1.5, %v854_v32 }
 0x2dd   : > { %v876_v34 = vpack.c.bf16 %v874_v31, %v873_v30 }
 0x2de   : > { %v856_v35 = vmul.f32 %v8394_v20, %v855_v33 }
 0x2df   : > { %1054 = vmatmul.bf16.vlgmr.msra.gmra.mxu2 %v876_v34  ;;  %1072 = vmatmul.bf16.vlgmr.msra.gmra.mxu3 %v876_v34 }
 0x2e0   : > { %v860_v37 = vsel %vm859_vm6, %v8394_v20, %v856_v35  ;;  %1090 = vmatmul.bf16.vlgmr.msrb.gmra.mxu1 %v876_v34  ;;  %v9139_v20 = vunpack.c.0.s8 %v1196_v16 }
 0x2e1   : > { %v863_v36 = vmul.f32 %v860_v37, %v8915_v41 }
 0x2e3   : > { %v869_v39 = vmul.f32 %v8369_v18, %v863_v36 }
 0x2e5   : > { %v875_v40 = vadd.f32 %v8370_v26, %v869_v39 }
 0x2e7   : > { %v877_v42 = vpack.c.bf16 %v875_v40, %v875_v40 }
 0x2ef   : > { %1059 = vmatmul.bf16.gmra.mxu2 %v877_v42  ;;  %1077 = vmatmul.bf16.gmra.mxu3 %v877_v42 }
 0x2f0   : > { %1095 = vmatmul.bf16.gmra.mxu1 %v877_v42  ;;  %v8674_v42 = vmov 1934713408  }
 0x35d   : > { %v1091_v43 = vpop.f32.mrf.mxu1 }
 0x35e   : > { %v9126_v2 = vadd.f32 %v1091_v43, %v914_v63  ;;  %v1244_v43 = vunpack.c.l.s4 %v8674_v42 }
 0x362   : > { %v1055_v47 = vpop.f32.mrf.mxu2  ;;  %v1073_v48 = vpop.f32.mrf.mxu3 }
 0x363   : > { %v9079_v49 = vadd.f32 %v1055_v47, %v912_v45  ;;  %v9081_v50 = vadd.f32 %v1073_v48, %v913_v46 }
 0x365   : > { %v1093_v41 = vpop.f32.mrf.mxu1  ;;  %1133 = vrot.lane.b32.xlu2 %v9081_v50, %s8670_s29  ;;  %1112 = vrot.lane.b32.xlu0 %v9079_v49, %s12148_s1  ;;  %v1193_v30 = vrot.slane %v9079_v49, 4  ;;  %v1217_v35 = vrot.slane %v9081_v50, 4 }
 0x366   : > { %1103 = vrot.lane.b32.xlu1 %v9079_v49, %s8670_s29  ;;  %v9122_v0 = vadd.f32 %v1093_v41, %v914_v63 }
 0x368   : > { %v8317_v3 = vpack.i.bf16 %v9122_v0, %v9126_v2 }
 0x36a   : > { %v1057_v51 = vpop.f32.mrf.mxu2  ;;  %v1075_v52 = vpop.f32.mrf.mxu3 }
 0x36b   : > { %v1058_v53 = vadd.f32 %v1057_v51, %v912_v45  ;;  %v9102_v62 = vadd.f32 %v1075_v52, %v913_v46 }
 0x36d   : > { %v1096_v54 = vpop.f32.mrf.mxu1  ;;  %1105 = vrot.lane.b32.xlu2 %v1058_v53, %s8670_s29  ;;  %1123 = vrot.lane.b32.xlu0 %v1058_v53, %s8672_s27  ;;  %v1361_v18 = vrot.slane %v1058_v53, 4 }
 0x36e   : > { %1121 = vrot.lane.b32.xlu1 %v9079_v49, %s8672_s27  ;;  %v9124_v1 = vadd.f32 %v1096_v54, %v914_v63  ;;  %v9161_v54 = vunpack.c.0.s8 %v1244_v43 }
 0x370   : > { %v8307_v4 = vpack.i.bf16 %v9126_v2, %v9124_v1 }
 0x372   : > { %v1060_v55 = vpop.f32.mrf.mxu2  ;;  %v1078_v56 = vpop.f32.mrf.mxu3 }
 0x373   : > { %v9093_v57 = vadd.f32 %v1078_v56, %v913_v46  ;;  %v9100_v61 = vadd.f32 %v1060_v55, %v912_v45 }
 0x375   : > { %v1098_v58 = vpop.f32.mrf.mxu1  ;;  %1114 = vrot.lane.b32.xlu2 %v1058_v53, %s12148_s1  ;;  %1155 = vrot.lane.b32.xlu0 %v9093_v57, %s8672_s27 }
 0x376   : > { %1151 = vrot.lane.b32.xlu1 %v9081_v50, %s8672_s27 }
 0x37a   : > { %v1062_v59 = vpop.f32.mrf.mxu2  ;;  %v1080_v60 = vpop.f32.mrf.mxu3 }
 0x37d   : > { %1137 = vrot.lane.b32.xlu2 %v9093_v57, %s8670_s29  ;;  %1125 = vrot.lane.b32.xlu0 %v9100_v61, %s8672_s27 }
 0x37e   : > { %1135 = vrot.lane.b32.xlu1 %v9102_v62, %s8670_s29 }
 0x385   : > { %1116 = vrot.lane.b32.xlu2 %v9100_v61, %s12148_s1  ;;  %1107 = vrot.lane.b32.xlu0 %v9100_v61, %s8670_s29 }
 0x386   : > { %1146 = vrot.lane.b32.xlu1 %v9093_v57, %s12148_s1 }
 0x38d   : > { %1142 = vrot.lane.b32.xlu2 %v9081_v50, %s12148_s1  ;;  %1153 = vrot.lane.b32.xlu0 %v9102_v62, %s8672_s27 }
 0x38e   : > { %1144 = vrot.lane.b32.xlu1 %v9102_v62, %s12148_s1 }
 0x395   : > { %8318 = vrot.lane.b32.xlu2 %v8317_v3, %s12148_s1  ;;  %8313 = vrot.lane.b32.xlu0 %v8317_v3, %s8670_s29 }
 0x396   : > { %8308 = vrot.lane.b32.xlu1 %v8307_v4, %s8672_s27 }
 0x3bf   : > { %v1134_v5 = vpop.permute.xlu2 %1133 }
 0x3c0   : > { %v1229_v33 = vrot.slane %v1134_v5, 4 }
 0x3c7   : > { %v1106_v6 = vpop.permute.xlu2 %1105 }
 0x3c8   : > { %v1373_v19 = vrot.slane %v1106_v6, 4 }
 0x3cf   : > { %v1115_v7 = vpop.permute.xlu2 %1114 }
 0x3d0   : > { %v1359_v17 = vrot.slane %v1115_v7, 4  ;;  %v1362_v24 = vsel %vm1191_vm7, %v1115_v7, %v1361_v18 }
 0x3d1   : > { %v1370_v36 = vperm.slane %v1362_v24, %v9139_v20 }
 0x3d2   : > { %v1360_v32 = vsel %vm1191_vm7, %v1359_v17, %v1058_v53 }
 0x3d3   : > { %v1366_v44 = vperm.slane %v1360_v32, %v9139_v20  ;;  %v1421_v63 = vrot.slane %v1370_v36, 4 }
 0x3d5   : > { %v1409_v60 = vrot.slane %v1366_v44, 4 }
 0x3d7   : > { %v9135_v8 = vpop.permute.xlu2 %1137  ;;  %v1113_v9 = vpop.permute.xlu0 %1112 }
 0x3d8   : > { %v1104_v10 = vpop.permute.xlu1 %1103  ;;  %v1190_v21 = vrot.slane %v1113_v9, 4  ;;  %v1194_v40 = vsel %vm1191_vm7, %v1113_v9, %v1193_v30 }
 0x3d9   : > { %v1205_v25 = vrot.slane %v1104_v10, 4  ;;  %v1202_v53 = vperm.slane %v1194_v40, %v9139_v20 }
 0x3da   : > { %v1192_v39 = vsel %vm1191_vm7, %v1190_v21, %v9079_v49 }
 0x3db   : > { %v1198_v49 = vperm.slane %v1192_v39, %v9139_v20  ;;  %v1253_v15 = vrot.slane %v1202_v53, 4 }
 0x3df   : > { %v1124_v11 = vpop.permute.xlu0 %1123  ;;  %v9137_v12 = vpop.permute.xlu2 %1116 }
 0x3e0   : > { %v1122_v13 = vpop.permute.xlu1 %1121  ;;  %v1371_v26 = vrot.slane %v1124_v11, 4  ;;  %v1374_v31 = vsel %vm1191_vm7, %v1124_v11, %v1373_v19  ;;  %v1527_v7 = vrot.slane %v9137_v12, 4 }
 0x3e1   : > { %v1203_v27 = vrot.slane %v1122_v13, 4  ;;  %v1206_v34 = vsel %vm1191_vm7, %v1122_v13, %v1205_v25  ;;  %v1382_v46 = vperm.slane %v1374_v31, %v9139_v20  ;;  %v1241_v13 = vrot.slane %v1198_v49, 4 }
 0x3e2   : > { %v1372_v45 = vsel %vm1191_vm7, %v1371_v26, %v1106_v6  ;;  %v1214_v48 = vperm.slane %v1206_v34, %v9139_v20 }
 0x3e3   : > { %v1204_v47 = vsel %vm1191_vm7, %v1203_v27, %v1104_v10  ;;  %v1378_v55 = vperm.slane %v1372_v45, %v9139_v20  ;;  %v1419_v3 = vrot.slane %v1382_v46, 4  ;;  %v1422_v16 = vsel %vm1191_vm7, %v1382_v46, %v1421_v63 }
 0x3e4   : > { %v1210_v56 = vperm.slane %v1204_v47, %v9139_v20  ;;  %v1251_v9 = vrot.slane %v1214_v48, 4  ;;  %v9185_v27 = vperm.slane %v1422_v16, %v9161_v54  ;;  %v1254_v30 = vsel %vm1191_vm7, %v1214_v48, %v1253_v15 }
 0x3e5   : > { %v1407_v18 = vrot.slane %v1378_v55, 4  ;;  %v1410_v19 = vsel %vm1191_vm7, %v1378_v55, %v1409_v60  ;;  %v1420_v12 = vsel %vm1191_vm7, %v1419_v3, %v1370_v36  ;;  %v1385_v47 = vrot.slane %v9102_v62, 4 }
 0x3e6   : > { %v1239_v21 = vrot.slane %v1210_v56, 4  ;;  %v9189_v32 = vperm.slane %v1410_v19, %v9161_v54  ;;  %v9195_v34 = vperm.slane %v1420_v12, %v9161_v54  ;;  %v1262_v48 = vperm.slane %v1254_v30, %v9161_v54 }
 0x3e7   : > { %v9141_v22 = vpop.permute.xlu0 %1155  ;;  %v1143_v37 = vpop.permute.xlu2 %1142 }
 0x3e8   : > { %v1152_v29 = vpop.permute.xlu1 %1151  ;;  %v1215_v41 = vrot.slane %v1143_v37, 4  ;;  %v1218_v58 = vsel %vm1191_vm7, %v1143_v37, %v1217_v35  ;;  %v1545_v24 = vrot.slane %v9141_v22, 4  ;;  %v1242_v22 = vsel %vm1191_vm7, %v1210_v56, %v1241_v13 }
 0x3e9   : > { %v1227_v51 = vrot.slane %v1152_v29, 4  ;;  %v1230_v52 = vsel %vm1191_vm7, %v1152_v29, %v1229_v33  ;;  %v1226_v17 = vperm.slane %v1218_v58, %v9139_v20  ;;  %v1252_v29 = vsel %vm1191_vm7, %v1251_v9, %v1202_v53 }
 0x3ea   : > { %v1238_v4 = vperm.slane %v1230_v52, %v9139_v20  ;;  %v1216_v10 = vsel %vm1191_vm7, %v1215_v41, %v9081_v50  ;;  %v1408_v33 = vsel %vm1191_vm7, %v1407_v18, %v1366_v44  ;;  %v1546_v35 = vsel %vm1191_vm7, %v1545_v24, %v9135_v8 }
 0x3eb   : > { %v1228_v11 = vsel %vm1191_vm7, %v1227_v51, %v1134_v5  ;;  %v1222_v25 = vperm.slane %v1216_v10, %v9139_v20  ;;  %v9182_v5 = vsel %vm1191_vm7, %v1527_v7, %v9100_v61  ;;  %v1277_v31 = vrot.slane %v1226_v17, 4 }
 0x3ec   : > { %v1234_v50 = vperm.slane %v1228_v11, %v9139_v20  ;;  %v1275_v26 = vrot.slane %v1238_v4, 4  ;;  %v1240_v61 = vsel %vm1191_vm7, %v1239_v21, %v1198_v49  ;;  %v1258_v36 = vperm.slane %v1252_v29, %v9161_v54 }
 0x3ed   : > { %v1265_v39 = vrot.slane %v1222_v25, 4  ;;  %v1532_v45 = vperm.slane %v9182_v5, %v9139_v20  ;;  %v1469_v44 = vrot.slane %v9185_v27, 4  ;;  %v9206_v46 = vperm.slane %v1242_v22, %v9161_v54 }
 0x3ee   : > { %v1263_v40 = vrot.slane %v1234_v50, 4  ;;  %v1276_v42 = vsel %vm1191_vm7, %v1275_v26, %v1226_v17  ;;  %v1246_v8 = vperm.slane %v1240_v61, %v9161_v54  ;;  %v1550_v41 = vperm.slane %v1546_v35, %v9139_v20 }
 0x3ef   : > { %v1126_v59 = vpop.permute.xlu0 %1125  ;;  %v1278_v51 = vsel %vm1191_vm7, %v1238_v4, %v1277_v31  ;;  %v9214_v52 = vperm.slane %v1408_v33, %v9161_v54  ;;  %v1461_v49 = vrot.slane %v9189_v32, 4  ;;  %v1282_v53 = vperm.slane %v1276_v42, %v9161_v54 }
 0x3f0   : > { %v9167_v6 = vpop.permute.xlu1 %1135  ;;  %v1533_v55 = vrot.slane %v1126_v59, 4  ;;  %v1465_v56 = vrot.slane %v9195_v34, 4  ;;  %v1297_v58 = vrot.slane %v1258_v36, 4  ;;  %v1264_v60 = vsel %vm1191_vm7, %v1263_v40, %v1222_v25 }
 0x3f1   : > { %v1266_v63 = vsel %vm1191_vm7, %v1234_v50, %v1265_v39  ;;  %v1293_v3 = vrot.slane %v9206_v46, 4  ;;  %v1286_v7 = vperm.slane %v1278_v51, %v9161_v54  ;;  %v1289_v10 = vrot.slane %v1246_v8, 4 }
 0x3f2   : > { %v1301_v11 = vrot.slane %v1262_v48, 4  ;;  %v1557_v13 = vrot.slane %v1550_v41, 4  ;;  %v1397_v15 = vrot.slane %v9167_v6, 4  ;;  %v1270_v59 = vperm.slane %v1264_v60, %v9161_v54 }
 0x3f3   : > { %v1274_v16 = vperm.slane %v1266_v63, %v9161_v54  ;;  %v1295_v17 = vrot.slane %v1282_v53, 4  ;;  %v1299_v26 = vrot.slane %v1286_v7, 4  ;;  %v1298_v39 = vsel %vm1191_vm7, %v1282_v53, %v1297_v58 }
 0x3f4   : > { %v1302_v31 = vsel %vm1191_vm7, %v1286_v7, %v1301_v11  ;;  %v1287_v35 = vrot.slane %v1270_v59, 4 }
 0x3f5   : > { %v1296_v42 = vsel %vm1191_vm7, %v1295_v17, %v1258_v36  ;;  %v1294_v63 = vsel %vm1191_vm7, %v1274_v16, %v1293_v3  ;;  %v1300_v7 = vsel %vm1191_vm7, %v1299_v26, %v1262_v48 }
 0x3f6   : > { %v9251_v36 = vsel %vm1191_vm7, %v1287_v35, %v1246_v8  ;;  %v1605_v11 = vrot.slane %v1296_v42, 4  ;;  %v1457_v8 = vrot.slane %v9214_v52, 4 }
 0x3f7   : > { %v1108_v37 = vpop.permute.xlu0 %1107 }
 0x3f8   : > { %v1147_v43 = vpop.permute.xlu1 %1146  ;;  %v1534_v4 = vsel %vm1191_vm7, %v1533_v55, %v1108_v37  ;;  %v1290_v37 = vsel %vm1191_vm7, %v1270_v59, %v1289_v10  ;;  %v1291_v10 = vrot.slane %v1274_v16, 4  ;;  %v1581_v16 = vrot.slane %v9251_v36, 4 }
 0x3f9   : > { %v1539_v9 = vrot.slane %v1147_v43, 4  ;;  %v1538_v21 = vperm.slane %v1534_v4, %v9139_v20  ;;  %v1593_v53 = vrot.slane %v1290_v37, 4  ;;  %v1617_v4 = vrot.slane %v1298_v39, 4 }
 0x3fb   : > { %v1540_v18 = vsel %vm1191_vm7, %v1539_v9, %v9093_v57  ;;  %v1551_v43 = vrot.slane %v1538_v21, 4  ;;  %v1618_v21 = vsel %vm1191_vm7, %v1302_v31, %v1617_v4 }
 0x3fc   : > { %v1544_v24 = vperm.slane %v1540_v18, %v9139_v20  ;;  %v1591_v18 = vrot.slane %v1294_v63, 4 }
 0x3fd   : > { %v1552_v3 = vsel %vm1191_vm7, %v1551_v43, %v1532_v45  ;;  %v1594_v45 = vsel %vm1191_vm7, %v1294_v63, %v1593_v53 }
 0x3fe   : > { %v1558_v33 = vsel %vm1191_vm7, %v1557_v13, %v1544_v24  ;;  %v1615_v13 = vrot.slane %v1302_v31, 4  ;;  %v1556_v24 = vperm.slane %v1552_v3, %v9161_v54  ;;  %v9277_v31 = vsel %vm1191_vm7, %v1291_v10, %v9206_v46 }
 0x3ff   : > { %v1154_v19 = vpop.permute.xlu0 %1153  ;;  %v1562_v51 = vperm.slane %v1558_v33, %v9161_v54  ;;  %v9280_v33 = vperm.slane %v1618_v21, %v9139_v20  ;;  %v9288_v35 = vperm.slane %v1594_v45, %v9139_v20 }
 0x400   : > { %v1395_v12 = vrot.slane %v1154_v19, 4  ;;  %v1398_v25 = vsel %vm1191_vm7, %v1154_v19, %v1397_v15  ;;  %v1145_v50 = vpop.permute.xlu1 %1144  ;;  %v1603_v15 = vrot.slane %v1300_v7, 4 }
 0x401   : > { %v1406_v29 = vperm.slane %v1398_v25, %v9139_v20  ;;  %v1383_v22 = vrot.slane %v1145_v50, 4  ;;  %v1386_v30 = vsel %vm1191_vm7, %v1145_v50, %v1385_v47  ;;  %v1563_v48 = vrot.slane %v1562_v51, 4 }
 0x402   : > { %v1396_v57 = vsel %vm1191_vm7, %v1395_v12, %v9167_v6  ;;  %v1394_v61 = vperm.slane %v1386_v30, %v9139_v20  ;;  %v1606_v12 = vsel %vm1191_vm7, %v1300_v7, %v1605_v11  ;;  %v1616_v25 = vsel %vm1191_vm7, %v1615_v13, %v1298_v39 }
 0x403   : > { %v1402_v40 = vperm.slane %v1396_v57, %v9139_v20  ;;  %v1384_v47 = vsel %vm1191_vm7, %v1383_v22, %v9102_v62  ;;  %v1443_v6 = vrot.slane %v1406_v29, 4  ;;  %v9273_v30 = vsel %vm1191_vm7, %v1563_v48, %v1556_v24 }
 0x404   : > { %v1445_v41 = vrot.slane %v1394_v61, 4  ;;  %v1390_v60 = vperm.slane %v1384_v47, %v9139_v20  ;;  %v1592_v39 = vsel %vm1191_vm7, %v1591_v18, %v1290_v37  ;;  %v1639_v63 = vrot.slane %v9288_v35, 4 }
 0x405   : > { %v1431_v55 = vrot.slane %v1402_v40, 4  ;;  %v1444_v17 = vsel %vm1191_vm7, %v1443_v6, %v1394_v61  ;;  %v1582_v61 = vsel %vm1191_vm7, %v9277_v31, %v1581_v16  ;;  %v9319_v7 = vperm.slane %v1592_v39, %v9139_v20 }
 0x406   : > { %v1446_v58 = vsel %vm1191_vm7, %v1406_v29, %v1445_v41  ;;  %v1433_v9 = vrot.slane %v1390_v60, 4  ;;  %v1450_v26 = vperm.slane %v1444_v17, %v9161_v54  ;;  %v1604_v29 = vsel %vm1191_vm7, %v1603_v15, %v1296_v42 }
 0x407   : > { %v1454_v62 = vperm.slane %v1446_v58, %v9161_v54  ;;  %v1432_v59 = vsel %vm1191_vm7, %v1431_v55, %v1390_v60  ;;  %v9299_v42 = vperm.slane %v1606_v12, %v9139_v20  ;;  %v1803_v41 = vrot.slane %v9273_v30, 4 }
 0x408   : > { %v1434_v19 = vsel %vm1191_vm7, %v1402_v40, %v1433_v9  ;;  %v1438_v50 = vperm.slane %v1432_v59, %v9161_v54  ;;  %v9292_v40 = vperm.slane %v1616_v25, %v9139_v20  ;;  %v1466_v47 = vsel %vm1191_vm7, %v1450_v26, %v1465_v56 }
 0x409   : > { %v1467_v5 = vrot.slane %v1454_v62, 4  ;;  %v1442_v22 = vperm.slane %v1434_v19, %v9161_v54  ;;  %v1470_v57 = vsel %vm1191_vm7, %v1454_v62, %v1469_v44  ;;  %v1463_v44 = vrot.slane %v1450_v26, 4 }
 0x40a   : > { %v1455_v43 = vrot.slane %v1438_v50, 4  ;;  %v9306_v37 = vperm.slane %v1604_v29, %v9139_v20  ;;  %v9312_v55 = vperm.slane %v1582_v61, %v9139_v20  ;;  %v1804_v60 = vsel %vm1191_vm7, 0.0, %v1803_v41 }
 0x40b   : > { %v9296_v46 = vsel %vm1191_vm7, %v1467_v5, %v9185_v27  ;;  %v1462_v51 = vsel %vm1191_vm7, %v1442_v22, %v1461_v49  ;;  %v1727_v27 = vrot.slane %v1470_v57, 4  ;;  %v1663_v56 = vrot.slane %v9280_v33, 4 }
 0x40c   : > { %v1715_v6 = vrot.slane %v9296_v46, 4  ;;  %v1651_v53 = vrot.slane %v9292_v40, 4  ;;  %v1729_v58 = vrot.slane %v1466_v47, 4  ;;  %v1812_v49 = vperm.slane %v1804_v60, %v9139_v20 }
 0x40d   : > { %v9325_v4 = vsel %vm1191_vm7, %v1455_v43, %v9214_v52  ;;  %v1464_v9 = vsel %vm1191_vm7, %v1463_v44, %v9195_v34  ;;  %v1703_v62 = vrot.slane %v1462_v51, 4  ;;  %v1664_v10 = vsel %vm1191_vm7, %v1663_v56, %v9299_v42 }
 0x40e   : > { %v1728_v11 = vsel %vm1191_vm7, %v1727_v27, %v1466_v47  ;;  %v1828_v13 = vperm.slane %v1812_v49, %v9161_v54  ;;  %v1823_v3 = vrot.slane %v1812_v49, 4  ;;  %v1670_v15 = vperm.slane %v1664_v10, %v9161_v54 }
 0x40f   : > { %v1653_v48 = vrot.slane %v9306_v37, 4  ;;  %v1459_v59 = vrot.slane %v1442_v22, 4  ;;  %v1716_v52 = vsel %vm1191_vm7, %v1715_v6, %v1464_v9  ;;  %v1640_v17 = vsel %vm1191_vm7, %v1639_v63, %v9312_v55 }
 0x410   : > { %v1693_v34 = vrot.slane %v9325_v4, 4  ;;  %v1997_v18 = vpack.c.bf16 %v1828_v13, %v1828_v13  ;;  %v1837_v19 = vrot.slane %v1828_v13, 4  ;;  %v1458_v16 = vsel %vm1191_vm7, %v1438_v50, %v1457_v8 }
 0x411   : > { %v1730_v21 = vsel %vm1191_vm7, %v1470_v57, %v1729_v58  ;;  %v9342_v24 = vperm.slane %v1728_v11, %v9139_v20  ;;  %v1824_v5 = vsel %vm1191_vm7, 0.0, %v1823_v3  ;;  %v1704_v45 = vsel %vm1191_vm7, %v1703_v62, %v1458_v16 }
 0x412   : > { %v9347_v12 = vperm.slane %v1716_v52, %v9139_v20  ;;  %v1646_v25 = vperm.slane %v1640_v17, %v9161_v54  ;;  %v1683_v26 = vrot.slane %v1670_v15, 4  ;;  %v2032_v29 = vunpack.c.l.b16 %v1997_v18 }
 0x413   : > { %v1838_v22 = vsel %vm1191_vm7, 0.0, %v1837_v19  ;;  %v1832_v8 = vperm.slane %v1824_v5, %v9161_v54  ;;  %v9354_v50 = vsel %vm1191_vm7, %v1459_v59, %v9189_v32  ;;  %v1705_v57 = vrot.slane %v1458_v16, 4 }
 0x414   : > { %v1717_v61 = vrot.slane %v1464_v9, 4  ;;  %v1738_v39 = vperm.slane %v1730_v21, %v9139_v20  ;;  %v1694_v43 = vsel %vm1191_vm7, %v9354_v50, %v1693_v34  ;;  %v9360_v44 = vperm.slane %v1704_v45, %v9139_v20 }
 0x415   : > { %v1763_v47 = vrot.slane %v9342_v24, 4  ;;  %v2034_v41 = vpack.c.b16 %v2032_v29, %v2032_v29  ;;  %v1579_v27 = vrot.slane %v9277_v31, 4  ;;  %v1765_v6 = vrot.slane %v9347_v12, 4 }
 0x416   : > { %v2000_v60 = vpack.c.bf16 %v1838_v22, %v1838_v22  ;;  %v1839_v32 = vrot.slane %v1832_v8, 4  ;;  %v1684_v63 = vsel %vm1191_vm7, %v1683_v26, %v1646_v25  ;;  %v2003_v58 = vpack.c.bf16 %v1832_v8, %v1832_v8 }
 0x417   : > { %v2046_v56 = vsel %vm2035_vm8, %v2034_v41, 0  ;;  %v1691_v49 = vrot.slane %v9354_v50, 4  ;;  %v1702_v9 = vperm.slane %v1694_v43, %v9139_v20  ;;  %v1706_v10 = vsel %vm1191_vm7, %v1462_v51, %v1705_v57 }
 0x418   : > { %2054 = vmatpush.bf16.xpose.msrb.mxu0 %v2046_v56  ;;  %v2079_v62 = vunpack.c.l.b16 %v2000_v60  ;;  %v1718_v31 = vsel %vm1191_vm7, %v9296_v46, %v1717_v61  ;;  %v1775_v11 = vrot.slane %v1738_v39, 4  ;;  %v2125_v13 = vunpack.c.l.b16 %v2003_v58 }
 0x419   : > { %v1714_v3 = vperm.slane %v1706_v10, %v9139_v20  ;;  %v1726_v59 = vperm.slane %v1718_v31, %v9139_v20  ;;  %v1995_v52 = vpack.c.bf16 %v1684_v63, %v1684_v63  ;;  %v1840_v34 = vsel %vm1191_vm7, 0.0, %v1839_v32 }
 0x41a   : > { %v2081_v17 = vpack.c.b16 %v2079_v62, %v2079_v62  ;;  %v1685_v18 = vrot.slane %v1646_v25, 4  ;;  %v1641_v19 = vrot.slane %v9312_v55, 4  ;;  %v2127_v16 = vpack.c.b16 %v2125_v13, %v2125_v13 }
 0x41b   : > { %v1751_v21 = vrot.slane %v1714_v3, 4  ;;  %v1776_v51 = vsel %vm1191_vm7, %v1775_v11, %v1726_v59  ;;  %v2030_v5 = vunpack.c.l.b16 %v1995_v52  ;;  %v2006_v26 = vpack.c.bf16 %v1840_v34, %v1840_v34 }
 0x41c   : > { %v2092_v46 = vsel %vm2035_vm8, %v2081_v17, 0  ;;  %v1782_v45 = vperm.slane %v1776_v51, %v9161_v54  ;;  %v1686_v29 = vsel %vm1191_vm7, %v1670_v15, %v1685_v18  ;;  %v2138_v22 = vsel %vm2035_vm8, %v2127_v16, 0 }
 0x41d   : > { %2100 = vmatpush.bf16.xpose.msrb.mxu2 %v2092_v46  ;;  %v1752_v8 = vsel %vm1191_vm7, %v1751_v21, %v1702_v9  ;;  %v1998_v25 = vpack.c.bf16 %v1686_v29, %v1686_v29  ;;  %v1642_v55 = vsel %vm1191_vm7, %v9288_v35, %v1641_v19  ;;  %2146 = vmatpush.bf16.xpose.msrb.mxu3 %v2138_v22  ;;  %v2171_v61 = vunpack.c.l.b16 %v2006_v26 }
 0x41e   : > { %v1758_v50 = vperm.slane %v1752_v8, %v9161_v54  ;;  %v1795_v57 = vrot.slane %v1782_v45, 4  ;;  %v9386_v43 = vperm.slane %v1642_v55, %v9161_v54  ;;  %v1665_v15 = vrot.slane %v9299_v42, 4 }
 0x41f   : > { %v2077_v41 = vunpack.c.l.b16 %v1998_v25  ;;  %v1753_v60 = vrot.slane %v1702_v9, 4  ;;  %v1777_v32 = vrot.slane %v1726_v59, 4  ;;  %v2173_v56 = vpack.c.b16 %v2171_v61, %v2171_v61 }
 0x420   : > { %v1796_v63 = vsel %vm1191_vm7, %v1795_v57, %v1758_v50  ;;  %v1797_v58 = vrot.slane %v1758_v50, 4  ;;  %v1580_v35 = vsel %vm1191_vm7, %v1579_v27, %v9251_v36  ;;  %v1666_v10 = vsel %vm1191_vm7, %v9280_v33, %v1665_v15 }
 0x421   : > { %v1996_v62 = vpack.c.bf16 %v1796_v63, %v1796_v63  ;;  %v1754_v31 = vsel %vm1191_vm7, %v1714_v3, %v1753_v60  ;;  %v1778_v11 = vsel %vm1191_vm7, %v1738_v39, %v1777_v32  ;;  %v2184_v13 = vsel %vm2035_vm8, %v2173_v56, 0 }
 0x422   : > { %v1798_v42 = vsel %vm1191_vm7, %v1782_v45, %v1797_v58  ;;  %v9399_v9 = vperm.slane %v1666_v10, %v9161_v54  ;;  %v9402_v59 = vperm.slane %v1754_v31, %v9161_v54  ;;  %v9405_v27 = vperm.slane %v1778_v11, %v9161_v54 }
 0x423   : > { %v2031_v52 = vunpack.c.l.b16 %v1996_v62  ;;  %v1999_v36 = vpack.c.bf16 %v1798_v42, %v1798_v42  ;;  %v1586_v33 = vperm.slane %v1580_v35, %v9139_v20  ;;  %v1627_v39 = vrot.slane %v9319_v7, 4 }
 0x424   : > { %v1687_v3 = vrot.slane %v9399_v9, 4  ;;  %v1652_v17 = vsel %vm1191_vm7, %v1651_v53, %v9306_v37  ;;  %v1692_v34 = vsel %vm1191_vm7, %v1691_v49, %v9325_v4  ;;  %v1799_v16 = vrot.slane %v9405_v27, 4 }
 0x425   : > { %v2033_v18 = vpack.c.b16 %v2031_v52, %v2030_v5  ;;  %v2078_v19 = vunpack.c.l.b16 %v1999_v36  ;;  %v1658_v21 = vperm.slane %v1652_v17, %v9161_v54  ;;  %v1628_v46 = vsel %vm1191_vm7, %v1627_v39, %v1586_v33 }
 0x426   : > { %v1688_v51 = vsel %vm1191_vm7, %v1687_v3, %v9386_v43  ;;  %v1698_v45 = vperm.slane %v1692_v34, %v9139_v20  ;;  %v1739_v26 = vrot.slane %v9360_v44, 4  ;;  %v1800_v4 = vsel %vm1191_vm7, %v1799_v16, %v9402_v59 }
 0x427   : > { %v2043_v53 = vsel %vm2035_vm8, %v2033_v18, 0  ;;  %v2080_v29 = vpack.c.b16 %v2078_v19, %v2077_v41  ;;  %v2001_v49 = vpack.c.bf16 %v1688_v51, %v1688_v51  ;;  %v2002_v5 = vpack.c.bf16 %v1800_v4, %v1800_v4 }
 0x428   : > { %2055 = vmatpush.bf16.xpose.msrb.mxu0 %v2043_v53  ;;  %v1634_v22 = vperm.slane %v1628_v46, %v9161_v54  ;;  %v1675_v8 = vrot.slane %v1658_v21, 4  ;;  %v1740_v25 = vsel %vm1191_vm7, %v1739_v26, %v1698_v45  ;;  %v1764_v61 = vsel %vm1191_vm7, %v1763_v47, %v9347_v12 }
 0x429   : > { %v2089_v55 = vsel %vm2035_vm8, %v2080_v29, 0  ;;  %v2123_v50 = vunpack.c.l.b16 %v2001_v49  ;;  %v1746_v57 = vperm.slane %v1740_v25, %v9161_v54  ;;  %v2124_v41 = vunpack.c.l.b16 %v2002_v5 }
 0x42a   : > { %2101 = vmatpush.bf16.xpose.msrb.mxu2 %v2089_v55  ;;  %v1676_v15 = vsel %vm1191_vm7, %v1675_v8, %v1634_v22  ;;  %v1770_v60 = vperm.slane %v1764_v61, %v9161_v54  ;;  %v1677_v32 = vrot.slane %v1634_v22, 4  ;;  %v1629_v58 = vrot.slane %v1586_v33, 4 }
 0x42b   : > { %v1971_v63 = vmul.f32 0.17677669, %v1676_v15  ;;  %v1789_v56 = vrot.slane %v1746_v57, 4  ;;  %v1654_v35 = vsel %vm1191_vm7, %v9292_v40, %v1653_v48  ;;  %v2126_v62 = vpack.c.b16 %v2124_v41, %v2123_v50 }
 0x42c   : > { %v1787_v10 = vrot.slane %v1770_v60, 4  ;;  %v1678_v31 = vsel %vm1191_vm7, %v1658_v21, %v1677_v32  ;;  %v9442_v47 = vperm.slane %v1654_v35, %v9161_v54  ;;  %v1630_v52 = vsel %vm1191_vm7, %v9319_v7, %v1629_v58 }
 0x42d   : > { %v1983_v11 = vpack.c.bf16 %v1971_v63, %v1971_v63  ;;  %v1974_v42 = vmul.f32 0.17677669, %v1678_v31  ;;  %v2135_v36 = vsel %vm2035_vm8, %v2126_v62, 0  ;;  %v9450_v40 = vperm.slane %v1630_v52, %v9161_v54 }
 0x42e   : > { %v1788_v37 = vsel %vm1191_vm7, %v1787_v10, %v1746_v57  ;;  %2147 = vmatpush.bf16.xpose.msrb.mxu3 %v2135_v36  ;;  %v1679_v39 = vrot.slane %v9442_v47, 4  ;;  %v1741_v18 = vrot.slane %v1698_v45, 4  ;;  %v1766_v7 = vsel %vm1191_vm7, %v9342_v24, %v1765_v6 }
 0x42f   : > { %v1972_v48 = vmul.f32 0.17677669, %v1788_v37  ;;  %v1986_v3 = vpack.c.bf16 %v1974_v42, %v1974_v42  ;;  %v2022_v17 = vunpack.c.l.b16 %v1983_v11  ;;  %v1774_v51 = vperm.slane %v1766_v7, %v9161_v54 }
 0x430   : > { %2192 = vmatpush.bf16.xpose.msra.mxu0 %v2184_v13  ;;  %v1790_v13 = vsel %vm1191_vm7, %v1770_v60, %v1789_v56  ;;  %v1680_v21 = vsel %vm1191_vm7, %v1679_v39, %v9450_v40  ;;  %v1742_v26 = vsel %vm1191_vm7, %v9360_v44, %v1741_v18  ;;  %v1689_v29 = vrot.slane %v9386_v43, 4 }
 0x431   : > { %v1975_v33 = vmul.f32 0.17677669, %v1790_v13  ;;  %v1984_v19 = vpack.c.bf16 %v1972_v48, %v1972_v48  ;;  %v2069_v16 = vunpack.c.l.b16 %v1986_v3  ;;  %v1977_v53 = vmul.f32 0.17677669, %v1680_v21 }
 0x432   : > { %v1750_v12 = vperm.slane %v1742_v26, %v9161_v54  ;;  %v1791_v4 = vrot.slane %v1774_v51, 4  ;;  %v1801_v24 = vrot.slane %v9402_v59, 4  ;;  %v1690_v49 = vsel %vm1191_vm7, %v9399_v9, %v1689_v29 }
 0x433   : > { %v1987_v34 = vpack.c.bf16 %v1975_v33, %v1975_v33  ;;  %v2023_v45 = vunpack.c.l.b16 %v1984_v19  ;;  %v1808_v5 = vperm.slane %v9273_v30, %v9139_v20  ;;  %v1989_v25 = vpack.c.bf16 %v1977_v53, %v1977_v53 }
 0x434   : > { %v1792_v8 = vsel %vm1191_vm7, %v1791_v4, %v1750_v12  ;;  %v1802_v44 = vsel %vm1191_vm7, %v9405_v27, %v1801_v24  ;;  %v2004_v55 = vpack.c.bf16 %v1690_v49, %v1690_v49  ;;  %v1793_v36 = vrot.slane %v1750_v12, 4 }
 0x435   : > { %v2070_v46 = vunpack.c.l.b16 %v1987_v34  ;;  %v2025_v22 = vpack.c.b16 %v2023_v45, %v2022_v17  ;;  %v1978_v43 = vmul.f32 0.17677669, %v1792_v8  ;;  %v2005_v50 = vpack.c.bf16 %v1802_v44, %v1802_v44 }
 0x436   : > { %v1818_v59 = vperm.slane %v1808_v5, %v9161_v54  ;;  %v1813_v9 = vrot.slane %v1808_v5, 4  ;;  %v2169_v61 = vunpack.c.l.b16 %v2004_v55  ;;  %v2115_v32 = vunpack.c.l.b16 %v1989_v25 }
 0x437   : > { %v2072_v6 = vpack.c.b16 %v2070_v46, %v2069_v16  ;;  %7168 = vmatmul.msk.bf16.vlgmr.msrb.gmra.mxu0 %vm2035_vm8, %v2025_v22  ;;  %v1990_v57 = vpack.c.bf16 %v1978_v43, %v1978_v43  ;;  %v2170_v30 = vunpack.c.l.b16 %v2005_v50  ;;  %v1681_v37 = vrot.slane %v9450_v40, 4 }
 0x438   : > { %v1973_v41 = vmul.f32 0.17677669, %v1818_v59  ;;  %v1833_v15 = vrot.slane %v1818_v59, 4  ;;  %v1814_v60 = vsel %vm1191_vm7, 0.0, %v1813_v9  ;;  %v1794_v39 = vsel %vm1191_vm7, %v1774_v51, %v1793_v36 }
 0x439   : > { %7170 = vmatmul.msk.bf16.vlgmr.msrb.gmra.mxu2 %vm2035_vm8, %v2072_v6  ;;  %v2116_v27 = vunpack.c.l.b16 %v1990_v57  ;;  %v2172_v63 = vpack.c.b16 %v2170_v30, %v2169_v61  ;;  %v1822_v10 = vperm.slane %v1814_v60, %v9161_v54  ;;  %v1682_v34 = vsel %vm1191_vm7, %v9442_v47, %v1681_v37 }
 0x43a   : > { %v1834_v56 = vsel %vm1191_vm7, 0.0, %v1833_v15  ;;  %v1985_v31 = vpack.c.bf16 %v1973_v41, %v1973_v41  ;;  %v1981_v18 = vmul.f32 0.17677669, %v1794_v39  ;;  %v1980_v7 = vmul.f32 0.17677669, %v1682_v34 }
 0x43b   : > { %v2118_v58 = vpack.c.b16 %v2116_v27, %v2115_v32  ;;  %v2181_v35 = vsel %vm2035_vm8, %v2172_v63, 0  ;;  %v1976_v62 = vmul.f32 0.17677669, %v1834_v56  ;;  %v1979_v42 = vmul.f32 0.17677669, %v1822_v10 }
 0x43c   : > { %2193 = vmatpush.bf16.xpose.msra.mxu0 %v2181_v35  ;;  %v2024_v52 = vunpack.c.l.b16 %v1985_v31  ;;  %v1993_v16 = vpack.c.bf16 %v1981_v18, %v1981_v18  ;;  %v1992_v40 = vpack.c.bf16 %v1980_v7, %v1980_v7  ;;  %v1835_v46 = vrot.slane %v1822_v10, 4  ;;  %v9539_v10 = vpop.permute.xlu2 %8318  ;;  %v9541_v31 = vpop.permute.xlu1 %8308 }
 0x43d   : > { %7172 = vmatmul.msk.bf16.vlgmr.msrb.gmra.mxu3 %vm2035_vm8, %v2118_v58  ;;  %v1988_v11 = vpack.c.bf16 %v1976_v62, %v1976_v62  ;;  %v1991_v48 = vpack.c.bf16 %v1979_v42, %v1979_v42  ;;  %v8311_v42 = vunpack.i.h.bf16 %v9541_v31  ;;  %v1305_v39 = vrot.slane %v9126_v2, 4 }
 0x43e   : > { %v2026_v3 = vpack.c.b16 %v2024_v52, %v2024_v52  ;;  %v2162_v21 = vunpack.c.l.b16 %v1993_v16  ;;  %v2161_v26 = vunpack.c.l.b16 %v1992_v40  ;;  %v1836_v29 = vsel %vm1191_vm7, 0.0, %v1835_v46 }
 0x43f   : > { %v2071_v13 = vunpack.c.l.b16 %v1988_v11  ;;  %v2117_v17 = vunpack.c.l.b16 %v1991_v48  ;;  %v1982_v51 = vmul.f32 0.17677669, %v1836_v29  ;;  %v8320_v11 = vunpack.i.l.bf16 %v9539_v10 }
 0x440   : > { %v2164_v53 = vpack.c.b16 %v2162_v21, %v2161_v26  ;;  %v1315_v37 = vrot.slane %v8311_v42, 4 }
 0x441   : > { %v2073_v33 = vpack.c.b16 %v2071_v13, %v2071_v13  ;;  %v2119_v19 = vpack.c.b16 %v2117_v17, %v2117_v17  ;;  %v1994_v45 = vpack.c.bf16 %v1982_v51, %v1982_v51  ;;  %v9544_v13 = vpop.permute.xlu0 %8313  ;;  %v1303_v52 = vrot.slane %v8320_v11, 4 }
 0x442   : > { %v8315_v36 = vunpack.i.l.bf16 %v9544_v13  ;;  %v1306_v7 = vsel %vm1191_vm7, %v8320_v11, %v1305_v39 }
 0x443   : > { %v2163_v12 = vunpack.c.l.b16 %v1994_v45  ;;  %v1314_v21 = vperm.slane %v1306_v7, %v9139_v20 }
 0x444   : > { %v1317_v17 = vrot.slane %v8315_v36, 4  ;;  %v1316_v18 = vsel %vm1191_vm7, %v1315_v37, %v8315_v36 }
 0x445   : > { %v2165_v4 = vpack.c.b16 %v2163_v12, %v2163_v12  ;;  %v1322_v40 = vperm.slane %v1316_v18, %v9139_v20 }
 0x446   : > { %v1318_v16 = vsel %vm1191_vm7, %v8311_v42, %v1317_v17 }
 0x447   : > { %7169 = vmatmul.msk.bf16.gmra.mxu0 %vm2035_vm8, %v2026_v3  ;;  %v1304_v3 = vsel %vm1191_vm7, %v1303_v52, %v9126_v2  ;;  %v1326_v2 = vperm.slane %v1318_v16, %v9139_v20  ;;  %v1327_v51 = vrot.slane %v1322_v40, 4 }
 0x449   : > { %7171 = vmatmul.msk.bf16.gmra.mxu2 %vm2035_vm8, %v2073_v33 }
 0x44d   : > { %7173 = vmatmul.msk.bf16.gmra.mxu3 %vm2035_vm8, %v2119_v19  ;;  %v1310_v19 = vperm.slane %v1304_v3, %v9139_v20 }
 0x44f   : > { %v1329_v26 = vrot.slane %v1310_v19, 4 }
 0x451   : > { %v1330_v45 = vsel %vm1191_vm7, %v1322_v40, %v1329_v26 }
 0x457   : > { %7174 = vmatmul.msk.bf16.vlgmr.msra.gmra.mxu0 %vm2035_vm8, %v2164_v53 }
 0x467   : > { %7175 = vmatmul.msk.bf16.gmra.mxu0 %vm2035_vm8, %v2165_v4  ;;  %v1341_v4 = vrot.slane %v1314_v21, 4 }
 0x4b4   : > { %v2057_v47 = vpop.f32.mrf.mxu0 }
 0x4b5   : > { %v2205_v24 = vsel %vm2204_vm9, %v2057_v47, -inf }
 0x4b6   : > { %2206 = vmax.xlane.f32.xlu2 %v2205_v24 }
 0x4bc   : > { %v9491_v6 = vpop.f32.mrf.mxu2  ;;  %v9493_v49 = vpop.f32.mrf.mxu0 }
 0x4bd   : > { %v2208_v5 = vsel %vm2204_vm9, %v9493_v49, -inf  ;;  %v2215_v25 = vsel %vm2204_vm9, %v9491_v6, -inf }
 0x4be   : > { %2209 = vmax.xlane.f32.xlu1 %v2208_v5  ;;  %v1338_v5 = vperm.slane %v1330_v45, %v9161_v54 }
 0x4c0   : > { %v9497_v22 = vpop.f32.mrf.mxu3 }
 0x4c1   : > { %v2224_v44 = vsel %vm2204_vm9, %v9497_v22, -inf }
 0x4c2   : > { %2225 = vmax.xlane.f32.xlu0 %v2224_v44  ;;  %v1339_v44 = vrot.slane %v1326_v2, 4 }
 0x4c4   : > { %v9499_v8 = vpop.f32.mrf.mxu2  ;;  %v9503_v43 = vpop.f32.mrf.mxu0 }
 0x4c5   : > { %v2218_v55 = vsel %vm2204_vm9, %v9499_v8, -inf }
 0x4c6   : > { %2216 = vmax.xlane.f32.xlu1 %v2215_v25 }
 0x4c8   : > { %v9509_v50 = vpop.f32.mrf.mxu3 }
 0x4c9   : > { %v2227_v9 = vsel %vm2204_vm9, %v9509_v50, -inf }
 0x4ca   : > { %2219 = vmax.xlane.f32.xlu0 %v2218_v55  ;;  %2228 = vmax.xlane.f32.xlu2 %v2227_v9  ;;  %v1328_v55 = vsel %vm1191_vm7, %v1327_v51, %v1310_v19 }
 0x4cc   : > { %v9511_v59 = vpop.f32.mrf.mxu2  ;;  %v2064_v57 = vpop.f32.mrf.mxu0 }
 0x4cd   : > { %v2221_v62 = vsel %vm2211_vm10, %v9511_v59, -inf }
 0x4d0   : > { %v9515_v61 = vpop.f32.mrf.mxu3 }
 0x4d1   : > { %v2230_v58 = vsel %vm2211_vm10, %v9515_v61, -inf }
 0x4d4   : > { %v2110_v30 = vpop.f32.mrf.mxu2  ;;  %v9517_v41 = vpop.f32.mrf.mxu0 }
 0x4d5   : > { %v2233_v15 = vsel %vm2204_vm9, %v9517_v41, -inf }
 0x4d6   : > { %2234 = vmax.xlane.f32.xlu0 %v2233_v15 }
 0x4d8   : > { %v2156_v60 = vpop.f32.mrf.mxu3 }
 0x4d9   : > { %v1334_v60 = vperm.slane %v1328_v55, %v9161_v54 }
 0x4dc   : > { %v9521_v32 = vpop.f32.mrf.mxu0 }
 0x4dd   : > { %v2236_v27 = vsel %vm2204_vm9, %v9521_v32, -inf }
 0x4de   : > { %2237 = vmax.xlane.f32.xlu2 %v2236_v27  ;;  %v1340_v27 = vsel %vm1191_vm7, %v1339_v44, %v1314_v21 }
 0x4df   : > { %1176 = vrot.lane.b32.xlu1 %v9124_v1, %s12148_s1 }
 0x4e4   : > { %v9527_v63 = vpop.f32.mrf.mxu0 }
 0x4e5   : > { %v2239_v35 = vsel %vm2211_vm10, %v9527_v63, -inf }
 0x4ea   : > { %1167 = vrot.lane.b32.xlu0 %v9124_v1, %s8670_s29 }
 0x4ec   : > { %v2202_v56 = vpop.f32.mrf.mxu0 }
 0x4ed   : > { %v1353_v56 = vrot.slane %v1338_v5, 4 }
 0x4ef   : > { %v1354_v36 = vsel %vm1191_vm7, 0.0, %v1353_v56 }
 0x4f0   : > { %v1846_v17 = vrot.slane %v1354_v36, 4 }
 0x4f6   : > { %1183 = vrot.lane.b32.xlu2 %v9122_v0, %s8672_s27 }
 0x514   : > { %2231 = vmax.xlane.f32.xlu0 %v2230_v58 }
 0x51c   : > { %2240 = vmax.xlane.f32.xlu0 %v2239_v35 }
 0x51f   : > { %2222 = vmax.xlane.f32.xlu2 %v2221_v62  ;;  %v1346_v62 = vperm.slane %v1340_v27, %v9161_v54 }
 0x521   : > { %v1355_v7 = vrot.slane %v1346_v62, 4 }
 0x523   : > { %v1356_v21 = vsel %vm1191_vm7, 0.0, %v1355_v7 }
 0x529   : > { %v2207_v33 = vpop.xlane.xlu2 %2206 }
 0x52a   : > { %v2242_v48 = vsub.f32 %v2057_v47, %v2207_v33 }
 0x52c   : > { %v2254_v34 = vmul.f32 1.442695, %v2242_v48 }
 0x52e   : > { %8395 = vpow2.f32 %v2254_v34 }
 0x531   : > { %v2210_v46 = vpop.xlane.xlu1 %2209 }
 0x532   : > { %v2243_v53 = vsub.f32 %v9493_v49, %v2210_v46  ;;  %v1342_v49 = vsel %vm1191_vm7, %v1326_v2, %v1341_v4 }
 0x533   : > { %v1350_v30 = vperm.slane %v1342_v49, %v9161_v54 }
 0x534   : > { %v9559_v29 = vpop.eup %8395  ;;  %v2256_v12 = vmul.f32 1.442695, %v2243_v53  ;;  %v1841_v53 = vsel %vm1191_vm7, %v1353_v56, %v1334_v60  ;;  %v2212_v56 = vsel %vm2211_vm10, %v9503_v43, -inf }
 0x535   : > { %v2278_v47 = vsel %vm2204_vm9, %v9559_v29, 0.0  ;;  %v2226_v24 = vpop.xlane.xlu0 %2225  ;;  %v1357_v11 = vrot.slane %v1350_v30, 4  ;;  %v1845_v44 = vperm.slane %v1841_v53, %v9139_v20 }
 0x536   : > { %8397 = vpow2.f32 %v2256_v12  ;;  %2279 = vadd.xlane.f32.xlu1 %v2278_v47  ;;  %v2248_v25 = vsub.f32 %v9497_v22, %v2226_v24  ;;  %v8321_v24 = vunpack.i.h.bf16 %v9539_v10 }
 0x537   : > { %v1358_v19 = vsel %vm1191_vm7, 0.0, %v1357_v11  ;;  %v1852_v45 = vsel %vm1191_vm7, %v1357_v11, %v1346_v62  ;;  %v1865_v30 = vrot.slane %v1845_v44, 4 }
 0x538   : > { %v2266_v9 = vmul.f32 1.442695, %v2248_v25  ;;  %v1856_v25 = vperm.slane %v1852_v45, %v9139_v20 }
 0x539   : > { %v2217_v57 = vpop.xlane.xlu1 %2216 }
 0x53a   : > { %v2245_v15 = vsub.f32 %v9491_v6, %v2217_v57  ;;  %8399 = vpow2.f32 %v2266_v9  ;;  %v1351_v6 = vrot.slane %v1334_v60, 4  ;;  %v1471_v57 = vrot.slane %v8321_v24, 4 }
 0x53b   : > { %v1877_v27 = vrot.slane %v1856_v25, 4 }
 0x53c   : > { %v9572_v58 = vpop.eup %8397  ;;  %v2260_v35 = vmul.f32 1.442695, %v2245_v15  ;;  %v1352_v18 = vsel %vm1191_vm7, 0.0, %v1351_v6 }
 0x53d   : > { %v2281_v22 = vsel %vm2204_vm9, %v9572_v58, 0.0  ;;  %v2220_v42 = vpop.xlane.xlu0 %2219  ;;  %v2229_v52 = vpop.xlane.xlu2 %2228  ;;  %v1847_v40 = vsel %vm1191_vm7, %v1846_v17, %v1352_v18 }
 0x53e   : > { %8401 = vpow2.f32 %v2260_v35  ;;  %2282 = vadd.xlane.f32.xlu2 %v2281_v22  ;;  %v2246_v37 = vsub.f32 %v9499_v8, %v2220_v42  ;;  %v2249_v33 = vsub.f32 %v9509_v50, %v2229_v52  ;;  %v1857_v50 = vrot.slane %v1358_v19, 4 }
 0x53f   : > { %v1851_v2 = vperm.slane %v1847_v40, %v9139_v20  ;;  %v1472_v22 = vsel %vm1191_vm7, %v1471_v57, %v9122_v0  ;;  %v8316_v42 = vunpack.i.h.bf16 %v9544_v13  ;;  %v8310_v13 = vunpack.i.l.bf16 %v9541_v31 }
 0x540   : > { %v9580_v48 = vpop.eup %8399  ;;  %v2262_v3 = vmul.f32 1.442695, %v2246_v37  ;;  %v2268_v39 = vmul.f32 1.442695, %v2249_v33  ;;  %v1858_v12 = vsel %vm1191_vm7, %v1857_v50, %v1356_v21 }
 0x541   : > { %v2296_v34 = vsel %vm2204_vm9, %v9580_v48, 0.0  ;;  %v1862_v55 = vperm.slane %v1858_v12, %v9139_v20  ;;  %v1863_v9 = vrot.slane %v1851_v2, 4  ;;  %v1866_v36 = vsel %vm1191_vm7, %v1851_v2, %v1865_v30 }
 0x542   : > { %8403 = vpow2.f32 %v2262_v3  ;;  %2297 = vadd.xlane.f32.xlu0 %v2296_v34  ;;  %v1874_v17 = vperm.slane %v1866_v36, %v9161_v54  ;;  %v1485_v34 = vrot.slane %v8316_v42, 4  ;;  %v1571_v2 = vrot.slane %v8310_v13, 4 }
 0x543   : > { %8405 = vpow2.f32 %v2268_v39  ;;  %v1864_v10 = vsel %vm1191_vm7, %v1863_v9, %v1845_v44  ;;  %v1875_v60 = vrot.slane %v1862_v55, 4  ;;  %v1878_v33 = vsel %vm1191_vm7, %v1862_v55, %v1877_v27 }
 0x544   : > { %v9586_v16 = vpop.eup %8401  ;;  %v1870_v6 = vperm.slane %v1864_v10, %v9161_v54  ;;  %v1886_v19 = vperm.slane %v1878_v33, %v9161_v54  ;;  %v1893_v31 = vrot.slane %v1874_v17, 4 }
 0x545   : > { %v2287_v8 = vsel %vm2204_vm9, %v9586_v16, 0.0 }
 0x546   : > { %2288 = vadd.xlane.f32.xlu1 %v2287_v8  ;;  %v1889_v7 = vrot.slane %v1870_v6, 4  ;;  %v1891_v44 = vrot.slane %v1886_v19, 4 }
 0x548   : > { %v9592_v46 = vpop.eup %8403 }
 0x549   : > { %v2235_v26 = vpop.xlane.xlu0 %2234  ;;  %v9596_v51 = vpop.eup %8405  ;;  %v2290_v4 = vsel %vm2204_vm9, %v9592_v46, 0.0 }
 0x54a   : > { %v2251_v47 = vsub.f32 %v9517_v41, %v2235_v26  ;;  %2291 = vadd.xlane.f32.xlu2 %v2290_v4  ;;  %v2299_v49 = vsel %vm2204_vm9, %v9596_v51, 0.0  ;;  %v1473_v41 = vrot.slane %v9122_v0, 4  ;;  %v1478_v0 = vperm.slane %v1472_v22, %v9139_v20 }
 0x54c   : > { %v2272_v5 = vmul.f32 1.442695, %v2251_v47  ;;  %v1474_v62 = vsel %vm1191_vm7, %v8321_v24, %v1473_v41  ;;  %v1497_v50 = vrot.slane %v1478_v0, 4 }
 0x54d   : > { %v1482_v3 = vperm.slane %v1474_v62, %v9139_v20 }
 0x54e   : > { %8407 = vpow2.f32 %v2272_v5  ;;  %2300 = vadd.xlane.f32.xlu1 %v2299_v49 }
 0x54f   : > { %v1509_v53 = vrot.slane %v1482_v3, 4 }
 0x551   : > { %v2238_v15 = vpop.xlane.xlu2 %2237  ;;  %v1177_v39 = vpop.permute.xlu1 %1176 }
 0x552   : > { %v2252_v35 = vsub.f32 %v9521_v32, %v2238_v15  ;;  %2213 = vmax.xlane.f32.xlu2 %v2212_v56  ;;  %v1876_v32 = vsel %vm1191_vm7, %v1875_v60, %v1856_v25  ;;  %v1565_v40 = vrot.slane %v1177_v39, 4  ;;  %v9652_v56 = vsel %vm1191_vm7, %v1886_v19, %v1893_v31 }
 0x553   : > { %v1882_v18 = vperm.slane %v1876_v32, %v9161_v54 }
 0x554   : > { %v9617_v11 = vpop.eup %8407  ;;  %v2274_v52 = vmul.f32 1.442695, %v2252_v35  ;;  %v1566_v57 = vsel %vm1191_vm7, %v1565_v40, %v9124_v1 }
 0x555   : > { %v2305_v37 = vsel %vm2204_vm9, %v9617_v11, 0.0  ;;  %v1887_v24 = vrot.slane %v1882_v18, 4  ;;  %v9638_v5 = vsel %vm1191_vm7, %v1882_v18, %v1889_v7 }
 0x556   : > { %8409 = vpow2.f32 %v2274_v52  ;;  %2306 = vadd.xlane.f32.xlu0 %v2305_v37  ;;  %v2010_v36 = vpack.c.bf16 %v9638_v5, %v9638_v5  ;;  %v9661_v37 = vsel %vm1191_vm7, %v1891_v44, %v1874_v17 }
 0x557   : > { %v1888_v7 = vsel %vm1191_vm7, %v1887_v24, %v1870_v6 }
 0x559   : > { %v1184_v8 = vpop.permute.xlu2 %1183 }
 0x55a   : > { %v1483_v21 = vrot.slane %v1184_v8, 4  ;;  %v1486_v26 = vsel %vm1191_vm7, %v1184_v8, %v1485_v34 }
 0x55b   : > { %v1494_v45 = vperm.slane %v1486_v26, %v9139_v20 }
 0x55c   : > { %v9634_v12 = vpop.eup %8409  ;;  %v1484_v4 = vsel %vm1191_vm7, %v1483_v21, %v8316_v42  ;;  %v1168_v47 = vpop.permute.xlu0 %1167  ;;  %v1570_v42 = vperm.slane %v1566_v57, %v9139_v20  ;;  %v2007_v57 = vpack.c.bf16 %v1888_v7, %v1888_v7 }
 0x55d   : > { %v1490_v49 = vperm.slane %v1484_v4, %v9139_v20  ;;  %v1507_v25 = vrot.slane %v1494_v45, 4  ;;  %v1510_v55 = vsel %vm1191_vm7, %v1494_v45, %v1509_v53  ;;  %v1572_v9 = vsel %vm1191_vm7, %v1571_v2, %v1168_v47 }
 0x55e   : > { %v1518_v30 = vperm.slane %v1510_v55, %v9161_v54  ;;  %v1576_v41 = vperm.slane %v1572_v9, %v9139_v20  ;;  %v2308_v15 = vsel %vm2204_vm9, %v9634_v12, 0.0  ;;  %v2013_v47 = vpack.c.bf16 %v9661_v37, %v9661_v37 }
 0x55f   : > { %v1495_v10 = vrot.slane %v1490_v49, 4  ;;  %v1498_v60 = vsel %vm1191_vm7, %v1490_v49, %v1497_v50  ;;  %v1508_v27 = vsel %vm1191_vm7, %v1507_v25, %v1482_v3  ;;  %2309 = vadd.xlane.f32.xlu1 %v2308_v15 }
 0x560   : > { %v1506_v35 = vperm.slane %v1498_v60, %v9161_v54  ;;  %v1514_v1 = vperm.slane %v1508_v27, %v9161_v54  ;;  %v1525_v22 = vrot.slane %v1518_v30, 4  ;;  %v1577_v62 = vrot.slane %v1576_v41, 4 }
 0x561   : > { %v1496_v52 = vsel %vm1191_vm7, %v1495_v10, %v1478_v0  ;;  %v8675_v41 = vmov 0  }
 0x562   : > { %v1502_v32 = vperm.slane %v1496_v52, %v9161_v54  ;;  %v1521_v33 = vrot.slane %v1506_v35, 4  ;;  %v1523_v3 = vrot.slane %v1514_v1, 4  ;;  %v1526_v13 = vsel %vm1191_vm7, 0.0, %v1525_v22 }
 0x563   : > { %v1906_v39 = vsel %vm1191_vm7, %v1525_v22, %v1514_v1  ;;  %v1911_v34 = vrot.slane %v1526_v13, 4  ;;  %v1578_v18 = vsel %vm1191_vm7, %v1577_v62, %v1570_v42  ;;  %v9686_v15 = vsel %vm722_vm1, 65535, %v8675_v41 }
 0x564   : > { %v1519_v0 = vrot.slane %v1502_v32, 4  ;;  %v1522_v19 = vsel %vm1191_vm7, 0.0, %v1521_v33  ;;  %v1524_v8 = vsel %vm1191_vm7, 0.0, %v1523_v3  ;;  %v1910_v17 = vperm.slane %v1906_v39, %v9139_v20 }
 0x565   : > { %v1900_v50 = vrot.slane %v1522_v19, 4  ;;  %v1912_v40 = vsel %vm1191_vm7, %v1911_v34, %v1524_v8  ;;  %v1952_v21 = vperm.slane %v1578_v18, %v9161_v54  ;;  %v1895_v26 = vsel %vm1191_vm7, %v1521_v33, %v1502_v32 }
 0x566   : > { %v1520_v53 = vsel %vm1191_vm7, 0.0, %v1519_v0  ;;  %v1916_v2 = vperm.slane %v1912_v40, %v9139_v20  ;;  %v1931_v45 = vrot.slane %v1910_v17, 4  ;;  %v1899_v6 = vperm.slane %v1895_v26, %v9139_v20 }
 0x567   : > { %v1956_v31 = vperm.slane %v1952_v21, %v9139_v20  ;;  %v1901_v4 = vsel %vm1191_vm7, %v1900_v50, %v1520_v53 }
 0x568   : > { %v1929_v24 = vrot.slane %v1916_v2, 4  ;;  %v1905_v44 = vperm.slane %v1901_v4, %v9139_v20  ;;  %v1919_v49 = vrot.slane %v1899_v6, 4  ;;  %v1932_v25 = vsel %vm1191_vm7, %v1916_v2, %v1931_v45 }
 0x569   : > { %v1957_v55 = vrot.slane %v1956_v31, 4  ;;  %v1962_v9 = vperm.slane %v1956_v31, %v9161_v54  ;;  %v1940_v30 = vperm.slane %v1932_v25, %v9161_v54  ;;  %v2361_v45 = vunpack.c.l.b16 %v2007_v57 }
 0x56a   : > { %v1917_v10 = vrot.slane %v1905_v44, 4  ;;  %v1930_v60 = vsel %vm1191_vm7, %v1929_v24, %v1910_v17  ;;  %v1920_v27 = vsel %vm1191_vm7, %v1905_v44, %v1919_v49 }
 0x56b   : > { %v2009_v35 = vpack.c.bf16 %v1962_v9, %v1962_v9  ;;  %v1967_v1 = vrot.slane %v1962_v9, 4  ;;  %v1958_v22 = vsel %vm1191_vm7, 0.0, %v1957_v55  ;;  %v1936_v62 = vperm.slane %v1930_v60, %v9161_v54 }
 0x56c   : > { %v1966_v42 = vperm.slane %v1958_v22, %v9161_v54  ;;  %v1918_v52 = vsel %vm1191_vm7, %v1917_v10, %v1899_v6  ;;  %v1928_v37 = vperm.slane %v1920_v27, %v9161_v54  ;;  %v1945_v32 = vrot.slane %v1940_v30, 4 }
 0x56d   : > { %v2363_v33 = vunpack.c.l.b16 %v2009_v35  ;;  %v1968_v3 = vsel %vm1191_vm7, 0.0, %v1967_v1  ;;  %v1924_v13 = vperm.slane %v1918_v52, %v9161_v54  ;;  %v1941_v39 = vrot.slane %v1936_v62, 4 }
 0x56e   : > { %v2012_v34 = vpack.c.bf16 %v1968_v3, %v1968_v3  ;;  %v2015_v18 = vpack.c.bf16 %v1966_v42, %v1966_v42  ;;  %v1969_v7 = vrot.slane %v1966_v42, 4  ;;  %v1946_v0 = vsel %vm1191_vm7, %v1945_v32, %v1928_v37 }
 0x56f   : > { %v2365_v19 = vpack.c.b16 %v2363_v33, %v2363_v33  ;;  %v1942_v8 = vsel %vm1191_vm7, %v1941_v39, %v1924_v13  ;;  %v1943_v17 = vrot.slane %v1924_v13, 4  ;;  %v2014_v50 = vpack.c.bf16 %v1946_v0, %v1946_v0 }
 0x570   : > { %v2409_v40 = vunpack.c.l.b16 %v2012_v34  ;;  %v2453_v21 = vunpack.c.l.b16 %v2015_v18  ;;  %v2008_v26 = vpack.c.bf16 %v1942_v8, %v1942_v8  ;;  %v1970_v53 = vsel %vm1191_vm7, 0.0, %v1969_v7 }
 0x571   : > { %v2376_v2 = vand.u32 %v9686_v15, %v2365_v19  ;;  %v2018_v6 = vpack.c.bf16 %v1970_v53, %v1970_v53  ;;  %v1944_v31 = vsel %vm1191_vm7, %v1936_v62, %v1943_v17  ;;  %v2407_v55 = vunpack.c.l.b16 %v2010_v36 }
 0x572   : > { %v2411_v4 = vpack.c.b16 %v2409_v40, %v2409_v40  ;;  %v2455_v24 = vpack.c.b16 %v2453_v21, %v2453_v21  ;;  %v2362_v44 = vunpack.c.l.b16 %v2008_v26  ;;  %v2011_v49 = vpack.c.bf16 %v1944_v31, %v1944_v31 }
 0x573   : > { %2384 = vmatpush.bf16.msra.mxu1 %v2376_v2  ;;  %v2497_v25 = vunpack.c.l.b16 %v2018_v6  ;;  %v2452_v9 = vunpack.c.l.b16 %v2014_v50  ;;  %v1947_v41 = vrot.slane %v1928_v37, 4  ;;  %v2016_v22 = vpack.c.bf16 %v9652_v56, %v9652_v56 }
 0x574   : > { %v2420_v10 = vand.u32 %v2411_v4, %v9686_v15  ;;  %v2464_v60 = vand.u32 %v2455_v24, %v9686_v15  ;;  %v2364_v57 = vpack.c.b16 %v2362_v44, %v2361_v45  ;;  %v2408_v27 = vunpack.c.l.b16 %v2011_v49 }
 0x575   : > { %v2499_v35 = vpack.c.b16 %v2497_v25, %v2497_v25  ;;  %v1948_v1 = vsel %vm1191_vm7, %v1940_v30, %v1947_v41  ;;  %v2451_v42 = vunpack.c.l.b16 %v2013_v47  ;;  %v2495_v32 = vunpack.c.l.b16 %v2016_v22 }
 0x576   : > { %2428 = vmatpush.bf16.msra.mxu2 %v2420_v10  ;;  %2472 = vmatpush.bf16.msra.mxu3 %v2464_v60  ;;  %v2410_v62 = vpack.c.b16 %v2408_v27, %v2407_v55  ;;  %v2017_v5 = vpack.c.bf16 %v1948_v1, %v1948_v1 }
 0x577   : > { %2385 = vmatpush.bf16.msra.mxu1 %v2364_v57  ;;  %v2508_v36 = vand.u32 %v2499_v35, %v9686_v15  ;;  %v2454_v52 = vpack.c.b16 %v2452_v9, %v2451_v42 }
 0x578   : > { %v2496_v37 = vunpack.c.l.b16 %v2017_v5 }
 0x579   : > { %2516 = vmatpush.bf16.msrb.mxu0 %v2508_v36 }
 0x57a   : > { %2429 = vmatpush.bf16.msra.mxu2 %v2410_v62  ;;  %2473 = vmatpush.bf16.msra.mxu3 %v2454_v52  ;;  %v2498_v33 = vpack.c.b16 %v2496_v37, %v2495_v32 }
 0x57d   : > { %2517 = vmatpush.bf16.msrb.mxu0 %v2498_v33 }
 0x587   : > { %v2232_v30 = vpop.xlane.xlu0 %2231 }
 0x588   : > { %v2250_v3 = vsub.f32 %v9515_v61, %v2232_v30 }
 0x58a   : > { %v2270_v56 = vmul.f32 1.442695, %v2250_v3 }
 0x58c   : > { %8411 = vpow2.f32 %v2270_v56 }
 0x58f   : > { %v2241_v13 = vpop.xlane.xlu0 %2240 }
 0x590   : > { %v2253_v47 = vsub.f32 %v9527_v63, %v2241_v13 }
 0x592   : > { %v9713_v39 = vpop.eup %8411  ;;  %v2276_v34 = vmul.f32 1.442695, %v2253_v47  ;;  %v2223_v18 = vpop.xlane.xlu2 %2222 }
 0x593   : > { %v2247_v7 = vsub.f32 %v9511_v59, %v2223_v18  ;;  %v2302_v0 = vsel %vm2211_vm10, %v9713_v39, 0.0 }
 0x594   : > { %8413 = vpow2.f32 %v2276_v34  ;;  %2303 = vadd.xlane.f32.xlu1 %v2302_v0 }
 0x595   : > { %v2264_v19 = vmul.f32 1.442695, %v2247_v7 }
 0x597   : > { %8415 = vpow2.f32 %v2264_v19 }
 0x59a   : > { %v9718_v8 = vpop.eup %8413 }
 0x59b   : > { %v2311_v61 = vsel %vm2211_vm10, %v9718_v8, 0.0 }
 0x59c   : > { %2312 = vadd.xlane.f32.xlu2 %v2311_v61 }
 0x59d   : > { %v9722_v63 = vpop.eup %8415 }
 0x59e   : > { %v2293_v17 = vsel %vm2211_vm10, %v9722_v63, 0.0 }
 0x59f   : > { %2294 = vadd.xlane.f32.xlu0 %v2293_v17 }
 0x5a9   : > { %v2280_v59 = vpop.xlane.xlu1 %2279 }
 0x5aa   : > { %8417 = vrcp.f32 %v2280_v59 }
 0x5b0   : > { %v8418_v40 = vpop.eup %8417 }
 0x5b1   : > { %v2283_v50 = vpop.xlane.xlu2 %2282  ;;  %v2326_v21 = vmul.f32 %v8418_v40, %v9559_v29 }
 0x5b2   : > { %8419 = vrcp.f32 %v2283_v50 }
 0x5b3   : > { %v2338_v53 = vpack.c.bf16 %v2326_v21, %v2326_v21 }
 0x5b5   : > { %v2298_v45 = vpop.xlane.xlu0 %2297  ;;  %v2353_v4 = vunpack.c.l.b16 %v2338_v53 }
 0x5b8   : > { %v8420_v26 = vpop.eup %8419 }
 0x5b9   : > { %v2327_v2 = vmul.f32 %v8420_v26, %v9572_v58  ;;  %v2289_v6 = vpop.xlane.xlu1 %2288 }
 0x5ba   : > { %8421 = vrcp.f32 %v2289_v6 }
 0x5bb   : > { %v2339_v31 = vpack.c.bf16 %v2327_v2, %v2327_v2  ;;  %8423 = vrcp.f32 %v2298_v45 }
 0x5bd   : > { %v2354_v24 = vunpack.c.l.b16 %v2339_v31  ;;  %v2292_v44 = vpop.xlane.xlu2 %2291 }
 0x5be   : > { %8425 = vrcp.f32 %v2292_v44 }
 0x5bf   : > { %v2356_v49 = vpack.c.b16 %v2354_v24, %v2353_v4 }
 0x5c0   : > { %v8422_v25 = vpop.eup %8421 }
 0x5c1   : > { %v2329_v55 = vmul.f32 %v8422_v25, %v9586_v16  ;;  %v2301_v9 = vpop.xlane.xlu1 %2300  ;;  %7176 = vmatmul.msk.bf16.vlgmr.msra.gmra.mxu1 %vm2204_vm9, %v2356_v49  ;;  %v8424_v29 = vpop.eup %8423 }
 0x5c2   : > { %8427 = vrcp.f32 %v2301_v9  ;;  %v2332_v10 = vmul.f32 %v8424_v29, %v9580_v48 }
 0x5c3   : > { %v2341_v41 = vpack.c.bf16 %v2329_v55, %v2329_v55 }
 0x5c4   : > { %v8426_v58 = vpop.eup %8425  ;;  %v2344_v62 = vpack.c.bf16 %v2332_v10, %v2332_v10 }
 0x5c5   : > { %v2330_v60 = vmul.f32 %v8426_v58, %v9592_v46  ;;  %v2214_v57 = vpop.xlane.xlu2 %2213  ;;  %v2399_v1 = vunpack.c.l.b16 %v2341_v41 }
 0x5c6   : > { %v2244_v27 = vsub.f32 %v9503_v43, %v2214_v57  ;;  %v2443_v32 = vunpack.c.l.b16 %v2344_v62 }
 0x5c7   : > { %v2342_v22 = vpack.c.bf16 %v2330_v60, %v2330_v60 }
 0x5c8   : > { %v8428_v35 = vpop.eup %8427  ;;  %v2258_v42 = vmul.f32 1.442695, %v2244_v27 }
 0x5c9   : > { %v2333_v16 = vmul.f32 %v8428_v35, %v9596_v51  ;;  %v2400_v5 = vunpack.c.l.b16 %v2342_v22  ;;  %v2307_v36 = vpop.xlane.xlu0 %2306 }
 0x5ca   : > { %8429 = vpow2.f32 %v2258_v42 }
 0x5cb   : > { %v2345_v52 = vpack.c.bf16 %v2333_v16, %v2333_v16  ;;  %v2402_v37 = vpack.c.b16 %v2400_v5, %v2399_v1  ;;  %8431 = vrcp.f32 %v2307_v36 }
 0x5cd   : > { %v2444_v33 = vunpack.c.l.b16 %v2345_v52  ;;  %7178 = vmatmul.msk.bf16.vlgmr.msra.gmra.mxu2 %vm2204_vm9, %v2402_v37 }
 0x5cf   : > { %v2446_v48 = vpack.c.b16 %v2444_v33, %v2443_v32 }
 0x5d0   : > { %v8430_v46 = vpop.eup %8429 }
 0x5d1   : > { %7180 = vmatmul.msk.bf16.vlgmr.msra.gmra.mxu3 %vm2204_vm9, %v2446_v48  ;;  %v2284_v43 = vsel %vm2211_vm10, %v8430_v46, 0.0  ;;  %v8432_v3 = vpop.eup %8431 }
 0x5d2   : > { %v2310_v30 = vpop.xlane.xlu1 %2309  ;;  %2285 = vadd.xlane.f32.xlu0 %v2284_v43  ;;  %v2335_v51 = vmul.f32 %v8432_v3, %v9617_v11 }
 0x5d3   : > { %8433 = vrcp.f32 %v2310_v30 }
 0x5d4   : > { %v2347_v13 = vpack.c.bf16 %v2335_v51, %v2335_v51 }
 0x5d6   : > { %v2487_v18 = vunpack.c.l.b16 %v2347_v13 }
 0x5d9   : > { %v8434_v56 = vpop.eup %8433 }
 0x5da   : > { %v2336_v47 = vmul.f32 %v8434_v56, %v9634_v12 }
 0x5dc   : > { %v2348_v34 = vpack.c.bf16 %v2336_v47, %v2336_v47 }
 0x5de   : > { %v2488_v7 = vunpack.c.l.b16 %v2348_v34 }
 0x5e0   : > { %v2490_v0 = vpack.c.b16 %v2488_v7, %v2487_v18 }
 0x5e2   : > { %7182 = vmatmul.msk.bf16.vlgmr.msrb.gmra.mxu0 %vm2204_vm9, %v2490_v0 }
 0x607   : > { %v2304_v19 = vpop.xlane.xlu1 %2303 }
 0x608   : > { %8435 = vrcp.f32 %v2304_v19 }
 0x60e   : > { %v8436_v61 = vpop.eup %8435 }
 0x60f   : > { %v2313_v17 = vpop.xlane.xlu2 %2312  ;;  %v2334_v59 = vmul.f32 %v8436_v61, %v9713_v39 }
 0x610   : > { %8437 = vrcp.f32 %v2313_v17 }
 0x611   : > { %v2346_v50 = vpack.c.bf16 %v2334_v59, %v2334_v59 }
 0x612   : > { %v2295_v40 = vpop.xlane.xlu0 %2294 }
 0x613   : > { %8439 = vrcp.f32 %v2295_v40  ;;  %v2445_v11 = vunpack.c.l.b16 %v2346_v50 }
 0x615   : > { %v2447_v21 = vpack.c.b16 %v2445_v11, %v2445_v11 }
 0x616   : > { %v8438_v26 = vpop.eup %8437 }
 0x617   : > { %7181 = vmatmul.msk.bf16.gmra.mxu3 %vm2204_vm9, %v2447_v21  ;;  %v2337_v12 = vmul.f32 %v8438_v26, %v9718_v8 }
 0x619   : > { %v8440_v53 = vpop.eup %8439  ;;  %v2349_v2 = vpack.c.bf16 %v2337_v12, %v2337_v12 }
 0x61a   : > { %v2331_v45 = vmul.f32 %v8440_v53, %v9722_v63 }
 0x61b   : > { %v2489_v6 = vunpack.c.l.b16 %v2349_v2 }
 0x61c   : > { %v2343_v31 = vpack.c.bf16 %v2331_v45, %v2331_v45 }
 0x61d   : > { %v2491_v4 = vpack.c.b16 %v2489_v6, %v2489_v6 }
 0x61e   : > { %v2401_v24 = vunpack.c.l.b16 %v2343_v31 }
 0x61f   : > { %7183 = vmatmul.msk.bf16.gmra.mxu0 %vm2204_vm9, %v2491_v4 }
 0x620   : > { %v2403_v39 = vpack.c.b16 %v2401_v24, %v2401_v24 }
 0x622   : > { %7179 = vmatmul.msk.bf16.gmra.mxu2 %vm2204_vm9, %v2403_v39 }
 0x63e   : > { %v2387_v55 = vpop.f32.mrf.mxu1 }
 0x63f   : > { %v2530_v58 = vrot.slane %v2387_v55, 4 }
 0x645   : > { %v2286_v44 = vpop.xlane.xlu0 %2285 }
 0x646   : > { %8441 = vrcp.f32 %v2286_v44  ;;  %v2389_v10 = vpop.f32.mrf.mxu1 }
 0x647   : > { %v2586_v1 = vrot.slane %v2389_v10, 4 }
 0x64c   : > { %v8442_v49 = vpop.eup %8441 }
 0x64d   : > { %v2328_v25 = vmul.f32 %v8442_v49, %v8430_v46 }
 0x64f   : > { %v2340_v9 = vpack.c.bf16 %v2328_v25, %v2328_v25 }
 0x650   : > { %v2431_v60 = vpop.f32.mrf.mxu2 }
 0x651   : > { %v2355_v8 = vunpack.c.l.b16 %v2340_v9  ;;  %v2542_v16 = vrot.slane %v2431_v60, 4 }
 0x653   : > { %v2357_v29 = vpack.c.b16 %v2355_v8, %v2355_v8 }
 0x654   : > { %v2475_v41 = vpop.f32.mrf.mxu3 }
 0x655   : > { %7177 = vmatmul.msk.bf16.gmra.mxu1 %vm2204_vm9, %v2357_v29  ;;  %v2528_v63 = vrot.slane %v2475_v41, 4  ;;  %v2531_v57 = vsel %vm1191_vm7, %v2475_v41, %v2530_v58 }
 0x656   : > { %v2539_v22 = vperm.slane %v2531_v57, %v9139_v20 }
 0x657   : > { %v2529_v27 = vsel %vm1191_vm7, %v2528_v63, %v2387_v55 }
 0x658   : > { %v2535_v42 = vperm.slane %v2529_v27, %v9139_v20  ;;  %v2566_v33 = vrot.slane %v2539_v22, 4  ;;  %v2433_v47 = vpop.f32.mrf.mxu2 }
 0x659   : > { %v2598_v59 = vrot.slane %v2433_v47, 4 }
 0x65a   : > { %v2554_v46 = vrot.slane %v2535_v42, 4 }
 0x65c   : > { %v2477_v35 = vpop.f32.mrf.mxu3 }
 0x65d   : > { %v2584_v62 = vrot.slane %v2477_v35, 4  ;;  %v2587_v5 = vsel %vm1191_vm7, %v2477_v35, %v2586_v1 }
 0x65e   : > { %v2595_v43 = vperm.slane %v2587_v5, %v9139_v20 }
 0x65f   : > { %v2519_v36 = vpop.f32.mrf.mxu0  ;;  %v2585_v52 = vsel %vm1191_vm7, %v2584_v62, %v2389_v10 }
 0x660   : > { %v2540_v37 = vrot.slane %v2519_v36, 4  ;;  %v2543_v32 = vsel %vm1191_vm7, %v2519_v36, %v2542_v16  ;;  %v2591_v3 = vperm.slane %v2585_v52, %v9139_v20  ;;  %v2622_v40 = vrot.slane %v2595_v43, 4 }
 0x661   : > { %v2551_v48 = vperm.slane %v2543_v32, %v9139_v20 }
 0x662   : > { %v2541_v30 = vsel %vm1191_vm7, %v2540_v37, %v2431_v60  ;;  %v2610_v50 = vrot.slane %v2591_v3, 4 }
 0x663   : > { %v2547_v51 = vperm.slane %v2541_v30, %v9139_v20  ;;  %v2564_v56 = vrot.slane %v2551_v48, 4  ;;  %v2567_v13 = vsel %vm1191_vm7, %v2551_v48, %v2566_v33 }
 0x664   : > { %v2575_v34 = vperm.slane %v2567_v13, %v9161_v54 }
 0x665   : > { %v2552_v18 = vrot.slane %v2547_v51, 4  ;;  %v2555_v7 = vsel %vm1191_vm7, %v2547_v51, %v2554_v46  ;;  %v2565_v0 = vsel %vm1191_vm7, %v2564_v56, %v2539_v22 }
 0x666   : > { %v2563_v19 = vperm.slane %v2555_v7, %v9161_v54  ;;  %v2571_v61 = vperm.slane %v2565_v0, %v9161_v54  ;;  %v2582_v17 = vrot.slane %v2575_v34, 4 }
 0x667   : > { %v2553_v11 = vsel %vm1191_vm7, %v2552_v18, %v2535_v42  ;;  %v2521_v21 = vpop.f32.mrf.mxu0 }
 0x668   : > { %v2559_v26 = vperm.slane %v2553_v11, %v9161_v54  ;;  %v2578_v12 = vrot.slane %v2563_v19, 4  ;;  %v2580_v53 = vrot.slane %v2571_v61, 4  ;;  %v2583_v2 = vsel %vm1191_vm7, 0.0, %v2582_v17 }
 0x669   : > { %v2665_v45 = vsel %vm1191_vm7, %v2582_v17, %v2571_v61  ;;  %v2670_v6 = vrot.slane %v2583_v2, 4  ;;  %v2596_v31 = vrot.slane %v2521_v21, 4  ;;  %v2599_v4 = vsel %vm1191_vm7, %v2521_v21, %v2598_v59 }
 0x66a   : > { %v2576_v24 = vrot.slane %v2559_v26, 4  ;;  %v2579_v39 = vsel %vm1191_vm7, 0.0, %v2578_v12  ;;  %v2581_v44 = vsel %vm1191_vm7, 0.0, %v2580_v53  ;;  %v2654_v49 = vsel %vm1191_vm7, %v2578_v12, %v2559_v26 }
 0x66b   : > { %v2659_v25 = vrot.slane %v2579_v39, 4  ;;  %v2669_v55 = vperm.slane %v2665_v45, %v9139_v20  ;;  %v2671_v9 = vsel %vm1191_vm7, %v2670_v6, %v2581_v44  ;;  %v2597_v8 = vsel %vm1191_vm7, %v2596_v31, %v2433_v47 }
 0x66c   : > { %v2675_v29 = vperm.slane %v2671_v9, %v9139_v20  ;;  %v2603_v41 = vperm.slane %v2597_v8, %v9139_v20  ;;  %v2607_v63 = vperm.slane %v2599_v4, %v9139_v20  ;;  %v2577_v58 = vsel %vm1191_vm7, 0.0, %v2576_v24 }
 0x66d   : > { %v2690_v10 = vrot.slane %v2669_v55, 4  ;;  %v2658_v60 = vperm.slane %v2654_v49, %v9139_v20  ;;  %v2660_v57 = vsel %vm1191_vm7, %v2659_v25, %v2577_v58 }
 0x66e   : > { %v2608_v27 = vrot.slane %v2603_v41, 4  ;;  %v2611_v35 = vsel %vm1191_vm7, %v2603_v41, %v2610_v50  ;;  %v2620_v1 = vrot.slane %v2607_v63, 4  ;;  %v2623_v22 = vsel %vm1191_vm7, %v2607_v63, %v2622_v40 }
 0x66f   : > { %v2619_v62 = vperm.slane %v2611_v35, %v9161_v54  ;;  %v2631_v16 = vperm.slane %v2623_v22, %v9161_v54  ;;  %v2664_v42 = vperm.slane %v2660_v57, %v9139_v20  ;;  %v2678_v5 = vrot.slane %v2658_v60, 4 }
 0x670   : > { %v2609_v36 = vsel %vm1191_vm7, %v2608_v27, %v2591_v3  ;;  %v2621_v52 = vsel %vm1191_vm7, %v2620_v1, %v2595_v43  ;;  %v2691_v37 = vsel %vm1191_vm7, %v2675_v29, %v2690_v10  ;;  %v2688_v32 = vrot.slane %v2675_v29, 4 }
 0x671   : > { %v2615_v33 = vperm.slane %v2609_v36, %v9161_v54  ;;  %v2627_v48 = vperm.slane %v2621_v52, %v9161_v54  ;;  %v2634_v46 = vrot.slane %v2619_v62, 4  ;;  %v2638_v30 = vrot.slane %v2631_v16, 4 }
 0x672   : > { %v2679_v51 = vsel %vm1191_vm7, %v2664_v42, %v2678_v5  ;;  %v2699_v56 = vperm.slane %v2691_v37, %v9161_v54  ;;  %v2676_v0 = vrot.slane %v2664_v42, 4  ;;  %v2689_v59 = vsel %vm1191_vm7, %v2688_v32, %v2669_v55 }
 0x673   : > { %v2632_v13 = vrot.slane %v2615_v33, 4  ;;  %v2635_v47 = vsel %vm1191_vm7, 0.0, %v2634_v46  ;;  %v2636_v34 = vrot.slane %v2627_v48, 4  ;;  %v2639_v3 = vsel %vm1191_vm7, 0.0, %v2638_v30 }
 0x674   : > { %v2713_v43 = vrot.slane %v2635_v47, 4  ;;  %v2719_v18 = vsel %vm1191_vm7, %v2638_v30, %v2627_v48  ;;  %v2724_v7 = vrot.slane %v2639_v3, 4  ;;  %v2687_v40 = vperm.slane %v2679_v51, %v9161_v54  ;;  %v8096_v3 = vld [vmem:[%s12128_s10 + $0x30] sm:$0xff] }
 0x675   : > { %v2637_v19 = vsel %vm1191_vm7, 0.0, %v2636_v34  ;;  %v2723_v61 = vperm.slane %v2719_v18, %v9139_v20  ;;  %v2633_v17 = vsel %vm1191_vm7, 0.0, %v2632_v13  ;;  %v2708_v11 = vsel %vm1191_vm7, %v2634_v46, %v2615_v33  ;;  %v8097_v34 = vld [vmem:[%s12128_s10 + $0x38] sm:$0xff]  ;;  %v8094_v18 = vld [vmem:[%s12128_s10 + $0x20] sm:$0xff] }
 0x676   : > { %v2725_v50 = vsel %vm1191_vm7, %v2724_v7, %v2637_v19  ;;  %v2714_v21 = vsel %vm1191_vm7, %v2713_v43, %v2633_v17  ;;  %v2712_v26 = vperm.slane %v2708_v11, %v9139_v20  ;;  %v2677_v45 = vsel %vm1191_vm7, %v2676_v0, %v2658_v60  ;;  %2900 = vmatpush.bf16.msrb.mxu1 %v8097_v34  ;;  %v8095_v43 = vld [vmem:[%s12128_s10 + $0x28] sm:$0xff]  ;;  %v8093_v19 = vld [vmem:[%s12128_s10 + $0x18] sm:$0xff] }
 0x677   : > { %v2718_v12 = vperm.slane %v2714_v21, %v9139_v20  ;;  %v2729_v53 = vperm.slane %v2725_v50, %v9139_v20  ;;  %v2744_v2 = vrot.slane %v2723_v61, 4  ;;  %v2695_v6 = vperm.slane %v2689_v59, %v9161_v54  ;;  %v8092_v59 = vld [vmem:[%s12128_s10 + $0x10] sm:$0xff] }
 0x678   : > { %v2732_v31 = vrot.slane %v2712_v26, 4  ;;  %v2683_v4 = vperm.slane %v2677_v45, %v9161_v54  ;;  %v2704_v44 = vrot.slane %v2699_v56, 4  ;;  %v2706_v25 = vrot.slane %v2687_v40, 4 }
 0x679   : > { %v2730_v24 = vrot.slane %v2718_v12, 4  ;;  %v2742_v39 = vrot.slane %v2729_v53, 4  ;;  %v2745_v49 = vsel %vm1191_vm7, %v2729_v53, %v2744_v2  ;;  %v2700_v55 = vrot.slane %v2695_v6, 4  ;;  %v8091_v53 = vld [vmem:[%s12128_s10 + $0x8] sm:$0xff] }
 0x67a   : > { %v2733_v9 = vsel %vm1191_vm7, %v2718_v12, %v2732_v31  ;;  %v2753_v8 = vperm.slane %v2745_v49, %v9161_v54  ;;  %v2702_v29 = vrot.slane %v2683_v4, 4  ;;  %v2705_v22 = vsel %vm1191_vm7, %v2704_v44, %v2687_v40  ;;  %2901 = vmatpush.bf16.msrb.mxu1 %v8096_v3 }
 0x67b   : > { %v2731_v41 = vsel %vm1191_vm7, %v2730_v24, %v2712_v26  ;;  %v2741_v63 = vperm.slane %v2733_v9, %v9161_v54  ;;  %v2743_v10 = vsel %vm1191_vm7, %v2742_v39, %v2723_v61  ;;  %v9819_v60 = vsel %vm1191_vm7, %v2700_v55, %v2683_v4 }
 0x67c   : > { %v2737_v58 = vperm.slane %v2731_v41, %v9161_v54  ;;  %v2758_v57 = vrot.slane %v2753_v8, 4  ;;  %v2749_v27 = vperm.slane %v2743_v10, %v9161_v54  ;;  %v2707_v16 = vsel %vm1191_vm7, %v2699_v56, %v2706_v25 }
 0x67d   : > { %v2760_v35 = vrot.slane %v2741_v63, 4  ;;  %v2703_v52 = vsel %vm1191_vm7, %v2695_v6, %v2702_v29  ;;  %v8090_v6 = vld [vmem:[%s12128_s10] sm:$0xff] }
 0x67e   : > { %v2756_v1 = vrot.slane %v2737_v58, 4  ;;  %v2759_v62 = vsel %vm1191_vm7, %v2758_v57, %v2741_v63  ;;  %v2754_v42 = vrot.slane %v2749_v27, 4  ;;  %2902 = vmatpush.bf16.msrb.mxu1 %v8095_v43 }
 0x67f   : > { %v8327_v5 = vpack.i.bf16 %v2759_v62, %v2705_v22  ;;  %v2761_v36 = vsel %vm1191_vm7, %v2753_v8, %v2760_v35 }
 0x680   : > { %v2757_v37 = vsel %vm1191_vm7, %v2749_v27, %v2756_v1  ;;  %v8332_v32 = vpack.i.bf16 %v2761_v36, %v2707_v16  ;;  %v2755_v48 = vsel %vm1191_vm7, %v2754_v42, %v2737_v58 }
 0x681   : > { %v8322_v33 = vpack.i.bf16 %v2757_v37, %v2703_v52  ;;  %8328 = vrot.lane.b32.xlu2 %v8327_v5, %s12148_s1 }
 0x682   : > { %8333 = vrot.lane.b32.xlu0 %v8332_v32, %s8670_s29  ;;  %2903 = vmatpush.bf16.msrb.mxu1 %v8094_v18 }
 0x683   : > { %8323 = vrot.lane.b32.xlu1 %v8322_v33, %s8672_s27 }
 0x686   : > { %2904 = vmatpush.bf16.msrb.mxu1 %v8093_v19 }
 0x68a   : > { %2905 = vmatpush.bf16.msrb.mxu1 %v8092_v59 }
 0x68e   : > { %2906 = vmatpush.bf16.msrb.mxu1 %v8091_v53  ;;  %v7330_v53 = vld [vmem:[%s12132_s14 + $0xe0] sm:$0xf] }
 0x692   : > { %2907 = vmatpush.bf16.msrb.mxu1 %v8090_v6 }
 0x69a   : > { %v2480_v46 = vpop.f32.mrf.mxu3 }
 0x69b   : > { %v2640_v17 = vrot.slane %v2480_v46, 4  ;;  %v8371_v46 = vld [vmem:[%s12129_s11] ss:$0 sm:$0xff] }
 0x69c   : > { %v2524_v30 = vpop.f32.mrf.mxu0 }
 0x69d   : > { %v2646_v7 = vrot.slane %v2524_v30, 4 }
 0x6a2   : > { %v2482_v51 = vpop.f32.mrf.mxu3 }
 0x6a4   : > { %v2526_v56 = vpop.f32.mrf.mxu0 }
 0x6a5   : > { %v2436_v13 = vpop.f32.mrf.mxu2 }
 0x6a6   : > { %v2647_v0 = vsel %vm1191_vm7, %v2646_v7, %v2436_v13 }
 0x6a7   : > { %v2651_v61 = vperm.slane %v2647_v0, %v9139_v20 }
 0x6a9   : > { %v2652_v11 = vrot.slane %v2651_v61, 4 }
 0x6ad   : > { %v2438_v47 = vpop.f32.mrf.mxu2 }
 0x6d2   : > { %v2392_v50 = vpop.f32.mrf.mxu1 }
 0x6d3   : > { %v2641_v40 = vsel %vm1191_vm7, %v2640_v17, %v2392_v50 }
 0x6d4   : > { %v2645_v21 = vperm.slane %v2641_v40, %v9139_v20 }
 0x6d6   : > { %v2653_v26 = vsel %vm1191_vm7, %v2652_v11, %v2645_v21 }
 0x6d7   : > { %v2765_v12 = vperm.slane %v2653_v26, %v9161_v54 }
 0x6d9   : > { %v2769_v2 = vperm.slane %v2765_v12, %v9139_v20 }
 0x6da   : > { %v2394_v45 = vpop.f32.mrf.mxu1 }
 0x6db   : > { %v2775_v31 = vperm.slane %v2769_v2, %v9161_v54  ;;  %v2770_v4 = vrot.slane %v2769_v2, 4  ;;  %v8329_v9 = vpop.permute.xlu2 %8328  ;;  %v8128_v2 = vld [vmem:[%s12132_s14 + $0xec] sm:$0xf0]  ;;  %v8126_v45 = vld [vmem:[%s12132_s14 + $0xe4] sm:$0xf] }
 0x6dc   : > { %v8331_v58 = vunpack.i.h.bf16 %v8329_v9  ;;  %v8330_v10 = vunpack.i.l.bf16 %v8329_v9  ;;  %v7331_v6 = vor.u32 %v8128_v2, %v7330_v53  ;;  %v7314_v9 = vld [vmem:[%s12132_s14 + $0xc0] sm:$0xf]  ;;  %v8110_v53 = vld [vmem:[%s12132_s14 + $0x64] sm:$0xf]  ;;  %v7268_v2 = vld [vmem:[%s12132_s14 + $0x70] sm:$0xf0] }
 0x6dd   : > { %v2780_v24 = vrot.slane %v2775_v31, 4  ;;  %v2771_v39 = vsel %vm1191_vm7, 0.0, %v2770_v4  ;;  %v7338_v4 = vld [vmem:[%s12132_s14 + $0xe8] sm:$0xf] }
 0x6de   : > { %v2779_v44 = vperm.slane %v2771_v39, %v9161_v54  ;;  %3201 = vmatpush.bf16.msrb.mxu2 %v7331_v6 }
 0x6df   : > { %v2781_v49 = vsel %vm1191_vm7, 0.0, %v2780_v24  ;;  %v8129_v24 = vld [vmem:[%s12132_s14 + $0xf4] sm:$0xf0] }
 0x6e0   : > { %2791 = vrot.lane.b32.xlu1 %v2781_v49, %s8672_s27  ;;  %2803 = vrot.lane.b32.xlu0 %v2779_v44, %s12148_s1  ;;  %v2782_v25 = vrot.slane %v2779_v44, 4  ;;  %v7339_v44 = vor.u32 %v8129_v24, %v7338_v4  ;;  %v8127_v49 = vld [vmem:[%s12132_s14 + $0xec] sm:$0xf]  ;;  %v7276_v24 = vld [vmem:[%s12132_s14 + $0x78] sm:$0xf0] }
 0x6e1   : > { %v8111_v4 = vld [vmem:[%s12132_s14 + $0x6c] sm:$0xf] }
 0x6e2   : > { %v2783_v55 = vsel %vm1191_vm7, 0.0, %v2782_v25  ;;  %v7340_v25 = vld [vmem:[%s12132_s14 + $0xf8] sm:$0xf0]  ;;  %3237 = vmatpush.bf16.msra.mxu0 %v7339_v44  ;;  %v7250_v44 = vld [vmem:[%s12132_s14 + $0x40] sm:$0xf] }
 0x6e3   : > { %2815 = vrot.lane.b32.xlu2 %v2783_v55, %s8670_s29  ;;  %v7343_v55 = vor.u32 %v8127_v49, %v7340_v25 }
 0x6e5   : > { %3255 = vmatpush.bf16.msra.mxu1 %v7343_v55  ;;  %v7271_v55 = vor.u32 %v8110_v53, %v7268_v2 }
 0x6f4   : > { %v8334_v8 = vpop.permute.xlu0 %8333 }
 0x6f5   : > { %v8324_v29 = vpop.permute.xlu1 %8323  ;;  %v8336_v57 = vunpack.i.h.bf16 %v8334_v8  ;;  %v8335_v27 = vunpack.i.l.bf16 %v8334_v8  ;;  %v8124_v8 = vld [vmem:[%s12132_s14 + $0xcc] sm:$0xf0] }
 0x6f6   : > { %v8326_v41 = vunpack.i.h.bf16 %v8324_v29  ;;  %v8325_v63 = vunpack.i.l.bf16 %v8324_v29  ;;  %v8122_v29 = vld [vmem:[%s12132_s14 + $0xc4] sm:$0xf] }
 0x6f8   : > { %v2820_v35 = vsel %vm2035_vm8, %v9819_v60, %v8325_v63  ;;  %v2821_v1 = vsel %vm2035_vm8, %v2755_v48, %v8326_v41  ;;  %v7315_v63 = vor.u32 %v8124_v8, %v7314_v9  ;;  %v8108_v8 = vld [vmem:[%s12132_s14 + $0x4c] sm:$0xf0] }
 0x6f9   : > { %v2823_v22 = vsel %vm677_vm0, %v2820_v35, %v8330_v10  ;;  %v2824_v62 = vsel %vm677_vm0, %v2821_v1, %v8331_v58  ;;  %v7316_v58 = vld [vmem:[%s12132_s14 + $0xd0] sm:$0xf0]  ;;  %v7322_v10 = vld [vmem:[%s12132_s14 + $0xc8] sm:$0xf] }
 0x6fa   : > { %v2827_v16 = vsel %vm2826_vm11, %v2823_v22, %v8335_v27  ;;  %v2828_v42 = vsel %vm2826_vm11, %v2824_v62, %v8336_v57  ;;  %v8125_v57 = vld [vmem:[%s12132_s14 + $0xd4] sm:$0xf0]  ;;  %v7319_v35 = vor.u32 %v8122_v29, %v7316_v58  ;;  %v8123_v22 = vld [vmem:[%s12132_s14 + $0xcc] sm:$0xf]  ;;  %v7324_v62 = vld [vmem:[%s12132_s14 + $0xd8] sm:$0xf0]  ;;  %3202 = vmatpush.bf16.msrb.mxu2 %v7315_v63  ;;  %v7279_v63 = vor.u32 %v8111_v4, %v7276_v24 }
 0x6fb   : > { %v2830_v5 = vpack.c.bf16 %v2828_v42, %v2827_v16  ;;  %v7323_v1 = vor.u32 %v8125_v57, %v7322_v10  ;;  %v7298_v16 = vld [vmem:[%s12132_s14 + $0xa0] sm:$0xf]  ;;  %v7327_v42 = vor.u32 %v8123_v22, %v7324_v62  ;;  %v8106_v29 = vld [vmem:[%s12132_s14 + $0x44] sm:$0xf]  ;;  %v7252_v58 = vld [vmem:[%s12132_s14 + $0x50] sm:$0xf0]  ;;  %v7251_v22 = vor.u32 %v8108_v8, %v7250_v44 }
 0x6fc   : > { %v7258_v10 = vld [vmem:[%s12132_s14 + $0x48] sm:$0xf]  ;;  %v8109_v57 = vld [vmem:[%s12132_s14 + $0x54] sm:$0xf0]  ;;  %v7234_v62 = vld [vmem:[%s12132_s14 + $0x20] sm:$0xf] }
 0x6fd   : > { %2908 = vmatmul.bf16.vlgmr.msrb.gmra.mxu1 %v2830_v5  ;;  %v8120_v5 = vld [vmem:[%s12132_s14 + $0xac] sm:$0xf0]  ;;  %3238 = vmatpush.bf16.msra.mxu0 %v7323_v1  ;;  %v8373_v8 = vld [vmem:[%s12131_s13] ss:$0 sm:$0xff] }
 0x6fe   : > { %3256 = vmatpush.bf16.msra.mxu1 %v7327_v42  ;;  %v7259_v42 = vor.u32 %v8109_v57, %v7258_v10 }
 0x73d   : > { %v2816_v32 = vpop.permute.xlu2 %2815 }
 0x752   : > { %v2792_v36 = vpop.permute.xlu1 %2791  ;;  %v2804_v52 = vpop.permute.xlu0 %2803 }
 0x753   : > { %v2822_v37 = vsel %vm2035_vm8, %v2775_v31, %v2792_v36  ;;  %v7332_v31 = vld [vmem:[%s12132_s14 + $0xf0] sm:$0xf0]  ;;  %v8118_v36 = vld [vmem:[%s12132_s14 + $0xa4] sm:$0xf] }
 0x754   : > { %v2825_v33 = vsel %vm677_vm0, %v2822_v37, %v2804_v52  ;;  %v7335_v39 = vor.u32 %v8126_v45, %v7332_v31  ;;  %v7300_v52 = vld [vmem:[%s12132_s14 + $0xb0] sm:$0xf0]  ;;  %v7274_v45 = vld [vmem:[%s12132_s14 + $0x68] sm:$0xf]  ;;  %v8113_v31 = vld [vmem:[%s12132_s14 + $0x74] sm:$0xf0] }
 0x755   : > { %v2829_v60 = vsel %vm2826_vm11, %v2825_v33, %v2816_v32  ;;  %v7299_v32 = vor.u32 %v8120_v5, %v7298_v16  ;;  %v7303_v33 = vor.u32 %v8118_v36, %v7300_v52  ;;  %v7275_v9 = vor.u32 %v8113_v31, %v7274_v45  ;;  %v8104_v5 = vld [vmem:[%s12132_s14 + $0x2c] sm:$0xf0]  ;;  %v8102_v36 = vld [vmem:[%s12132_s14 + $0x24] sm:$0xf]  ;;  %v7236_v52 = vld [vmem:[%s12132_s14 + $0x30] sm:$0xf0] }
 0x756   : > { %v2831_v48 = vpack.c.bf16 %v2829_v60, %v2829_v60  ;;  %3219 = vmatpush.bf16.msrb.mxu3 %v7335_v39  ;;  %v7306_v60 = vld [vmem:[%s12132_s14 + $0xa8] sm:$0xf]  ;;  %v7255_v16 = vor.u32 %v8106_v29, %v7252_v58 }
 0x757   : > { %3203 = vmatpush.bf16.msrb.mxu2 %v7299_v32 }
 0x758   : > { %2913 = vmatmul.bf16.gmra.mxu1 %v2831_v48  ;;  %v8121_v48 = vld [vmem:[%s12132_s14 + $0xb4] sm:$0xf0] }
 0x75a   : > { %3220 = vmatpush.bf16.msrb.mxu3 %v7319_v35  ;;  %v7260_v35 = vld [vmem:[%s12132_s14 + $0x58] sm:$0xf0] }
 0x75e   : > { %3221 = vmatpush.bf16.msrb.mxu3 %v7303_v33 }
 0x77a   : > { %v2909_v30 = vpop.f32.mrf.mxu1 }
 0x77b   : > { %v2910_v51 = vadd.f32 %v8371_v46, %v2909_v30  ;;  %v8119_v30 = vld [vmem:[%s12132_s14 + $0xac] sm:$0xf] }
 0x77d   : > { %v9885_v56 = vadd.f32 %v2910_v51, %v8891_v14  ;;  %v7308_v51 = vld [vmem:[%s12132_s14 + $0xb8] sm:$0xf0] }
 0x77f   : > { %2923 = vadd.xlane.f32.xlu1 %v9885_v56 }
 0x782   : > { %v2911_v13 = vpop.f32.mrf.mxu1 }
 0x783   : > { %v2912_v47 = vadd.f32 %v8371_v46, %v2911_v13  ;;  %v7282_v13 = vld [vmem:[%s12132_s14 + $0x80] sm:$0xf] }
 0x785   : > { %v9889_v34 = vadd.f32 %v2912_v47, %v8894_v23  ;;  %v7311_v47 = vor.u32 %v8119_v30, %v7308_v51  ;;  %v7244_v30 = vld [vmem:[%s12132_s14 + $0x38] sm:$0xf0] }
 0x787   : > { %2925 = vadd.xlane.f32.xlu0 %v9889_v34  ;;  %3257 = vmatpush.bf16.msra.mxu1 %v7311_v47 }
 0x7d5   : > { %v2914_v3 = vpop.f32.mrf.mxu1 }
 0x7d6   : > { %v2915_v43 = vadd.f32 %v8371_v46, %v2914_v3  ;;  %v7307_v46 = vor.u32 %v8121_v48, %v7306_v60  ;;  %v8116_v3 = vld [vmem:[%s12132_s14 + $0x8c] sm:$0xf0]  ;;  %v7242_v60 = vld [vmem:[%s12132_s14 + $0x28] sm:$0xf]  ;;  %v8105_v48 = vld [vmem:[%s12132_s14 + $0x34] sm:$0xf0] }
 0x7d8   : > { %v9893_v18 = vadd.f32 %v2915_v43, %v8897_v28  ;;  %v8114_v43 = vld [vmem:[%s12132_s14 + $0x84] sm:$0xf]  ;;  %3239 = vmatpush.bf16.msra.mxu0 %v7307_v46  ;;  %v8103_v46 = vld [vmem:[%s12132_s14 + $0x2c] sm:$0xf] }
 0x7da   : > { %v2927_v7 = vsel %vm722_vm1, %v9893_v18, 0.0 }
 0x7db   : > { %2928 = vadd.xlane.f32.xlu2 %v2927_v7  ;;  %v7284_v7 = vld [vmem:[%s12132_s14 + $0x90] sm:$0xf0] }
 0x7dd   : > { %v2916_v14 = vpop.f32.mrf.mxu1 }
 0x7de   : > { %v7283_v14 = vor.u32 %v8116_v3, %v7282_v13  ;;  %v7235_v13 = vor.u32 %v8104_v5, %v7234_v62  ;;  %v7239_v3 = vor.u32 %v8102_v36, %v7236_v52  ;;  %v3031_v52 = vld [vmem:[%s12133_s15] sm:$0xf] }
 0x7e0   : > { %3204 = vmatpush.bf16.msrb.mxu2 %v7283_v14  ;;  %v8100_v14 = vld [vmem:[%s12132_s14 + $0xc] sm:$0xf0] }
 0x7f2   : > { %v2924_v0 = vpop.xlane.xlu1 %2923 }
 0x7f3   : > { %v2930_v19 = vmul.f32 %v2924_v0, %v8876_v38  ;;  %v7290_v0 = vld [vmem:[%s12132_s14 + $0x88] sm:$0xf] }
 0x7f5   : > { %v9899_v61 = vsub.f32 %v9885_v56, %v2930_v19  ;;  %v8117_v19 = vld [vmem:[%s12132_s14 + $0x94] sm:$0xf0] }
 0x7f7   : > { %v2936_v23 = vmul.f32 %v9899_v61, %v9899_v61 }
 0x7f9   : > { %2939 = vadd.xlane.f32.xlu1 %v2936_v23  ;;  %v8115_v23 = vld [vmem:[%s12132_s14 + $0x8c] sm:$0xf] }
 0x7fa   : > { %v2926_v17 = vpop.xlane.xlu0 %2925 }
 0x7fb   : > { %v2931_v59 = vmul.f32 %v2926_v17, %v8876_v38  ;;  %v7287_v17 = vor.u32 %v8114_v43, %v7284_v7  ;;  %v7243_v43 = vor.u32 %v8105_v48, %v7242_v60  ;;  %v7218_v7 = vld [vmem:[%s12132_s14] sm:$0xf]  ;;  %v10142_v60 = vperm.slane %v3031_v52, 3 }
 0x7fc   : > { %v7219_v53 = vor.u32 %v8100_v14, %v7218_v7  ;;  %v10157_v14 = vperm.slane %v3031_v52, 1 }
 0x7fd   : > { %v9905_v28 = vsub.f32 %v9889_v34, %v2931_v59  ;;  %v7291_v59 = vor.u32 %v8117_v19, %v7290_v0  ;;  %3222 = vmatpush.bf16.msrb.mxu3 %v7287_v17  ;;  %v8098_v0 = vld [vmem:[%s12132_s14 + $0x4] sm:$0xf]  ;;  %v7247_v17 = vor.u32 %v8103_v46, %v7244_v30  ;;  %v10150_v30 = vperm.slane %v3031_v52, 0 }
 0x7ff   : > { %v2937_v50 = vmul.f32 %v9905_v28, %v9905_v28  ;;  %3240 = vmatpush.bf16.msra.mxu0 %v7291_v59  ;;  %v7220_v59 = vld [vmem:[%s12132_s14 + $0x10] sm:$0xf0] }
 0x800   : > { %v7223_v2 = vor.u32 %v8098_v0, %v7220_v59 }
 0x801   : > { %2941 = vadd.xlane.f32.xlu0 %v2937_v50  ;;  %v7292_v50 = vld [vmem:[%s12132_s14 + $0x98] sm:$0xf0]  ;;  %3223 = vmatpush.bf16.msrb.mxu3 %v7271_v55 }
 0x803   : > { %3241 = vmatpush.bf16.msra.mxu0 %v7275_v9 }
 0x805   : > { %3224 = vmatpush.bf16.msrb.mxu3 %v7255_v16 }
 0x807   : > { %3242 = vmatpush.bf16.msra.mxu0 %v7259_v42 }
 0x809   : > { %3225 = vmatpush.bf16.msrb.mxu3 %v7239_v3 }
 0x80b   : > { %3243 = vmatpush.bf16.msra.mxu0 %v7243_v43 }
 0x80d   : > { %3226 = vmatpush.bf16.msrb.mxu3 %v7223_v2 }
 0x84e   : > { %v2929_v40 = vpop.xlane.xlu2 %2928 }
 0x84f   : > { %v2932_v11 = vmul.f32 %v2929_v40, %v8876_v38  ;;  %v7266_v40 = vld [vmem:[%s12132_s14 + $0x60] sm:$0xf] }
 0x851   : > { %v9911_v21 = vsub.f32 %v9893_v18, %v2932_v11  ;;  %v8112_v11 = vld [vmem:[%s12132_s14 + $0x6c] sm:$0xf0] }
 0x852   : > { %v7267_v39 = vor.u32 %v8112_v11, %v7266_v40  ;;  %v8101_v40 = vld [vmem:[%s12132_s14 + $0x14] sm:$0xf0]  ;;  %v8099_v11 = vld [vmem:[%s12132_s14 + $0xc] sm:$0xf] }
 0x853   : > { %v2938_v26 = vmul.f32 %v9911_v21, %v9911_v21 }
 0x854   : > { %3205 = vmatpush.bf16.msrb.mxu2 %v7267_v39 }
 0x855   : > { %v2943_v12 = vsel %vm722_vm1, %v2938_v26, 0.0 }
 0x856   : > { %2944 = vadd.xlane.f32.xlu2 %v2943_v12  ;;  %v7295_v12 = vor.u32 %v8115_v23, %v7292_v50  ;;  %v7226_v50 = vld [vmem:[%s12132_s14 + $0x8] sm:$0xf] }
 0x857   : > { %v7227_v45 = vor.u32 %v8101_v40, %v7226_v50 }
 0x858   : > { %3258 = vmatpush.bf16.msra.mxu1 %v7295_v12  ;;  %3206 = vmatpush.bf16.msrb.mxu2 %v7251_v22 }
 0x859   : > { %3244 = vmatpush.bf16.msra.mxu0 %v7227_v45 }
 0x85c   : > { %3259 = vmatpush.bf16.msra.mxu1 %v7279_v63  ;;  %3207 = vmatpush.bf16.msrb.mxu2 %v7235_v13 }
 0x860   : > { %3208 = vmatpush.bf16.msrb.mxu2 %v7219_v53 }
 0x86c   : > { %v2940_v41 = vpop.xlane.xlu1 %2939 }
 0x86d   : > { %v2946_v27 = vmul.f32 %v2940_v41, %v8876_v38 }
 0x86f   : > { %v9977_v37 = vadd.f32 1e-05, %v2946_v27  ;;  %v8107_v27 = vld [vmem:[%s12132_s14 + $0x4c] sm:$0xf] }
 0x870   : > { %v7263_v33 = vor.u32 %v8107_v27, %v7260_v35 }
 0x871   : > { %8443 = vrsqrt.f32 %v9977_v37  ;;  %vm2958_vm13 = vweird.f32 %v9977_v37 }
 0x872   : > { %3260 = vmatpush.bf16.msra.mxu1 %v7263_v33 }
 0x874   : > { %v2942_v26 = vpop.xlane.xlu0 %2941 }
 0x875   : > { %v2947_v6 = vmul.f32 %v2942_v26, %v8876_v38  ;;  %v7228_v26 = vld [vmem:[%s12132_s14 + $0x18] sm:$0xf0] }
 0x876   : > { %3261 = vmatpush.bf16.msra.mxu1 %v7247_v17  ;;  %v7231_v4 = vor.u32 %v8099_v11, %v7228_v26 }
 0x877   : > { %v10044_v49 = vpop.eup %8443  ;;  %v10046_v25 = vadd.f32 1e-05, %v2947_v6 }
 0x878   : > { %v2953_v41 = vmul.f32 %v10044_v49, %v9977_v37  ;;  %vm2959_vm12 = vweird.f32 %v10044_v49  ;;  %v8372_v37 = vld [vmem:[%s12130_s12] ss:$0 sm:$0xff] }
 0x879   : > { %8445 = vrsqrt.f32 %v10046_v25  ;;  %vm2960_vm14 = vmor %vm2958_vm13, %vm2959_vm12  ;;  %vm2968_vm2 = vweird.f32 %v10046_v25 }
 0x87a   : > { %v2954_v1 = vmul.f32 %v10044_v49, %v2953_v41  ;;  %3262 = vmatpush.bf16.msra.mxu1 %v7231_v4 }
 0x87c   : > { %v2955_v32 = vmul.f32 0.5, %v2954_v1 }
 0x87e   : > { %v2956_v51 = vsub.f32 1.5, %v2955_v32  ;;  %v10140_v32 = vperm.slane %v3031_v52, 2 }
 0x87f   : > { %v8446_v47 = vpop.eup %8445 }
 0x880   : > { %v2957_v19 = vmul.f32 %v10044_v49, %v2956_v51  ;;  %v2963_v23 = vmul.f32 %v8446_v47, %v10046_v25  ;;  %vm2969_vm15 = vweird.f32 %v8446_v47 }
 0x881   : > { %vm2970_vm3 = vmor %vm2968_vm2, %vm2969_vm15 }
 0x882   : > { %v2964_v12 = vmul.f32 %v8446_v47, %v2963_v23  ;;  %v2961_v6 = vsel %vm2960_vm14, %v10044_v49, %v2957_v19 }
 0x883   : > { %v2982_v39 = vmul.f32 %v2961_v6, %v9899_v61  ;;  %v8153_v6 = vld [vmem:[%s12134_s16 + $0xb8] sm:$0xff] }
 0x884   : > { %v2965_v31 = vmul.f32 0.5, %v2964_v12  ;;  %3829 = vmatpush.bf16.msrb.mxu0 %v8153_v6 }
 0x885   : > { %v2988_v9 = vmul.f32 %v8372_v37, %v2982_v39 }
 0x886   : > { %v2966_v24 = vsub.f32 1.5, %v2965_v31  ;;  %v8161_v31 = vld [vmem:[%s12134_s16 + $0xf8] sm:$0xff] }
 0x887   : > { %v2994_v29 = vadd.f32 %v8373_v8, %v2988_v9  ;;  %3847 = vmatpush.bf16.msrb.mxu1 %v8161_v31  ;;  %v8160_v9 = vld [vmem:[%s12134_s16 + $0xf0] sm:$0xff] }
 0x888   : > { %v2967_v44 = vmul.f32 %v8446_v47, %v2966_v24 }
 0x88a   : > { %v2971_v49 = vsel %vm2970_vm3, %v8446_v47, %v2967_v44 }
 0x88b   : > { %v2983_v55 = vmul.f32 %v2971_v49, %v9905_v28  ;;  %3848 = vmatpush.bf16.msrb.mxu1 %v8160_v9 }
 0x88d   : > { %v2989_v61 = vmul.f32 %v8372_v37, %v2983_v55  ;;  %v8152_v55 = vld [vmem:[%s12134_s16 + $0xb0] sm:$0xff] }
 0x88e   : > { %3830 = vmatpush.bf16.msrb.mxu0 %v8152_v55 }
 0x88f   : > { %v2995_v41 = vadd.f32 %v8373_v8, %v2989_v61 }
 0x891   : > { %v2997_v63 = vpack.c.bf16 %v2995_v41, %v2994_v29  ;;  %v8137_v41 = vld [vmem:[%s12134_s16 + $0x38] sm:$0xff] }
 0x892   : > { %3793 = vmatpush.bf16.msra.mxu2 %v8137_v41  ;;  %v8156_v41 = vld [vmem:[%s12134_s16 + $0xd0] sm:$0xff] }
 0x893   : > { %3209 = vmatmul.bf16.vlgmr.msrb.gmra.mxu2 %v2997_v63  ;;  %3227 = vmatmul.bf16.vlgmr.msrb.gmra.mxu3 %v2997_v63 }
 0x894   : > { %3245 = vmatmul.bf16.vlgmr.msra.gmra.mxu0 %v2997_v63  ;;  %3263 = vmatmul.bf16.vlgmr.msra.gmra.mxu1 %v2997_v63  ;;  %v8145_v63 = vld [vmem:[%s12134_s16 + $0x78] sm:$0xff] }
 0x895   : > { %3811 = vmatpush.bf16.msra.mxu3 %v8145_v63 }
 0x8c9   : > { %v2945_v58 = vpop.xlane.xlu2 %2944 }
 0x8ca   : > { %v2948_v25 = vmul.f32 %v2945_v58, %v8876_v38 }
 0x8cc   : > { %v2951_v10 = vadd.f32 1e-05, %v2948_v25 }
 0x8ce   : > { %8447 = vrsqrt.f32 %v2951_v10  ;;  %vm2978_vm5 = vweird.f32 %v2951_v10 }
 0x8d4   : > { %v8448_v57 = vpop.eup %8447 }
 0x8d5   : > { %v2973_v28 = vmul.f32 %v8448_v57, %v2951_v10  ;;  %vm2979_vm4 = vweird.f32 %v8448_v57 }
 0x8d6   : > { %vm2980_vm6 = vmor %vm2978_vm5, %vm2979_vm4 }
 0x8d7   : > { %v2974_v27 = vmul.f32 %v8448_v57, %v2973_v28  ;;  %v8159_v28 = vld [vmem:[%s12134_s16 + $0xe8] sm:$0xff] }
 0x8d8   : > { %3849 = vmatpush.bf16.msrb.mxu1 %v8159_v28 }
 0x8d9   : > { %v2975_v35 = vmul.f32 0.5, %v2974_v27 }
 0x8db   : > { %v2976_v1 = vsub.f32 1.5, %v2975_v35 }
 0x8dd   : > { %v2977_v22 = vmul.f32 %v8448_v57, %v2976_v1 }
 0x8df   : > { %v2981_v62 = vsel %vm2980_vm6, %v8448_v57, %v2977_v22  ;;  %v8151_v57 = vld [vmem:[%s12134_s16 + $0xa8] sm:$0xff] }
 0x8e0   : > { %v2984_v16 = vmul.f32 %v2981_v62, %v9911_v21  ;;  %3831 = vmatpush.bf16.msrb.mxu0 %v8151_v57  ;;  %v8141_v57 = vld [vmem:[%s12134_s16 + $0x58] sm:$0xff] }
 0x8e2   : > { %v2990_v42 = vmul.f32 %v8372_v37, %v2984_v16  ;;  %v8136_v16 = vld [vmem:[%s12134_s16 + $0x30] sm:$0xff] }
 0x8e3   : > { %3794 = vmatpush.bf16.msra.mxu2 %v8136_v16 }
 0x8e4   : > { %v2996_v5 = vadd.f32 %v8373_v8, %v2990_v42  ;;  %v8144_v42 = vld [vmem:[%s12134_s16 + $0x70] sm:$0xff] }
 0x8e5   : > { %3812 = vmatpush.bf16.msra.mxu3 %v8144_v42 }
 0x8e6   : > { %v2998_v36 = vpack.c.bf16 %v2996_v5, %v2996_v5 }
 0x8e8   : > { %3214 = vmatmul.bf16.gmra.mxu2 %v2998_v36  ;;  %3232 = vmatmul.bf16.gmra.mxu3 %v2998_v36 }
 0x8e9   : > { %3250 = vmatmul.bf16.gmra.mxu0 %v2998_v36  ;;  %3268 = vmatmul.bf16.gmra.mxu1 %v2998_v36 }
 0x911   : > { %v3246_v33 = vpop.f32.mrf.mxu0  ;;  %v3264_v21 = vpop.f32.mrf.mxu1 }
 0x912   : > { %v10145_v48 = vadd.f32 %v3246_v33, %v10140_v32  ;;  %v10148_v46 = vadd.f32 %v3264_v21, %v10142_v60 }
 0x914   : > { %v7346_v51 = vmul.f32 -1.702, %v10145_v48  ;;  %v7347_v13 = vmul.f32 -1.702, %v10148_v46 }
 0x916   : > { %v3301_v47 = vmul.f32 1.442695, %v7346_v51  ;;  %v3210_v3 = vpop.f32.mrf.mxu2  ;;  %v3303_v43 = vmul.f32 1.442695, %v7347_v13  ;;  %v3228_v0 = vpop.f32.mrf.mxu3  ;;  %v8150_v51 = vld [vmem:[%s12134_s16 + $0xa0] sm:$0xff] }
 0x917   : > { %v10155_v7 = vadd.f32 %v3210_v3, %v10150_v30  ;;  %v10161_v23 = vadd.f32 %v3228_v0, %v10157_v14  ;;  %3832 = vmatpush.bf16.msrb.mxu0 %v8150_v51 }
 0x918   : > { %8449 = vpow2.f32 %v3301_v47 }
 0x919   : > { %8451 = vpow2.f32 %v3303_v43  ;;  %v7344_v19 = vmul.f32 -1.702, %v10155_v7  ;;  %v3248_v17 = vpop.f32.mrf.mxu0  ;;  %v3266_v59 = vpop.f32.mrf.mxu1  ;;  %v7345_v40 = vmul.f32 -1.702, %v10161_v23  ;;  %v8158_v43 = vld [vmem:[%s12134_s16 + $0xe0] sm:$0xff] }
 0x91a   : > { %v10165_v11 = vadd.f32 %v3248_v17, %v10140_v32  ;;  %v10168_v26 = vadd.f32 %v3266_v59, %v10142_v60  ;;  %v8135_v17 = vld [vmem:[%s12134_s16 + $0x28] sm:$0xff]  ;;  %3850 = vmatpush.bf16.msrb.mxu1 %v8158_v43 }
 0x91b   : > { %v3297_v50 = vmul.f32 1.442695, %v7344_v19  ;;  %v3299_v12 = vmul.f32 1.442695, %v7345_v40  ;;  %v8143_v59 = vld [vmem:[%s12134_s16 + $0x68] sm:$0xff]  ;;  %3795 = vmatpush.bf16.msra.mxu2 %v8135_v17  ;;  %v8132_v17 = vld [vmem:[%s12134_s16 + $0x10] sm:$0xff] }
 0x91c   : > { %v7350_v53 = vmul.f32 -1.702, %v10165_v11  ;;  %v7351_v2 = vmul.f32 -1.702, %v10168_v26  ;;  %3813 = vmatpush.bf16.msra.mxu3 %v8143_v59  ;;  %v8140_v59 = vld [vmem:[%s12134_s16 + $0x50] sm:$0xff] }
 0x91d   : > { %8453 = vpow2.f32 %v3297_v50 }
 0x91e   : > { %v8450_v45 = vpop.eup %8449  ;;  %v3309_v39 = vmul.f32 1.442695, %v7350_v53  ;;  %8455 = vpow2.f32 %v3299_v12  ;;  %v3311_v44 = vmul.f32 1.442695, %v7351_v2  ;;  %v3212_v49 = vpop.f32.mrf.mxu2  ;;  %v8149_v53 = vld [vmem:[%s12134_s16 + $0x98] sm:$0xff] }
 0x91f   : > { %v8452_v4 = vpop.eup %8451  ;;  %v10178_v24 = vadd.f32 1.0, %v8450_v45  ;;  %v10191_v61 = vadd.f32 %v3212_v49, %v10150_v30  ;;  %v3230_v25 = vpop.f32.mrf.mxu3  ;;  %v8157_v2 = vld [vmem:[%s12134_s16 + $0xd8] sm:$0xff]  ;;  %3833 = vmatpush.bf16.msrb.mxu0 %v8149_v53  ;;  %v8142_v49 = vld [vmem:[%s12134_s16 + $0x60] sm:$0xff] }
 0x920   : > { %v10180_v37 = vadd.f32 1.0, %v8452_v4  ;;  %v10216_v62 = vadd.f32 %v3230_v25, %v10157_v14  ;;  %3851 = vmatpush.bf16.msrb.mxu1 %v8157_v2  ;;  %3814 = vmatpush.bf16.msra.mxu3 %v8142_v49  ;;  %v8154_v49 = vld [vmem:[%s12134_s16 + $0xc0] sm:$0xff] }
 0x921   : > { %8457 = vrcp.f32 %v10178_v24  ;;  %v7348_v58 = vmul.f32 -1.702, %v10191_v61  ;;  %v3372_v40 = vand.u32 2147483647, %v10178_v24  ;;  %v3374_v12 = vand.u32 2147483648, %v10178_v24 }
 0x922   : > { %8459 = vrcp.f32 %v10180_v37  ;;  %v7349_v19 = vmul.f32 -1.702, %v10216_v62  ;;  %v3387_v6 = vand.u32 2147483647, %v10180_v37  ;;  %v3389_v9 = vand.u32 2147483648, %v10180_v37 }
 0x923   : > { %v8454_v8 = vpop.eup %8453  ;;  %8461 = vpow2.f32 %v3309_v39  ;;  %v3305_v35 = vmul.f32 1.442695, %v7348_v58  ;;  %vm3368_vm13 = vweird.f32 %v10178_v24  ;;  %vm10281_vm14 = vcmp.eq.f32.partialorder %v3372_v40, 8.507059e+37  ;;  %v8131_v58 = vld [vmem:[%s12134_s16 + $0x8] sm:$0xff] }
 0x924   : > { %v10193_v29 = vadd.f32 1.0, %v8454_v8  ;;  %8463 = vpow2.f32 %v3311_v44  ;;  %v8456_v10 = vpop.eup %8455  ;;  %v3307_v39 = vmul.f32 1.442695, %v7349_v19  ;;  %v8134_v44 = vld [vmem:[%s12134_s16 + $0x20] sm:$0xff]  ;;  %v8148_v8 = vld [vmem:[%s12134_s16 + $0x90] sm:$0xff]  ;;  %v3375_v25 = vor.u32 1.1754944e-38, %v3374_v12  ;;  %3852 = vmatpush.bf16.msrb.mxu1 %v8156_v41  ;;  %3815 = vmatpush.bf16.msra.mxu3 %v8141_v57 }
 0x925   : > { %v10231_v47 = vadd.f32 1.0, %v8456_v10  ;;  %vm3383_vm15 = vweird.f32 %v10180_v37  ;;  %3796 = vmatpush.bf16.msra.mxu2 %v8134_v44  ;;  %v8133_v10 = vld [vmem:[%s12134_s16 + $0x18] sm:$0xff]  ;;  %vm10300_vm4 = vcmp.eq.f32.partialorder %v3387_v6, 8.507059e+37  ;;  %3834 = vmatpush.bf16.msrb.mxu0 %v8148_v8  ;;  %v3390_v51 = vor.u32 1.1754944e-38, %v3389_v9 }
 0x926   : > { %8465 = vrcp.f32 %v10193_v29  ;;  %vm3338_vm6 = vweird.f32 %v10193_v29 }
 0x927   : > { %v10208_v27 = vpop.eup %8457  ;;  %8467 = vpow2.f32 %v3305_v35 }
 0x928   : > { %v10211_v1 = vpop.eup %8459  ;;  %v3364_v22 = vmul.f32 %v10208_v27, %v10178_v24  ;;  %vm3369_vm12 = vweird.f32 %v10208_v27  ;;  %3816 = vmatpush.bf16.msra.mxu3 %v8140_v59 }
 0x929   : > { %v8462_v5 = vpop.eup %8461  ;;  %v3379_v36 = vmul.f32 %v10211_v1, %v10180_v37  ;;  %vm10294_vm2 = vmor %vm3368_vm13, %vm3369_vm12  ;;  %vm3384_vm3 = vweird.f32 %v10211_v1  ;;  %3797 = vmatpush.bf16.msra.mxu2 %v8133_v10 }
 0x92a   : > { %v8464_v52 = vpop.eup %8463  ;;  %v3365_v33 = vsub.f32 1.0, %v3364_v22  ;;  %v10226_v21 = vadd.f32 1.0, %v8462_v5  ;;  %vm10341_vm13 = vmor %vm3383_vm15, %vm3384_vm3 }
 0x92b   : > { %v3380_v13 = vsub.f32 1.0, %v3379_v36  ;;  %v10233_v3 = vadd.f32 1.0, %v8464_v52  ;;  %v8147_v52 = vld [vmem:[%s12134_s16 + $0x88] sm:$0xff] }
 0x92c   : > { %v3366_v0 = vmul.f32 %v10208_v27, %v3365_v33  ;;  %8469 = vrcp.f32 %v10226_v21  ;;  %v10247_v50 = vpop.eup %8465  ;;  %vm3428_vm12 = vweird.f32 %v10226_v21  ;;  %v3434_v19 = vand.u32 2147483648, %v10226_v21  ;;  %3835 = vmatpush.bf16.msrb.mxu0 %v8147_v52 }
 0x92d   : > { %8471 = vrcp.f32 %v10233_v3  ;;  %v3381_v45 = vmul.f32 %v10211_v1, %v3380_v13  ;;  %v3334_v4 = vmul.f32 %v10247_v50, %v10193_v29  ;;  %v8468_v55 = vpop.eup %8467  ;;  %vm3339_vm5 = vweird.f32 %v10247_v50  ;;  %3798 = vmatpush.bf16.msra.mxu2 %v8132_v17 }
 0x92e   : > { %8473 = vrcp.f32 %v10231_v47  ;;  %v3367_v31 = vadd.f32 %v10208_v27, %v3366_v0  ;;  %v10311_v36 = vadd.f32 1.0, %v8468_v55  ;;  %v3432_v0 = vand.u32 2147483647, %v10226_v21 }
 0x92f   : > { %v3382_v28 = vadd.f32 %v10211_v1, %v3381_v45  ;;  %v3335_v5 = vsub.f32 1.0, %v3334_v4  ;;  %8475 = vpow2.f32 %v3307_v39  ;;  %v3449_v37 = vand.u32 2147483648, %v10233_v3  ;;  %v8146_v4 = vld [vmem:[%s12134_s16 + $0x80] sm:$0xff] }
 0x930   : > { %v3371_v42 = vsel %vm10294_vm2, %v10208_v27, %v3367_v31  ;;  %v8155_v27 = vld [vmem:[%s12134_s16 + $0xc8] sm:$0xff]  ;;  %8477 = vrcp.f32 %v10311_v36  ;;  %vm3433_vm3 = vcmp.eq.f32.partialorder %v3432_v0, 8.507059e+37  ;;  %v3435_v41 = vor.u32 1.1754944e-38, %v3434_v19  ;;  %3836 = vmatpush.bf16.msrb.mxu0 %v8146_v4 }
 0x931   : > { %v3376_v40 = vsel %vm10281_vm14, %v3375_v25, %v3371_v42  ;;  %v3386_v45 = vsel %vm10341_vm13, %v10211_v1, %v3382_v28  ;;  %v3336_v6 = vmul.f32 %v10247_v50, %v3335_v5  ;;  %v3447_v1 = vand.u32 2147483647, %v10233_v3  ;;  %3853 = vmatpush.bf16.msrb.mxu1 %v8155_v27  ;;  %3799 = vmatpush.bf16.msra.mxu2 %v8131_v58 }
 0x932   : > { %v10278_v63 = vpop.eup %8469  ;;  %v3515_v9 = vmul.f32 %v3376_v40, %v10145_v48  ;;  %vm3443_vm13 = vweird.f32 %v10233_v3  ;;  %v8139_v48 = vld [vmem:[%s12134_s16 + $0x48] sm:$0xff]  ;;  %v3450_v42 = vor.u32 1.1754944e-38, %v3449_v37  ;;  %v3342_v52 = vand.u32 2147483647, %v10193_v29 }
 0x933   : > { %v3424_v22 = vmul.f32 %v10278_v63, %v10226_v21  ;;  %v10306_v16 = vpop.eup %8471  ;;  %vm3429_vm2 = vweird.f32 %v10278_v63  ;;  %v3391_v21 = vsel %vm10300_vm4, %v3390_v51, %v3386_v45  ;;  %v3337_v24 = vadd.f32 %v10247_v50, %v3336_v6  ;;  %3817 = vmatpush.bf16.msra.mxu3 %v8139_v48 }
 0x934   : > { %v10316_v33 = vpop.eup %8473  ;;  %v3439_v43 = vmul.f32 %v10306_v16, %v10233_v3  ;;  %vm3444_vm14 = vweird.f32 %v10306_v16  ;;  %vm10369_vm15 = vmor %vm3428_vm12, %vm3429_vm2  ;;  %vm3448_vm4 = vcmp.eq.f32.partialorder %v3447_v1, 8.507059e+37  ;;  %v3344_v51 = vand.u32 2147483648, %v10193_v29 }
 0x935   : > { %v3425_v13 = vsub.f32 1.0, %v3424_v22  ;;  %v3349_v31 = vmul.f32 %v10316_v33, %v10231_v47  ;;  %v8476_v55 = vpop.eup %8475  ;;  %vm3445_vm12 = vmor %vm3443_vm13, %vm3444_vm14  ;;  %3854 = vmatpush.bf16.msrb.mxu1 %v8154_v49  ;;  %v3402_v29 = vand.u32 2147483647, %v10311_v36  ;;  %v3357_v49 = vand.u32 2147483647, %v10231_v47 }
 0x936   : > { %v3440_v2 = vsub.f32 1.0, %v3439_v43  ;;  %v10386_v3 = vadd.f32 1.0, %v8476_v55  ;;  %v8478_v57 = vpop.eup %8477  ;;  %v8130_v43 = vld [vmem:[%s12134_s16] sm:$0xff]  ;;  %vm10408_vm2 = vmor %vm3338_vm6, %vm3339_vm5  ;;  %vm3343_vm5 = vcmp.eq.f32.partialorder %v3342_v52, 8.507059e+37  ;;  %vm3398_vm6 = vweird.f32 %v10311_v36 }
 0x937   : > { %v3426_v53 = vmul.f32 %v10278_v63, %v3425_v13  ;;  %v3350_v28 = vsub.f32 1.0, %v3349_v31  ;;  %v3341_v59 = vsel %vm10408_vm2, %v10247_v50, %v3337_v24  ;;  %vm3399_vm14 = vweird.f32 %v8478_v57  ;;  %3800 = vmatpush.bf16.msra.mxu2 %v8130_v43 }
 0x938   : > { %v3441_v44 = vmul.f32 %v10306_v16, %v3440_v2  ;;  %8479 = vrcp.f32 %v10386_v3  ;;  %v3345_v2 = vor.u32 1.1754944e-38, %v3344_v51  ;;  %vm3403_vm13 = vcmp.eq.f32.partialorder %v3402_v29, 8.507059e+37 }
 0x939   : > { %v3427_v39 = vadd.f32 %v10278_v63, %v3426_v53  ;;  %v3351_v40 = vmul.f32 %v10316_v33, %v3350_v28 }
 0x93a   : > { %v3442_v10 = vadd.f32 %v10306_v16, %v3441_v44  ;;  %v3346_v50 = vsel %vm3343_vm5, %v3345_v2, %v3341_v59  ;;  %vm3413_vm5 = vweird.f32 %v10386_v3 }
 0x93b   : > { %v3431_v25 = vsel %vm10369_vm15, %v10278_v63, %v3427_v39  ;;  %v3394_v63 = vmul.f32 %v8478_v57, %v10311_v36  ;;  %v3352_v6 = vadd.f32 %v10316_v33, %v3351_v40  ;;  %vm3354_vm15 = vweird.f32 %v10316_v33 }
 0x93c   : > { %v3436_v22 = vsel %vm3433_vm3, %v3435_v41, %v3431_v25  ;;  %v3446_v5 = vsel %vm3445_vm12, %v10306_v16, %v3442_v10  ;;  %v3516_v16 = vmul.f32 %v3391_v21, %v10148_v46  ;;  %v3404_v46 = vand.u32 2147483648, %v10311_v36  ;;  %vm3400_vm3 = vmor %vm3398_vm6, %vm3399_vm14 }
 0x93d   : > { %v3519_v35 = vmul.f32 %v3436_v22, %v10165_v11  ;;  %v3451_v13 = vsel %vm3448_vm4, %v3450_v42, %v3446_v5  ;;  %v8138_v11 = vld [vmem:[%s12134_s16 + $0x40] sm:$0xff]  ;;  %v3395_v17 = vsub.f32 1.0, %v3394_v63  ;;  %vm3353_vm12 = vweird.f32 %v10231_v47 }
 0x93e   : > { %v3520_v19 = vmul.f32 %v3451_v13, %v10168_v26  ;;  %3818 = vmatpush.bf16.msra.mxu3 %v8138_v11  ;;  %v8480_v45 = vpop.eup %8479  ;;  %v3405_v31 = vor.u32 1.1754944e-38, %v3404_v46  ;;  %v3359_v39 = vand.u32 2147483648, %v10231_v47  ;;  %v3513_v36 = vmul.f32 %v3346_v50, %v10155_v7  ;;  %vm10426_vm4 = vmor %vm3353_vm12, %vm3354_vm15 }
 0x93f   : > { %v3527_v0 = vpack.c.bf16 %v3519_v35, %v3515_v9  ;;  %v3396_v53 = vmul.f32 %v8478_v57, %v3395_v17  ;;  %v3409_v4 = vmul.f32 %v8480_v45, %v10386_v3  ;;  %v3356_v8 = vsel %vm10426_vm4, %v10316_v33, %v3352_v6 }
 0x940   : > { %v3528_v12 = vpack.c.bf16 %v3520_v19, %v3516_v16  ;;  %v3419_v41 = vand.u32 2147483648, %v10386_v3  ;;  %vm3414_vm2 = vweird.f32 %v8480_v45  ;;  %v3417_v7 = vand.u32 2147483647, %v10386_v3 }
 0x941   : > { %3837 = vmatmul.bf16.vlgmr.msrb.gmra.mxu0 %v3527_v0  ;;  %v3397_v26 = vadd.f32 %v8478_v57, %v3396_v53  ;;  %v3410_v9 = vsub.f32 1.0, %v3409_v4  ;;  %v3360_v21 = vor.u32 1.1754944e-38, %v3359_v39  ;;  %vm3358_vm14 = vcmp.eq.f32.partialorder %v3357_v49, 8.507059e+37  ;;  %vm3415_vm6 = vmor %vm3413_vm5, %vm3414_vm2 }
 0x942   : > { %3855 = vmatmul.bf16.vlgmr.msrb.gmra.mxu1 %v3528_v12  ;;  %vm3418_vm15 = vcmp.eq.f32.partialorder %v3417_v7, 8.507059e+37 }
 0x943   : > { %v3401_v37 = vsel %vm3400_vm3, %v8478_v57, %v3397_v26  ;;  %v3411_v48 = vmul.f32 %v8480_v45, %v3410_v9  ;;  %v3361_v47 = vsel %vm3358_vm14, %v3360_v21, %v3356_v8 }
 0x944   : > { %v3406_v44 = vsel %vm3403_vm13, %v3405_v31, %v3401_v37  ;;  %v3514_v33 = vmul.f32 %v3361_v47, %v10161_v23 }
 0x945   : > { %v3517_v55 = vmul.f32 %v3406_v44, %v10191_v61  ;;  %v3412_v25 = vadd.f32 %v8480_v45, %v3411_v48  ;;  %v3420_v61 = vor.u32 1.1754944e-38, %v3419_v41 }
 0x947   : > { %v3525_v58 = vpack.c.bf16 %v3517_v55, %v3513_v36  ;;  %v3416_v10 = vsel %vm3415_vm6, %v8480_v45, %v3412_v25 }
 0x948   : > { %v3421_v57 = vsel %vm3418_vm15, %v3420_v61, %v3416_v10 }
 0x949   : > { %3801 = vmatmul.bf16.vlgmr.msra.gmra.mxu2 %v3525_v58  ;;  %v3518_v24 = vmul.f32 %v3421_v57, %v10216_v62 }
 0x94b   : > { %v3526_v28 = vpack.c.bf16 %v3518_v24, %v3514_v33 }
 0x94d   : > { %3819 = vmatmul.bf16.vlgmr.msra.gmra.mxu3 %v3526_v28 }
 0x966   : > { %v3251_v22 = vpop.f32.mrf.mxu0  ;;  %v3269_v42 = vpop.f32.mrf.mxu1 }
 0x967   : > { %v10441_v35 = vadd.f32 %v3251_v22, %v10140_v32  ;;  %v10444_v3 = vadd.f32 %v3269_v42, %v10142_v60 }
 0x969   : > { %v7354_v5 = vmul.f32 -1.702, %v10441_v35  ;;  %v7355_v63 = vmul.f32 -1.702, %v10444_v3 }
 0x96b   : > { %v3317_v52 = vmul.f32 1.442695, %v7354_v5  ;;  %v3319_v51 = vmul.f32 1.442695, %v7355_v63  ;;  %v3215_v13 = vpop.f32.mrf.mxu2  ;;  %v3233_v23 = vpop.f32.mrf.mxu3 }
 0x96c   : > { %v10449_v62 = vadd.f32 %v3215_v13, %v10150_v30  ;;  %v10452_v43 = vadd.f32 %v3233_v23, %v10157_v14 }
 0x96d   : > { %8481 = vpow2.f32 %v3317_v52 }
 0x96e   : > { %8483 = vpow2.f32 %v3319_v51  ;;  %v7352_v32 = vmul.f32 -1.702, %v10449_v62  ;;  %v7353_v60 = vmul.f32 -1.702, %v10452_v43  ;;  %v3253_v11 = vpop.f32.mrf.mxu0  ;;  %v3271_v16 = vpop.f32.mrf.mxu1 }
 0x970   : > { %v3313_v27 = vmul.f32 1.442695, %v7352_v32  ;;  %v3315_v0 = vmul.f32 1.442695, %v7353_v60 }
 0x972   : > { %8485 = vpow2.f32 %v3313_v27 }
 0x973   : > { %v8482_v19 = vpop.eup %8481  ;;  %8487 = vpow2.f32 %v3315_v0  ;;  %v3217_v17 = vpop.f32.mrf.mxu2 }
 0x974   : > { %v3235_v59 = vpop.f32.mrf.mxu3  ;;  %v8484_v30 = vpop.eup %8483  ;;  %v3331_v40 = vadd.f32 1.0, %v8482_v19 }
 0x975   : > { %v3332_v46 = vadd.f32 1.0, %v8484_v30 }
 0x976   : > { %8489 = vrcp.f32 %v3331_v40  ;;  %v3492_v50 = vand.u32 2147483647, %v3331_v40  ;;  %v3494_v6 = vand.u32 2147483648, %v3331_v40  ;;  %vm3488_vm3 = vweird.f32 %v3331_v40 }
 0x977   : > { %8491 = vrcp.f32 %v3332_v46  ;;  %v3507_v4 = vand.u32 2147483647, %v3332_v46  ;;  %v3509_v39 = vand.u32 2147483648, %v3332_v46  ;;  %vm3503_vm4 = vweird.f32 %v3332_v46 }
 0x978   : > { %v8486_v14 = vpop.eup %8485  ;;  %vm10459_vm12 = vcmp.eq.f32.partialorder %v3492_v50, 8.507059e+37  ;;  %v3495_v9 = vor.u32 1.1754944e-38, %v3494_v6 }
 0x979   : > { %v8488_v12 = vpop.eup %8487  ;;  %v3329_v53 = vadd.f32 1.0, %v8486_v14  ;;  %vm10463_vm14 = vcmp.eq.f32.partialorder %v3507_v4, 8.507059e+37  ;;  %v3510_v7 = vor.u32 1.1754944e-38, %v3509_v39  ;;  %v8374_v14 = vld [vmem:[%s12135_s17] ss:$0 sm:$0xff] }
 0x97a   : > { %v10456_v29 = vadd.f32 1.0, %v8488_v12 }
 0x97b   : > { %8493 = vrcp.f32 %v3329_v53  ;;  %v3462_v61 = vand.u32 2147483647, %v3329_v53  ;;  %v3464_v10 = vand.u32 2147483648, %v3329_v53 }
 0x97c   : > { %v8490_v2 = vpop.eup %8489  ;;  %8495 = vrcp.f32 %v10456_v29  ;;  %v3477_v24 = vand.u32 2147483647, %v10456_v29  ;;  %v3479_v28 = vand.u32 2147483648, %v10456_v29 }
 0x97d   : > { %v8492_v26 = vpop.eup %8491  ;;  %v3484_v45 = vmul.f32 %v8490_v2, %v3331_v40  ;;  %vm3489_vm13 = vweird.f32 %v8490_v2  ;;  %v3465_v60 = vor.u32 1.1754944e-38, %v3464_v10 }
 0x97e   : > { %v3499_v31 = vmul.f32 %v8492_v26, %v3332_v46  ;;  %vm3504_vm2 = vweird.f32 %v8492_v26  ;;  %vm3490_vm5 = vmor %vm3488_vm3, %vm3489_vm13  ;;  %vm3458_vm13 = vweird.f32 %v3329_v53 }
 0x97f   : > { %v3485_v37 = vsub.f32 1.0, %v3484_v45  ;;  %vm3505_vm6 = vmor %vm3503_vm4, %vm3504_vm2  ;;  %vm3463_vm2 = vcmp.eq.f32.partialorder %v3462_v61, 8.507059e+37 }
 0x980   : > { %v3500_v44 = vsub.f32 1.0, %v3499_v31 }
 0x981   : > { %v8494_v36 = vpop.eup %8493  ;;  %v3486_v1 = vmul.f32 %v8490_v2, %v3485_v37 }
 0x982   : > { %v8496_v55 = vpop.eup %8495  ;;  %v3501_v8 = vmul.f32 %v8492_v26, %v3500_v44  ;;  %v3454_v41 = vmul.f32 %v8494_v36, %v3329_v53  ;;  %vm3459_vm15 = vweird.f32 %v8494_v36 }
 0x983   : > { %v3487_v58 = vadd.f32 %v8490_v2, %v3486_v1  ;;  %v3469_v21 = vmul.f32 %v8496_v55, %v10456_v29  ;;  %vm3474_vm3 = vweird.f32 %v8496_v55  ;;  %vm3460_vm4 = vmor %vm3458_vm13, %vm3459_vm15 }
 0x984   : > { %v3502_v25 = vadd.f32 %v8492_v26, %v3501_v8  ;;  %v3455_v47 = vsub.f32 1.0, %v3454_v41 }
 0x985   : > { %v3491_v57 = vsel %vm3490_vm5, %v8490_v2, %v3487_v58  ;;  %v3470_v33 = vsub.f32 1.0, %v3469_v21 }
 0x986   : > { %v3496_v22 = vsel %vm10459_vm12, %v3495_v9, %v3491_v57  ;;  %v3506_v42 = vsel %vm3505_vm6, %v8492_v26, %v3502_v25  ;;  %v3456_v5 = vmul.f32 %v8494_v36, %v3455_v47  ;;  %vm3473_vm12 = vweird.f32 %v10456_v29 }
 0x987   : > { %v3523_v63 = vmul.f32 %v3496_v22, %v10441_v35  ;;  %v3511_v52 = vsel %vm10463_vm14, %v3510_v7, %v3506_v42  ;;  %v3471_v51 = vmul.f32 %v8496_v55, %v3470_v33  ;;  %vm3475_vm5 = vmor %vm3473_vm12, %vm3474_vm3  ;;  %v3480_v35 = vor.u32 1.1754944e-38, %v3479_v28 }
 0x988   : > { %v3524_v13 = vmul.f32 %v3511_v52, %v10444_v3  ;;  %v3457_v23 = vadd.f32 %v8494_v36, %v3456_v5  ;;  %vm3478_vm14 = vcmp.eq.f32.partialorder %v3477_v24, 8.507059e+37 }
 0x989   : > { %v3531_v32 = vpack.c.bf16 %v3523_v63, %v3523_v63  ;;  %v3472_v11 = vadd.f32 %v8496_v55, %v3471_v51 }
 0x98a   : > { %v3532_v16 = vpack.c.bf16 %v3524_v13, %v3524_v13  ;;  %v3461_v27 = vsel %vm3460_vm4, %v8494_v36, %v3457_v23  ;;  %v7605_v23 = vld [vmem:[%s12126_s8 + $0x168] sm:$0xf] }
 0x98b   : > { %3842 = vmatmul.bf16.gmra.mxu0 %v3531_v32  ;;  %v3466_v0 = vsel %vm3463_vm2, %v3465_v60, %v3461_v27  ;;  %v3476_v19 = vsel %vm3475_vm5, %v8496_v55, %v3472_v11  ;;  %v8184_v32 = vld [vmem:[%s12126_s8 + $0x170] sm:$0xf0]  ;;  %v8183_v60 = vld [vmem:[%s12126_s8 + $0x16c] sm:$0xf]  ;;  %v7613_v27 = vld [vmem:[%s12126_s8 + $0x170] sm:$0xf] }
 0x98c   : > { %3860 = vmatmul.bf16.gmra.mxu1 %v3532_v16  ;;  %v3521_v3 = vmul.f32 %v3466_v0, %v10449_v62  ;;  %v3481_v17 = vsel %vm3478_vm14, %v3480_v35, %v3476_v19  ;;  %v7606_v11 = vor.u32 %v8184_v32, %v7605_v23  ;;  %v7607_v16 = vld [vmem:[%s12126_s8 + $0x174] sm:$0xf0]  ;;  %v8185_v35 = vld [vmem:[%s12126_s8 + $0x178] sm:$0xf0]  ;;  %v8170_v32 = vld [vmem:[%s12126_s8 + $0x100] sm:$0xf0] }
 0x98d   : > { %v3522_v59 = vmul.f32 %v3481_v17, %v10452_v43  ;;  %v7610_v0 = vor.u32 %v8183_v60, %v7607_v16  ;;  %v7614_v19 = vor.u32 %v8185_v35, %v7613_v27  ;;  %v8181_v17 = vld [vmem:[%s12126_s8 + $0x158] sm:$0xf0]  ;;  %v7553_v23 = vld [vmem:[%s12126_s8 + $0xf8] sm:$0xf] }
 0x98e   : > { %v3529_v30 = vpack.c.bf16 %v3521_v3, %v3521_v3  ;;  %4118 = vmatpush.bf16.msrb.mxu2 %v7606_v11  ;;  %v7593_v3 = vld [vmem:[%s12126_s8 + $0x150] sm:$0xf] }
 0x98f   : > { %v3530_v40 = vpack.c.bf16 %v3522_v59, %v3522_v59  ;;  %4136 = vmatpush.bf16.msrb.mxu3 %v7610_v0  ;;  %4154 = vmatpush.bf16.msra.mxu0 %v7614_v19  ;;  %v8180_v59 = vld [vmem:[%s12126_s8 + $0x154] sm:$0xf]  ;;  %v7554_v0 = vor.u32 %v8170_v32, %v7553_v23  ;;  %v7533_v19 = vld [vmem:[%s12126_s8 + $0xd8] sm:$0xf] }
 0x990   : > { %3806 = vmatmul.bf16.gmra.mxu2 %v3529_v30  ;;  %v7594_v30 = vor.u32 %v8181_v17, %v7593_v3  ;;  %v8166_v3 = vld [vmem:[%s12126_s8 + $0xe0] sm:$0xf0]  ;;  %v8165_v17 = vld [vmem:[%s12126_s8 + $0xdc] sm:$0xf] }
 0x991   : > { %3824 = vmatmul.bf16.gmra.mxu3 %v3530_v40  ;;  %v7595_v40 = vld [vmem:[%s12126_s8 + $0x15c] sm:$0xf0] }
 0x992   : > { %4119 = vmatpush.bf16.msrb.mxu2 %v7594_v30  ;;  %v7535_v30 = vld [vmem:[%s12126_s8 + $0xe4] sm:$0xf0] }
 0x9be   : > { %v3838_v53 = vpop.f32.mrf.mxu0 }
 0x9bf   : > { %v3856_v26 = vpop.f32.mrf.mxu1 }
 0x9c6   : > { %v3840_v4 = vpop.f32.mrf.mxu0 }
 0x9c7   : > { %v3858_v44 = vpop.f32.mrf.mxu1 }
 0x9cc   : > { %v3802_v46 = vpop.f32.mrf.mxu2 }
 0x9cd   : > { %v3803_v12 = vadd.f32 %v8374_v14, %v3802_v46  ;;  %v7601_v46 = vld [vmem:[%s12126_s8 + $0x158] sm:$0xf] }
 0x9d0   : > { %v3820_v29 = vpop.f32.mrf.mxu3 }
 0x9d1   : > { %v3821_v2 = vadd.f32 %v3820_v29, %v3803_v12  ;;  %v7598_v12 = vor.u32 %v8180_v59, %v7595_v40  ;;  %v7581_v29 = vld [vmem:[%s12126_s8 + $0x138] sm:$0xf]  ;;  %v7541_v40 = vld [vmem:[%s12126_s8 + $0xe0] sm:$0xf] }
 0x9d3   : > { %v3839_v50 = vadd.f32 %v3838_v53, %v3821_v2  ;;  %v8178_v2 = vld [vmem:[%s12126_s8 + $0x140] sm:$0xf0]  ;;  %4137 = vmatpush.bf16.msrb.mxu3 %v7598_v12  ;;  %v7534_v12 = vor.u32 %v8166_v3, %v7533_v19 }
 0x9d4   : > { %v3804_v45 = vpop.f32.mrf.mxu2 }
 0x9d5   : > { %v3857_v62 = vadd.f32 %v3856_v26, %v3839_v50  ;;  %v3805_v6 = vadd.f32 %v8374_v14, %v3804_v45  ;;  %v8177_v26 = vld [vmem:[%s12126_s8 + $0x13c] sm:$0xf]  ;;  %v7582_v50 = vor.u32 %v8178_v2, %v7581_v29  ;;  %v7538_v29 = vor.u32 %v8165_v17, %v7535_v30 }
 0x9d7   : > { %v10485_v43 = vadd.f32 %v3857_v62, %v9885_v56  ;;  %v7583_v62 = vld [vmem:[%s12126_s8 + $0x144] sm:$0xf0]  ;;  %4120 = vmatpush.bf16.msrb.mxu2 %v7582_v50  ;;  %v7523_v50 = vld [vmem:[%s12126_s8 + $0xcc] sm:$0xf0] }
 0x9d8   : > { %v3822_v31 = vpop.f32.mrf.mxu3 }
 0x9d9   : > { %v3823_v37 = vadd.f32 %v3822_v31, %v3805_v6  ;;  %3872 = vadd.xlane.f32.xlu1 %v10485_v43  ;;  %v7589_v6 = vld [vmem:[%s12126_s8 + $0x140] sm:$0xf]  ;;  %v8179_v31 = vld [vmem:[%s12126_s8 + $0x148] sm:$0xf0] }
 0x9db   : > { %v3841_v39 = vadd.f32 %v3840_v4, %v3823_v37  ;;  %v7586_v4 = vor.u32 %v8177_v26, %v7583_v62  ;;  %v8163_v26 = vld [vmem:[%s12126_s8 + $0xc8] sm:$0xf0] }
 0x9dd   : > { %v3859_v36 = vadd.f32 %v3858_v44, %v3841_v39  ;;  %v7590_v39 = vor.u32 %v8179_v31, %v7589_v6  ;;  %v7569_v44 = vld [vmem:[%s12126_s8 + $0x120] sm:$0xf]  ;;  %4138 = vmatpush.bf16.msrb.mxu3 %v7586_v4  ;;  %v7529_v6 = vld [vmem:[%s12126_s8 + $0xc8] sm:$0xf]  ;;  %v8164_v31 = vld [vmem:[%s12126_s8 + $0xd0] sm:$0xf0] }
 0x9df   : > { %v10489_v1 = vadd.f32 %v3859_v36, %v9889_v34  ;;  %v8175_v36 = vld [vmem:[%s12126_s8 + $0x128] sm:$0xf0] }
 0x9e1   : > { %3874 = vadd.xlane.f32.xlu0 %v10489_v1 }
 0xa08   : > { %v3843_v49 = vpop.f32.mrf.mxu0 }
 0xa09   : > { %v3861_v55 = vpop.f32.mrf.mxu1 }
 0xa10   : > { %v3845_v9 = vpop.f32.mrf.mxu0 }
 0xa11   : > { %v3863_v8 = vpop.f32.mrf.mxu1  ;;  %v7577_v9 = vld [vmem:[%s12126_s8 + $0x128] sm:$0xf] }
 0xa12   : > { %v8176_v8 = vld [vmem:[%s12126_s8 + $0x130] sm:$0xf0] }
 0xa13   : > { %v3807_v41 = vpop.f32.mrf.mxu2 }
 0xa14   : > { %v3808_v56 = vadd.f32 %v8374_v14, %v3807_v41  ;;  %v3825_v58 = vpop.f32.mrf.mxu3  ;;  %v8182_v14 = vld [vmem:[%s12126_s8 + $0x160] sm:$0xf0] }
 0xa15   : > { %v7602_v53 = vor.u32 %v8182_v14, %v7601_v46  ;;  %v8167_v46 = vld [vmem:[%s12126_s8 + $0xe8] sm:$0xf0] }
 0xa16   : > { %v3826_v48 = vadd.f32 %v3825_v58, %v3808_v56  ;;  %v7570_v56 = vor.u32 %v8175_v36, %v7569_v44  ;;  %v7542_v2 = vor.u32 %v8167_v46, %v7541_v40 }
 0xa17   : > { %4155 = vmatpush.bf16.msra.mxu0 %v7602_v53  ;;  %v7521_v53 = vld [vmem:[%s12126_s8 + $0xc0] sm:$0xf] }
 0xa18   : > { %v3844_v7 = vadd.f32 %v3843_v49, %v3826_v48  ;;  %v8174_v49 = vld [vmem:[%s12126_s8 + $0x124] sm:$0xf]  ;;  %v7578_v48 = vor.u32 %v8176_v8, %v7577_v9  ;;  %4121 = vmatpush.bf16.msrb.mxu2 %v7570_v56  ;;  %v7522_v44 = vor.u32 %v8163_v26, %v7521_v53 }
 0xa1a   : > { %v3862_v21 = vadd.f32 %v3861_v55, %v3844_v7  ;;  %v7571_v55 = vld [vmem:[%s12126_s8 + $0x12c] sm:$0xf0]  ;;  %v7557_v7 = vld [vmem:[%s12126_s8 + $0x108] sm:$0xf] }
 0xa1b   : > { %v3809_v25 = vpop.f32.mrf.mxu2  ;;  %4156 = vmatpush.bf16.msra.mxu0 %v7590_v39  ;;  %v7574_v58 = vor.u32 %v8174_v49, %v7571_v55  ;;  %v7530_v49 = vor.u32 %v8164_v31, %v7529_v6 }
 0xa1c   : > { %v3827_v47 = vpop.f32.mrf.mxu3  ;;  %v10493_v61 = vadd.f32 %v3862_v21, %v9893_v18  ;;  %v8172_v21 = vld [vmem:[%s12126_s8 + $0x110] sm:$0xf0]  ;;  %v8171_v25 = vld [vmem:[%s12126_s8 + $0x10c] sm:$0xf] }
 0xa1d   : > { %v7559_v47 = vld [vmem:[%s12126_s8 + $0x114] sm:$0xf0]  ;;  %4139 = vmatpush.bf16.msrb.mxu3 %v7574_v58 }
 0xa1e   : > { %v3876_v34 = vsel %vm722_vm1, %v10493_v61, 0.0 }
 0xa1f   : > { %3877 = vadd.xlane.f32.xlu2 %v3876_v34  ;;  %v7565_v34 = vld [vmem:[%s12126_s8 + $0x110] sm:$0xf]  ;;  %4157 = vmatpush.bf16.msra.mxu0 %v7578_v48  ;;  %v8375_v48 = vld [vmem:[%s12124_s6 + $0x1] ss:$0 sm:$0xff] }
 0xa4c   : > { %v3873_v10 = vpop.xlane.xlu1 %3872 }
 0xa4d   : > { %v3879_v57 = vmul.f32 %v3873_v10, %v8876_v38  ;;  %v8173_v10 = vld [vmem:[%s12126_s8 + $0x118] sm:$0xf0] }
 0xa4f   : > { %v10499_v33 = vsub.f32 %v10485_v43, %v3879_v57 }
 0xa51   : > { %v3885_v24 = vmul.f32 %v10499_v33, %v10499_v33 }
 0xa53   : > { %3888 = vadd.xlane.f32.xlu1 %v3885_v24  ;;  %v7558_v24 = vor.u32 %v8172_v21, %v7557_v7 }
 0xa54   : > { %v3875_v28 = vpop.xlane.xlu0 %3874 }
 0xa55   : > { %v3880_v22 = vmul.f32 %v3875_v28, %v8876_v38  ;;  %4122 = vmatpush.bf16.msrb.mxu2 %v7558_v24 }
 0xa57   : > { %v10505_v18 = vsub.f32 %v10489_v1, %v3880_v22  ;;  %v7562_v22 = vor.u32 %v8171_v25, %v7559_v47  ;;  %v8376_v47 = vld [vmem:[%s12125_s7 + $0x1] ss:$0 sm:$0xff] }
 0xa59   : > { %v3886_v42 = vmul.f32 %v10505_v18, %v10505_v18  ;;  %4140 = vmatpush.bf16.msrb.mxu3 %v7562_v22 }
 0xa5b   : > { %3890 = vadd.xlane.f32.xlu0 %v3886_v42  ;;  %v7566_v42 = vor.u32 %v8173_v10, %v7565_v34 }
 0xa5d   : > { %4158 = vmatpush.bf16.msra.mxu0 %v7566_v42 }
 0xa61   : > { %4159 = vmatpush.bf16.msra.mxu0 %v7554_v0 }
 0xa65   : > { %4160 = vmatpush.bf16.msra.mxu0 %v7542_v2 }
 0xa69   : > { %4161 = vmatpush.bf16.msra.mxu0 %v7530_v49 }
 0xa92   : > { %v3878_v5 = vpop.xlane.xlu2 %3877 }
 0xa93   : > { %v3881_v63 = vmul.f32 %v3878_v5, %v8876_v38  ;;  %v7545_v5 = vld [vmem:[%s12126_s8 + $0xf0] sm:$0xf] }
 0xa95   : > { %v10511_v52 = vsub.f32 %v10493_v61, %v3881_v63  ;;  %v8169_v63 = vld [vmem:[%s12126_s8 + $0xf8] sm:$0xf0] }
 0xa96   : > { %v7546_v27 = vor.u32 %v8169_v63, %v7545_v5 }
 0xa97   : > { %v3887_v51 = vmul.f32 %v10511_v52, %v10511_v52 }
 0xa98   : > { %4123 = vmatpush.bf16.msrb.mxu2 %v7546_v27  ;;  %v7518_v27 = vld [vmem:[%s12127_s9 + $0x3] sm:$0x7] }
 0xa99   : > { %v3892_v13 = vsel %vm722_vm1, %v3887_v51, 0.0  ;;  %v8168_v51 = vld [vmem:[%s12126_s8 + $0xf4] sm:$0xf]  ;;  %v3985_v0 = vperm.slane %v7518_v27, 1  ;;  %v3986_v31 = vperm.slane %v7518_v27, 2 }
 0xa9a   : > { %3893 = vadd.xlane.f32.xlu2 %v3892_v13  ;;  %v7547_v13 = vld [vmem:[%s12126_s8 + $0xfc] sm:$0xf0] }
 0xa9b   : > { %v7550_v35 = vor.u32 %v8168_v51, %v7547_v13 }
 0xa9c   : > { %4124 = vmatpush.bf16.msrb.mxu2 %v7534_v12 }
 0xa9d   : > { %4141 = vmatpush.bf16.msrb.mxu3 %v7550_v35  ;;  %v3984_v35 = vperm.slane %v7518_v27, 0 }
 0xaa0   : > { %4125 = vmatpush.bf16.msrb.mxu2 %v7522_v44 }
 0xaa1   : > { %4142 = vmatpush.bf16.msrb.mxu3 %v7538_v29 }
 0xac6   : > { %v3889_v45 = vpop.xlane.xlu1 %3888 }
 0xac7   : > { %v3895_v37 = vmul.f32 %v3889_v45, %v8876_v38  ;;  %v8162_v45 = vld [vmem:[%s12126_s8 + $0xc4] sm:$0xf] }
 0xac8   : > { %v7526_v36 = vor.u32 %v8162_v45, %v7523_v50 }
 0xac9   : > { %v10589_v41 = vadd.f32 1e-05, %v3895_v37 }
 0xaca   : > { %4143 = vmatpush.bf16.msrb.mxu3 %v7526_v36 }
 0xacb   : > { %8497 = vrsqrt.f32 %v10589_v41  ;;  %vm3907_vm15 = vweird.f32 %v10589_v41 }
 0xace   : > { %v3891_v57 = vpop.xlane.xlu0 %3890 }
 0xacf   : > { %v3896_v28 = vmul.f32 %v3891_v57, %v8876_v38 }
 0xad1   : > { %v8498_v60 = vpop.eup %8497  ;;  %v3899_v11 = vadd.f32 1e-05, %v3896_v28 }
 0xad2   : > { %v3902_v16 = vmul.f32 %v8498_v60, %v10589_v41  ;;  %vm3908_vm6 = vweird.f32 %v8498_v60 }
 0xad3   : > { %8499 = vrsqrt.f32 %v3899_v11  ;;  %vm3909_vm3 = vmor %vm3907_vm15, %vm3908_vm6  ;;  %vm3917_vm4 = vweird.f32 %v3899_v11 }
 0xad4   : > { %v3903_v59 = vmul.f32 %v8498_v60, %v3902_v16 }
 0xad6   : > { %v3904_v14 = vmul.f32 0.5, %v3903_v59 }
 0xad8   : > { %v3905_v62 = vsub.f32 1.5, %v3904_v14 }
 0xad9   : > { %v8500_v37 = vpop.eup %8499 }
 0xada   : > { %v3906_v4 = vmul.f32 %v8498_v60, %v3905_v62  ;;  %v3912_v39 = vmul.f32 %v8500_v37, %v3899_v11  ;;  %vm3918_vm13 = vweird.f32 %v8500_v37 }
 0xadb   : > { %vm3919_vm12 = vmor %vm3917_vm4, %vm3918_vm13 }
 0xadc   : > { %v3913_v55 = vmul.f32 %v8500_v37, %v3912_v39  ;;  %v3910_v9 = vsel %vm3909_vm3, %v8498_v60, %v3906_v4 }
 0xadd   : > { %v3931_v58 = vmul.f32 %v3910_v9, %v10499_v33 }
 0xade   : > { %v3914_v8 = vmul.f32 0.5, %v3913_v55 }
 0xadf   : > { %v3937_v25 = vmul.f32 %v8375_v48, %v3931_v58 }
 0xae0   : > { %v3915_v56 = vsub.f32 1.5, %v3914_v8 }
 0xae1   : > { %v3943_v10 = vadd.f32 %v8376_v47, %v3937_v25 }
 0xae2   : > { %v3916_v7 = vmul.f32 %v8500_v37, %v3915_v56 }
 0xae4   : > { %v3920_v21 = vsel %vm3919_vm12, %v8500_v37, %v3916_v7 }
 0xae5   : > { %v3932_v41 = vmul.f32 %v3920_v21, %v10505_v18 }
 0xae7   : > { %v3938_v34 = vmul.f32 %v8375_v48, %v3932_v41 }
 0xae9   : > { %v3944_v57 = vadd.f32 %v8376_v47, %v3938_v34 }
 0xaeb   : > { %v3946_v24 = vpack.c.bf16 %v3944_v57, %v3943_v10 }
 0xaed   : > { %4126 = vmatmul.bf16.vlgmr.msrb.gmra.mxu2 %v3946_v24  ;;  %4144 = vmatmul.bf16.vlgmr.msrb.gmra.mxu3 %v3946_v24 }
 0xaee   : > { %4162 = vmatmul.bf16.vlgmr.msra.gmra.mxu0 %v3946_v24 }
 0xb0d   : > { %v3894_v33 = vpop.xlane.xlu2 %3893 }
 0xb0e   : > { %v3897_v28 = vmul.f32 %v3894_v33, %v8876_v38 }
 0xb10   : > { %v3900_v22 = vadd.f32 1e-05, %v3897_v28 }
 0xb12   : > { %8501 = vrsqrt.f32 %v3900_v22  ;;  %vm3927_vm5 = vweird.f32 %v3900_v22 }
 0xb18   : > { %v8502_v42 = vpop.eup %8501 }
 0xb19   : > { %v3922_v5 = vmul.f32 %v8502_v42, %v3900_v22  ;;  %vm3928_vm2 = vweird.f32 %v8502_v42 }
 0xb1a   : > { %vm3929_vm14 = vmor %vm3927_vm5, %vm3928_vm2 }
 0xb1b   : > { %v3923_v18 = vmul.f32 %v8502_v42, %v3922_v5 }
 0xb1d   : > { %v3924_v63 = vmul.f32 0.5, %v3923_v18 }
 0xb1f   : > { %v3925_v51 = vsub.f32 1.5, %v3924_v63 }
 0xb21   : > { %v3926_v13 = vmul.f32 %v8502_v42, %v3925_v51 }
 0xb23   : > { %v3930_v23 = vsel %vm3929_vm14, %v8502_v42, %v3926_v13 }
 0xb24   : > { %v3933_v32 = vmul.f32 %v3930_v23, %v10511_v52 }
 0xb26   : > { %v3939_v60 = vmul.f32 %v8375_v48, %v3933_v32 }
 0xb28   : > { %v3945_v11 = vadd.f32 %v8376_v47, %v3939_v60 }
 0xb2a   : > { %v3947_v16 = vpack.c.bf16 %v3945_v11, %v3945_v11 }
 0xb2c   : > { %4131 = vmatmul.bf16.gmra.mxu2 %v3947_v16  ;;  %4149 = vmatmul.bf16.gmra.mxu3 %v3947_v16 }
 0xb2d   : > { %4167 = vmatmul.bf16.gmra.mxu0 %v3947_v16 }
 0xb6b   : > { %v4163_v14 = vpop.f32.mrf.mxu0 }
 0xb6c   : > { %v10727_v39 = vadd.f32 %v4163_v14, %v3986_v31 }
 0xb70   : > { %v4127_v19 = vpop.f32.mrf.mxu2  ;;  %v4145_v3 = vpop.f32.mrf.mxu3 }
 0xb71   : > { %v10680_v17 = vadd.f32 %v4127_v19, %v3984_v35  ;;  %v4146_v59 = vadd.f32 %v4145_v3, %v3985_v0 }
 0xb73   : > { %4223 = vrot.lane.b32.xlu1 %v4146_v59, %s8672_s27  ;;  %4205 = vrot.lane.b32.xlu0 %v4146_v59, %s8670_s29  ;;  %v4165_v12 = vpop.f32.mrf.mxu0  ;;  %v4288_v10 = vrot.slane %v4146_v59, 4  ;;  %v4264_v19 = vrot.slane %v10680_v17, 4 }
 0xb74   : > { %4175 = vrot.lane.b32.xlu2 %v10680_v17, %s8670_s29  ;;  %v10723_v37 = vadd.f32 %v4165_v12, %v3986_v31 }
 0xb76   : > { %v10731_v44 = vpack.i.bf16 %v10723_v37, %v10727_v39 }
 0xb78   : > { %v4147_v52 = vpop.f32.mrf.mxu3  ;;  %v4129_v40 = vpop.f32.mrf.mxu2 }
 0xb79   : > { %v10686_v30 = vadd.f32 %v4147_v52, %v3985_v0  ;;  %v10693_v46 = vadd.f32 %v4129_v40, %v3984_v35 }
 0xb7b   : > { %4207 = vrot.lane.b32.xlu1 %v10686_v30, %s8670_s29  ;;  %4193 = vrot.lane.b32.xlu0 %v10680_v17, %s8672_s27 }
 0xb7c   : > { %4214 = vrot.lane.b32.xlu2 %v4146_v59, %s12189_s25 }
 0xb83   : > { %4195 = vrot.lane.b32.xlu1 %v10693_v46, %s8672_s27  ;;  %4177 = vrot.lane.b32.xlu0 %v10693_v46, %s8670_s29 }
 0xb84   : > { %4225 = vrot.lane.b32.xlu2 %v10686_v30, %s8672_s27 }
 0xbaa   : > { %v4168_v53 = vpop.f32.mrf.mxu0 }
 0xbab   : > { %v10725_v4 = vadd.f32 %v4168_v53, %v3986_v31 }
 0xbad   : > { %v8337_v36 = vpack.i.bf16 %v10727_v39, %v10725_v4 }
 0xbaf   : > { %v4132_v29 = vpop.f32.mrf.mxu2  ;;  %v4150_v2 = vpop.f32.mrf.mxu3 }
 0xbb0   : > { %v10701_v26 = vadd.f32 %v4132_v29, %v3984_v35  ;;  %v10703_v45 = vadd.f32 %v4150_v2, %v3985_v0  ;;  %v4432_v35 = vrot.slane %v10693_v46, 4  ;;  %v4456_v29 = vrot.slane %v10686_v30, 4 }
 0xbb2   : > { %v4170_v50 = vpop.f32.mrf.mxu0  ;;  %4227 = vrot.lane.b32.xlu1 %v10703_v45, %s8672_s27  ;;  %4197 = vrot.lane.b32.xlu0 %v10701_v26, %s8672_s27 }
 0xbb3   : > { %4209 = vrot.lane.b32.xlu2 %v10703_v45, %s8670_s29 }
 0xbb7   : > { %v4134_v62 = vpop.f32.mrf.mxu2  ;;  %v4152_v6 = vpop.f32.mrf.mxu3 }
 0xbba   : > { %4179 = vrot.lane.b32.xlu1 %v10701_v26, %s8670_s29  ;;  %4218 = vrot.lane.b32.xlu0 %v10703_v45, %s12189_s25 }
 0xbbb   : > { %4188 = vrot.lane.b32.xlu2 %v10701_v26, %s12189_s25 }
 0xbc2   : > { %4184 = vrot.lane.b32.xlu1 %v10680_v17, %s12189_s25  ;;  %4216 = vrot.lane.b32.xlu0 %v10686_v30, %s12189_s25 }
 0xbc3   : > { %4186 = vrot.lane.b32.xlu2 %v10693_v46, %s12189_s25 }
 0xbca   : > { %8343 = vrot.lane.b32.xlu0 %v10731_v44, %s8670_s29 }
 0xbcb   : > { %8338 = vrot.lane.b32.xlu2 %v8337_v36, %s8672_s27 }
 0xbce   : > { %v4176_v49 = vpop.permute.xlu2 %4175 }
 0xbcf   : > { %v4276_v2 = vrot.slane %v4176_v49, 4 }
 0xbd6   : > { %v4215_v55 = vpop.permute.xlu2 %4214 }
 0xbd7   : > { %v4286_v21 = vrot.slane %v4215_v55, 4  ;;  %v4289_v22 = vsel %vm1191_vm7, %v4215_v55, %v4288_v10 }
 0xbd8   : > { %v4297_v63 = vperm.slane %v4289_v22, %v9139_v20 }
 0xbd9   : > { %v4287_v34 = vsel %vm1191_vm7, %v4286_v21, %v4146_v59 }
 0xbda   : > { %v4293_v42 = vperm.slane %v4287_v34, %v9139_v20  ;;  %v4348_v11 = vrot.slane %v4297_v63, 4 }
 0xbdc   : > { %v4336_v51 = vrot.slane %v4293_v42, 4 }
 0xbde   : > { %v4226_v9 = vpop.permute.xlu2 %4225 }
 0xbdf   : > { %v4466_v50 = vrot.slane %v4226_v9, 4 }
 0xbe5   : > { %v4224_v8 = vpop.permute.xlu1 %4223  ;;  %v4206_v56 = vpop.permute.xlu0 %4205 }
 0xbe6   : > { %v4298_v41 = vrot.slane %v4224_v8, 4  ;;  %v4300_v25 = vrot.slane %v4206_v56, 4 }
 0xbe8   : > { %v4299_v57 = vsel %vm1191_vm7, %v4298_v41, %v4206_v56  ;;  %v4301_v24 = vsel %vm1191_vm7, %v4224_v8, %v4300_v25 }
 0xbe9   : > { %v4305_v5 = vperm.slane %v4299_v57, %v9139_v20  ;;  %v4309_v18 = vperm.slane %v4301_v24, %v9139_v20 }
 0xbeb   : > { %v4334_v13 = vrot.slane %v4305_v5, 4  ;;  %v4337_v23 = vsel %vm1191_vm7, %v4305_v5, %v4336_v51  ;;  %v4346_v32 = vrot.slane %v4309_v18, 4  ;;  %v4349_v52 = vsel %vm1191_vm7, %v4309_v18, %v4348_v11 }
 0xbec   : > { %v10753_v59 = vperm.slane %v4337_v23, %v9161_v54  ;;  %v10762_v36 = vperm.slane %v4349_v52, %v9161_v54 }
 0xbed   : > { %v4208_v48 = vpop.permute.xlu1 %4207  ;;  %v4194_v7 = vpop.permute.xlu0 %4193  ;;  %v4335_v3 = vsel %vm1191_vm7, %v4334_v13, %v4293_v42  ;;  %v4347_v14 = vsel %vm1191_vm7, %v4346_v32, %v4297_v63 }
 0xbee   : > { %v4468_v62 = vrot.slane %v4208_v48, 4  ;;  %v4274_v6 = vrot.slane %v4194_v7, 4  ;;  %v10759_v31 = vperm.slane %v4335_v3, %v9161_v54  ;;  %v10767_v56 = vperm.slane %v4347_v14, %v9161_v54 }
 0xbef   : > { %v4362_v21 = vrot.slane %v10753_v59, 4  ;;  %v4467_v41 = vsel %vm1191_vm7, %v4466_v50, %v4208_v48  ;;  %v4277_v34 = vsel %vm1191_vm7, %v4194_v7, %v4276_v2 }
 0xbf0   : > { %v4469_v22 = vsel %vm1191_vm7, %v4226_v9, %v4468_v62  ;;  %v10785_v51 = vperm.slane %v4467_v41, %v9139_v20  ;;  %v4285_v32 = vperm.slane %v4277_v34, %v9139_v20 }
 0xbf1   : > { %v10790_v13 = vperm.slane %v4469_v22, %v9139_v20 }
 0xbf2   : > { %v4322_v50 = vrot.slane %v4285_v32, 4 }
 0xbf5   : > { %v4196_v33 = vpop.permute.xlu1 %4195  ;;  %v4178_v28 = vpop.permute.xlu0 %4177 }
 0xbf6   : > { %v4444_v40 = vrot.slane %v4178_v28, 4  ;;  %v4442_v12 = vrot.slane %v4196_v33, 4 }
 0xbf8   : > { %v4445_v25 = vsel %vm1191_vm7, %v4196_v33, %v4444_v40  ;;  %v4443_v10 = vsel %vm1191_vm7, %v4442_v12, %v4178_v28  ;;  %v4502_v40 = vrot.slane %v10785_v51, 4 }
 0xbf9   : > { %v4453_v33 = vperm.slane %v4445_v25, %v9139_v20 }
 0xbfb   : > { %v4490_v3 = vrot.slane %v4453_v33, 4 }
 0xc0d   : > { %v4210_v58 = vpop.permute.xlu2 %4209 }
 0xc15   : > { %v10738_v47 = vpop.permute.xlu2 %4188 }
 0xc16   : > { %v4598_v7 = vrot.slane %v10738_v47, 4 }
 0xc18   : > { %v4599_v52 = vsel %vm1191_vm7, %v4598_v7, %v10701_v26 }
 0xc1d   : > { %v4187_v60 = vpop.permute.xlu2 %4186 }
 0xc1e   : > { %v4430_v53 = vrot.slane %v4187_v60, 4  ;;  %v4433_v55 = vsel %vm1191_vm7, %v4187_v60, %v4432_v35  ;;  %v4358_v35 = vrot.slane %v10759_v31, 4 }
 0xc1f   : > { %v4441_v42 = vperm.slane %v4433_v55, %v9139_v20 }
 0xc20   : > { %v4431_v57 = vsel %vm1191_vm7, %v4430_v53, %v10693_v46  ;;  %v4370_v46 = vrot.slane %v10762_v36, 4  ;;  %v4514_v53 = vrot.slane %v10790_v13, 4 }
 0xc21   : > { %v4437_v9 = vperm.slane %v4431_v57, %v9139_v20  ;;  %v4492_v60 = vrot.slane %v4441_v42, 4  ;;  %v4491_v62 = vsel %vm1191_vm7, %v4490_v3, %v4441_v42 }
 0xc23   : > { %v4480_v12 = vrot.slane %v4437_v9, 4 }
 0xc24   : > { %v4228_v16 = vpop.permute.xlu1 %4227  ;;  %v4198_v27 = vpop.permute.xlu0 %4197 }
 0xc25   : > { %v4616_v0 = vrot.slane %v4228_v16, 4  ;;  %v4604_v24 = vrot.slane %v4198_v27, 4 }
 0xc27   : > { %v4617_v8 = vsel %vm1191_vm7, %v4616_v0, %v4210_v58  ;;  %v4275_v58 = vsel %vm1191_vm7, %v4274_v6, %v4176_v49  ;;  %v4449_v49 = vperm.slane %v4443_v10, %v9139_v20  ;;  %v4366_v0 = vrot.slane %v10767_v56, 4 }
 0xc28   : > { %v4621_v5 = vperm.slane %v4617_v8, %v9139_v20  ;;  %v4281_v23 = vperm.slane %v4275_v58, %v9139_v20  ;;  %v4603_v6 = vperm.slane %v4599_v52, %v9139_v20  ;;  %v4493_v8 = vsel %vm1191_vm7, %v4453_v33, %v4492_v60 }
 0xc29   : > { %v4478_v14 = vrot.slane %v4449_v49, 4  ;;  %v4481_v22 = vsel %vm1191_vm7, %v4449_v49, %v4480_v12  ;;  %v10815_v58 = vperm.slane %v4491_v62, %v9161_v54 }
 0xc2a   : > { %v4628_v11 = vrot.slane %v4621_v5, 4  ;;  %v4310_v2 = vrot.slane %v4281_v23, 4 }
 0xc2b   : > { %v4479_v55 = vsel %vm1191_vm7, %v4478_v14, %v4437_v9 }
 0xc2c   : > { %v4180_v18 = vpop.permute.xlu1 %4179  ;;  %v4219_v48 = vpop.permute.xlu0 %4218 }
 0xc2d   : > { %v4605_v28 = vsel %vm1191_vm7, %v4604_v24, %v4180_v18  ;;  %v4610_v63 = vrot.slane %v4219_v48, 4  ;;  %v10822_v18 = vperm.slane %v4479_v55, %v9161_v54  ;;  %v10825_v48 = vperm.slane %v4493_v8, %v9161_v54 }
 0xc2e   : > { %v4609_v16 = vperm.slane %v4605_v28, %v9139_v20 }
 0xc2f   : > { %v4611_v47 = vsel %vm1191_vm7, %v4610_v63, %v10703_v45  ;;  %v4528_v12 = vrot.slane %v10822_v18, 4 }
 0xc30   : > { %v4615_v27 = vperm.slane %v4611_v47, %v9139_v20  ;;  %v4622_v41 = vrot.slane %v4609_v16, 4 }
 0xc32   : > { %v4629_v45 = vsel %vm1191_vm7, %v4628_v11, %v4615_v27  ;;  %v4623_v7 = vsel %vm1191_vm7, %v4622_v41, %v4603_v6  ;;  %v4536_v27 = vrot.slane %v10815_v58, 4 }
 0xc33   : > { %v4633_v34 = vperm.slane %v4629_v45, %v9161_v54  ;;  %v4627_v3 = vperm.slane %v4623_v7, %v9161_v54  ;;  %v4540_v45 = vrot.slane %v10825_v48, 4 }
 0xc34   : > { %v4185_v26 = vpop.permute.xlu1 %4184  ;;  %v4217_v25 = vpop.permute.xlu0 %4216 }
 0xc35   : > { %v4262_v10 = vrot.slane %v4185_v26, 4  ;;  %v4265_v57 = vsel %vm1191_vm7, %v4185_v26, %v4264_v19  ;;  %v4454_v24 = vrot.slane %v4217_v25, 4  ;;  %v4457_v5 = vsel %vm1191_vm7, %v4217_v25, %v4456_v29 }
 0xc36   : > { %v4273_v42 = vperm.slane %v4265_v57, %v9139_v20  ;;  %v10835_v29 = vperm.slane %v4481_v22, %v9161_v54  ;;  %v4634_v9 = vrot.slane %v4633_v34, 4  ;;  %v4465_v60 = vperm.slane %v4457_v5, %v9139_v20 }
 0xc37   : > { %v4263_v19 = vsel %vm1191_vm7, %v4262_v10, %v10680_v17  ;;  %v4455_v33 = vsel %vm1191_vm7, %v4454_v24, %v10686_v30 }
 0xc38   : > { %v4269_v28 = vperm.slane %v4263_v19, %v9139_v20  ;;  %v4323_v63 = vsel %vm1191_vm7, %v4322_v50, %v4273_v42  ;;  %v4324_v49 = vrot.slane %v4273_v42, 4  ;;  %v4461_v16 = vperm.slane %v4455_v33, %v9139_v20 }
 0xc39   : > { %v4329_v47 = vperm.slane %v4323_v63, %v9161_v54  ;;  %v4532_v62 = vrot.slane %v10835_v29, 4  ;;  %v10853_v55 = vsel %vm1191_vm7, %v4634_v9, %v4627_v3  ;;  %v4515_v25 = vsel %vm1191_vm7, %v4514_v53, %v4465_v60 }
 0xc3a   : > { %v4311_v17 = vsel %vm1191_vm7, %v4310_v2, %v4269_v28  ;;  %v4312_v11 = vrot.slane %v4269_v28, 4  ;;  %v4325_v30 = vsel %vm1191_vm7, %v4285_v32, %v4324_v49  ;;  %v4504_v26 = vrot.slane %v4461_v16, 4 }
 0xc3b   : > { %v4333_v52 = vperm.slane %v4325_v30, %v9161_v54  ;;  %v4368_v14 = vrot.slane %v4329_v47, 4  ;;  %v4317_v2 = vperm.slane %v4311_v17, %v9161_v54  ;;  %v4367_v6 = vsel %vm1191_vm7, %v4366_v0, %v4329_v47 }
 0xc3c   : > { %v4313_v50 = vsel %vm1191_vm7, %v4281_v23, %v4312_v11  ;;  %v4676_v22 = vrot.slane %v4367_v6, 4  ;;  %v4516_v5 = vrot.slane %v4465_v60, 4  ;;  %v4505_v63 = vsel %vm1191_vm7, %v10785_v51, %v4504_v26 }
 0xc3d   : > { %v4321_v32 = vperm.slane %v4313_v50, %v9161_v54  ;;  %v4371_v8 = vsel %vm1191_vm7, %v4370_v46, %v4333_v52  ;;  %v4372_v41 = vrot.slane %v4333_v52, 4  ;;  %v4369_v0 = vsel %vm1191_vm7, %v10767_v56, %v4368_v14 }
 0xc3e   : > { %v4674_v10 = vrot.slane %v4371_v8, 4  ;;  %v4360_v57 = vrot.slane %v4317_v2, 4  ;;  %v10877_v56 = vsel %vm1191_vm7, %v4358_v35, %v4317_v2  ;;  %v4688_v33 = vrot.slane %v4369_v0, 4 }
 0xc3f   : > { %v10862_v23 = vsel %vm1191_vm7, %v4362_v21, %v4321_v32  ;;  %v4364_v34 = vrot.slane %v4321_v32, 4  ;;  %v4373_v24 = vsel %vm1191_vm7, %v10762_v36, %v4372_v41  ;;  %v4503_v36 = vsel %vm1191_vm7, %v4502_v40, %v4461_v16 }
 0xc40   : > { %v4650_v46 = vrot.slane %v10862_v23, 4  ;;  %v4675_v42 = vsel %vm1191_vm7, %v4674_v10, %v4367_v6  ;;  %v4686_v21 = vrot.slane %v4373_v24, 4  ;;  %v10891_v35 = vsel %vm1191_vm7, %v10759_v31, %v4360_v57 }
 0xc41   : > { %v10871_v53 = vsel %vm1191_vm7, %v10753_v59, %v4364_v34  ;;  %v4681_v7 = vperm.slane %v4675_v42, %v9139_v20  ;;  %v4677_v49 = vsel %vm1191_vm7, %v4371_v8, %v4676_v22  ;;  %v4513_v40 = vperm.slane %v4505_v63, %v9161_v54 }
 0xc42   : > { %v4662_v19 = vrot.slane %v10871_v53, 4  ;;  %v4651_v59 = vsel %vm1191_vm7, %v4650_v46, %v10877_v56  ;;  %v4687_v28 = vsel %vm1191_vm7, %v4686_v21, %v4369_v0  ;;  %v4509_v60 = vperm.slane %v4503_v36, %v9161_v54 }
 0xc43   : > { %v4693_v9 = vperm.slane %v4687_v28, %v9139_v20  ;;  %v4517_v17 = vsel %vm1191_vm7, %v10790_v13, %v4516_v5  ;;  %v4521_v51 = vperm.slane %v4515_v25, %v9161_v54  ;;  %v4652_v11 = vrot.slane %v10877_v56, 4 }
 0xc44   : > { %v4663_v47 = vsel %vm1191_vm7, %v4662_v19, %v10891_v35  ;;  %v10904_v31 = vperm.slane %v4651_v59, %v9139_v20  ;;  %v4525_v30 = vperm.slane %v4517_v17, %v9161_v54  ;;  %v4874_v16 = vrot.slane %v10853_v55, 4 }
 0xc45   : > { %v4664_v3 = vrot.slane %v10891_v35, 4  ;;  %v10910_v52 = vperm.slane %v4677_v49, %v9139_v20  ;;  %v4689_v14 = vsel %vm1191_vm7, %v4373_v24, %v4688_v33  ;;  %v4724_v50 = vrot.slane %v4681_v7, 4 }
 0xc46   : > { %v10914_v13 = vperm.slane %v4663_v47, %v9139_v20  ;;  %v4722_v2 = vrot.slane %v4693_v9, 4  ;;  %v10917_v32 = vsel %vm1191_vm7, %v4513_v40, %v4532_v62  ;;  %v4534_v6 = vrot.slane %v4521_v51, 4 }
 0xc47   : > { %v4526_v8 = vrot.slane %v4509_v60, 4  ;;  %v4537_v41 = vsel %vm1191_vm7, %v4521_v51, %v4536_v27  ;;  %v4538_v26 = vrot.slane %v4525_v30, 4  ;;  %v4541_v25 = vsel %vm1191_vm7, %v4525_v30, %v4540_v45 }
 0xc48   : > { %v10922_v34 = vperm.slane %v4689_v14, %v9139_v20  ;;  %v4700_v0 = vrot.slane %v10904_v31, 4  ;;  %v4535_v10 = vsel %vm1191_vm7, %v4534_v6, %v10815_v58  ;;  %v4774_v57 = vrot.slane %v10917_v32, 4 }
 0xc49   : > { %v10929_v62 = vsel %vm1191_vm7, %v4509_v60, %v4528_v12  ;;  %v4539_v24 = vsel %vm1191_vm7, %v4538_v26, %v10825_v48  ;;  %v4798_v27 = vrot.slane %v4541_v25, 4  ;;  %v4800_v46 = vrot.slane %v4537_v41, 4 }
 0xc4a   : > { %v4723_v45 = vsel %vm1191_vm7, %v4722_v2, %v4681_v7  ;;  %v4725_v22 = vsel %vm1191_vm7, %v4693_v9, %v4724_v50  ;;  %v4775_v42 = vsel %vm1191_vm7, %v4774_v57, %v10929_v62  ;;  %v4786_v21 = vrot.slane %v4539_v24, 4 }
 0xc4b   : > { %v4698_v58 = vrot.slane %v10914_v13, 4  ;;  %v4527_v5 = vsel %vm1191_vm7, %v4526_v8, %v10822_v18  ;;  %v4788_v12 = vrot.slane %v4535_v10, 4  ;;  %v4799_v56 = vsel %vm1191_vm7, %v4798_v27, %v4537_v41 }
 0xc4c   : > { %v4530_v19 = vrot.slane %v4513_v40, 4  ;;  %v10942_v48 = vperm.slane %v4775_v42, %v9139_v20  ;;  %v4787_v33 = vsel %vm1191_vm7, %v4786_v21, %v4535_v10  ;;  %v4805_v36 = vperm.slane %v4799_v56, %v9139_v20 }
 0xc4d   : > { %v10947_v59 = vperm.slane %v4723_v45, %v9161_v54  ;;  %v10950_v7 = vperm.slane %v4725_v22, %v9161_v54  ;;  %v4793_v28 = vperm.slane %v4787_v33, %v9139_v20  ;;  %v4801_v18 = vsel %vm1191_vm7, %v4541_v25, %v4800_v46 }
 0xc4e   : > { %v4764_v63 = vrot.slane %v4527_v5, 4  ;;  %v4776_v35 = vrot.slane %v10929_v62, 4  ;;  %v4834_v49 = vrot.slane %v4805_v36, 4  ;;  %v4875_v9 = vsel %vm1191_vm7, 0.0, %v4874_v16 }
 0xc4f   : > { %v4789_v40 = vsel %vm1191_vm7, %v4539_v24, %v4788_v12  ;;  %v4836_v47 = vrot.slane %v4793_v28, 4  ;;  %v4883_v60 = vperm.slane %v4875_v9, %v9139_v20  ;;  %v4653_v17 = vsel %vm1191_vm7, %v10862_v23, %v4652_v11 }
 0xc50   : > { %v10961_v51 = vperm.slane %v4801_v18, %v9139_v20  ;;  %v4810_v30 = vrot.slane %v10942_v48, 4  ;;  %v10965_v14 = vsel %vm1191_vm7, %v4834_v49, %v4793_v28  ;;  %v4531_v50 = vsel %vm1191_vm7, %v4530_v19, %v10835_v29 }
 0xc51   : > { %v4837_v16 = vsel %vm1191_vm7, %v4805_v36, %v4836_v47  ;;  %v4899_v2 = vperm.slane %v4883_v60, %v9161_v54  ;;  %v4894_v6 = vrot.slane %v4883_v60, 4  ;;  %v4665_v8 = vsel %vm1191_vm7, %v10871_v53, %v4664_v3 }
 0xc52   : > { %v10974_v23 = vperm.slane %v4837_v16, %v9161_v54  ;;  %v4661_v11 = vperm.slane %v4653_v17, %v9139_v20  ;;  %v4673_v41 = vperm.slane %v4665_v8, %v9139_v20  ;;  %v4734_v26 = vrot.slane %v10922_v34, 4 }
 0xc53   : > { %v5068_v25 = vpack.c.bf16 %v4899_v2, %v4899_v2  ;;  %v4908_v10 = vrot.slane %v4899_v2, 4  ;;  %v4895_v29 = vsel %vm1191_vm7, 0.0, %v4894_v6  ;;  %v4762_v57 = vrot.slane %v4531_v50, 4 }
 0xc54   : > { %v4862_v62 = vrot.slane %v10974_v23, 4  ;;  %v4903_v24 = vperm.slane %v4895_v29, %v9161_v54  ;;  %v4710_v27 = vrot.slane %v4673_v41, 4  ;;  %v4735_v53 = vsel %vm1191_vm7, %v4734_v26, %v10910_v52 }
 0xc55   : > { %v5103_v3 = vunpack.c.l.b16 %v5068_v25  ;;  %v4909_v46 = vsel %vm1191_vm7, 0.0, %v4908_v10  ;;  %v4741_v45 = vperm.slane %v4735_v53, %v9161_v54  ;;  %v10987_v22 = vsel %vm1191_vm7, %v4762_v57, %v4527_v5 }
 0xc56   : > { %v5071_v42 = vpack.c.bf16 %v4909_v46, %v4909_v46  ;;  %v5074_v21 = vpack.c.bf16 %v4903_v24, %v4903_v24  ;;  %v4910_v12 = vrot.slane %v4903_v24, 4  ;;  %v4711_v56 = vsel %vm1191_vm7, %v4710_v27, %v4661_v11 }
 0xc57   : > { %v5105_v19 = vpack.c.b16 %v5103_v3, %v5103_v3  ;;  %v4717_v33 = vperm.slane %v4711_v56, %v9161_v54  ;;  %v4754_v36 = vrot.slane %v4741_v45, 4  ;;  %v4765_v28 = vsel %vm1191_vm7, %v4531_v50, %v4764_v63 }
 0xc58   : > { %v5149_v18 = vunpack.c.l.b16 %v5071_v42  ;;  %v5195_v49 = vunpack.c.l.b16 %v5074_v21  ;;  %v4911_v9 = vsel %vm1191_vm7, 0.0, %v4910_v12  ;;  %v4773_v47 = vperm.slane %v4765_v28, %v9139_v20 }
 0xc59   : > { %v5116_v5 = vsel %vm2035_vm8, %v5105_v19, 0  ;;  %v5077_v60 = vpack.c.bf16 %v4911_v9, %v4911_v9  ;;  %v4755_v17 = vsel %vm1191_vm7, %v4754_v36, %v4717_v33  ;;  %v4777_v16 = vsel %vm1191_vm7, %v10917_v32, %v4776_v35 }
 0xc5a   : > { %5124 = vmatpush.bf16.xpose.msra.mxu1 %v5116_v5  ;;  %v5151_v2 = vpack.c.b16 %v5149_v18, %v5149_v18  ;;  %v5197_v6 = vpack.c.b16 %v5195_v49, %v5195_v49  ;;  %v4785_v8 = vperm.slane %v4777_v16, %v9139_v20  ;;  %v4797_v63 = vperm.slane %v4789_v40, %v9139_v20 }
 0xc5b   : > { %v5241_v50 = vunpack.c.l.b16 %v5077_v60  ;;  %v4846_v26 = vrot.slane %v10961_v51, 4  ;;  %v5066_v25 = vpack.c.bf16 %v4755_v17, %v4755_v17  ;;  %v4712_v10 = vrot.slane %v4661_v11, 4 }
 0xc5c   : > { %v5162_v29 = vsel %vm2035_vm8, %v5151_v2, 0  ;;  %v5208_v57 = vsel %vm2035_vm8, %v5197_v6, 0  ;;  %v4822_v24 = vrot.slane %v4785_v8, 4  ;;  %v4736_v27 = vrot.slane %v10910_v52, 4 }
 0xc5d   : > { %5170 = vmatpush.bf16.xpose.msra.mxu2 %v5162_v29  ;;  %5216 = vmatpush.bf16.xpose.msra.mxu3 %v5208_v57  ;;  %v5243_v32 = vpack.c.b16 %v5241_v50, %v5241_v50  ;;  %v4847_v35 = vsel %vm1191_vm7, %v4846_v26, %v4797_v63  ;;  %v5101_v53 = vunpack.c.l.b16 %v5066_v25  ;;  %v4713_v40 = vsel %vm1191_vm7, %v4673_v41, %v4712_v10 }
 0xc5e   : > { %v4823_v3 = vsel %vm1191_vm7, %v4822_v24, %v4773_v47  ;;  %v4853_v46 = vperm.slane %v4847_v35, %v9161_v54  ;;  %v4721_v11 = vperm.slane %v4713_v40, %v9161_v54  ;;  %v4737_v42 = vsel %vm1191_vm7, %v10922_v34, %v4736_v27 }
 0xc5f   : > { %v5254_v21 = vsel %vm2035_vm8, %v5243_v32, 0  ;;  %v4829_v52 = vperm.slane %v4823_v3, %v9161_v54  ;;  %v4745_v12 = vperm.slane %v4737_v42, %v9161_v54  ;;  %v4824_v56 = vrot.slane %v4773_v47, 4 }
 0xc60   : > { %5262 = vmatpush.bf16.xpose.msrb.mxu0 %v5254_v21  ;;  %v4866_v19 = vrot.slane %v4853_v46, 4  ;;  %v4848_v36 = vrot.slane %v4797_v63, 4  ;;  %v4756_v41 = vrot.slane %v4717_v33, 4  ;;  %v4760_v28 = vrot.slane %v4721_v11, 4 }
 0xc61   : > { %v4758_v18 = vrot.slane %v4745_v12, 4  ;;  %v4825_v49 = vsel %vm1191_vm7, %v4785_v8, %v4824_v56  ;;  %v4868_v9 = vrot.slane %v4829_v52, 4  ;;  %v4699_v34 = vsel %vm1191_vm7, %v4698_v58, %v10904_v31 }
 0xc62   : > { %v4867_v5 = vsel %vm1191_vm7, %v4866_v19, %v4829_v52  ;;  %v4833_v60 = vperm.slane %v4825_v49, %v9161_v54  ;;  %v4849_v47 = vsel %vm1191_vm7, %v10961_v51, %v4848_v36  ;;  %v4757_v17 = vsel %vm1191_vm7, %v4741_v45, %v4756_v41 }
 0xc63   : > { %v5067_v33 = vpack.c.bf16 %v4867_v5, %v4867_v5  ;;  %v4759_v16 = vsel %vm1191_vm7, %v4758_v18, %v4721_v11  ;;  %v4857_v2 = vperm.slane %v4849_v47, %v9161_v54  ;;  %v4869_v6 = vsel %vm1191_vm7, %v4853_v46, %v4868_v9 }
 0xc64   : > { %v5072_v8 = vpack.c.bf16 %v4759_v16, %v4759_v16  ;;  %v5069_v63 = vpack.c.bf16 %v4757_v17, %v4757_v17  ;;  %v5070_v50 = vpack.c.bf16 %v4869_v6, %v4869_v6  ;;  %v4761_v58 = vsel %vm1191_vm7, %v4745_v12, %v4760_v28 }
 0xc65   : > { %v5102_v26 = vunpack.c.l.b16 %v5067_v33  ;;  %v4870_v25 = vrot.slane %v4857_v2, 4  ;;  %v4872_v10 = vrot.slane %v4833_v60, 4  ;;  %v5075_v29 = vpack.c.bf16 %v4761_v58, %v4761_v58 }
 0xc66   : > { %v5193_v57 = vunpack.c.l.b16 %v5072_v8  ;;  %v5147_v51 = vunpack.c.l.b16 %v5069_v63  ;;  %v5148_v24 = vunpack.c.l.b16 %v5070_v50  ;;  %v4705_v45 = vperm.slane %v4699_v34, %v9161_v54 }
 0xc67   : > { %v5104_v27 = vpack.c.b16 %v5102_v26, %v5101_v53  ;;  %v4871_v32 = vsel %vm1191_vm7, %v4870_v25, %v4833_v60  ;;  %v4873_v35 = vsel %vm1191_vm7, %v4857_v2, %v4872_v10  ;;  %v5239_v40 = vunpack.c.l.b16 %v5075_v29 }
 0xc68   : > { %v5073_v3 = vpack.c.bf16 %v4871_v32, %v4871_v32  ;;  %v5150_v46 = vpack.c.b16 %v5148_v24, %v5147_v51  ;;  %v5076_v11 = vpack.c.bf16 %v4873_v35, %v4873_v35  ;;  %v4746_v42 = vrot.slane %v10947_v59, 4 }
 0xc69   : > { %v5113_v21 = vsel %vm2035_vm8, %v5104_v27, 0  ;;  %v4748_v52 = vrot.slane %v4705_v45, 4  ;;  %v4769_v12 = vperm.slane %v10987_v22, %v9139_v20  ;;  %v4841_v56 = vperm.slane %v10965_v14, %v9161_v54 }
 0xc6a   : > { %5125 = vmatpush.bf16.xpose.msra.mxu1 %v5113_v21  ;;  %v5194_v53 = vunpack.c.l.b16 %v5073_v3  ;;  %v5159_v19 = vsel %vm2035_vm8, %v5150_v46, 0  ;;  %v5240_v36 = vunpack.c.l.b16 %v5076_v11  ;;  %v4747_v41 = vsel %vm1191_vm7, %v4746_v42, %v4705_v45 }
 0xc6b   : > { %5171 = vmatpush.bf16.xpose.msra.mxu2 %v5159_v19  ;;  %v4811_v28 = vsel %vm1191_vm7, %v4810_v30, %v4769_v12  ;;  %v4812_v18 = vrot.slane %v4769_v12, 4  ;;  %v4858_v49 = vrot.slane %v4841_v56, 4  ;;  %v5042_v9 = vmul.f32 0.17677669, %v4747_v41 }
 0xc6c   : > { %v5196_v34 = vpack.c.b16 %v5194_v53, %v5193_v57  ;;  %v5242_v22 = vpack.c.b16 %v5240_v36, %v5239_v40  ;;  %v4817_v5 = vperm.slane %v4811_v28, %v9161_v54  ;;  %v4701_v14 = vsel %vm1191_vm7, %v10914_v13, %v4700_v0 }
 0xc6d   : > { %v5054_v60 = vpack.c.bf16 %v5042_v9, %v5042_v9  ;;  %v4709_v47 = vperm.slane %v4701_v14, %v9161_v54  ;;  %v4750_v17 = vrot.slane %v10950_v7, 4  ;;  %v4813_v30 = vsel %vm1191_vm7, %v10942_v48, %v4812_v18 }
 0xc6e   : > { %v5205_v33 = vsel %vm2035_vm8, %v5196_v34, 0  ;;  %v5251_v16 = vsel %vm2035_vm8, %v5242_v22, 0  ;;  %v4859_v2 = vsel %vm1191_vm7, %v4858_v49, %v4817_v5  ;;  %v4860_v6 = vrot.slane %v4817_v5, 4 }
 0xc6f   : > { %5217 = vmatpush.bf16.xpose.msra.mxu3 %v5205_v33  ;;  %5263 = vmatpush.bf16.xpose.msrb.mxu0 %v5251_v16  ;;  %v5043_v31 = vmul.f32 0.17677669, %v4859_v2  ;;  %v5093_v8 = vunpack.c.l.b16 %v5054_v60  ;;  %v4751_v13 = vsel %vm1191_vm7, %v4750_v17, %v4709_v47  ;;  %v4821_v0 = vperm.slane %v4813_v30, %v9161_v54 }
 0xc70   : > { %v5048_v63 = vmul.f32 0.17677669, %v4751_v13  ;;  %v4749_v50 = vsel %vm1191_vm7, %v10947_v59, %v4748_v52  ;;  %v4861_v48 = vsel %vm1191_vm7, %v4841_v56, %v4860_v6  ;;  %v4752_v58 = vrot.slane %v4709_v47, 4 }
 0xc71   : > { %v5055_v26 = vpack.c.bf16 %v5043_v31, %v5043_v31  ;;  %v4863_v25 = vsel %vm1191_vm7, %v4862_v62, %v4821_v0  ;;  %v5045_v10 = vmul.f32 0.17677669, %v4749_v50  ;;  %v5046_v29 = vmul.f32 0.17677669, %v4861_v48 }
 0xc72   : > { %v5049_v57 = vmul.f32 0.17677669, %v4863_v25  ;;  %v5060_v51 = vpack.c.bf16 %v5048_v63, %v5048_v63  ;;  %v4753_v24 = vsel %vm1191_vm7, %v10950_v7, %v4752_v58  ;;  %v4864_v45 = vrot.slane %v4821_v0, 4 }
 0xc73   : > { %v5094_v27 = vunpack.c.l.b16 %v5055_v26  ;;  %v5057_v32 = vpack.c.bf16 %v5045_v10, %v5045_v10  ;;  %v5058_v35 = vpack.c.bf16 %v5046_v29, %v5046_v29  ;;  %v5051_v59 = vmul.f32 0.17677669, %v4753_v24 }
 0xc74   : > { %v5061_v40 = vpack.c.bf16 %v5049_v57, %v5049_v57  ;;  %v5185_v3 = vunpack.c.l.b16 %v5060_v51  ;;  %v4865_v46 = vsel %vm1191_vm7, %v10974_v23, %v4864_v45  ;;  %v4879_v62 = vperm.slane %v10853_v55, %v9139_v20 }
 0xc75   : > { %v5096_v11 = vpack.c.b16 %v5094_v27, %v5093_v8  ;;  %v5139_v42 = vunpack.c.l.b16 %v5057_v32  ;;  %v5140_v21 = vunpack.c.l.b16 %v5058_v35  ;;  %v5052_v52 = vmul.f32 0.17677669, %v4865_v46 }
 0xc76   : > { %v5186_v12 = vunpack.c.l.b16 %v5061_v40  ;;  %v5063_v56 = vpack.c.bf16 %v5051_v59, %v5051_v59  ;;  %v4889_v7 = vperm.slane %v4879_v62, %v9161_v54  ;;  %v4884_v53 = vrot.slane %v4879_v62, 4 }
 0xc77   : > { %7615 = vmatmul.msk.bf16.vlgmr.msra.gmra.mxu1 %vm2035_vm8, %v5096_v11  ;;  %v5142_v19 = vpack.c.b16 %v5140_v21, %v5139_v42  ;;  %v5064_v36 = vpack.c.bf16 %v5052_v52, %v5052_v52 }
 0xc78   : > { %v5188_v41 = vpack.c.b16 %v5186_v12, %v5185_v3  ;;  %v5231_v28 = vunpack.c.l.b16 %v5063_v56  ;;  %v4885_v23 = vsel %vm1191_vm7, 0.0, %v4884_v53  ;;  %v5044_v18 = vmul.f32 0.17677669, %v4889_v7 }
 0xc79   : > { %7617 = vmatmul.msk.bf16.vlgmr.msra.gmra.mxu2 %vm2035_vm8, %v5142_v19  ;;  %v5232_v55 = vunpack.c.l.b16 %v5064_v36  ;;  %v4893_v49 = vperm.slane %v4885_v23, %v9161_v54  ;;  %v4904_v9 = vrot.slane %v4889_v7, 4 }
 0xc7a   : > { %7619 = vmatmul.msk.bf16.vlgmr.msra.gmra.mxu3 %vm2035_vm8, %v5188_v41  ;;  %v5056_v47 = vpack.c.bf16 %v5044_v18, %v5044_v18  ;;  %v11122_v41 = vpop.permute.xlu2 %8338 }
 0xc7b   : > { %v5234_v34 = vpack.c.b16 %v5232_v55, %v5231_v28  ;;  %v4905_v22 = vsel %vm1191_vm7, 0.0, %v4904_v9  ;;  %v4906_v5 = vrot.slane %v4893_v49, 4  ;;  %v5050_v14 = vmul.f32 0.17677669, %v4893_v49 }
 0xc7c   : > { %v5047_v60 = vmul.f32 0.17677669, %v4905_v22  ;;  %v5095_v2 = vunpack.c.l.b16 %v5056_v47 }
 0xc7d   : > { %7621 = vmatmul.msk.bf16.vlgmr.msrb.gmra.mxu0 %vm2035_vm8, %v5234_v34  ;;  %v4907_v17 = vsel %vm1191_vm7, 0.0, %v4906_v5  ;;  %v5062_v16 = vpack.c.bf16 %v5050_v14, %v5050_v14 }
 0xc7e   : > { %v5059_v30 = vpack.c.bf16 %v5047_v60, %v5047_v60  ;;  %v5053_v33 = vmul.f32 0.17677669, %v4907_v17  ;;  %v5097_v13 = vpack.c.b16 %v5095_v2, %v5095_v2 }
 0xc7f   : > { %v5187_v8 = vunpack.c.l.b16 %v5062_v16 }
 0xc80   : > { %v5141_v6 = vunpack.c.l.b16 %v5059_v30  ;;  %v5065_v31 = vpack.c.bf16 %v5053_v33, %v5053_v33 }
 0xc81   : > { %v5189_v50 = vpack.c.b16 %v5187_v8, %v5187_v8 }
 0xc82   : > { %v5143_v0 = vpack.c.b16 %v5141_v6, %v5141_v6  ;;  %v5233_v63 = vunpack.c.l.b16 %v5065_v31 }
 0xc84   : > { %v5235_v48 = vpack.c.b16 %v5233_v63, %v5233_v63 }
 0xc87   : > { %7616 = vmatmul.msk.bf16.gmra.mxu1 %vm2035_vm8, %v5097_v13 }
 0xc89   : > { %7618 = vmatmul.msk.bf16.gmra.mxu2 %vm2035_vm8, %v5143_v0 }
 0xc8a   : > { %7620 = vmatmul.msk.bf16.gmra.mxu3 %vm2035_vm8, %v5189_v50 }
 0xc8d   : > { %7622 = vmatmul.msk.bf16.gmra.mxu0 %vm2035_vm8, %v5235_v48 }
 0xcf4   : > { %v5127_v58 = vpop.f32.mrf.mxu1 }
 0xcf5   : > { %v5274_v26 = vsel %vm2204_vm9, %v5127_v58, -inf }
 0xcf6   : > { %5275 = vmax.xlane.f32.xlu1 %v5274_v26  ;;  %v8340_v26 = vunpack.i.l.bf16 %v11122_v41 }
 0xcfa   : > { %v11082_v25 = vpop.f32.mrf.mxu0 }
 0xcfb   : > { %v5301_v10 = vsel %vm2204_vm9, %v11082_v25, -inf }
 0xcfc   : > { %5302 = vmax.xlane.f32.xlu0 %v5301_v10  ;;  %v11086_v29 = vpop.f32.mrf.mxu1  ;;  %v5173_v57 = vpop.f32.mrf.mxu2 }
 0xcfd   : > { %v5219_v51 = vpop.f32.mrf.mxu3  ;;  %v5277_v24 = vsel %vm2204_vm9, %v11086_v29, -inf  ;;  %v5283_v3 = vsel %vm2204_vm9, %v5173_v57, -inf }
 0xcfe   : > { %5278 = vmax.xlane.f32.xlu2 %v5277_v24  ;;  %v5292_v27 = vsel %vm2204_vm9, %v5219_v51, -inf }
 0xd02   : > { %v5267_v45 = vpop.f32.mrf.mxu0 }
 0xd03   : > { %v5304_v32 = vsel %vm2204_vm9, %v5267_v45, -inf }
 0xd04   : > { %5293 = vmax.xlane.f32.xlu0 %v5292_v27  ;;  %5305 = vmax.xlane.f32.xlu1 %v5304_v32  ;;  %v11092_v35 = vpop.f32.mrf.mxu1  ;;  %v11094_v59 = vpop.f32.mrf.mxu2 }
 0xd05   : > { %v5221_v40 = vpop.f32.mrf.mxu3  ;;  %v5286_v7 = vsel %vm2204_vm9, %v11094_v59, -inf  ;;  %v5280_v53 = vsel %vm2211_vm10, %v11092_v35, -inf }
 0xd06   : > { %5284 = vmax.xlane.f32.xlu2 %v5283_v3  ;;  %v5295_v62 = vsel %vm2204_vm9, %v5221_v40, -inf }
 0xd0a   : > { %v11097_v46 = vpop.f32.mrf.mxu0 }
 0xd0b   : > { %v5307_v31 = vsel %vm2211_vm10, %v11097_v46, -inf }
 0xd0c   : > { %5296 = vmax.xlane.f32.xlu1 %v5295_v62  ;;  %v5134_v11 = vpop.f32.mrf.mxu1  ;;  %v11100_v42 = vpop.f32.mrf.mxu2 }
 0xd0d   : > { %v11102_v21 = vpop.f32.mrf.mxu3  ;;  %v5289_v36 = vsel %vm2211_vm10, %v11100_v42, -inf }
 0xd0e   : > { %v5298_v19 = vsel %vm2211_vm10, %v11102_v21, -inf }
 0xd12   : > { %v5272_v52 = vpop.f32.mrf.mxu0 }
 0xd14   : > { %v5180_v12 = vpop.f32.mrf.mxu2 }
 0xd15   : > { %v5226_v56 = vpop.f32.mrf.mxu3 }
 0xd18   : > { %4239 = vrot.lane.b32.xlu0 %v10725_v4, %s8670_s29 }
 0xd1e   : > { %4248 = vrot.lane.b32.xlu2 %v10725_v4, %s12189_s25 }
 0xd25   : > { %8348 = vrot.lane.b32.xlu1 %v10731_v44, %s12189_s25  ;;  %v11120_v44 = vpop.permute.xlu0 %8343 }
 0xd42   : > { %5287 = vmax.xlane.f32.xlu0 %v5286_v7 }
 0xd47   : > { %5281 = vmax.xlane.f32.xlu2 %v5280_v53 }
 0xd4f   : > { %5299 = vmax.xlane.f32.xlu1 %v5298_v19  ;;  %5290 = vmax.xlane.f32.xlu2 %v5289_v36 }
 0xd56   : > { %4255 = vrot.lane.b32.xlu0 %v10723_v37, %s8672_s27 }
 0xd69   : > { %v5276_v28 = vpop.xlane.xlu1 %5275 }
 0xd6a   : > { %v5310_v23 = vsub.f32 %v5127_v58, %v5276_v28 }
 0xd6c   : > { %v5322_v55 = vmul.f32 1.442695, %v5310_v23 }
 0xd6e   : > { %8503 = vpow2.f32 %v5322_v55 }
 0xd6f   : > { %v11124_v18 = vpop.xlane.xlu0 %5302 }
 0xd71   : > { %v5279_v49 = vpop.xlane.xlu2 %5278 }
 0xd72   : > { %v5311_v16 = vsub.f32 %v11086_v29, %v5279_v49 }
 0xd74   : > { %v11126_v9 = vpop.eup %8503  ;;  %v5324_v0 = vmul.f32 1.442695, %v5311_v16 }
 0xd75   : > { %v5346_v34 = vsel %vm2204_vm9, %v11126_v9, 0.0 }
 0xd76   : > { %5347 = vadd.xlane.f32.xlu2 %v5346_v34 }
 0xd77   : > { %v5294_v22 = vpop.xlane.xlu0 %5293  ;;  %v5306_v5 = vpop.xlane.xlu1 %5305 }
 0xd78   : > { %v5316_v14 = vsub.f32 %v5219_v51, %v5294_v22  ;;  %v5320_v17 = vsub.f32 %v5267_v45, %v5306_v5  ;;  %v4642_v51 = vrot.slane %v8340_v26, 4 }
 0xd79   : > { %v5285_v60 = vpop.xlane.xlu2 %5284 }
 0xd7a   : > { %v5334_v47 = vmul.f32 1.442695, %v5316_v14  ;;  %v5313_v30 = vsub.f32 %v5173_v57, %v5285_v60  ;;  %v5342_v2 = vmul.f32 1.442695, %v5320_v17 }
 0xd7c   : > { %8505 = vpow2.f32 %v5334_v47  ;;  %v5328_v33 = vmul.f32 1.442695, %v5313_v30 }
 0xd7e   : > { %8507 = vpow2.f32 %v5328_v33 }
 0xd7f   : > { %v5297_v6 = vpop.xlane.xlu1 %5296  ;;  %8509 = vpow2.f32 %v5342_v2 }
 0xd80   : > { %v5317_v8 = vsub.f32 %v5221_v40, %v5297_v6  ;;  %5308 = vmax.xlane.f32.xlu0 %v5307_v31 }
 0xd81   : > { %v4249_v58 = vpop.permute.xlu2 %4248 }
 0xd82   : > { %v11133_v13 = vpop.eup %8505  ;;  %v5336_v63 = vmul.f32 1.442695, %v5317_v8  ;;  %v4636_v29 = vrot.slane %v4249_v58, 4 }
 0xd83   : > { %v5364_v50 = vsel %vm2204_vm9, %v11133_v13, 0.0 }
 0xd84   : > { %v11137_v48 = vpop.eup %8507  ;;  %8511 = vpow2.f32 %v5336_v63  ;;  %5365 = vadd.xlane.f32.xlu2 %v5364_v50  ;;  %v4637_v27 = vsel %vm1191_vm7, %v4636_v29, %v10725_v4  ;;  %v8345_v63 = vunpack.i.l.bf16 %v11120_v44  ;;  %v4376_v50 = vrot.slane %v10727_v39, 4 }
 0xd85   : > { %v5355_v10 = vsel %vm2204_vm9, %v11137_v48, 0.0  ;;  %8513 = vpow2.f32 %v5324_v0  ;;  %v11142_v57 = vpop.eup %8509  ;;  %v4641_v52 = vperm.slane %v4637_v27, %v9139_v20 }
 0xd86   : > { %v5376_v3 = vsel %vm2204_vm9, %v11142_v57, 0.0 }
 0xd88   : > { %5356 = vadd.xlane.f32.xlu0 %v5355_v10 }
 0xd8a   : > { %v11144_v24 = vpop.eup %8511  ;;  %v4240_v45 = vpop.permute.xlu0 %4239 }
 0xd8b   : > { %v4643_v32 = vsel %vm1191_vm7, %v4642_v51, %v4240_v45  ;;  %v5367_v40 = vsel %vm2204_vm9, %v11144_v24, 0.0  ;;  %v11153_v62 = vpop.eup %8513  ;;  %v8341_v51 = vunpack.i.h.bf16 %v11122_v41 }
 0xd8c   : > { %v4647_v11 = vperm.slane %v4643_v32, %v9139_v20  ;;  %5368 = vadd.xlane.f32.xlu1 %v5367_v40  ;;  %5377 = vadd.xlane.f32.xlu2 %v5376_v3  ;;  %v5349_v4 = vsel %vm2204_vm9, %v11153_v62, 0.0  ;;  %v4388_v32 = vrot.slane %v8345_v63, 4 }
 0xd8e   : > { %v4648_v12 = vrot.slane %v4647_v11, 4 }
 0xd90   : > { %v4649_v56 = vsel %vm1191_vm7, %v4648_v12, %v4641_v52  ;;  %5350 = vadd.xlane.f32.xlu0 %v5349_v4  ;;  %v4386_v52 = vrot.slane %v8341_v51, 4  ;;  %v4389_v4 = vsel %vm1191_vm7, %v8341_v51, %v4388_v32 }
 0xd91   : > { %v5023_v7 = vperm.slane %v4649_v56, %v9161_v54 }
 0xd92   : > { %v4387_v56 = vsel %vm1191_vm7, %v4386_v52, %v8345_v63 }
 0xd93   : > { %v5027_v53 = vperm.slane %v5023_v7, %v9139_v20 }
 0xd95   : > { %v5028_v19 = vrot.slane %v5027_v53, 4  ;;  %v5033_v36 = vperm.slane %v5027_v53, %v9161_v54  ;;  %v4393_v53 = vperm.slane %v4387_v56, %v9139_v20 }
 0xd97   : > { %v5080_v28 = vpack.c.bf16 %v5033_v36, %v5033_v36  ;;  %v5038_v23 = vrot.slane %v5033_v36, 4  ;;  %v5029_v55 = vsel %vm1191_vm7, 0.0, %v5028_v19  ;;  %v11166_v5 = vpop.permute.xlu1 %8348 }
 0xd98   : > { %v5037_v49 = vperm.slane %v5029_v55, %v9161_v54  ;;  %v8350_v17 = vunpack.i.l.bf16 %v11166_v5  ;;  %v4398_v55 = vrot.slane %v4393_v53, 4 }
 0xd99   : > { %v5431_v34 = vunpack.c.l.b16 %v5080_v28  ;;  %v5039_v22 = vsel %vm1191_vm7, 0.0, %v5038_v23 }
 0xd9a   : > { %v5083_v60 = vpack.c.bf16 %v5039_v22, %v5039_v22  ;;  %v5086_v47 = vpack.c.bf16 %v5037_v49, %v5037_v49  ;;  %v5040_v30 = vrot.slane %v5037_v49, 4  ;;  %v4374_v31 = vrot.slane %v8350_v17, 4 }
 0xd9b   : > { %v5433_v14 = vpack.c.b16 %v5431_v34, %v5431_v34  ;;  %v4377_v29 = vsel %vm1191_vm7, %v8350_v17, %v4376_v50 }
 0xd9c   : > { %v5475_v16 = vunpack.c.l.b16 %v5083_v60  ;;  %v5519_v2 = vunpack.c.l.b16 %v5086_v47  ;;  %v5041_v0 = vsel %vm1191_vm7, 0.0, %v5040_v30  ;;  %v4375_v45 = vsel %vm1191_vm7, %v4374_v31, %v10727_v39 }
 0xd9d   : > { %v5442_v33 = vand.u32 %v5433_v14, %v9686_v15  ;;  %v5089_v10 = vpack.c.bf16 %v5041_v0, %v5041_v0  ;;  %v4385_v40 = vperm.slane %v4377_v29, %v9139_v20  ;;  %v4381_v11 = vperm.slane %v4375_v45, %v9139_v20 }
 0xd9e   : > { %v5477_v6 = vpack.c.b16 %v5475_v16, %v5475_v16  ;;  %v5521_v8 = vpack.c.b16 %v5519_v2, %v5519_v2  ;;  %v4397_v39 = vperm.slane %v4389_v4, %v9139_v20  ;;  %v5319_v47 = vsub.f32 %v11082_v25, %v11124_v18 }
 0xd9f   : > { %5450 = vmatpush.bf16.msrb.mxu1 %v5442_v33  ;;  %v5563_v27 = vunpack.c.l.b16 %v5089_v10  ;;  %v4412_v7 = vrot.slane %v4385_v40, 4  ;;  %v4400_v41 = vrot.slane %v4381_v11, 4  ;;  %v4399_v22 = vsel %vm1191_vm7, %v4398_v55, %v4381_v11 }
 0xda0   : > { %v5486_v58 = vand.u32 %v5477_v6, %v9686_v15  ;;  %v5530_v26 = vand.u32 %v5521_v8, %v9686_v15  ;;  %v4410_v23 = vrot.slane %v4397_v39, 4  ;;  %v4405_v16 = vperm.slane %v4399_v22, %v9161_v54 }
 0xda1   : > { %v5565_v3 = vpack.c.b16 %v5563_v27, %v5563_v27  ;;  %v4413_v19 = vsel %vm1191_vm7, %v4397_v39, %v4412_v7  ;;  %v4401_v36 = vsel %vm1191_vm7, %v4393_v53, %v4400_v41  ;;  %v5340_v31 = vmul.f32 1.442695, %v5319_v47 }
 0xda2   : > { %5494 = vmatpush.bf16.msrb.mxu2 %v5486_v58  ;;  %5538 = vmatpush.bf16.msrb.mxu3 %v5530_v26  ;;  %v4421_v28 = vperm.slane %v4413_v19, %v9161_v54  ;;  %v4411_v49 = vsel %vm1191_vm7, %v4410_v23, %v4385_v40  ;;  %v8351_v0 = vunpack.i.h.bf16 %v11166_v5  ;;  %v4544_v45 = vrot.slane %v10723_v37, 4 }
 0xda3   : > { %v5574_v12 = vand.u32 %v5565_v3, %v9686_v15  ;;  %v4409_v15 = vperm.slane %v4401_v36, %v9161_v54  ;;  %v4417_v30 = vperm.slane %v4411_v49, %v9161_v54 }
 0xda4   : > { %v4428_v14 = vrot.slane %v4421_v28, 4  ;;  %v4542_v10 = vrot.slane %v8351_v0, 4  ;;  %v4545_v4 = vsel %vm1191_vm7, %v8351_v0, %v4544_v45 }
 0xda5   : > { %5582 = vmatpush.bf16.msra.mxu0 %v5574_v12  ;;  %v4424_v17 = vrot.slane %v4409_v15, 4  ;;  %v4426_v63 = vrot.slane %v4417_v30, 4  ;;  %v8346_v12 = vunpack.i.h.bf16 %v11120_v44  ;;  %v4553_v44 = vperm.slane %v4545_v4, %v9139_v20 }
 0xda6   : > { %v4429_v2 = vsel %vm1191_vm7, 0.0, %v4428_v14  ;;  %v4923_v50 = vsel %vm1191_vm7, %v4428_v14, %v4417_v30  ;;  %v4543_v41 = vsel %vm1191_vm7, %v4542_v10, %v10723_v37 }
 0xda7   : > { %v4425_v8 = vsel %vm1191_vm7, 0.0, %v4424_v17  ;;  %v4928_v25 = vrot.slane %v4429_v2, 4  ;;  %v4912_v58 = vsel %vm1191_vm7, %v4424_v17, %v4405_v16  ;;  %v4427_v29 = vsel %vm1191_vm7, 0.0, %v4426_v63 }
 0xda8   : > { %v4917_v18 = vrot.slane %v4425_v8, 4  ;;  %v4927_v51 = vperm.slane %v4923_v50, %v9139_v20  ;;  %v4916_v11 = vperm.slane %v4912_v58, %v9139_v20  ;;  %v4580_v17 = vrot.slane %v4553_v44, 4 }
 0xda9   : > { %v4929_v27 = vsel %vm1191_vm7, %v4928_v25, %v4427_v29 }
 0xdaa   : > { %v4933_v39 = vperm.slane %v4929_v27, %v9139_v20  ;;  %v4948_v53 = vrot.slane %v4927_v51, 4  ;;  %v4936_v55 = vrot.slane %v4916_v11, 4 }
 0xdac   : > { %v4946_v47 = vrot.slane %v4933_v39, 4 }
 0xdb5   : > { %v5288_v34 = vpop.xlane.xlu0 %5287 }
 0xdb6   : > { %v5314_v60 = vsub.f32 %v11094_v59, %v5288_v34  ;;  %v4422_v59 = vrot.slane %v4405_v16, 4  ;;  %v4949_v34 = vsel %vm1191_vm7, %v4933_v39, %v4948_v53 }
 0xdb7   : > { %v4957_v0 = vperm.slane %v4949_v34, %v9161_v54 }
 0xdb8   : > { %v5330_v33 = vmul.f32 1.442695, %v5314_v60  ;;  %v4423_v5 = vsel %vm1191_vm7, 0.0, %v4422_v59 }
 0xdb9   : > { %v4918_v52 = vsel %vm1191_vm7, %v4917_v18, %v4423_v5  ;;  %v4947_v18 = vsel %vm1191_vm7, %v4946_v47, %v4927_v51 }
 0xdba   : > { %8515 = vpow2.f32 %v5330_v33  ;;  %v5282_v6 = vpop.xlane.xlu2 %5281  ;;  %v4922_v23 = vperm.slane %v4918_v52, %v9139_v20  ;;  %v4953_v52 = vperm.slane %v4947_v18, %v9161_v54 }
 0xdbb   : > { %8517 = vpow2.f32 %v5340_v31  ;;  %v5312_v15 = vsub.f32 %v11092_v35, %v5282_v6 }
 0xdbc   : > { %v4934_v60 = vrot.slane %v4922_v23, 4  ;;  %v4937_v33 = vsel %vm1191_vm7, %v4922_v23, %v4936_v55 }
 0xdbd   : > { %v5326_v30 = vmul.f32 1.442695, %v5312_v15  ;;  %v4945_v50 = vperm.slane %v4937_v33, %v9161_v54 }
 0xdbe   : > { %v4935_v25 = vsel %vm1191_vm7, %v4934_v60, %v4916_v11  ;;  %v4962_v11 = vrot.slane %v4957_v0, 4 }
 0xdbf   : > { %v4941_v53 = vperm.slane %v4935_v25, %v9161_v54 }
 0xdc0   : > { %v11202_v26 = vpop.eup %8515 }
 0xdc1   : > { %v5358_v32 = vsel %vm2204_vm9, %v11202_v26, 0.0  ;;  %v11220_v19 = vpop.eup %8517 }
 0xdc2   : > { %5359 = vadd.xlane.f32.xlu1 %v5358_v32  ;;  %v5300_v40 = vpop.xlane.xlu1 %5299  ;;  %v5291_v3 = vpop.xlane.xlu2 %5290  ;;  %v5373_v49 = vsel %vm2204_vm9, %v11220_v19, 0.0 }
 0xdc3   : > { %v5318_v56 = vsub.f32 %v11102_v21, %v5300_v40  ;;  %v5315_v7 = vsub.f32 %v11100_v42, %v5291_v3  ;;  %v4556_v21 = vrot.slane %v8346_v12, 4  ;;  %v4549_v42 = vperm.slane %v4543_v41, %v9139_v20 }
 0xdc5   : > { %v5338_v36 = vmul.f32 1.442695, %v5318_v56  ;;  %v5332_v28 = vmul.f32 1.442695, %v5315_v7  ;;  %v4568_v16 = vrot.slane %v4549_v42, 4 }
 0xdc7   : > { %8519 = vpow2.f32 %v5338_v36  ;;  %v4964_v36 = vrot.slane %v4945_v50, 4 }
 0xdc8   : > { %8521 = vpow2.f32 %v5332_v28  ;;  %v4256_v37 = vpop.permute.xlu0 %4255 }
 0xdc9   : > { %v4554_v22 = vrot.slane %v4256_v37, 4  ;;  %v4557_v14 = vsel %vm1191_vm7, %v4256_v37, %v4556_v21  ;;  %8523 = vpow2.f32 %v5326_v30 }
 0xdca   : > { %v4565_v35 = vperm.slane %v4557_v14, %v9139_v20  ;;  %5374 = vadd.xlane.f32.xlu1 %v5373_v49 }
 0xdcb   : > { %v4555_v2 = vsel %vm1191_vm7, %v4554_v22, %v8346_v12 }
 0xdcc   : > { %v4561_v6 = vperm.slane %v4555_v2, %v9139_v20  ;;  %v4578_v31 = vrot.slane %v4565_v35, 4  ;;  %v4581_v8 = vsel %vm1191_vm7, %v4565_v35, %v4580_v17  ;;  %v4958_v17 = vrot.slane %v4953_v52, 4 }
 0xdcd   : > { %v11236_v63 = vpop.eup %8519  ;;  %v4589_v59 = vperm.slane %v4581_v8, %v9161_v54 }
 0xdce   : > { %v11242_v58 = vpop.eup %8521  ;;  %v4566_v10 = vrot.slane %v4561_v6, 4  ;;  %v4569_v29 = vsel %vm1191_vm7, %v4561_v6, %v4568_v16  ;;  %v4579_v45 = vsel %vm1191_vm7, %v4578_v31, %v4553_v44  ;;  %v5370_v51 = vsel %vm2211_vm10, %v11236_v63, 0.0 }
 0xdcf   : > { %v4577_v5 = vperm.slane %v4569_v29, %v9161_v54  ;;  %v4585_v27 = vperm.slane %v4579_v45, %v9161_v54  ;;  %v4596_v32 = vrot.slane %v4589_v59, 4  ;;  %v5361_v40 = vsel %vm2211_vm10, %v11242_v58, 0.0  ;;  %v11261_v55 = vpop.eup %8523 }
 0xdd0   : > { %v4567_v3 = vsel %vm1191_vm7, %v4566_v10, %v4549_v42  ;;  %5362 = vadd.xlane.f32.xlu0 %v5361_v40  ;;  %v5352_v35 = vsel %vm2211_vm10, %v11261_v55, 0.0  ;;  %v4963_v16 = vsel %vm1191_vm7, %v4962_v11, %v4945_v50  ;;  %v4965_v6 = vsel %vm1191_vm7, %v4957_v0, %v4964_v36 }
 0xdd1   : > { %v4573_v12 = vperm.slane %v4567_v3, %v9161_v54  ;;  %v4592_v4 = vrot.slane %v4577_v5, 4  ;;  %v4594_v56 = vrot.slane %v4585_v27, 4  ;;  %v4597_v7 = vsel %vm1191_vm7, 0.0, %v4596_v32 }
 0xdd2   : > { %v4977_v41 = vsel %vm1191_vm7, %v4596_v32, %v4585_v27  ;;  %v4982_v39 = vrot.slane %v4597_v7, 4  ;;  %5371 = vadd.xlane.f32.xlu1 %v5370_v51  ;;  %v4960_v31 = vrot.slane %v4941_v53, 4  ;;  %v4959_v29 = vsel %vm1191_vm7, %v4958_v17, %v4941_v53 }
 0xdd3   : > { %v4590_v28 = vrot.slane %v4573_v12, 4  ;;  %v4593_v23 = vsel %vm1191_vm7, 0.0, %v4592_v4  ;;  %v4595_v44 = vsel %vm1191_vm7, 0.0, %v4594_v56  ;;  %v4966_v15 = vsel %vm1191_vm7, %v4592_v4, %v4573_v12 }
 0xdd4   : > { %v4971_v21 = vrot.slane %v4593_v23, 4  ;;  %v4981_v42 = vperm.slane %v4977_v41, %v9139_v20  ;;  %v4983_v37 = vsel %vm1191_vm7, %v4982_v39, %v4595_v44  ;;  %v4970_v49 = vperm.slane %v4966_v15, %v9139_v20 }
 0xdd5   : > { %v4591_v34 = vsel %vm1191_vm7, 0.0, %v4590_v28  ;;  %v4987_v22 = vperm.slane %v4983_v37, %v9139_v20  ;;  %v5084_v50 = vpack.c.bf16 %v4963_v16, %v4963_v16  ;;  %v5087_v32 = vpack.c.bf16 %v4965_v6, %v4965_v6 }
 0xdd6   : > { %v5002_v14 = vrot.slane %v4981_v42, 4  ;;  %v4972_v60 = vsel %vm1191_vm7, %v4971_v21, %v4591_v34  ;;  %v4990_v47 = vrot.slane %v4970_v49, 4  ;;  %v4961_v51 = vsel %vm1191_vm7, %v4953_v52, %v4960_v31 }
 0xdd7   : > { %v5000_v30 = vrot.slane %v4987_v22, 4  ;;  %v4976_v33 = vperm.slane %v4972_v60, %v9139_v20  ;;  %v5078_v12 = vpack.c.bf16 %v4959_v29, %v4959_v29  ;;  %v5081_v36 = vpack.c.bf16 %v4961_v51, %v4961_v51 }
 0xdd8   : > { %5353 = vadd.xlane.f32.xlu0 %v5352_v35  ;;  %v5003_v2 = vsel %vm1191_vm7, %v4987_v22, %v5002_v14  ;;  %v5517_v28 = vunpack.c.l.b16 %v5084_v50  ;;  %v5561_v44 = vunpack.c.l.b16 %v5087_v32 }
 0xdd9   : > { %v4991_v8 = vsel %vm1191_vm7, %v4976_v33, %v4990_v47  ;;  %v5011_v59 = vperm.slane %v5003_v2, %v9161_v54  ;;  %v4988_v25 = vrot.slane %v4976_v33, 4  ;;  %v5001_v18 = vsel %vm1191_vm7, %v5000_v30, %v4981_v42 }
 0xdda   : > { %v4999_v10 = vperm.slane %v4991_v8, %v9161_v54  ;;  %v5007_v45 = vperm.slane %v5001_v18, %v9161_v54  ;;  %v5429_v21 = vunpack.c.l.b16 %v5078_v12  ;;  %v5473_v14 = vunpack.c.l.b16 %v5081_v36 }
 0xddb   : > { %v5016_v5 = vrot.slane %v5011_v59, 4  ;;  %v4989_v27 = vsel %vm1191_vm7, %v4988_v25, %v4970_v49 }
 0xddc   : > { %v4995_v0 = vperm.slane %v4989_v27, %v9161_v54  ;;  %v5012_v40 = vrot.slane %v5007_v45, 4  ;;  %v5018_v3 = vrot.slane %v4999_v10, 4 }
 0xddd   : > { %v5017_v11 = vsel %vm1191_vm7, %v5016_v5, %v4999_v10 }
 0xdde   : > { %v5085_v4 = vpack.c.bf16 %v5017_v11, %v5017_v11  ;;  %v5013_v56 = vsel %vm1191_vm7, %v5012_v40, %v4995_v0  ;;  %v5019_v7 = vsel %vm1191_vm7, %v5011_v59, %v5018_v3  ;;  %v5014_v41 = vrot.slane %v4995_v0, 4 }
 0xddf   : > { %v5079_v39 = vpack.c.bf16 %v5013_v56, %v5013_v56  ;;  %v5088_v53 = vpack.c.bf16 %v5019_v7, %v5019_v7 }
 0xde0   : > { %v5518_v23 = vunpack.c.l.b16 %v5085_v4  ;;  %v5015_v15 = vsel %vm1191_vm7, %v5007_v45, %v5014_v41 }
 0xde1   : > { %v5430_v42 = vunpack.c.l.b16 %v5079_v39  ;;  %v5562_v52 = vunpack.c.l.b16 %v5088_v53  ;;  %v5082_v37 = vpack.c.bf16 %v5015_v15, %v5015_v15 }
 0xde2   : > { %v5520_v49 = vpack.c.b16 %v5518_v23, %v5517_v28 }
 0xde3   : > { %v5432_v34 = vpack.c.b16 %v5430_v42, %v5429_v21  ;;  %v5564_v22 = vpack.c.b16 %v5562_v52, %v5561_v44  ;;  %v5474_v60 = vunpack.c.l.b16 %v5082_v37 }
 0xde4   : > { %5539 = vmatpush.bf16.msrb.mxu3 %v5520_v49 }
 0xde5   : > { %5451 = vmatpush.bf16.msrb.mxu1 %v5432_v34  ;;  %5583 = vmatpush.bf16.msra.mxu0 %v5564_v22  ;;  %v5476_v47 = vpack.c.b16 %v5474_v60, %v5473_v14 }
 0xde7   : > { %5495 = vmatpush.bf16.msrb.mxu2 %v5476_v47 }
 0xde9   : > { %v5348_v17 = vpop.xlane.xlu2 %5347 }
 0xdf3   : > { %v5309_v30 = vpop.xlane.xlu0 %5308 }
 0xdf4   : > { %v5321_v35 = vsub.f32 %v11097_v46, %v5309_v30 }
 0xdf6   : > { %v5344_v33 = vmul.f32 1.442695, %v5321_v35 }
 0xdf7   : > { %v5366_v16 = vpop.xlane.xlu2 %5365 }
 0xdf8   : > { %8525 = vpow2.f32 %v5344_v33 }
 0xdf9   : > { %8527 = vrcp.f32 %v5366_v16 }
 0xdfa   : > { %8529 = vrcp.f32 %v5348_v17 }
 0xdfb   : > { %v5357_v2 = vpop.xlane.xlu0 %5356 }
 0xdfe   : > { %v11289_v6 = vpop.eup %8525 }
 0xdff   : > { %v5369_v31 = vpop.xlane.xlu1 %5368  ;;  %v5379_v8 = vsel %vm2211_vm10, %v11289_v6, 0.0  ;;  %v8528_v59 = vpop.eup %8527 }
 0xe00   : > { %8531 = vrcp.f32 %v5369_v31  ;;  %5380 = vadd.xlane.f32.xlu2 %v5379_v8  ;;  %v5400_v25 = vmul.f32 %v8528_v59, %v11133_v13  ;;  %v8530_v10 = vpop.eup %8529 }
 0xe01   : > { %v5394_v29 = vmul.f32 %v8530_v10, %v11126_v9  ;;  %v5378_v9 = vpop.xlane.xlu2 %5377 }
 0xe02   : > { %v5412_v45 = vpack.c.bf16 %v5400_v25, %v5400_v25 }
 0xe03   : > { %v5351_v18 = vpop.xlane.xlu0 %5350  ;;  %v5406_v32 = vpack.c.bf16 %v5394_v29, %v5394_v29 }
 0xe04   : > { %8533 = vrcp.f32 %v5351_v18  ;;  %v5509_v0 = vunpack.c.l.b16 %v5412_v45 }
 0xe05   : > { %v5421_v12 = vunpack.c.l.b16 %v5406_v32  ;;  %8535 = vrcp.f32 %v5357_v2 }
 0xe06   : > { %v8532_v46 = vpop.eup %8531 }
 0xe07   : > { %v5401_v5 = vmul.f32 %v8532_v46, %v11144_v24 }
 0xe09   : > { %v5413_v50 = vpack.c.bf16 %v5401_v5, %v5401_v5 }
 0xe0a   : > { %v8534_v27 = vpop.eup %8533 }
 0xe0b   : > { %v5510_v40 = vunpack.c.l.b16 %v5413_v50  ;;  %v5395_v3 = vmul.f32 %v8534_v27, %v11153_v62  ;;  %v8536_v24 = vpop.eup %8535 }
 0xe0c   : > { %v5397_v7 = vmul.f32 %v8536_v24, %v11137_v48 }
 0xe0d   : > { %v5512_v51 = vpack.c.b16 %v5510_v40, %v5509_v0  ;;  %v5407_v11 = vpack.c.bf16 %v5395_v3, %v5395_v3 }
 0xe0e   : > { %v5409_v39 = vpack.c.bf16 %v5397_v7, %v5397_v7 }
 0xe0f   : > { %v5422_v13 = vunpack.c.l.b16 %v5407_v11  ;;  %7627 = vmatmul.msk.bf16.vlgmr.msrb.gmra.mxu3 %vm2204_vm9, %v5512_v51 }
 0xe10   : > { %v5465_v23 = vunpack.c.l.b16 %v5409_v39 }
 0xe11   : > { %v5424_v4 = vpack.c.b16 %v5422_v13, %v5421_v12 }
 0xe13   : > { %7623 = vmatmul.msk.bf16.vlgmr.msrb.gmra.mxu1 %vm2204_vm9, %v5424_v4 }
 0xe35   : > { %v5360_v56 = vpop.xlane.xlu1 %5359 }
 0xe36   : > { %8537 = vrcp.f32 %v5360_v56 }
 0xe37   : > { %8539 = vrcp.f32 %v5378_v9 }
 0xe3c   : > { %v8538_v41 = vpop.eup %8537 }
 0xe3d   : > { %v5398_v62 = vmul.f32 %v8538_v41, %v11202_v26  ;;  %v5375_v53 = vpop.xlane.xlu1 %5374  ;;  %v8540_v36 = vpop.eup %8539 }
 0xe3e   : > { %8541 = vrcp.f32 %v5375_v53  ;;  %v5404_v44 = vmul.f32 %v8540_v36, %v11142_v57 }
 0xe3f   : > { %v5410_v28 = vpack.c.bf16 %v5398_v62, %v5398_v62 }
 0xe40   : > { %v5416_v37 = vpack.c.bf16 %v5404_v44, %v5404_v44 }
 0xe41   : > { %v5466_v15 = vunpack.c.l.b16 %v5410_v28 }
 0xe42   : > { %v5554_v34 = vunpack.c.l.b16 %v5416_v37 }
 0xe43   : > { %v5468_v21 = vpack.c.b16 %v5466_v15, %v5465_v23  ;;  %v5363_v42 = vpop.xlane.xlu0 %5362 }
 0xe44   : > { %v8542_v52 = vpop.eup %8541  ;;  %8543 = vrcp.f32 %v5363_v42 }
 0xe45   : > { %v5403_v49 = vmul.f32 %v8542_v52, %v11220_v19  ;;  %v5372_v48 = vpop.xlane.xlu1 %5371  ;;  %7625 = vmatmul.msk.bf16.vlgmr.msrb.gmra.mxu2 %vm2204_vm9, %v5468_v21 }
 0xe46   : > { %8545 = vrcp.f32 %v5372_v48 }
 0xe47   : > { %v5415_v26 = vpack.c.bf16 %v5403_v49, %v5403_v49 }
 0xe49   : > { %v5553_v22 = vunpack.c.l.b16 %v5415_v26 }
 0xe4a   : > { %v8544_v14 = vpop.eup %8543 }
 0xe4b   : > { %v5556_v60 = vpack.c.b16 %v5554_v34, %v5553_v22  ;;  %v5399_v47 = vmul.f32 %v8544_v14, %v11242_v58  ;;  %v5354_v57 = vpop.xlane.xlu0 %5353 }
 0xe4c   : > { %v8546_v17 = vpop.eup %8545  ;;  %8547 = vrcp.f32 %v5354_v57 }
 0xe4d   : > { %v5402_v30 = vmul.f32 %v8546_v17, %v11236_v63  ;;  %v5411_v35 = vpack.c.bf16 %v5399_v47, %v5399_v47  ;;  %7629 = vmatmul.msk.bf16.vlgmr.msra.gmra.mxu0 %vm2204_vm9, %v5556_v60 }
 0xe4f   : > { %v5414_v19 = vpack.c.bf16 %v5402_v30, %v5402_v30  ;;  %v5467_v33 = vunpack.c.l.b16 %v5411_v35 }
 0xe51   : > { %v5511_v16 = vunpack.c.l.b16 %v5414_v19  ;;  %v5469_v2 = vpack.c.b16 %v5467_v33, %v5467_v33 }
 0xe52   : > { %v8548_v31 = vpop.eup %8547 }
 0xe53   : > { %v5396_v8 = vmul.f32 %v8548_v31, %v11261_v55  ;;  %v5513_v59 = vpack.c.b16 %v5511_v16, %v5511_v16 }
 0xe55   : > { %v5408_v25 = vpack.c.bf16 %v5396_v8, %v5396_v8  ;;  %7628 = vmatmul.msk.bf16.gmra.mxu3 %vm2204_vm9, %v5513_v59  ;;  %7626 = vmatmul.msk.bf16.gmra.mxu2 %vm2204_vm9, %v5469_v2 }
 0xe57   : > { %v5423_v58 = vunpack.c.l.b16 %v5408_v25 }
 0xe59   : > { %v5425_v18 = vpack.c.b16 %v5423_v58, %v5423_v58 }
 0xe5b   : > { %7624 = vmatmul.msk.bf16.gmra.mxu1 %vm2204_vm9, %v5425_v18 }
 0xe73   : > { %v5381_v63 = vpop.xlane.xlu2 %5380 }
 0xe74   : > { %8549 = vrcp.f32 %v5381_v63 }
 0xe7a   : > { %v8550_v10 = vpop.eup %8549 }
 0xe7b   : > { %v5405_v46 = vmul.f32 %v8550_v10, %v11289_v6 }
 0xe7d   : > { %v5417_v29 = vpack.c.bf16 %v5405_v46, %v5405_v46 }
 0xe7f   : > { %v5555_v45 = vunpack.c.l.b16 %v5417_v29 }
 0xe81   : > { %v5557_v5 = vpack.c.b16 %v5555_v45, %v5555_v45 }
 0xe83   : > { %7630 = vmatmul.msk.bf16.gmra.mxu0 %vm2204_vm9, %v5557_v5 }
 0xe90   : > { %v5453_v55 = vpop.f32.mrf.mxu1 }
 0xe91   : > { %v5596_v27 = vrot.slane %v5453_v55, 4 }
 0xe92   : > { %v5541_v50 = vpop.f32.mrf.mxu3 }
 0xe93   : > { %v5594_v32 = vrot.slane %v5541_v50, 4  ;;  %v5597_v40 = vsel %vm1191_vm7, %v5541_v50, %v5596_v27 }
 0xe94   : > { %v5605_v11 = vperm.slane %v5597_v40, %v9139_v20 }
 0xe95   : > { %v5595_v3 = vsel %vm1191_vm7, %v5594_v32, %v5453_v55 }
 0xe96   : > { %v5601_v6 = vperm.slane %v5595_v3, %v9139_v20  ;;  %v5632_v39 = vrot.slane %v5605_v11, 4 }
 0xe98   : > { %v5455_v0 = vpop.f32.mrf.mxu1  ;;  %v5620_v53 = vrot.slane %v5601_v6, 4 }
 0xe99   : > { %v5652_v51 = vrot.slane %v5455_v0, 4 }
 0xe9a   : > { %v5543_v12 = vpop.f32.mrf.mxu3 }
 0xe9b   : > { %v5650_v56 = vrot.slane %v5543_v12, 4  ;;  %v5653_v24 = vsel %vm1191_vm7, %v5543_v12, %v5652_v51 }
 0xe9c   : > { %v5661_v28 = vperm.slane %v5653_v24, %v9139_v20 }
 0xe9d   : > { %v5651_v21 = vsel %vm1191_vm7, %v5650_v56, %v5455_v0 }
 0xe9e   : > { %v5657_v60 = vperm.slane %v5651_v21, %v9139_v20  ;;  %v5688_v47 = vrot.slane %v5661_v28, 4 }
 0xea0   : > { %v5676_v45 = vrot.slane %v5657_v60, 4 }
 0xec8   : > { %v5497_v13 = vpop.f32.mrf.mxu2 }
 0xec9   : > { %v5608_v4 = vrot.slane %v5497_v13, 4 }
 0xeca   : > { %v5585_v9 = vpop.f32.mrf.mxu0 }
 0xecb   : > { %v5606_v7 = vrot.slane %v5585_v9, 4  ;;  %v5609_v41 = vsel %vm1191_vm7, %v5585_v9, %v5608_v4 }
 0xecc   : > { %v5617_v62 = vperm.slane %v5609_v41, %v9139_v20 }
 0xecd   : > { %v5607_v36 = vsel %vm1191_vm7, %v5606_v7, %v5497_v13 }
 0xece   : > { %v5613_v23 = vperm.slane %v5607_v36, %v9139_v20  ;;  %v5630_v44 = vrot.slane %v5617_v62, 4  ;;  %v5633_v15 = vsel %vm1191_vm7, %v5617_v62, %v5632_v39 }
 0xecf   : > { %v5641_v42 = vperm.slane %v5633_v15, %v9161_v54 }
 0xed0   : > { %v5618_v52 = vrot.slane %v5613_v23, 4  ;;  %v5621_v37 = vsel %vm1191_vm7, %v5613_v23, %v5620_v53  ;;  %v5631_v49 = vsel %vm1191_vm7, %v5630_v44, %v5605_v11  ;;  %v5499_v48 = vpop.f32.mrf.mxu2 }
 0xed1   : > { %v5629_v26 = vperm.slane %v5621_v37, %v9161_v54  ;;  %v5637_v34 = vperm.slane %v5631_v49, %v9161_v54  ;;  %v5648_v22 = vrot.slane %v5641_v42, 4  ;;  %v5664_v14 = vrot.slane %v5499_v48, 4 }
 0xed2   : > { %v5619_v57 = vsel %vm1191_vm7, %v5618_v52, %v5601_v6  ;;  %v5587_v17 = vpop.f32.mrf.mxu0 }
 0xed3   : > { %v5625_v30 = vperm.slane %v5619_v57, %v9161_v54  ;;  %v5644_v35 = vrot.slane %v5629_v26, 4  ;;  %v5646_v19 = vrot.slane %v5637_v34, 4  ;;  %v5649_v33 = vsel %vm1191_vm7, 0.0, %v5648_v22 }
 0xed4   : > { %v5731_v16 = vsel %vm1191_vm7, %v5648_v22, %v5637_v34  ;;  %v5736_v2 = vrot.slane %v5649_v33, 4  ;;  %v5662_v31 = vrot.slane %v5587_v17, 4  ;;  %v5665_v8 = vsel %vm1191_vm7, %v5587_v17, %v5664_v14 }
 0xed5   : > { %v5642_v59 = vrot.slane %v5625_v30, 4  ;;  %v5645_v25 = vsel %vm1191_vm7, 0.0, %v5644_v35  ;;  %v5647_v58 = vsel %vm1191_vm7, 0.0, %v5646_v19  ;;  %v5720_v18 = vsel %vm1191_vm7, %v5644_v35, %v5625_v30 }
 0xed6   : > { %v5725_v63 = vrot.slane %v5645_v25, 4  ;;  %v11340_v10 = vperm.slane %v5731_v16, %v9139_v20  ;;  %v5737_v46 = vsel %vm1191_vm7, %v5736_v2, %v5647_v58  ;;  %v5663_v29 = vsel %vm1191_vm7, %v5662_v31, %v5499_v48 }
 0xed7   : > { %v5669_v5 = vperm.slane %v5663_v29, %v9139_v20  ;;  %v5673_v55 = vperm.slane %v5665_v8, %v9139_v20  ;;  %v5643_v50 = vsel %vm1191_vm7, 0.0, %v5642_v59  ;;  %v5741_v27 = vperm.slane %v5737_v46, %v9139_v20 }
 0xed8   : > { %v5756_v32 = vrot.slane %v11340_v10, 4  ;;  %v11349_v0 = vpop.f32.mrf.mxu3  ;;  %v11351_v40 = vpop.f32.mrf.mxu2  ;;  %v5724_v3 = vperm.slane %v5720_v18, %v9139_v20  ;;  %v5726_v51 = vsel %vm1191_vm7, %v5725_v63, %v5643_v50 }
 0xed9   : > { %v5674_v11 = vrot.slane %v5669_v5, 4  ;;  %v5677_v12 = vsel %vm1191_vm7, %v5669_v5, %v5676_v45  ;;  %v5686_v13 = vrot.slane %v5673_v55, 4  ;;  %v5689_v6 = vsel %vm1191_vm7, %v5673_v55, %v5688_v47  ;;  %v11357_v4 = vpop.f32.mrf.mxu1 }
 0xeda   : > { %v5685_v9 = vperm.slane %v5677_v12, %v9161_v54  ;;  %v5697_v56 = vperm.slane %v5689_v6, %v9161_v54  ;;  %v5730_v24 = vperm.slane %v5726_v51, %v9139_v20  ;;  %v5744_v39 = vrot.slane %v5724_v3, 4 }
 0xedb   : > { %v5675_v7 = vsel %vm1191_vm7, %v5674_v11, %v5657_v60  ;;  %v5687_v41 = vsel %vm1191_vm7, %v5686_v13, %v5661_v28  ;;  %v5757_v15 = vsel %vm1191_vm7, %v5741_v27, %v5756_v32  ;;  %v5754_v63 = vrot.slane %v5741_v27, 4 }
 0xedc   : > { %v5681_v62 = vperm.slane %v5675_v7, %v9161_v54  ;;  %v5693_v53 = vperm.slane %v5687_v41, %v9161_v54  ;;  %v5700_v36 = vrot.slane %v5685_v9, 4  ;;  %v5704_v23 = vrot.slane %v5697_v56, 4 }
 0xedd   : > { %v5745_v44 = vsel %vm1191_vm7, %v5730_v24, %v5744_v39  ;;  %v5742_v21 = vrot.slane %v5730_v24, 4  ;;  %v5765_v19 = vperm.slane %v5757_v15, %v9161_v54 }
 0xede   : > { %v5698_v42 = vrot.slane %v5681_v62, 4  ;;  %v5701_v52 = vsel %vm1191_vm7, 0.0, %v5700_v36  ;;  %v5702_v37 = vrot.slane %v5693_v53, 4  ;;  %v5705_v49 = vsel %vm1191_vm7, 0.0, %v5704_v23 }
 0xedf   : > { %v5774_v28 = vsel %vm1191_vm7, %v5700_v36, %v5681_v62  ;;  %v5779_v48 = vrot.slane %v5701_v52, 4  ;;  %v5785_v26 = vsel %vm1191_vm7, %v5704_v23, %v5693_v53  ;;  %v5790_v34 = vrot.slane %v5705_v49, 4 }
 0xee0   : > { %v5703_v22 = vsel %vm1191_vm7, 0.0, %v5702_v37  ;;  %v5789_v14 = vperm.slane %v5785_v26, %v9139_v20  ;;  %v5548_v60 = vpop.f32.mrf.mxu3  ;;  %v5504_v47 = vpop.f32.mrf.mxu2  ;;  %v5699_v57 = vsel %vm1191_vm7, 0.0, %v5698_v42  ;;  %v5753_v35 = vperm.slane %v5745_v44, %v9161_v54 }
 0xee1   : > { %v5791_v17 = vsel %vm1191_vm7, %v5790_v34, %v5703_v22  ;;  %v5460_v30 = vpop.f32.mrf.mxu1  ;;  %v5778_v33 = vperm.slane %v5774_v28, %v9139_v20  ;;  %v5780_v31 = vsel %vm1191_vm7, %v5779_v48, %v5699_v57  ;;  %v5743_v8 = vsel %vm1191_vm7, %v5742_v21, %v5724_v3 }
 0xee2   : > { %v5795_v16 = vperm.slane %v5791_v17, %v9139_v20  ;;  %v5810_v2 = vrot.slane %v5789_v14, 4  ;;  %v5784_v59 = vperm.slane %v5780_v31, %v9139_v20  ;;  %v5749_v18 = vperm.slane %v5743_v8, %v9161_v54  ;;  %v8190_v31 = vld [vmem:[%s12128_s10 + $0x60] sm:$0xff]  ;;  %v8189_v8 = vld [vmem:[%s12128_s10 + $0x58] sm:$0xff] }
 0xee3   : > { %v5798_v25 = vrot.slane %v5778_v33, 4  ;;  %v5770_v29 = vrot.slane %v5765_v19, 4  ;;  %v5772_v32 = vrot.slane %v5753_v35, 4  ;;  %v5755_v3 = vsel %vm1191_vm7, %v5754_v63, %v11340_v10 }
 0xee4   : > { %v5811_v58 = vsel %vm1191_vm7, %v5795_v16, %v5810_v2  ;;  %v5808_v46 = vrot.slane %v5795_v16, 4  ;;  %v5796_v55 = vrot.slane %v5784_v59, 4  ;;  %v5761_v12 = vperm.slane %v5755_v3, %v9161_v54  ;;  %v8191_v2 = vld [vmem:[%s12128_s10 + $0x68] sm:$0xff] }
 0xee5   : > { %v5799_v45 = vsel %vm1191_vm7, %v5784_v59, %v5798_v25  ;;  %v5819_v5 = vperm.slane %v5811_v58, %v9161_v54  ;;  %v5768_v9 = vrot.slane %v5749_v18, 4  ;;  %v5771_v24 = vsel %vm1191_vm7, %v5770_v29, %v5753_v35  ;;  %v8188_v59 = vld [vmem:[%s12128_s10 + $0x50] sm:$0xff]  ;;  %v8187_v25 = vld [vmem:[%s12128_s10 + $0x48] sm:$0xff]  ;;  %v8186_v58 = vld [vmem:[%s12128_s10 + $0x40] sm:$0xff] }
 0xee6   : > { %v5807_v50 = vperm.slane %v5799_v45, %v9161_v54  ;;  %v5809_v51 = vsel %vm1191_vm7, %v5808_v46, %v5789_v14  ;;  %v5797_v27 = vsel %vm1191_vm7, %v5796_v55, %v5778_v33  ;;  %v5766_v41 = vrot.slane %v5761_v12, 4 }
 0xee7   : > { %v5824_v11 = vrot.slane %v5819_v5, 4  ;;  %v5815_v13 = vperm.slane %v5809_v51, %v9161_v54  ;;  %v5803_v56 = vperm.slane %v5797_v27, %v9161_v54  ;;  %v5773_v62 = vsel %vm1191_vm7, %v5765_v19, %v5772_v32 }
 0xee8   : > { %v5826_v6 = vrot.slane %v5807_v50, 4  ;;  %v5767_v44 = vsel %vm1191_vm7, %v5766_v41, %v5749_v18  ;;  %v5769_v21 = vsel %vm1191_vm7, %v5761_v12, %v5768_v9  ;;  %v5706_v37 = vrot.slane %v11349_v0, 4 }
 0xee9   : > { %v5825_v7 = vsel %vm1191_vm7, %v5824_v11, %v5807_v50  ;;  %v5820_v39 = vrot.slane %v5815_v13, 4  ;;  %v5822_v36 = vrot.slane %v5803_v56, 4 }
 0xeea   : > { %v8357_v10 = vpack.i.bf16 %v5825_v7, %v5771_v24  ;;  %v5827_v53 = vsel %vm1191_vm7, %v5819_v5, %v5826_v6  ;;  %v5707_v48 = vsel %vm1191_vm7, %v5706_v37, %v11357_v4 }
 0xeeb   : > { %v8362_v23 = vpack.i.bf16 %v5827_v53, %v5773_v62  ;;  %v5821_v15 = vsel %vm1191_vm7, %v5820_v39, %v5803_v56  ;;  %v5823_v42 = vsel %vm1191_vm7, %v5815_v13, %v5822_v36  ;;  %v5711_v22 = vperm.slane %v5707_v48, %v9139_v20  ;;  %v8377_v62 = vld [vmem:[%s12129_s11 + $0x1] ss:$0 sm:$0xff] }
 0xeec   : > { %8358 = vrot.lane.b32.xlu2 %v8357_v10, %s12189_s25  ;;  %v8352_v52 = vpack.i.bf16 %v5823_v42, %v5769_v21 }
 0xeed   : > { %8363 = vrot.lane.b32.xlu0 %v8362_v23, %s8670_s29 }
 0xeee   : > { %8353 = vrot.lane.b32.xlu1 %v8352_v52, %s8672_s27 }
 0xf00   : > { %v5590_v49 = vpop.f32.mrf.mxu0 }
 0xf01   : > { %v5712_v28 = vrot.slane %v5590_v49, 4 }
 0xf03   : > { %v5713_v26 = vsel %vm1191_vm7, %v5712_v28, %v11351_v40 }
 0xf04   : > { %v5717_v34 = vperm.slane %v5713_v26, %v9139_v20 }
 0xf06   : > { %v5718_v14 = vrot.slane %v5717_v34, 4 }
 0xf08   : > { %v5592_v60 = vpop.f32.mrf.mxu0  ;;  %v5719_v47 = vsel %vm1191_vm7, %v5718_v14, %v5711_v22 }
 0xf09   : > { %v5831_v57 = vperm.slane %v5719_v47, %v9161_v54 }
 0xf0b   : > { %v5835_v0 = vperm.slane %v5831_v57, %v9139_v20  ;;  %v8193_v20 = vld [vmem:[%s12128_s10 + $0x78] sm:$0xff] }
 0xf0c   : > { %5967 = vmatpush.bf16.msra.mxu1 %v8193_v20 }
 0xf0d   : > { %v5841_v17 = vperm.slane %v5835_v0, %v9161_v54  ;;  %v5836_v30 = vrot.slane %v5835_v0, 4 }
 0xf0f   : > { %v5846_v35 = vrot.slane %v5841_v17, 4  ;;  %v5837_v4 = vsel %vm1191_vm7, 0.0, %v5836_v30  ;;  %v7829_v30 = vld [vmem:[%s12132_s14 + $0x1e0] sm:$0xf] }
 0xf10   : > { %v5845_v40 = vperm.slane %v5837_v4, %v9161_v54  ;;  %v8192_v54 = vld [vmem:[%s12128_s10 + $0x70] sm:$0xff]  ;;  %v8222_v4 = vld [vmem:[%s12132_s14 + $0x1e4] sm:$0xf] }
 0xf11   : > { %v5847_v19 = vsel %vm1191_vm7, 0.0, %v5846_v35  ;;  %5968 = vmatpush.bf16.msra.mxu1 %v8192_v54  ;;  %v8224_v35 = vld [vmem:[%s12132_s14 + $0x1ec] sm:$0xf0] }
 0xf12   : > { %5857 = vrot.lane.b32.xlu1 %v5847_v19, %s8672_s27  ;;  %5869 = vrot.lane.b32.xlu0 %v5845_v40, %s12189_s25  ;;  %v5848_v33 = vrot.slane %v5845_v40, 4  ;;  %v7830_v40 = vor.u32 %v8224_v35, %v7829_v30  ;;  %v7831_v19 = vld [vmem:[%s12132_s14 + $0x1f0] sm:$0xf0]  ;;  %s12212_s27 = sld [smem:[#allocation8_spill]] }
 0xf13   : > { %v7834_v20 = vor.u32 %v8222_v4, %v7831_v19  ;;  %v7767_v30 = vld [vmem:[%s12132_s14 + $0x170] sm:$0xf0]  ;;  %v7773_v4 = vld [vmem:[%s12132_s14 + $0x168] sm:$0xf]  ;;  %v8207_v19 = vld [vmem:[%s12132_s14 + $0x16c] sm:$0xf] }
 0xf14   : > { %v5849_v16 = vsel %vm1191_vm7, 0.0, %v5848_v33  ;;  %v7837_v33 = vld [vmem:[%s12132_s14 + $0x1e8] sm:$0xf]  ;;  %6272 = vmatpush.bf16.msra.mxu2 %v7830_v40  ;;  %v8209_v40 = vld [vmem:[%s12132_s14 + $0x174] sm:$0xf0] }
 0xf15   : > { %5881 = vrot.lane.b32.xlu2 %v5849_v16, %s8670_s29  ;;  %5969 = vmatpush.bf16.msra.mxu1 %v8191_v2  ;;  %v8225_v16 = vld [vmem:[%s12132_s14 + $0x1f4] sm:$0xf0]  ;;  %v8223_v2 = vld [vmem:[%s12132_s14 + $0x1ec] sm:$0xf] }
 0xf16   : > { %v7838_v54 = vor.u32 %v8225_v16, %v7837_v33  ;;  %6290 = vmatpush.bf16.msra.mxu3 %v7834_v20  ;;  %v7775_v16 = vld [vmem:[%s12132_s14 + $0x178] sm:$0xf0] }
 0xf18   : > { %6308 = vmatpush.bf16.msrb.mxu0 %v7838_v54  ;;  %s8258_s1 = sshll.u32 %s12212_s27, 4  ;;  %s6939_s27 = scalar_lea.sflag [#allocation3], %s566_s24 }
 0xf19   : > { %5970 = vmatpush.bf16.msra.mxu1 %v8190_v31  ;;  %v7839_v31 = vld [vmem:[%s12132_s14 + $0x1f8] sm:$0xf0]  ;;  %s6950_s20 = scalar_lea.hbm %s12213_s19, %s8258_s1 }
 0xf1a   : > { %s6953_s23 = sshll.u32 %s6950_s20, 4  ;;  %s6954_s23 = int_to_ptr.hbm [resolvable:$true] %s6953_s23 }
 0xf1b   : > { %s8619_s30 = sshra.s32 %s6954_s23, 4  ;;  %s8620_s30 = int_to_ptr.hbm [resolvable:$true] %s8619_s30 }
 0xf1c   : > { %s8621_s29 = scalar_lea.hbm %s8620_s30, 16  ;;  %p8626_p0 = scmp.lt.s32.totalorder %s8620_s30, %s12213_s19 }
 0xf1d   : > { %5971 = vmatpush.bf16.msra.mxu1 %v8189_v8  ;;  %v7842_v8 = vor.u32 %v8223_v2, %v7839_v31  ;;  %v7749_v2 = vld [vmem:[%s12132_s14 + $0x140] sm:$0xf]  ;;  %v8204_v31 = vld [vmem:[%s12132_s14 + $0x14c] sm:$0xf0]  ;;  %p8622_p11 = scmp.ne.s32.totalorder %s8620_s30, %s8621_s29  ;;  %p8627_p1 = scmp.lt.s32.totalorder %s8625_s0, %s8621_s29 }
 0xf1f   : > { %p8623_p12 = pnand %p8622_p11, %p8811_p5  ;;  %p8628_p2 = por %p8627_p1, %p8626_p0 }
 0xf21   : > { %5972 = vmatpush.bf16.msra.mxu1 %v8188_v59  ;;  %p8624_p13 = pneg %p8623_p12 }
 0xf23   : > { %p8629_p3 = pnand %p8628_p2, %p8624_p13 }
 0xf25   : > { %5973 = vmatpush.bf16.msra.mxu1 %v8187_v25 }
 0xf29   : > { %5974 = vmatpush.bf16.msra.mxu1 %v8186_v58  ;;  %v7813_v58 = vld [vmem:[%s12132_s14 + $0x1c0] sm:$0xf] }
 0xf2d   : > { %6326 = vmatpush.bf16.msrb.mxu1 %v7842_v8  ;;  %v8202_v8 = vld [vmem:[%s12132_s14 + $0x144] sm:$0xf] }
 0xf46   : > { %v8359_v18 = vpop.permute.xlu2 %8358 }
 0xf47   : > { %v8361_v5 = vunpack.i.h.bf16 %v8359_v18  ;;  %v8360_v55 = vunpack.i.l.bf16 %v8359_v18  ;;  %v8220_v18 = vld [vmem:[%s12132_s14 + $0x1cc] sm:$0xf0] }
 0xf5f   : > { %v8364_v63 = vpop.permute.xlu0 %8363 }
 0xf60   : > { %v8354_v46 = vpop.permute.xlu1 %8353  ;;  %v8366_v50 = vunpack.i.h.bf16 %v8364_v63  ;;  %v8365_v32 = vunpack.i.l.bf16 %v8364_v63  ;;  %v8218_v63 = vld [vmem:[%s12132_s14 + $0x1c4] sm:$0xf] }
 0xf61   : > { %v8356_v29 = vunpack.i.h.bf16 %v8354_v46  ;;  %v8355_v45 = vunpack.i.l.bf16 %v8354_v46 }
 0xf63   : > { %v5886_v3 = vsel %vm2035_vm8, %v5767_v44, %v8355_v45  ;;  %v5887_v51 = vsel %vm2035_vm8, %v5821_v15, %v8356_v29  ;;  %v7814_v29 = vor.u32 %v8220_v18, %v7813_v58  ;;  %v7815_v45 = vld [vmem:[%s12132_s14 + $0x1d0] sm:$0xf0]  ;;  %v7757_v18 = vld [vmem:[%s12132_s14 + $0x148] sm:$0xf] }
 0xf64   : > { %v5889_v11 = vsel %vm677_vm0, %v5886_v3, %v8360_v55  ;;  %v5890_v12 = vsel %vm677_vm0, %v5887_v51, %v8361_v5  ;;  %v7821_v5 = vld [vmem:[%s12132_s14 + $0x1c8] sm:$0xf]  ;;  %v7818_v55 = vor.u32 %v8218_v63, %v7815_v45  ;;  %v7823_v3 = vld [vmem:[%s12132_s14 + $0x1d8] sm:$0xf0]  ;;  %v7751_v58 = vld [vmem:[%s12132_s14 + $0x150] sm:$0xf0] }
 0xf65   : > { %v5892_v27 = vsel %vm2826_vm11, %v5889_v11, %v8365_v32  ;;  %v5893_v13 = vsel %vm2826_vm11, %v5890_v12, %v8366_v50  ;;  %v8221_v50 = vld [vmem:[%s12132_s14 + $0x1d4] sm:$0xf0]  ;;  %v8219_v32 = vld [vmem:[%s12132_s14 + $0x1cc] sm:$0xf]  ;;  %6273 = vmatpush.bf16.msra.mxu2 %v7814_v29  ;;  %v7797_v12 = vld [vmem:[%s12132_s14 + $0x1a0] sm:$0xf] }
 0xf66   : > { %v5895_v6 = vpack.c.bf16 %v5893_v13, %v5892_v27  ;;  %v7822_v51 = vor.u32 %v8221_v50, %v7821_v5  ;;  %v7826_v11 = vor.u32 %v8219_v32, %v7823_v3  ;;  %v8216_v27 = vld [vmem:[%s12132_s14 + $0x1ac] sm:$0xf0]  ;;  %v8214_v13 = vld [vmem:[%s12132_s14 + $0x1a4] sm:$0xf]  ;;  %6291 = vmatpush.bf16.msra.mxu3 %v7818_v55  ;;  %v8205_v63 = vld [vmem:[%s12132_s14 + $0x154] sm:$0xf0]  ;;  %v7750_v55 = vor.u32 %v8204_v31, %v7749_v2 }
 0xf67   : > { %v8203_v45 = vld [vmem:[%s12132_s14 + $0x14c] sm:$0xf]  ;;  %v7759_v5 = vld [vmem:[%s12132_s14 + $0x158] sm:$0xf0]  ;;  %v7754_v32 = vor.u32 %v8202_v8, %v7751_v58  ;;  %v7733_v3 = vld [vmem:[%s12132_s14 + $0x120] sm:$0xf] }
 0xf68   : > { %5975 = vmatmul.bf16.vlgmr.msra.gmra.mxu1 %v5895_v6  ;;  %v7798_v6 = vor.u32 %v8216_v27, %v7797_v12  ;;  %6309 = vmatpush.bf16.msrb.mxu0 %v7822_v51  ;;  %v8200_v51 = vld [vmem:[%s12132_s14 + $0x12c] sm:$0xf0]  ;;  %v7758_v12 = vor.u32 %v8205_v63, %v7757_v18  ;;  %v7762_v27 = vor.u32 %v8203_v45, %v7759_v5 }
 0xf69   : > { %6327 = vmatpush.bf16.msrb.mxu1 %v7826_v11 }
 0xf6a   : > { %6274 = vmatpush.bf16.msra.mxu2 %v7798_v6  ;;  %v7735_v6 = vld [vmem:[%s12132_s14 + $0x130] sm:$0xf0] }
 0xf6f   : > { %v5882_v7 = vpop.permute.xlu2 %5881 }
 0xf84   : > { %v5858_v9 = vpop.permute.xlu1 %5857  ;;  %v5870_v56 = vpop.permute.xlu0 %5869 }
 0xf85   : > { %v5888_v24 = vsel %vm2035_vm8, %v5841_v17, %v5858_v9  ;;  %v7799_v9 = vld [vmem:[%s12132_s14 + $0x1b0] sm:$0xf0] }
 0xf86   : > { %v5891_v41 = vsel %vm677_vm0, %v5888_v24, %v5870_v56  ;;  %v7805_v56 = vld [vmem:[%s12132_s14 + $0x1a8] sm:$0xf]  ;;  %v8217_v24 = vld [vmem:[%s12132_s14 + $0x1b4] sm:$0xf0] }
 0xf87   : > { %v5894_v39 = vsel %vm2826_vm11, %v5891_v41, %v5882_v7  ;;  %v7802_v7 = vor.u32 %v8214_v13, %v7799_v9  ;;  %v7806_v41 = vor.u32 %v8217_v24, %v7805_v56  ;;  %v8198_v13 = vld [vmem:[%s12132_s14 + $0x124] sm:$0xf]  ;;  %v7741_v9 = vld [vmem:[%s12132_s14 + $0x128] sm:$0xf] }
 0xf88   : > { %v5896_v10 = vpack.c.bf16 %v5894_v39, %v5894_v39  ;;  %v8215_v39 = vld [vmem:[%s12132_s14 + $0x1ac] sm:$0xf] }
 0xf89   : > { %6292 = vmatpush.bf16.msra.mxu3 %v7802_v7  ;;  %6310 = vmatpush.bf16.msrb.mxu0 %v7806_v41  ;;  %v8201_v7 = vld [vmem:[%s12132_s14 + $0x134] sm:$0xf0]  ;;  %v8199_v41 = vld [vmem:[%s12132_s14 + $0x12c] sm:$0xf] }
 0xf8a   : > { %5980 = vmatmul.bf16.gmra.mxu1 %v5896_v10  ;;  %v7807_v10 = vld [vmem:[%s12132_s14 + $0x1b8] sm:$0xf0] }
 0xfe5   : > { %v5976_v53 = vpop.f32.mrf.mxu1 }
 0xfe6   : > { %v5977_v36 = vadd.f32 %v8377_v62, %v5976_v53 }
 0xfe8   : > { %v11461_v23 = vadd.f32 %v5977_v36, %v10485_v43  ;;  %v7810_v36 = vor.u32 %v8215_v39, %v7807_v10  ;;  %v7743_v39 = vld [vmem:[%s12132_s14 + $0x138] sm:$0xf0] }
 0xfea   : > { %5992 = vadd.xlane.f32.xlu1 %v11461_v23  ;;  %6328 = vmatpush.bf16.msrb.mxu1 %v7810_v36  ;;  %v7717_v36 = vld [vmem:[%s12132_s14 + $0x100] sm:$0xf] }
 0xfed   : > { %v5978_v44 = vpop.f32.mrf.mxu1 }
 0xfee   : > { %v5979_v15 = vadd.f32 %v8377_v62, %v5978_v44  ;;  %v8212_v44 = vld [vmem:[%s12132_s14 + $0x18c] sm:$0xf0] }
 0xff0   : > { %v11465_v21 = vadd.f32 %v5979_v15, %v10489_v1  ;;  %v8210_v15 = vld [vmem:[%s12132_s14 + $0x184] sm:$0xf] }
 0xff2   : > { %5994 = vadd.xlane.f32.xlu0 %v11465_v21 }
0x1007   : > { %v5981_v42 = vpop.f32.mrf.mxu1 }
0x1008   : > { %v5982_v52 = vadd.f32 %v8377_v62, %v5981_v42  ;;  %v7781_v62 = vld [vmem:[%s12132_s14 + $0x180] sm:$0xf]  ;;  %v7783_v42 = vld [vmem:[%s12132_s14 + $0x190] sm:$0xf0] }
0x100a   : > { %v5987_v37 = vadd.f32 %v5982_v52, %v10493_v61 }
0x100c   : > { %v5996_v49 = vsel %vm722_vm1, %v5987_v37, 0.0 }
0x100d   : > { %5997 = vadd.xlane.f32.xlu2 %v5996_v49  ;;  %v7789_v49 = vld [vmem:[%s12132_s14 + $0x188] sm:$0xf] }
0x100f   : > { %v5983_v28 = vpop.f32.mrf.mxu1 }
0x1010   : > { %v8213_v28 = vld [vmem:[%s12132_s14 + $0x194] sm:$0xf0] }
0x105d   : > { %v5993_v48 = vpop.xlane.xlu1 %5992 }
0x105e   : > { %v5999_v43 = vmul.f32 %v5993_v48, %v8876_v38  ;;  %v8211_v48 = vld [vmem:[%s12132_s14 + $0x18c] sm:$0xf] }
0x1060   : > { %v11472_v26 = vsub.f32 %v11461_v23, %v5999_v43  ;;  %v7786_v43 = vor.u32 %v8210_v15, %v7783_v42  ;;  %v8194_v15 = vld [vmem:[%s12132_s14 + $0x104] sm:$0xf]  ;;  %v7742_v42 = vor.u32 %v8201_v7, %v7741_v9 }
0x1062   : > { %v6005_v1 = vmul.f32 %v11472_v26, %v11472_v26  ;;  %6293 = vmatpush.bf16.msra.mxu3 %v7786_v43 }
0x1064   : > { %6008 = vadd.xlane.f32.xlu1 %v6005_v1  ;;  %v7791_v1 = vld [vmem:[%s12132_s14 + $0x198] sm:$0xf0] }
0x1065   : > { %v5995_v34 = vpop.xlane.xlu0 %5994 }
0x1066   : > { %v6000_v22 = vmul.f32 %v5995_v34, %v8876_v38  ;;  %v7765_v34 = vld [vmem:[%s12132_s14 + $0x160] sm:$0xf] }
0x1068   : > { %v11478_v14 = vsub.f32 %v11465_v21, %v6000_v22  ;;  %v8208_v22 = vld [vmem:[%s12132_s14 + $0x16c] sm:$0xf0] }
0x1069   : > { %v7766_v33 = vor.u32 %v8208_v22, %v7765_v34  ;;  %v7727_v34 = vld [vmem:[%s12132_s14 + $0x118] sm:$0xf0] }
0x106a   : > { %v6006_v61 = vmul.f32 %v11478_v14, %v11478_v14 }
0x106c   : > { %6010 = vadd.xlane.f32.xlu0 %v6006_v61 }
0x1080   : > { %v5998_v60 = vpop.xlane.xlu2 %5997 }
0x1081   : > { %v6001_v47 = vmul.f32 %v5998_v60, %v8876_v38 }
0x1083   : > { %v11483_v57 = vsub.f32 %v5987_v37, %v6001_v47  ;;  %v7782_v37 = vor.u32 %v8212_v44, %v7781_v62  ;;  %v7790_v47 = vor.u32 %v8213_v28, %v7789_v49  ;;  %v8196_v44 = vld [vmem:[%s12132_s14 + $0x10c] sm:$0xf0]  ;;  %v7725_v49 = vld [vmem:[%s12132_s14 + $0x108] sm:$0xf]  ;;  %v8197_v28 = vld [vmem:[%s12132_s14 + $0x114] sm:$0xf0] }
0x1084   : > { %v7718_v22 = vor.u32 %v8196_v44, %v7717_v36 }
0x1085   : > { %v6007_v0 = vmul.f32 %v11483_v57, %v11483_v57  ;;  %6275 = vmatpush.bf16.msra.mxu2 %v7782_v37  ;;  %6311 = vmatpush.bf16.msrb.mxu0 %v7790_v47  ;;  %v7719_v37 = vld [vmem:[%s12132_s14 + $0x110] sm:$0xf0] }
0x1087   : > { %v6012_v17 = vsel %vm722_vm1, %v6007_v0, 0.0  ;;  %v7794_v0 = vor.u32 %v8211_v48, %v7791_v1  ;;  %v8195_v1 = vld [vmem:[%s12132_s14 + $0x10c] sm:$0xf] }
0x1088   : > { %6013 = vadd.xlane.f32.xlu2 %v6012_v17  ;;  %v8206_v17 = vld [vmem:[%s12132_s14 + $0x164] sm:$0xf] }
0x1089   : > { %v7770_v54 = vor.u32 %v8206_v17, %v7767_v30  ;;  %6329 = vmatpush.bf16.msrb.mxu1 %v7794_v0  ;;  %6276 = vmatpush.bf16.msra.mxu2 %v7766_v33  ;;  %v7722_v0 = vor.u32 %v8194_v15, %v7719_v37  ;;  %v8378_v17 = vld [vmem:[%s12130_s12 + $0x1] ss:$0 sm:$0xff]  ;;  %v7726_v30 = vor.u32 %v8197_v28, %v7725_v49 }
0x108b   : > { %6294 = vmatpush.bf16.msra.mxu3 %v7770_v54 }
0x108d   : > { %6277 = vmatpush.bf16.msra.mxu2 %v7750_v55 }
0x108f   : > { %6295 = vmatpush.bf16.msra.mxu3 %v7754_v32 }
0x10d7   : > { %v6009_v59 = vpop.xlane.xlu1 %6008 }
0x10d8   : > { %v6015_v25 = vmul.f32 %v6009_v59, %v8876_v38  ;;  %v7774_v59 = vor.u32 %v8209_v40, %v7773_v4 }
0x10da   : > { %v11522_v46 = vadd.f32 1e-05, %v6015_v25  ;;  %v7778_v25 = vor.u32 %v8207_v19, %v7775_v16  ;;  %6312 = vmatpush.bf16.msrb.mxu0 %v7774_v59  ;;  %v8379_v19 = vld [vmem:[%s12131_s13 + $0x1] ss:$0 sm:$0xff] }
0x10dc   : > { %8551 = vrsqrt.f32 %v11522_v46  ;;  %6330 = vmatpush.bf16.msrb.mxu1 %v7778_v25  ;;  %vm6027_vm1 = vweird.f32 %v11522_v46 }
0x10de   : > { %6313 = vmatpush.bf16.msrb.mxu0 %v7758_v12 }
0x10df   : > { %v6011_v53 = vpop.xlane.xlu0 %6010 }
0x10e0   : > { %v6016_v52 = vmul.f32 %v6011_v53, %v8876_v38  ;;  %v7738_v53 = vor.u32 %v8198_v13, %v7735_v6  ;;  %6331 = vmatpush.bf16.msrb.mxu1 %v7762_v27 }
0x10e2   : > { %v11595_v61 = vpop.eup %8551  ;;  %v11597_v60 = vadd.f32 1e-05, %v6016_v52  ;;  %v7746_v52 = vor.u32 %v8199_v41, %v7743_v39  ;;  %6296 = vmatpush.bf16.msra.mxu3 %v7738_v53  ;;  %6314 = vmatpush.bf16.msrb.mxu0 %v7742_v42  ;;  %v8248_v42 = vld [vmem:[%s12134_s16 + $0x1b0] sm:$0xff] }
0x10e3   : > { %v6022_v35 = vmul.f32 %v11595_v61, %v11522_v46  ;;  %vm6028_vm0 = vweird.f32 %v11595_v61  ;;  %v7734_v46 = vor.u32 %v8200_v51, %v7733_v3 }
0x10e4   : > { %8553 = vrsqrt.f32 %v11597_v60  ;;  %vm11675_vm7 = vmor %vm6027_vm1, %vm6028_vm0  ;;  %6332 = vmatpush.bf16.msrb.mxu1 %v7746_v52  ;;  %vm6037_vm9 = vweird.f32 %v11597_v60  ;;  %v8256_v52 = vld [vmem:[%s12134_s16 + $0x1f0] sm:$0xff] }
0x10e5   : > { %v6023_v20 = vmul.f32 %v11595_v61, %v6022_v35  ;;  %6278 = vmatpush.bf16.msra.mxu2 %v7734_v46  ;;  %v7730_v35 = vor.u32 %v8195_v1, %v7727_v34  ;;  %v8241_v1 = vld [vmem:[%s12134_s16 + $0x178] sm:$0xff] }
0x10e6   : > { %6297 = vmatpush.bf16.msra.mxu3 %v7722_v0  ;;  %6315 = vmatpush.bf16.msrb.mxu0 %v7726_v30  ;;  %v8255_v0 = vld [vmem:[%s12134_s16 + $0x1e8] sm:$0xff] }
0x10e7   : > { %v6024_v29 = vmul.f32 0.5, %v6023_v20 }
0x10e8   : > { %6333 = vmatpush.bf16.msrb.mxu1 %v7730_v35 }
0x10e9   : > { %v6025_v50 = vsub.f32 1.5, %v6024_v29  ;;  %6279 = vmatpush.bf16.msra.mxu2 %v7718_v22 }
0x10ea   : > { %v8554_v11 = vpop.eup %8553  ;;  %6883 = vmatpush.bf16.msrb.mxu3 %v8241_v1 }
0x10eb   : > { %v6026_v56 = vmul.f32 %v11595_v61, %v6025_v50  ;;  %v6032_v24 = vmul.f32 %v8554_v11, %v11597_v60  ;;  %vm6038_vm8 = vweird.f32 %v8554_v11  ;;  %v7714_v50 = vld [vmem:[%s12133_s15 + $0x4] sm:$0xf] }
0x10ec   : > { %vm6039_vm10 = vmor %vm6037_vm9, %vm6038_vm8  ;;  %v11720_v32 = vperm.slane %v7714_v50, 2  ;;  %v11722_v3 = vperm.slane %v7714_v50, 3  ;;  %v11730_v27 = vperm.slane %v7714_v50, 0  ;;  %v11732_v13 = vperm.slane %v7714_v50, 1 }
0x10ed   : > { %v6033_v62 = vmul.f32 %v8554_v11, %v6032_v24  ;;  %v6030_v48 = vsel %vm11675_vm7, %v11595_v61, %v6026_v56  ;;  %v8249_v56 = vld [vmem:[%s12134_s16 + $0x1b8] sm:$0xff] }
0x10ee   : > { %v6051_v61 = vmul.f32 %v6030_v48, %v11472_v26  ;;  %v8257_v24 = vld [vmem:[%s12134_s16 + $0x1f8] sm:$0xff]  ;;  %6900 = vmatpush.bf16.msra.mxu0 %v8249_v56  ;;  %v8244_v56 = vld [vmem:[%s12134_s16 + $0x190] sm:$0xff] }
0x10ef   : > { %v6034_v43 = vmul.f32 0.5, %v6033_v62  ;;  %6917 = vmatpush.bf16.msra.mxu1 %v8257_v24  ;;  %v8252_v24 = vld [vmem:[%s12134_s16 + $0x1d0] sm:$0xff] }
0x10f0   : > { %v6057_v33 = vmul.f32 %v8378_v17, %v6051_v61 }
0x10f1   : > { %v6035_v47 = vsub.f32 1.5, %v6034_v43  ;;  %v8233_v43 = vld [vmem:[%s12134_s16 + $0x138] sm:$0xff] }
0x10f2   : > { %v6063_v20 = vadd.f32 %v8379_v19, %v6057_v33  ;;  %6901 = vmatpush.bf16.msra.mxu0 %v8248_v42  ;;  %6866 = vmatpush.bf16.msrb.mxu2 %v8233_v43  ;;  %v8232_v33 = vld [vmem:[%s12134_s16 + $0x130] sm:$0xff] }
0x10f3   : > { %v6036_v4 = vmul.f32 %v8554_v11, %v6035_v47  ;;  %6918 = vmatpush.bf16.msra.mxu1 %v8256_v52  ;;  %v8247_v47 = vld [vmem:[%s12134_s16 + $0x1a8] sm:$0xff] }
0x10f5   : > { %v6040_v40 = vsel %vm6039_vm10, %v8554_v11, %v6036_v4 }
0x10f6   : > { %v6052_v16 = vmul.f32 %v6040_v40, %v11478_v14  ;;  %6902 = vmatpush.bf16.msra.mxu0 %v8247_v47  ;;  %6867 = vmatpush.bf16.msrb.mxu2 %v8232_v33  ;;  %v8251_v47 = vld [vmem:[%s12134_s16 + $0x1c8] sm:$0xff]  ;;  %v8228_v33 = vld [vmem:[%s12134_s16 + $0x110] sm:$0xff] }
0x10f7   : > { %6919 = vmatpush.bf16.msra.mxu1 %v8255_v0 }
0x10f8   : > { %v6058_v26 = vmul.f32 %v8378_v17, %v6052_v16  ;;  %v8240_v16 = vld [vmem:[%s12134_s16 + $0x170] sm:$0xff] }
0x10f9   : > { %6884 = vmatpush.bf16.msrb.mxu3 %v8240_v16  ;;  %v8236_v16 = vld [vmem:[%s12134_s16 + $0x150] sm:$0xff] }
0x10fa   : > { %v6064_v54 = vadd.f32 %v8379_v19, %v6058_v26 }
0x10fb   : > { %v6014_v2 = vpop.xlane.xlu2 %6013 }
0x10fc   : > { %v6017_v31 = vmul.f32 %v6014_v2, %v8876_v38  ;;  %v6066_v60 = vpack.c.bf16 %v6064_v54, %v6063_v20  ;;  %v8246_v20 = vld [vmem:[%s12134_s16 + $0x1a0] sm:$0xff] }
0x10fd   : > { %v8254_v54 = vld [vmem:[%s12134_s16 + $0x1e0] sm:$0xff]  ;;  %6903 = vmatpush.bf16.msra.mxu0 %v8246_v20 }
0x10fe   : > { %v6020_v8 = vadd.f32 1e-05, %v6017_v31  ;;  %6280 = vmatmul.bf16.vlgmr.msra.gmra.mxu2 %v6066_v60  ;;  %6298 = vmatmul.bf16.vlgmr.msra.gmra.mxu3 %v6066_v60 }
0x10ff   : > { %6316 = vmatmul.bf16.vlgmr.msrb.gmra.mxu0 %v6066_v60  ;;  %6334 = vmatmul.bf16.vlgmr.msrb.gmra.mxu1 %v6066_v60  ;;  %v8231_v60 = vld [vmem:[%s12134_s16 + $0x128] sm:$0xff] }
0x1100   : > { %8555 = vrsqrt.f32 %v6020_v8  ;;  %vm6047_vm6 = vweird.f32 %v6020_v8  ;;  %6920 = vmatpush.bf16.msra.mxu1 %v8254_v54  ;;  %6868 = vmatpush.bf16.msrb.mxu2 %v8231_v60 }
0x1106   : > { %v8556_v59 = vpop.eup %8555 }
0x1107   : > { %v6042_v25 = vmul.f32 %v8556_v59, %v6020_v8  ;;  %vm6048_vm11 = vweird.f32 %v8556_v59  ;;  %v8239_v8 = vld [vmem:[%s12134_s16 + $0x168] sm:$0xff] }
0x1108   : > { %vm6049_vm15 = vmor %vm6047_vm6, %vm6048_vm11  ;;  %6885 = vmatpush.bf16.msrb.mxu3 %v8239_v8 }
0x1109   : > { %v6043_v58 = vmul.f32 %v8556_v59, %v6042_v25 }
0x110b   : > { %v6044_v18 = vmul.f32 0.5, %v6043_v58 }
0x110d   : > { %v6045_v14 = vsub.f32 1.5, %v6044_v18 }
0x110f   : > { %v6046_v63 = vmul.f32 %v8556_v59, %v6045_v14  ;;  %v8245_v14 = vld [vmem:[%s12134_s16 + $0x198] sm:$0xff] }
0x1110   : > { %6904 = vmatpush.bf16.msra.mxu0 %v8245_v14 }
0x1111   : > { %v6050_v29 = vsel %vm6049_vm15, %v8556_v59, %v6046_v63  ;;  %v8253_v63 = vld [vmem:[%s12134_s16 + $0x1d8] sm:$0xff] }
0x1112   : > { %v6053_v45 = vmul.f32 %v6050_v29, %v11483_v57  ;;  %6921 = vmatpush.bf16.msra.mxu1 %v8253_v63 }
0x1114   : > { %v6059_v38 = vmul.f32 %v8378_v17, %v6053_v45  ;;  %6905 = vmatpush.bf16.msra.mxu0 %v8244_v56 }
0x1116   : > { %v6065_v5 = vadd.f32 %v8379_v19, %v6059_v38  ;;  %6922 = vmatpush.bf16.msra.mxu1 %v8252_v24 }
0x1118   : > { %v6067_v55 = vpack.c.bf16 %v6065_v5, %v6065_v5  ;;  %v8230_v5 = vld [vmem:[%s12134_s16 + $0x120] sm:$0xff] }
0x1119   : > { %6869 = vmatpush.bf16.msrb.mxu2 %v8230_v5 }
0x111a   : > { %6285 = vmatmul.bf16.gmra.mxu2 %v6067_v55  ;;  %6303 = vmatmul.bf16.gmra.mxu3 %v6067_v55 }
0x111b   : > { %6321 = vmatmul.bf16.gmra.mxu0 %v6067_v55  ;;  %6339 = vmatmul.bf16.gmra.mxu1 %v6067_v55  ;;  %v8238_v55 = vld [vmem:[%s12134_s16 + $0x160] sm:$0xff] }
0x111c   : > { %6886 = vmatpush.bf16.msrb.mxu3 %v8238_v55  ;;  %6923 = vmatpush.bf16.msra.mxu1 %v8251_v47 }
0x117c   : > { %v6317_v51 = vpop.f32.mrf.mxu0  ;;  %v6335_v11 = vpop.f32.mrf.mxu1 }
0x117d   : > { %v11725_v12 = vadd.f32 %v6317_v51, %v11720_v32  ;;  %v11728_v57 = vadd.f32 %v6335_v11, %v11722_v3 }
0x117f   : > { %v7845_v6 = vmul.f32 -1.702, %v11725_v12  ;;  %v7846_v9 = vmul.f32 -1.702, %v11728_v57 }
0x1181   : > { %v6372_v7 = vmul.f32 1.442695, %v7845_v6  ;;  %v6374_v41 = vmul.f32 1.442695, %v7846_v9  ;;  %v6281_v39 = vpop.f32.mrf.mxu2  ;;  %v6299_v10 = vpop.f32.mrf.mxu3 }
0x1182   : > { %v11743_v46 = vadd.f32 %v6281_v39, %v11730_v27  ;;  %v11746_v62 = vadd.f32 %v6299_v10, %v11732_v13 }
0x1183   : > { %8557 = vpow2.f32 %v6372_v7 }
0x1184   : > { %8559 = vpow2.f32 %v6374_v41  ;;  %v7843_v53 = vmul.f32 -1.702, %v11743_v46  ;;  %v7844_v36 = vmul.f32 -1.702, %v11746_v62  ;;  %v6319_v44 = vpop.f32.mrf.mxu0  ;;  %v6337_v15 = vpop.f32.mrf.mxu1 }
0x1185   : > { %v11757_v37 = vadd.f32 %v6319_v44, %v11720_v32  ;;  %v11760_v49 = vadd.f32 %v6337_v15, %v11722_v3  ;;  %v8237_v44 = vld [vmem:[%s12134_s16 + $0x158] sm:$0xff] }
0x1186   : > { %v6368_v28 = vmul.f32 1.442695, %v7843_v53  ;;  %v6370_v48 = vmul.f32 1.442695, %v7844_v36  ;;  %v8229_v36 = vld [vmem:[%s12134_s16 + $0x118] sm:$0xff]  ;;  %6887 = vmatpush.bf16.msrb.mxu3 %v8237_v44 }
0x1187   : > { %v7849_v34 = vmul.f32 -1.702, %v11757_v37  ;;  %v7850_v22 = vmul.f32 -1.702, %v11760_v49  ;;  %6870 = vmatpush.bf16.msrb.mxu2 %v8229_v36 }
0x1188   : > { %8561 = vpow2.f32 %v6368_v28 }
0x1189   : > { %v8558_v17 = vpop.eup %8557  ;;  %8563 = vpow2.f32 %v6370_v48  ;;  %v6380_v61 = vmul.f32 1.442695, %v7849_v34  ;;  %v6283_v30 = vpop.f32.mrf.mxu2  ;;  %v6382_v40 = vmul.f32 1.442695, %v7850_v22  ;;  %v8243_v22 = vld [vmem:[%s12134_s16 + $0x188] sm:$0xff] }
0x118a   : > { %v8560_v35 = vpop.eup %8559  ;;  %v11776_v4 = vadd.f32 1.0, %v8558_v17  ;;  %v11779_v19 = vadd.f32 %v6283_v30, %v11730_v27  ;;  %v6301_v18 = vpop.f32.mrf.mxu3  ;;  %6906 = vmatpush.bf16.msra.mxu0 %v8243_v22  ;;  %6888 = vmatpush.bf16.msrb.mxu3 %v8236_v16 }
0x118b   : > { %v11787_v26 = vadd.f32 1.0, %v8560_v35  ;;  %8565 = vpow2.f32 %v6380_v61  ;;  %v11828_v11 = vadd.f32 %v6301_v18, %v11732_v13  ;;  %6871 = vmatpush.bf16.msrb.mxu2 %v8228_v33 }
0x118c   : > { %8567 = vrcp.f32 %v11776_v4  ;;  %v7847_v31 = vmul.f32 -1.702, %v11779_v19  ;;  %v6443_v39 = vand.u32 2147483647, %v11776_v4  ;;  %v6445_v52 = vand.u32 2147483648, %v11776_v4 }
0x118d   : > { %8569 = vrcp.f32 %v11787_v26  ;;  %v7848_v28 = vmul.f32 -1.702, %v11828_v11  ;;  %vm6439_vm3 = vweird.f32 %v11776_v4  ;;  %v6458_v1 = vand.u32 2147483647, %v11787_v26 }
0x118e   : > { %v8562_v2 = vpop.eup %8561  ;;  %8571 = vpow2.f32 %v6382_v40  ;;  %v6376_v38 = vmul.f32 1.442695, %v7847_v31  ;;  %v6460_v34 = vand.u32 2147483648, %v11787_v26  ;;  %vm11872_vm4 = vcmp.eq.f32.partialorder %v6443_v39, 8.507059e+37 }
0x118f   : > { %v8564_v59 = vpop.eup %8563  ;;  %v11804_v25 = vadd.f32 1.0, %v8562_v2  ;;  %vm6454_vm12 = vweird.f32 %v11787_v26  ;;  %v6446_v20 = vor.u32 1.1754944e-38, %v6445_v52  ;;  %v6378_v31 = vmul.f32 1.442695, %v7848_v28 }
0x1190   : > { %v11806_v58 = vadd.f32 1.0, %v8564_v59  ;;  %vm11896_vm14 = vcmp.eq.f32.partialorder %v6458_v1, 8.507059e+37  ;;  %v6461_v18 = vor.u32 1.1754944e-38, %v6460_v34 }
0x1191   : > { %v8566_v29 = vpop.eup %8565  ;;  %8573 = vrcp.f32 %v11804_v25  ;;  %v6415_v40 = vand.u32 2147483648, %v11804_v25  ;;  %v6413_v14 = vand.u32 2147483647, %v11804_v25  ;;  %vm6409_vm0 = vweird.f32 %v11804_v25 }
0x1192   : > { %v11815_v45 = vpop.eup %8567  ;;  %8575 = vrcp.f32 %v11806_v58  ;;  %v11839_v41 = vadd.f32 1.0, %v8566_v29 }
0x1193   : > { %v11823_v50 = vpop.eup %8569  ;;  %v6435_v51 = vmul.f32 %v11815_v45, %v11776_v4  ;;  %8577 = vpow2.f32 %v6376_v38  ;;  %vm6440_vm13 = vweird.f32 %v11815_v45  ;;  %v8242_v4 = vld [vmem:[%s12134_s16 + $0x180] sm:$0xff]  ;;  %v11921_v56 = vor.u32 1.1754944e-38, %v6415_v40 }
0x1194   : > { %v8572_v6 = vpop.eup %8571  ;;  %v6450_v9 = vmul.f32 %v11823_v50, %v11787_v26  ;;  %8579 = vrcp.f32 %v11839_v41  ;;  %v6503_v54 = vand.u32 2147483647, %v11839_v41  ;;  %v6505_v2 = vand.u32 2147483648, %v11839_v41  ;;  %vm11891_vm2 = vmor %vm6439_vm3, %vm6440_vm13  ;;  %v8250_v38 = vld [vmem:[%s12134_s16 + $0x1c0] sm:$0xff]  ;;  %6907 = vmatpush.bf16.msra.mxu0 %v8242_v4 }
0x1195   : > { %v6436_v7 = vsub.f32 1.0, %v6435_v51  ;;  %v11842_v53 = vadd.f32 1.0, %v8572_v6  ;;  %vm6455_vm5 = vweird.f32 %v11823_v50  ;;  %vm6499_vm7 = vweird.f32 %v11839_v41  ;;  %6924 = vmatpush.bf16.msra.mxu1 %v8250_v38 }
0x1196   : > { %v6451_v10 = vsub.f32 1.0, %v6450_v9  ;;  %vm11932_vm8 = vcmp.eq.f32.partialorder %v6503_v54, 8.507059e+37  ;;  %vm11944_vm9 = vmor %vm6454_vm12, %vm6455_vm5  ;;  %vm11970_vm6 = vcmp.eq.f32.partialorder %v6413_v14, 8.507059e+37 }
0x1197   : > { %v11850_v15 = vpop.eup %8573  ;;  %v6437_v42 = vmul.f32 %v11815_v45, %v6436_v7  ;;  %8581 = vrcp.f32 %v11842_v53  ;;  %v8235_v7 = vld [vmem:[%s12134_s16 + $0x148] sm:$0xff]  ;;  %vm6514_vm11 = vweird.f32 %v11842_v53  ;;  %v6518_v40 = vand.u32 2147483647, %v11842_v53 }
0x1198   : > { %v6322_v48 = vpop.f32.mrf.mxu0  ;;  %v6340_v43 = vpop.f32.mrf.mxu1  ;;  %v6452_v17 = vmul.f32 %v11823_v50, %v6451_v10  ;;  %v6405_v61 = vmul.f32 %v11850_v15, %v11804_v25  ;;  %vm6410_vm1 = vweird.f32 %v11850_v15  ;;  %v6506_v10 = vor.u32 1.1754944e-38, %v6505_v2  ;;  %6889 = vmatpush.bf16.msrb.mxu3 %v8235_v7 }
0x1199   : > { %v6438_v0 = vadd.f32 %v11815_v45, %v6437_v42  ;;  %v11870_v30 = vpop.eup %8575  ;;  %8583 = vpow2.f32 %v6378_v31  ;;  %v11949_v22 = vadd.f32 %v6322_v48, %v11720_v32  ;;  %v11952_v47 = vadd.f32 %v6340_v43, %v11722_v3  ;;  %v8226_v32 = vld [vmem:[%s12134_s16 + $0x100] sm:$0xff] }
0x119a   : > { %v8578_v60 = vpop.eup %8577  ;;  %v6453_v51 = vadd.f32 %v11823_v50, %v6452_v17  ;;  %v6406_v6 = vsub.f32 1.0, %v6405_v61  ;;  %v6420_v9 = vmul.f32 %v11870_v30, %v11806_v58  ;;  %v8234_v3 = vld [vmem:[%s12134_s16 + $0x140] sm:$0xff]  ;;  %v6520_v33 = vand.u32 2147483648, %v11842_v53 }
0x119b   : > { %v11911_v5 = vpop.eup %8579  ;;  %v6442_v55 = vsel %vm11891_vm2, %v11815_v45, %v6438_v0  ;;  %v8227_v45 = vld [vmem:[%s12134_s16 + $0x108] sm:$0xff]  ;;  %v11936_v36 = vadd.f32 1.0, %v8578_v60  ;;  %vm6425_vm15 = vweird.f32 %v11870_v30  ;;  %v7853_v54 = vmul.f32 -1.702, %v11949_v22 }
0x119c   : > { %v6495_v24 = vmul.f32 %v11911_v5, %v11839_v41  ;;  %v6447_v28 = vsel %vm11872_vm4, %v6446_v20, %v6442_v55  ;;  %6872 = vmatpush.bf16.msrb.mxu2 %v8227_v45  ;;  %v6457_v0 = vsel %vm11944_vm9, %v11823_v50, %v6453_v51  ;;  %v6407_v17 = vmul.f32 %v11850_v15, %v6406_v6  ;;  %vm11999_vm4 = vmor %vm6409_vm0, %vm6410_vm1 }
0x119d   : > { %v11901_v63 = vpop.f32.mrf.mxu2  ;;  %v11903_v29 = vpop.f32.mrf.mxu3  ;;  %v6421_v26 = vsub.f32 1.0, %v6420_v9  ;;  %vm6500_vm10 = vweird.f32 %v11911_v5  ;;  %8585 = vrcp.f32 %v11936_v36  ;;  %v6586_v50 = vmul.f32 %v6447_v28, %v11725_v12  ;;  %6890 = vmatpush.bf16.msrb.mxu3 %v8234_v3 }
0x119e   : > { %v8582_v52 = vpop.eup %8581  ;;  %v6496_v34 = vsub.f32 1.0, %v6495_v24  ;;  %v6462_v16 = vsel %vm11896_vm14, %v6461_v18, %v6457_v0  ;;  %v7854_v12 = vmul.f32 -1.702, %v11952_v47  ;;  %v6408_v8 = vadd.f32 %v11850_v15, %v6407_v17  ;;  %vm6501_vm3 = vmor %vm6499_vm7, %vm6500_vm10 }
0x119f   : > { %v6510_v61 = vmul.f32 %v8582_v52, %v11842_v53  ;;  %v8584_v60 = vpop.eup %8583  ;;  %vm6515_vm13 = vweird.f32 %v8582_v52  ;;  %v11989_v18 = vadd.f32 %v11901_v63, %v11730_v27  ;;  %v6422_v14 = vmul.f32 %v11870_v30, %v6421_v26 }
0x11a0   : > { %v6324_v44 = vpop.f32.mrf.mxu0  ;;  %v6342_v42 = vpop.f32.mrf.mxu1  ;;  %v6497_v35 = vmul.f32 %v11911_v5, %v6496_v34  ;;  %6873 = vmatpush.bf16.msrb.mxu2 %v8226_v32  ;;  %v11993_v38 = vadd.f32 1.0, %v8584_v60  ;;  %v6388_v55 = vmul.f32 1.442695, %v7853_v54  ;;  %v6521_v63 = vor.u32 1.1754944e-38, %v6520_v33  ;;  %vm6516_vm12 = vmor %vm6514_vm11, %vm6515_vm13 }
0x11a1   : > { %v6511_v43 = vsub.f32 1.0, %v6510_v61  ;;  %v6390_v6 = vmul.f32 1.442695, %v7854_v12  ;;  %v7851_v25 = vmul.f32 -1.702, %v11989_v18  ;;  %v12012_v24 = vadd.f32 %v11903_v29, %v11732_v13 }
0x11a2   : > { %v6498_v20 = vadd.f32 %v11911_v5, %v6497_v35  ;;  %8587 = vrcp.f32 %v11993_v38  ;;  %v6412_v45 = vsel %vm11999_vm4, %v11850_v15, %v6408_v8  ;;  %vm6519_vm2 = vcmp.eq.f32.partialorder %v6518_v40, 8.507059e+37 }
0x11a3   : > { %v6512_v59 = vmul.f32 %v8582_v52, %v6511_v43  ;;  %v8586_v9 = vpop.eup %8585  ;;  %8589 = vpow2.f32 %v6388_v55  ;;  %v6423_v44 = vadd.f32 %v11870_v30, %v6422_v14  ;;  %v6417_v13 = vsel %vm11970_vm6, %v11921_v56, %v6412_v45 }
0x11a4   : > { %v6502_v4 = vsel %vm6501_vm3, %v11911_v5, %v6498_v20  ;;  %v6465_v39 = vmul.f32 %v8586_v9, %v11936_v36  ;;  %8591 = vpow2.f32 %v6390_v6  ;;  %v6475_v15 = vand.u32 2147483648, %v11936_v36 }
0x11a5   : > { %v6288_v2 = vpop.f32.mrf.mxu2  ;;  %v6306_v31 = vpop.f32.mrf.mxu3  ;;  %v6507_v51 = vsel %vm11932_vm8, %v6506_v10, %v6502_v4  ;;  %v6513_v27 = vadd.f32 %v8582_v52, %v6512_v59  ;;  %v6384_v29 = vmul.f32 1.442695, %v7851_v25  ;;  %vm6470_vm5 = vweird.f32 %v8586_v9 }
0x11a6   : > { %v6590_v5 = vmul.f32 %v6507_v51, %v11757_v37  ;;  %v6587_v37 = vmul.f32 %v6462_v16, %v11728_v57  ;;  %v6466_v28 = vsub.f32 1.0, %v6465_v39  ;;  %v6473_v34 = vand.u32 2147483647, %v11936_v36 }
0x11a7   : > { %v6517_v7 = vsel %vm6516_vm12, %v8582_v52, %v6513_v27  ;;  %v7852_v52 = vmul.f32 -1.702, %v12012_v24  ;;  %vm6424_vm14 = vweird.f32 %v11806_v58  ;;  %8593 = vpow2.f32 %v6384_v29 }
0x11a8   : > { %v6598_v53 = vpack.c.bf16 %v6590_v5, %v6586_v50  ;;  %v6522_v10 = vsel %vm6519_vm2, %v6521_v63, %v6517_v7  ;;  %v6467_v1 = vmul.f32 %v8586_v9, %v6466_v28  ;;  %v8588_v0 = vpop.eup %8587  ;;  %vm12031_vm0 = vmor %vm6424_vm14, %vm6425_vm15  ;;  %v6430_v26 = vand.u32 2147483648, %v11806_v58 }
0x11a9   : > { %v6591_v42 = vmul.f32 %v6522_v10, %v11760_v49  ;;  %v6428_v49 = vand.u32 2147483647, %v11806_v58  ;;  %v6386_v17 = vmul.f32 1.442695, %v7852_v52  ;;  %vm6469_vm1 = vweird.f32 %v11936_v36  ;;  %v8590_v32 = vpop.eup %8589 }
0x11aa   : > { %6908 = vmatmul.bf16.vlgmr.msra.gmra.mxu0 %v6598_v53  ;;  %v6468_v61 = vadd.f32 %v8586_v9, %v6467_v1  ;;  %v6480_v35 = vmul.f32 %v8588_v0, %v11993_v38  ;;  %v6584_v3 = vmul.f32 %v6417_v13, %v11743_v46  ;;  %v6427_v50 = vsel %vm12031_vm0, %v11870_v30, %v6423_v44  ;;  %vm6471_vm7 = vmor %vm6469_vm1, %vm6470_vm5  ;;  %v8592_v43 = vpop.eup %8591 }
0x11ab   : > { %v6599_v57 = vpack.c.bf16 %v6591_v42, %v6587_v37  ;;  %v6476_v48 = vor.u32 1.1754944e-38, %v6475_v15  ;;  %8595 = vpow2.f32 %v6386_v17  ;;  %vm6474_vm8 = vcmp.eq.f32.partialorder %v6473_v34, 8.507059e+37 }
0x11ac   : > { %v6472_v40 = vsel %vm6471_vm7, %v8586_v9, %v6468_v61  ;;  %v6481_v58 = vsub.f32 1.0, %v6480_v35  ;;  %v6402_v33 = vadd.f32 1.0, %v8590_v32  ;;  %v6488_v16 = vand.u32 2147483647, %v11993_v38 }
0x11ad   : > { %6925 = vmatmul.bf16.vlgmr.msra.gmra.mxu1 %v6599_v57  ;;  %v6477_v36 = vsel %vm6474_vm8, %v6476_v48, %v6472_v40  ;;  %v6490_v20 = vand.u32 2147483648, %v11993_v38  ;;  %v6403_v54 = vadd.f32 1.0, %v8592_v43  ;;  %vm6485_vm9 = vweird.f32 %v8588_v0  ;;  %v8594_v30 = vpop.eup %8593 }
0x11ae   : > { %v6588_v46 = vmul.f32 %v6477_v36, %v11779_v19  ;;  %v6482_v12 = vmul.f32 %v8588_v0, %v6481_v58  ;;  %8597 = vrcp.f32 %v6402_v33  ;;  %v6431_v2 = vor.u32 1.1754944e-38, %v6430_v26 }
0x11af   : > { %8599 = vrcp.f32 %v6403_v54  ;;  %vm6429_vm10 = vcmp.eq.f32.partialorder %v6428_v49, 8.507059e+37  ;;  %vm6484_vm11 = vweird.f32 %v11993_v38  ;;  %v6491_v14 = vor.u32 1.1754944e-38, %v6490_v20 }
0x11b0   : > { %v6596_v31 = vpack.c.bf16 %v6588_v46, %v6584_v3  ;;  %v6483_v60 = vadd.f32 %v8588_v0, %v6482_v12  ;;  %v6432_v59 = vsel %vm6429_vm10, %v6431_v2, %v6427_v50  ;;  %vm6486_vm6 = vmor %vm6484_vm11, %vm6485_vm9  ;;  %v12047_v4 = vadd.f32 1.0, %v8594_v30 }
0x11b1   : > { %v8596_v8 = vpop.eup %8595  ;;  %vm6489_vm15 = vcmp.eq.f32.partialorder %v6488_v16, 8.507059e+37  ;;  %v6585_v27 = vmul.f32 %v6432_v59, %v11746_v62  ;;  %v6563_v9 = vand.u32 2147483647, %v6402_v33  ;;  %v6565_v25 = vand.u32 2147483648, %v6402_v33 }
0x11b2   : > { %v6487_v55 = vsel %vm6486_vm6, %v8588_v0, %v6483_v60  ;;  %v12049_v19 = vadd.f32 1.0, %v8596_v8  ;;  %6874 = vmatmul.bf16.vlgmr.msrb.gmra.mxu2 %v6596_v31  ;;  %8601 = vrcp.f32 %v12047_v4  ;;  %v6578_v39 = vand.u32 2147483647, %v6403_v54 }
0x11b3   : > { %v6492_v41 = vsel %vm6489_vm15, %v6491_v14, %v6487_v55  ;;  %v6580_v37 = vand.u32 2147483648, %v6403_v54  ;;  %vm6559_vm3 = vweird.f32 %v6402_v33  ;;  %vm12055_vm4 = vcmp.eq.f32.partialorder %v6563_v9, 8.507059e+37  ;;  %v8380_v14 = vld [vmem:[%s12135_s17 + $0x1] ss:$0 sm:$0xff] }
0x11b4   : > { %v8598_v51 = vpop.eup %8597  ;;  %v6589_v63 = vmul.f32 %v6492_v41, %v11828_v11  ;;  %8603 = vrcp.f32 %v12049_v19  ;;  %vm6574_vm12 = vweird.f32 %v6403_v54  ;;  %v6566_v42 = vor.u32 1.1754944e-38, %v6565_v25 }
0x11b5   : > { %v8600_v38 = vpop.eup %8599  ;;  %v6555_v6 = vmul.f32 %v8598_v51, %v6402_v33  ;;  %vm6560_vm13 = vweird.f32 %v8598_v51  ;;  %vm12060_vm5 = vcmp.eq.f32.partialorder %v6578_v39, 8.507059e+37  ;;  %v6581_v52 = vor.u32 1.1754944e-38, %v6580_v37 }
0x11b6   : > { %v6597_v5 = vpack.c.bf16 %v6589_v63, %v6585_v27  ;;  %v6570_v45 = vmul.f32 %v8600_v38, %v6403_v54  ;;  %vm6575_vm2 = vweird.f32 %v8600_v38  ;;  %vm6561_vm14 = vmor %vm6559_vm3, %vm6560_vm13  ;;  %v6533_v0 = vand.u32 2147483647, %v12047_v4 }
0x11b7   : > { %v6556_v7 = vsub.f32 1.0, %v6555_v6  ;;  %v6535_v49 = vand.u32 2147483648, %v12047_v4  ;;  %vm6576_vm0 = vmor %vm6574_vm12, %vm6575_vm2  ;;  %v6548_v26 = vand.u32 2147483647, %v12049_v19  ;;  %v6550_v61 = vand.u32 2147483648, %v12049_v19 }
0x11b8   : > { %v6571_v53 = vsub.f32 1.0, %v6570_v45  ;;  %6891 = vmatmul.bf16.vlgmr.msrb.gmra.mxu3 %v6597_v5  ;;  %v8602_v10 = vpop.eup %8601  ;;  %vm6529_vm8 = vweird.f32 %v12047_v4  ;;  %vm6544_vm10 = vweird.f32 %v12049_v19  ;;  %vm6534_vm11 = vcmp.eq.f32.partialorder %v6533_v0, 8.507059e+37 }
0x11b9   : > { %v6557_v44 = vmul.f32 %v8598_v51, %v6556_v7  ;;  %v6525_v13 = vmul.f32 %v8602_v10, %v12047_v4  ;;  %vm6530_vm1 = vweird.f32 %v8602_v10  ;;  %v6536_v36 = vor.u32 1.1754944e-38, %v6535_v49 }
0x11ba   : > { %v8604_v11 = vpop.eup %8603  ;;  %v6572_v28 = vmul.f32 %v8600_v38, %v6571_v53  ;;  %vm6531_vm9 = vmor %vm6529_vm8, %vm6530_vm1  ;;  %vm6549_vm15 = vcmp.eq.f32.partialorder %v6548_v26, 8.507059e+37 }
0x11bb   : > { %v6558_v15 = vadd.f32 %v8598_v51, %v6557_v44  ;;  %v6540_v57 = vmul.f32 %v8604_v11, %v12049_v19  ;;  %v6526_v34 = vsub.f32 1.0, %v6525_v13  ;;  %vm6545_vm7 = vweird.f32 %v8604_v11 }
0x11bc   : > { %v6573_v1 = vadd.f32 %v8600_v38, %v6572_v28  ;;  %vm6546_vm6 = vmor %vm6544_vm10, %vm6545_vm7 }
0x11bd   : > { %v6562_v17 = vsel %vm6561_vm14, %v8598_v51, %v6558_v15  ;;  %v6541_v56 = vsub.f32 1.0, %v6540_v57  ;;  %v6527_v3 = vmul.f32 %v8602_v10, %v6526_v34 }
0x11be   : > { %v6567_v35 = vsel %vm12055_vm4, %v6566_v42, %v6562_v17  ;;  %v6577_v32 = vsel %vm6576_vm0, %v8600_v38, %v6573_v1 }
0x11bf   : > { %v6594_v50 = vmul.f32 %v6567_v35, %v11949_v22  ;;  %v6582_v48 = vsel %vm12060_vm5, %v6581_v52, %v6577_v32  ;;  %v6542_v43 = vmul.f32 %v8604_v11, %v6541_v56  ;;  %v6528_v58 = vadd.f32 %v8602_v10, %v6527_v3 }
0x11c0   : > { %v6595_v40 = vmul.f32 %v6582_v48, %v11952_v47  ;;  %v6551_v22 = vor.u32 1.1754944e-38, %v6550_v61 }
0x11c1   : > { %v6602_v33 = vpack.c.bf16 %v6594_v50, %v6594_v50  ;;  %v6543_v16 = vadd.f32 %v8604_v11, %v6542_v43  ;;  %v6532_v54 = vsel %vm6531_vm9, %v8602_v10, %v6528_v58 }
0x11c2   : > { %v6603_v20 = vpack.c.bf16 %v6595_v40, %v6595_v40  ;;  %v6537_v46 = vsel %vm6534_vm11, %v6536_v36, %v6532_v54 }
0x11c3   : > { %v6547_v12 = vsel %vm6546_vm6, %v8604_v11, %v6543_v16  ;;  %6913 = vmatmul.bf16.gmra.mxu0 %v6602_v33  ;;  %v6592_v47 = vmul.f32 %v6537_v46, %v11989_v18 }
0x11c4   : > { %v6552_v30 = vsel %vm6549_vm15, %v6551_v22, %v6547_v12  ;;  %6930 = vmatmul.bf16.gmra.mxu1 %v6603_v20 }
0x11c5   : > { %v6593_v2 = vmul.f32 %v6552_v30, %v12012_v24  ;;  %v6600_v31 = vpack.c.bf16 %v6592_v47, %v6592_v47 }
0x11c7   : > { %v6601_v60 = vpack.c.bf16 %v6593_v2, %v6593_v2  ;;  %6879 = vmatmul.bf16.gmra.mxu2 %v6600_v31 }
0x11c9   : > { %6896 = vmatmul.bf16.gmra.mxu3 %v6601_v60 }
0x1227   : > { %v6909_v8 = vpop.f32.mrf.mxu0 }
0x122a   : > { %v6926_v59 = vpop.f32.mrf.mxu1 }
0x122f   : > { %v6911_v55 = vpop.f32.mrf.mxu0 }
0x1232   : > { %v6928_v41 = vpop.f32.mrf.mxu1 }
0x1235   : > { %v6875_v4 = vpop.f32.mrf.mxu2 }
0x1236   : > { %v6876_v19 = vadd.f32 %v8380_v14, %v6875_v4 }
0x123b   : > { %v6892_v18 = vpop.f32.mrf.mxu3 }
0x123c   : > { %v6893_v51 = vadd.f32 %v6892_v18, %v6876_v19 }
0x123d   : > { %v6877_v27 = vpop.f32.mrf.mxu2 }
0x123e   : > { %v6910_v24 = vadd.f32 %v6909_v8, %v6893_v51  ;;  %v6878_v38 = vadd.f32 %v8380_v14, %v6877_v27 }
0x1240   : > { %v6927_v63 = vadd.f32 %v6926_v59, %v6910_v24  ;;  %v6914_v6 = vpop.f32.mrf.mxu0 }
0x1241   : > { %v6931_v9 = vpop.f32.mrf.mxu1 }
0x1242   : > { %v6934_v5 = vadd.f32 %v6927_v63, %v11461_v23 }
0x1243   : > { %v6894_v25 = vpop.f32.mrf.mxu3 }
0x1244   : > { %6936 = vst [vmem:[%s568_s22] sm:$0xff] %v6934_v5  ;;  %v6895_v45 = vadd.f32 %v6894_v25, %v6878_v38 }
0x1246   : > { %v6912_v7 = vadd.f32 %v6911_v55, %v6895_v45 }
0x1248   : > { %v6929_v39 = vadd.f32 %v6928_v41, %v6912_v7  ;;  %v6915_v37 = vpop.f32.mrf.mxu0 }
0x1249   : > { %v6932_v53 = vpop.f32.mrf.mxu1 }
0x124a   : > { %v6935_v10 = vadd.f32 %v6929_v39, %v11465_v21  ;;  %v6880_v23 = vpop.f32.mrf.mxu2 }
0x124c   : > { %6937 = vst [vmem:[%s568_s22 + $0x8] sm:$0xff] %v6935_v10  ;;  %v6897_v44 = vpop.f32.mrf.mxu3 }
0x124d   : > { %8632 = shalt.err (!%p8629_p3)
}
0x124e   : > { %s8676_s24 = smov 128   ;;  %s8677_s22 = smov 8  }
0x124f   : > { %8259 = dma.vmem_to_hbm [thread:$0]  (%p8811_p5), %s6952_s21, 256, %s6954_s23, %s6939_s27, %s8676_s24, %s8676_s24, %s8677_s22  }
0x1252   : > { %v6881_v21 = vpop.f32.mrf.mxu2 }
0x1254   : > { %v6898_v62 = vpop.f32.mrf.mxu3 }
0x1255 PF: > { %s12215_s3 = sld [smem:[#allocation7_spill]] }
0x1256   : > { %s12216_s4 = sld [smem:[#allocation5_spill]] }
0x125b   : > { %p8265_p4 = scmp.ge.s32.totalorder %s12215_s3, 2 }
0x125c   : > { %s6968_s1 = sand.u32 1, %s12216_s4  }
0x125d   : > { %p8262_p7 = pnand %p8265_p4, %p8815_p6  ;;  %s6969_s30 = scalar_lea.sflag [#allocation3], %s6968_s1 }
0x125f   : > { %p8263_p8 = pneg %p8262_p7 }
0x1261   : > { %8650 = dma.done.wait (%p8263_p8), %s6969_s30, 256  }
0x1262   : > { %8652 = vsyncadd (%p8263_p8), %s6969_s30, 4294967040  ;;  %s12218_s30 = sld [smem:[#allocation9_spill]]  ;;  %s12221_s27 = smov %s8659_s28 }
0x1263   : > { %s12219_s29 = sld [smem:[#allocation6_spill]] }
0x1264   : > { %s12220_s0 = sld [smem:[#allocation10_spill]] }
0x1268   : > { %p28_p5 = scmp.ge.s32.totalorder %s12218_s30, 4  }
0x1269   : > { %s12222_s28 = smov %s12219_s29 }
0x126a   : > { %s12223_s29 = smov %s12220_s0  ;;  %30 = sbr.rel (!%p28_p5) target bundleno = 10 (0xa), region = 139 }
0x126f   :  { %6975 = vsyncpa [#allocation3], 1 }
0x1270   :  { %6977 = vsyncpa [#allocation3 + $0x1], 1 }

</bundles_post_ra>
